<compile_context>
chip_gen: v7x
topology: tpu7x:2x2x1
jax: 0.10.0
libtpu: 0.0.40
codegen_flags: <defaults>
</compile_context>

<pallas_src>
import math
import functools

import jax
import jax.numpy as jnp
from jax.experimental import pallas as pl
from jax.experimental.pallas import tpu as pltpu

EPS = 1e-6
NEG_INF = -1e9


# ==========================================================================
# Fused decoder kernel (no grid: runs once, everything VMEM-resident)
# ==========================================================================
def _decoder_kernel(x_ref, eo_ref, tm_ref, sm_ref,
                    ln_a_ref, ln_b_ref,
                    wqkv1_ref, bqkv1_ref, wo1_ref, bo1_ref,
                    wq2_ref, bq2_ref, wkv2_ref, bkv2_ref, wo2_ref, bo2_ref,
                    w1_ref, b1_ref, w2_ref, b2_ref,
                    fna_ref, fnb_ref,
                    o_ref, *, n_layers, heads, d_k, batch, s_q, s_kv):
    f32, bf16 = jnp.float32, jnp.bfloat16
    B, H, dk = batch, heads, d_k
    Sq, Skv = s_q, s_kv
    D = H * dk
    scale = 1.0 / math.sqrt(d_k)

    x = x_ref[...]                                    # (B*Sq, D) residual stream, f32
    e_flat = eo_ref[...].astype(bf16)                 # (B*Skv, D) hoisted once

    # ---- compact int8 masks -> additive biases, expanded ONCE per (b, h) ----
    t_bias = jnp.where(tm_ref[...].astype(f32) == 0.0, f32(NEG_INF), f32(0.0))  # (B,Sq,Sq)
    s_bias = jnp.where(sm_ref[...].astype(f32) == 0.0, f32(NEG_INF), f32(0.0))  # (B,1,Skv)
    t_bias_bh = jnp.broadcast_to(t_bias[:, None], (B, H, Sq, Sq)).reshape(B * H, Sq, Sq)
    s_bias_bh = jnp.broadcast_to(s_bias[:, None], (B, H, 1, Skv)).reshape(B * H, 1, Skv)

    def layernorm(v, a, b):
        # alpha * (v - mean) / (std + eps) + bias; Bessel-corrected std (torch .std()).
        mean = jnp.mean(v, axis=-1, keepdims=True)
        diff = v - mean
        var = jnp.sum(diff * diff, axis=-1, keepdims=True) * (1.0 / (D - 1))
        inv = pl.reciprocal(jnp.sqrt(var) + EPS, approx=True)     # EUP, not a VPU divide
        return a * (diff * inv) + b

    def split_heads(z, col0, rows):
        # z (B*rows, C) f32 -> (B*H, rows, dk) bf16.  Columns [col0, col0+D)
        # are ordered (head, d_k) exactly like torch .view(bs, -1, h, d_k).
        z3 = z.reshape(B, rows, z.shape[-1])          # free split of the row dim
        parts = [z3[:, :, col0 + h * dk: col0 + (h + 1) * dk][:, None]   # (B,1,rows,dk)
                 for h in range(H)]
        return jnp.concatenate(parts, axis=1).reshape(B * H, rows, dk).astype(bf16)

    def merge_heads(zh, rows):
        # (B*H, rows, dk) f32 -> (B*rows, D) f32, columns ordered (head, d_k)
        # == torch's ctx.transpose(1, 2).reshape(bs, -1, d_model).
        z4 = zh.reshape(B, H, rows, dk)
        return jnp.concatenate([z4[:, h] for h in range(H)], axis=-1).reshape(B * rows, D)

    def attention(q, k, v, bias_bh, wo, bo):
        # q (B*H,Sq,dk) / k,v (B*H,Skv,dk) bf16; bias_bh (B*H, 1|Sq, Skv) f32;
        # wo (D,D) bf16; bo (1,D) f32.  One batched score matmul, one mask add,
        # one softmax, one ctx matmul for ALL (batch, head) pairs.
        s = jnp.einsum('bqd,bkd->bqk', q, k, preferred_element_type=f32) * scale
        s = s + bias_bh
        s = s - jnp.max(s, axis=-1, keepdims=True)
        p = jnp.exp(s)
        p = p * pl.reciprocal(jnp.sum(p, axis=-1, keepdims=True), approx=True)
        ctx = jnp.einsum('bqk,bkd->bqd', p.astype(bf16), v, preferred_element_type=f32)
        ctx = merge_heads(ctx, Sq)                                   # (B*Sq, D)
        # concat(heads) @ original Wo  ->  single (BS,D)x(D,D) MXU matmul
        return jnp.dot(ctx.astype(bf16), wo, preferred_element_type=f32) + bo

    for l in range(n_layers):            # static unroll; weights already VMEM-resident
        a_l = ln_a_ref[l]                # (3, D) = [norm1 | norm2 | norm3] scales
        b_l = ln_b_ref[l]

        # ---- sub-layer 1: masked self attention (fused QKV, flat matmul) ----
        x2 = layernorm(x, a_l[0:1], b_l[0:1]).astype(bf16)
        qkv = jnp.dot(x2, wqkv1_ref[l], preferred_element_type=f32) + bqkv1_ref[l]
        q = split_heads(qkv, 0 * D, Sq)
        k = split_heads(qkv, 1 * D, Sq)
        v = split_heads(qkv, 2 * D, Sq)
        x = x + attention(q, k, v, t_bias_bh, wo1_ref[l], bo1_ref[l])

        # ---- sub-layer 2: encoder-decoder cross attention (fused KV) ----
        x2 = layernorm(x, a_l[1:2], b_l[1:2]).astype(bf16)
        q2 = jnp.dot(x2, wq2_ref[l], preferred_element_type=f32) + bq2_ref[l]
        kv = jnp.dot(e_flat, wkv2_ref[l], preferred_element_type=f32) + bkv2_ref[l]
        q2h = split_heads(q2, 0, Sq)
        k2 = split_heads(kv, 0 * D, Skv)
        v2 = split_heads(kv, 1 * D, Skv)
        x = x + attention(q2h, k2, v2, s_bias_bh, wo2_ref[l], bo2_ref[l])

        # ---- sub-layer 3: feed forward (batch folded into M) ----
        x2 = layernorm(x, a_l[2:3], b_l[2:3]).astype(bf16)
        h = jnp.dot(x2, w1_ref[l], preferred_element_type=f32) + b1_ref[l]
        h = jnp.maximum(h, 0.0).astype(bf16)
        x = x + (jnp.dot(h, w2_ref[l], preferred_element_type=f32) + b2_ref[l])

    # final Norm
    o_ref[...] = layernorm(x, fna_ref[...], fnb_ref[...])


# ==========================================================================
# Weight packing: stack per-layer params, fuse QKV / KV along the output dim
# (original torch column order is preserved -> head h = columns [h*dk,(h+1)*dk))
# ==========================================================================
def _pack_decoder_weights(params):
    layers = params["layers"]
    D = params["embed"].shape[1]
    bf16, f32 = jnp.bfloat16, jnp.float32

    def stack(fn, dtype):
        return jnp.stack([fn(lp) for lp in layers]).astype(dtype)

    return dict(
        ln_a=stack(lambda lp: jnp.stack([lp["n1_a"], lp["n2_a"], lp["n3_a"]]), f32),
        ln_b=stack(lambda lp: jnp.stack([lp["n1_b"], lp["n2_b"], lp["n3_b"]]), f32),
        wqkv1=stack(lambda lp: jnp.concatenate(
            [lp["attn1"]["wq"], lp["attn1"]["wk"], lp["attn1"]["wv"]], axis=1), bf16),
        bqkv1=stack(lambda lp: jnp.concatenate(
            [lp["attn1"]["bq"], lp["attn1"]["bk"], lp["attn1"]["bv"]], axis=1), f32),
        wo1=stack(lambda lp: lp["attn1"]["wo"], bf16),
        bo1=stack(lambda lp: lp["attn1"]["bo"], f32),
        wq2=stack(lambda lp: lp["attn2"]["wq"], bf16),
        bq2=stack(lambda lp: lp["attn2"]["bq"], f32),
        wkv2=stack(lambda lp: jnp.concatenate(
            [lp["attn2"]["wk"], lp["attn2"]["wv"]], axis=1), bf16),
        bkv2=stack(lambda lp: jnp.concatenate(
            [lp["attn2"]["bk"], lp["attn2"]["bv"]], axis=1), f32),
        wo2=stack(lambda lp: lp["attn2"]["wo"], bf16),
        bo2=stack(lambda lp: lp["attn2"]["bo"], f32),
        w1=stack(lambda lp: lp["ff"]["w1"], bf16),
        b1=stack(lambda lp: lp["ff"]["b1"], f32),
        w2=stack(lambda lp: lp["ff"]["w2"], bf16),
        b2=stack(lambda lp: lp["ff"]["b2"], f32),
        fn_a=params["norm_a"].reshape(1, D).astype(f32),
        fn_b=params["norm_b"].reshape(1, D).astype(f32),
    )


# ==========================================================================
# Decoder.forward  (single fused pallas_call, no grid)
# ==========================================================================
def decoder_forward(params, trg, e_outputs, src_mask, trg_mask, *, heads, d_model):
    B, S = trg.shape
    S_src = e_outputs.shape[1]
    D = d_model
    d_k = D // heads
    N = len(params["layers"])
    d_ff = params["layers"][0]["ff"]["w1"].shape[1]

    # glue: embedding gather + positional encoding (dropout = identity, eval)
    x0 = jnp.take(params["embed"], trg, axis=0) * math.sqrt(d_model)
    x0 = (x0 + params["pe"][:S][None, :, :]).astype(jnp.float32).reshape(B * S, D)
    eo = e_outputs.astype(jnp.float32).reshape(B * S_src, D)

    # compact int8 masks; expanded to additive -1e9 biases inside the kernel
    trg_m = (jnp.broadcast_to(trg_mask, (B, S, S)) != 0).astype(jnp.int8)
    src_m = (jnp.broadcast_to(src_mask, (B, 1, S_src)) != 0).astype(jnp.int8)

    w = _pack_decoder_weights(params)

    args = (x0, eo, trg_m, src_m,
            w["ln_a"], w["ln_b"],
            w["wqkv1"], w["bqkv1"], w["wo1"], w["bo1"],
            w["wq2"], w["bq2"], w["wkv2"], w["bkv2"], w["wo2"], w["bo2"],
            w["w1"], w["b1"], w["w2"], w["b2"],
            w["fn_a"], w["fn_b"])

    # advisory cost estimate so XLA schedules the glue around the call
    flops_self = 2 * S * D * 3 * D + 4 * heads * S * S * d_k + 2 * S * D * D
    flops_cross = (2 * S * D * D + 2 * S_src * D * 2 * D
                   + 4 * heads * S * S_src * d_k + 2 * S * D * D)
    flops_ffn = 4 * S * D * d_ff
    flops = B * N * (flops_self + flops_cross + flops_ffn)
    transcendentals = B * N * heads * S * (S + S_src) + B * N * 3 * S + B * S
    bytes_accessed = sum(int(a.size) * a.dtype.itemsize for a in args) + B * S * D * 4

    kernel = functools.partial(_decoder_kernel, n_layers=N, heads=heads, d_k=d_k,
                               batch=B, s_q=S, s_kv=S_src)

    vmem = pl.BlockSpec(memory_space=pltpu.MemorySpace.VMEM)
    out = pl.pallas_call(
        kernel,
        out_shape=jax.ShapeDtypeStruct((B * S, D), jnp.float32),
        in_specs=[vmem] * len(args),
        out_specs=vmem,
        compiler_params=pltpu.CompilerParams(vmem_limit_bytes=32 * 1024 * 1024),
        cost_estimate=pl.CostEstimate(flops=int(flops),
                                      transcendentals=int(transcendentals),
                                      bytes_accessed=int(bytes_accessed)),
    )(*args)
    return out.reshape(B, S, D)


# ==========================================================================
# Pure-JAX f32 reference (same semantics, un-fused) for correctness check
# ==========================================================================
def decoder_reference(params, trg, e_outputs, src_mask, trg_mask, *, heads, d_model):
    D = d_model
    d_k = D // heads

    def norm(v, a, b):
        m = jnp.mean(v, axis=-1, keepdims=True)
        s = jnp.std(v, axis=-1, keepdims=True, ddof=1)
        return a * (v - m) / (s + EPS) + b

    def mha(xq, xkv, mask, p):
        B, Sq, _ = xq.shape
        Skv = xkv.shape[1]
        q = xq @ p["wq"] + p["bq"]
        k = xkv @ p["wk"] + p["bk"]
        v = xkv @ p["wv"] + p["bv"]
        q = q.reshape(B, Sq, heads, d_k).transpose(0, 2, 1, 3)
        k = k.reshape(B, Skv, heads, d_k).transpose(0, 2, 1, 3)
        v = v.reshape(B, Skv, heads, d_k).transpose(0, 2, 1, 3)
        sc = jnp.einsum('bhqd,bhkd->bhqk', q, k) / math.sqrt(d_k)
        bias = jnp.where(jnp.broadcast_to(mask, (B, Sq, Skv)) == 0, -1e9, 0.0)
        sc = sc + bias[:, None]
        pr = jax.nn.softmax(sc, axis=-1)
        ctx = jnp.einsum('bhqk,bhkd->bhqd', pr, v).transpose(0, 2, 1, 3).reshape(B, Sq, D)
        return ctx @ p["wo"] + p["bo"]

    x = jnp.take(params["embed"], trg, axis=0) * math.sqrt(d_model)
    x = x + params["pe"][: trg.shape[1]][None]
    for lp in params["layers"]:
        x2 = norm(x, lp["n1_a"], lp["n1_b"])
        x = x + mha(x2, x2, trg_mask, lp["attn1"])
        x2 = norm(x, lp["n2_a"], lp["n2_b"])
        x = x + mha(x2, e_outputs, src_mask, lp["attn2"])
        x2 = norm(x, lp["n3_a"], lp["n3_b"])
        h = jnp.maximum(x2 @ lp["ff"]["w1"] + lp["ff"]["b1"], 0.0)
        x = x + h @ lp["ff"]["w2"] + lp["ff"]["b2"]
    return norm(x, params["norm_a"], params["norm_b"])


# ==========================================================================
# Parameter construction (deterministic, synthetic)
# ==========================================================================
def _init_linear(key, d_in, d_out):
    kw, kb = jax.random.split(key)
    lim = 1.0 / math.sqrt(d_in)                     # torch nn.Linear default init
    w = jax.random.uniform(kw, (d_in, d_out), jnp.float32, -lim, lim)
    b = jax.random.uniform(kb, (1, d_out), jnp.float32, -lim, lim)
    return w, b


def make_pe(max_seq_len, d_model):
    pos = jnp.arange(max_seq_len, dtype=jnp.float32)[:, None]
    even = jnp.arange(0, d_model, 2, dtype=jnp.float32)
    pe_sin = jnp.sin(pos / jnp.power(10000.0, (2.0 * even) / d_model))
    pe_cos = jnp.cos(pos / jnp.power(10000.0, (2.0 * (even + 1.0)) / d_model))
    pe = jnp.zeros((max_seq_len, d_model), jnp.float32)
    pe = pe.at[:, 0::2].set(pe_sin)
    pe = pe.at[:, 1::2].set(pe_cos)
    return pe


def init_decoder_params(key, vocab_size, d_model, N, heads, max_seq_len, d_ff=2048):
    keys = jax.random.split(key, 4)
    embed = jax.random.normal(keys[0], (vocab_size, d_model), jnp.float32)  # nn.Embedding N(0,1)

    def attn_params(k):
        ks = jax.random.split(k, 4)
        wq, bq = _init_linear(ks[0], d_model, d_model)
        wk, bk = _init_linear(ks[1], d_model, d_model)
        wv, bv = _init_linear(ks[2], d_model, d_model)
        wo, bo = _init_linear(ks[3], d_model, d_model)
        return dict(wq=wq, bq=bq, wk=wk, bk=bk, wv=wv, bv=bv, wo=wo, bo=bo)

    def ff_params(k):
        k1, k2 = jax.random.split(k)
        w1, b1 = _init_linear(k1, d_model, d_ff)
        w2, b2 = _init_linear(k2, d_ff, d_model)
        return dict(w1=w1, b1=b1, w2=w2, b2=b2)

    ones = jnp.ones((d_model,), jnp.float32)
    zeros = jnp.zeros((d_model,), jnp.float32)
    layer = dict(n1_a=ones, n1_b=zeros, n2_a=ones, n2_b=zeros, n3_a=ones, n3_b=zeros,
                 attn1=attn_params(keys[1]), attn2=attn_params(keys[2]),
                 ff=ff_params(keys[3]))
    # get_clones uses deepcopy -> all N layers start with identical weights
    return dict(embed=embed, pe=make_pe(max_seq_len, d_model),
                layers=[layer] * N, norm_a=ones, norm_b=zeros)


# ==========================================================================
if __name__ == "__main__":
    vocab_size, d_model, N, heads, dropout, max_seq_len = 50, 32, 2, 4, 0.0, 16
    B, S_trg, S_src = 2, 8, 8
    d_ff = 2048

    key = jax.random.PRNGKey(0)
    k_trg, k_eo, k_par = jax.random.split(key, 3)

    trg = jax.random.randint(k_trg, (B, S_trg), 0, vocab_size, dtype=jnp.int32)
    e_outputs = jax.random.normal(k_eo, (B, S_src, d_model), jnp.float32)
    src_mask = jnp.ones((B, 1, S_src), jnp.float32)                        # no padding
    trg_mask = jnp.broadcast_to(jnp.tril(jnp.ones((S_trg, S_trg), jnp.float32)),
                                (B, S_trg, S_trg))                         # nopeak mask

    params = init_decoder_params(k_par, vocab_size, d_model, N, heads, max_seq_len,
                                 d_ff=d_ff)

    fwd = jax.jit(functools.partial(decoder_forward, heads=heads, d_model=d_model))
    out = jax.block_until_ready(fwd(params, trg, e_outputs, src_mask, trg_mask))

    assert out.shape == (B, S_trg, d_model) and out.dtype == jnp.float32
    assert bool(jnp.all(jnp.isfinite(out)))

    # tightened check vs the f32 pure-JAX reference: absolute AND relative
    # (bf16 MXU operands + approx EUP reciprocal give ~1e-2 level deviations)
    ref = decoder_reference(params, trg, e_outputs, src_mask, trg_mask,
                            heads=heads, d_model=d_model)
    err = float(jnp.max(jnp.abs(out - ref)))
    ref_max = float(jnp.max(jnp.abs(ref)))
    assert err < 0.1, f"max abs err too large: {err}"
    assert err / ref_max < 0.05, f"max rel err too large: {err / ref_max}"

    print("KERNEL_OK")
</pallas_src>

<mosaic_0001>
module attributes {stable_mosaic.version = 11 : i64} {
  func.func @_decoder_kernel(%arg0: memref<16x32xf32, #tpu.memory_space<vmem>>, %arg1: memref<16x32xf32, #tpu.memory_space<vmem>>, %arg2: memref<2x8x8xi8, #tpu.memory_space<vmem>>, %arg3: memref<2x1x8xi8, #tpu.memory_space<vmem>>, %arg4: memref<2x3x32xf32, #tpu.memory_space<vmem>>, %arg5: memref<2x3x32xf32, #tpu.memory_space<vmem>>, %arg6: memref<2x32x96xbf16, #tpu.memory_space<vmem>>, %arg7: memref<2x1x96xf32, #tpu.memory_space<vmem>>, %arg8: memref<2x32x32xbf16, #tpu.memory_space<vmem>>, %arg9: memref<2x1x32xf32, #tpu.memory_space<vmem>>, %arg10: memref<2x32x32xbf16, #tpu.memory_space<vmem>>, %arg11: memref<2x1x32xf32, #tpu.memory_space<vmem>>, %arg12: memref<2x32x64xbf16, #tpu.memory_space<vmem>>, %arg13: memref<2x1x64xf32, #tpu.memory_space<vmem>>, %arg14: memref<2x32x32xbf16, #tpu.memory_space<vmem>>, %arg15: memref<2x1x32xf32, #tpu.memory_space<vmem>>, %arg16: memref<2x32x2048xbf16, #tpu.memory_space<vmem>>, %arg17: memref<2x1x2048xf32, #tpu.memory_space<vmem>>, %arg18: memref<2x2048x32xbf16, #tpu.memory_space<vmem>>, %arg19: memref<2x1x32xf32, #tpu.memory_space<vmem>>, %arg20: memref<1x32xf32, #tpu.memory_space<vmem>>, %arg21: memref<1x32xf32, #tpu.memory_space<vmem>>, %arg22: memref<16x32xf32, #tpu.memory_space<vmem>>) attributes {dimension_semantics = [], scalar_prefetch = 0 : i64, scratch_operands = 0 : i64, tpu.core_type = #tpu.core_type<tc>} {
    %c0 = arith.constant 0 : index
    %c0_0 = arith.constant 0 : index
    %0 = vector.load %arg0[%c0, %c0_0] : memref<16x32xf32, #tpu.memory_space<vmem>>, vector<16x32xf32>
    %c0_1 = arith.constant 0 : index
    %c0_2 = arith.constant 0 : index
    %1 = vector.load %arg1[%c0_1, %c0_2] : memref<16x32xf32, #tpu.memory_space<vmem>>, vector<16x32xf32>
    %2 = arith.truncf %1 : vector<16x32xf32> to vector<16x32xbf16>
    %c0_3 = arith.constant 0 : index
    %c0_4 = arith.constant 0 : index
    %c0_5 = arith.constant 0 : index
    %3 = vector.load %arg2[%c0_3, %c0_4, %c0_5] : memref<2x8x8xi8, #tpu.memory_space<vmem>>, vector<2x8x8xi8>
    %4 = arith.sitofp %3 : vector<2x8x8xi8> to vector<2x8x8xf32>
    %cst = arith.constant 0.000000e+00 : f32
    %5 = vector.broadcast %cst : f32 to vector<2x8x8xf32>
    %6 = arith.cmpf oeq, %4, %5 : vector<2x8x8xf32>
    %cst_6 = arith.constant -1.000000e+09 : f32
    %cst_7 = arith.constant 0.000000e+00 : f32
    %7 = vector.broadcast %cst_6 : f32 to vector<2x8x8xf32>
    %8 = vector.broadcast %cst_7 : f32 to vector<2x8x8xf32>
    %9 = arith.select %6, %7, %8 : vector<2x8x8xi1>, vector<2x8x8xf32>
    %c0_8 = arith.constant 0 : index
    %c0_9 = arith.constant 0 : index
    %c0_10 = arith.constant 0 : index
    %10 = vector.load %arg3[%c0_8, %c0_9, %c0_10] : memref<2x1x8xi8, #tpu.memory_space<vmem>>, vector<2x1x8xi8>
    %11 = arith.sitofp %10 : vector<2x1x8xi8> to vector<2x1x8xf32>
    %cst_11 = arith.constant 0.000000e+00 : f32
    %12 = vector.broadcast %cst_11 : f32 to vector<2x1x8xf32>
    %13 = arith.cmpf oeq, %11, %12 : vector<2x1x8xf32>
    %cst_12 = arith.constant -1.000000e+09 : f32
    %cst_13 = arith.constant 0.000000e+00 : f32
    %14 = vector.broadcast %cst_12 : f32 to vector<2x1x8xf32>
    %15 = vector.broadcast %cst_13 : f32 to vector<2x1x8xf32>
    %16 = arith.select %13, %14, %15 : vector<2x1x8xi1>, vector<2x1x8xf32>
    %17 = vector.shape_cast %9 : vector<2x8x8xf32> to vector<2x1x8x8xf32>
    %18 = vector.shape_cast %17 : vector<2x1x8x8xf32> to vector<2x1x8x8xf32>
    %19 = vector.broadcast %18 : vector<2x1x8x8xf32> to vector<2x4x8x8xf32>
    %20 = vector.shape_cast %19 : vector<2x4x8x8xf32> to vector<8x8x8xf32>
    %21 = vector.shape_cast %16 : vector<2x1x8xf32> to vector<2x1x1x8xf32>
    %22 = vector.shape_cast %21 : vector<2x1x1x8xf32> to vector<2x1x1x8xf32>
    %23 = vector.broadcast %22 : vector<2x1x1x8xf32> to vector<2x4x1x8xf32>
    %24 = vector.shape_cast %23 : vector<2x4x1x8xf32> to vector<8x1x8xf32>
    %c0_14 = arith.constant 0 : index
    %c0_15 = arith.constant 0 : index
    %c0_16 = arith.constant 0 : index
    %25 = vector.load %arg4[%c0_14, %c0_15, %c0_16] : memref<2x3x32xf32, #tpu.memory_space<vmem>>, vector<1x3x32xf32>
    %26 = vector.shape_cast %25 : vector<1x3x32xf32> to vector<3x32xf32>
    %c0_17 = arith.constant 0 : index
    %c0_18 = arith.constant 0 : index
    %c0_19 = arith.constant 0 : index
    %27 = vector.load %arg5[%c0_17, %c0_18, %c0_19] : memref<2x3x32xf32, #tpu.memory_space<vmem>>, vector<1x3x32xf32>
    %28 = vector.shape_cast %27 : vector<1x3x32xf32> to vector<3x32xf32>
    %29 = vector.extract_strided_slice %26 {offsets = [0, 0], sizes = [1, 32], strides = [1, 1]} : vector<3x32xf32> to vector<1x32xf32>
    %30 = vector.extract_strided_slice %28 {offsets = [0, 0], sizes = [1, 32], strides = [1, 1]} : vector<3x32xf32> to vector<1x32xf32>
    %cst_20 = arith.constant dense<0.000000e+00> : vector<16xf32>
    %31 = vector.multi_reduction <add>, %0, %cst_20 [1] : vector<16x32xf32> to vector<16xf32>
    %32 = vector.shape_cast %31 : vector<16xf32> to vector<16x1xf32>
    %cst_21 = arith.constant 3.200000e+01 : f32
    %33 = vector.broadcast %cst_21 : f32 to vector<16x1xf32>
    %34 = arith.divf %32, %33 : vector<16x1xf32>
    %35 = vector.broadcast %34 : vector<16x1xf32> to vector<16x32xf32>
    %36 = arith.subf %0, %35 : vector<16x32xf32>
    %37 = arith.mulf %36, %36 : vector<16x32xf32>
    %cst_22 = arith.constant dense<0.000000e+00> : vector<16xf32>
    %38 = vector.multi_reduction <add>, %37, %cst_22 [1] : vector<16x32xf32> to vector<16xf32>
    %39 = vector.shape_cast %38 : vector<16xf32> to vector<16x1xf32>
    %cst_23 = arith.constant 0.0322580636 : f32
    %40 = vector.broadcast %cst_23 : f32 to vector<16x1xf32>
    %41 = arith.mulf %39, %40 : vector<16x1xf32>
    %42 = math.sqrt %41 : vector<16x1xf32>
    %cst_24 = arith.constant 9.99999997E-7 : f32
    %43 = vector.broadcast %cst_24 : f32 to vector<16x1xf32>
    %44 = arith.addf %42, %43 : vector<16x1xf32>
    %45 = tpu.reciprocal %44 {approx = true} : vector<16x1xf32> -> vector<16x1xf32>
    %46 = vector.broadcast %45 : vector<16x1xf32> to vector<16x32xf32>
    %47 = arith.mulf %36, %46 : vector<16x32xf32>
    %48 = vector.broadcast %29 : vector<1x32xf32> to vector<16x32xf32>
    %49 = arith.mulf %48, %47 : vector<16x32xf32>
    %50 = vector.broadcast %30 : vector<1x32xf32> to vector<16x32xf32>
    %51 = arith.addf %49, %50 : vector<16x32xf32>
    %52 = arith.truncf %51 : vector<16x32xf32> to vector<16x32xbf16>
    %c0_25 = arith.constant 0 : index
    %c0_26 = arith.constant 0 : index
    %c0_27 = arith.constant 0 : index
    %53 = vector.load %arg6[%c0_25, %c0_26, %c0_27] : memref<2x32x96xbf16, #tpu.memory_space<vmem>>, vector<1x32x96xbf16>
    %54 = vector.shape_cast %53 : vector<1x32x96xbf16> to vector<32x96xbf16>
    %cst_28 = arith.constant dense<0.000000e+00> : vector<16x96xf32>
    %55 = tpu.matmul %52, %54, %cst_28 {dimension_numbers = #tpu.dot_dimension_numbers<[1], [0], [0], [1], [0, 0, 1, 1], [], []>} : vector<16x32xbf16>, vector<32x96xbf16>, vector<16x96xf32> -> vector<16x96xf32>
    %c0_29 = arith.constant 0 : index
    %c0_30 = arith.constant 0 : index
    %c0_31 = arith.constant 0 : index
    %56 = vector.load %arg7[%c0_29, %c0_30, %c0_31] : memref<2x1x96xf32, #tpu.memory_space<vmem>>, vector<1x1x96xf32>
    %57 = vector.shape_cast %56 : vector<1x1x96xf32> to vector<1x96xf32>
    %58 = vector.broadcast %57 : vector<1x96xf32> to vector<16x96xf32>
    %59 = arith.addf %55, %58 : vector<16x96xf32>
    %60 = vector.shape_cast %59 : vector<16x96xf32> to vector<2x8x96xf32>
    %61 = vector.extract_strided_slice %60 {offsets = [0, 0, 0], sizes = [2, 8, 8], strides = [1, 1, 1]} : vector<2x8x96xf32> to vector<2x8x8xf32>
    %62 = vector.shape_cast %61 : vector<2x8x8xf32> to vector<2x1x8x8xf32>
    %63 = vector.extract_strided_slice %60 {offsets = [0, 0, 8], sizes = [2, 8, 8], strides = [1, 1, 1]} : vector<2x8x96xf32> to vector<2x8x8xf32>
    %64 = vector.shape_cast %63 : vector<2x8x8xf32> to vector<2x1x8x8xf32>
    %65 = vector.extract_strided_slice %60 {offsets = [0, 0, 16], sizes = [2, 8, 8], strides = [1, 1, 1]} : vector<2x8x96xf32> to vector<2x8x8xf32>
    %66 = vector.shape_cast %65 : vector<2x8x8xf32> to vector<2x1x8x8xf32>
    %67 = vector.extract_strided_slice %60 {offsets = [0, 0, 24], sizes = [2, 8, 8], strides = [1, 1, 1]} : vector<2x8x96xf32> to vector<2x8x8xf32>
    %68 = vector.shape_cast %67 : vector<2x8x8xf32> to vector<2x1x8x8xf32>
    %69 = tpu.concatenate %62, %64, %66, %68 in 1 : vector<2x1x8x8xf32>, vector<2x1x8x8xf32>, vector<2x1x8x8xf32>, vector<2x1x8x8xf32> -> vector<2x4x8x8xf32>
    %70 = vector.shape_cast %69 : vector<2x4x8x8xf32> to vector<8x8x8xf32>
    %71 = arith.truncf %70 : vector<8x8x8xf32> to vector<8x8x8xbf16>
    %72 = vector.shape_cast %59 : vector<16x96xf32> to vector<2x8x96xf32>
    %73 = vector.extract_strided_slice %72 {offsets = [0, 0, 32], sizes = [2, 8, 8], strides = [1, 1, 1]} : vector<2x8x96xf32> to vector<2x8x8xf32>
    %74 = vector.shape_cast %73 : vector<2x8x8xf32> to vector<2x1x8x8xf32>
    %75 = vector.extract_strided_slice %72 {offsets = [0, 0, 40], sizes = [2, 8, 8], strides = [1, 1, 1]} : vector<2x8x96xf32> to vector<2x8x8xf32>
    %76 = vector.shape_cast %75 : vector<2x8x8xf32> to vector<2x1x8x8xf32>
    %77 = vector.extract_strided_slice %72 {offsets = [0, 0, 48], sizes = [2, 8, 8], strides = [1, 1, 1]} : vector<2x8x96xf32> to vector<2x8x8xf32>
    %78 = vector.shape_cast %77 : vector<2x8x8xf32> to vector<2x1x8x8xf32>
    %79 = vector.extract_strided_slice %72 {offsets = [0, 0, 56], sizes = [2, 8, 8], strides = [1, 1, 1]} : vector<2x8x96xf32> to vector<2x8x8xf32>
    %80 = vector.shape_cast %79 : vector<2x8x8xf32> to vector<2x1x8x8xf32>
    %81 = tpu.concatenate %74, %76, %78, %80 in 1 : vector<2x1x8x8xf32>, vector<2x1x8x8xf32>, vector<2x1x8x8xf32>, vector<2x1x8x8xf32> -> vector<2x4x8x8xf32>
    %82 = vector.shape_cast %81 : vector<2x4x8x8xf32> to vector<8x8x8xf32>
    %83 = arith.truncf %82 : vector<8x8x8xf32> to vector<8x8x8xbf16>
    %84 = vector.shape_cast %59 : vector<16x96xf32> to vector<2x8x96xf32>
    %85 = vector.extract_strided_slice %84 {offsets = [0, 0, 64], sizes = [2, 8, 8], strides = [1, 1, 1]} : vector<2x8x96xf32> to vector<2x8x8xf32>
    %86 = vector.shape_cast %85 : vector<2x8x8xf32> to vector<2x1x8x8xf32>
    %87 = vector.extract_strided_slice %84 {offsets = [0, 0, 72], sizes = [2, 8, 8], strides = [1, 1, 1]} : vector<2x8x96xf32> to vector<2x8x8xf32>
    %88 = vector.shape_cast %87 : vector<2x8x8xf32> to vector<2x1x8x8xf32>
    %89 = vector.extract_strided_slice %84 {offsets = [0, 0, 80], sizes = [2, 8, 8], strides = [1, 1, 1]} : vector<2x8x96xf32> to vector<2x8x8xf32>
    %90 = vector.shape_cast %89 : vector<2x8x8xf32> to vector<2x1x8x8xf32>
    %91 = vector.extract_strided_slice %84 {offsets = [0, 0, 88], sizes = [2, 8, 8], strides = [1, 1, 1]} : vector<2x8x96xf32> to vector<2x8x8xf32>
    %92 = vector.shape_cast %91 : vector<2x8x8xf32> to vector<2x1x8x8xf32>
    %93 = tpu.concatenate %86, %88, %90, %92 in 1 : vector<2x1x8x8xf32>, vector<2x1x8x8xf32>, vector<2x1x8x8xf32>, vector<2x1x8x8xf32> -> vector<2x4x8x8xf32>
    %94 = vector.shape_cast %93 : vector<2x4x8x8xf32> to vector<8x8x8xf32>
    %95 = arith.truncf %94 : vector<8x8x8xf32> to vector<8x8x8xbf16>
    %c0_32 = arith.constant 0 : index
    %c0_33 = arith.constant 0 : index
    %c0_34 = arith.constant 0 : index
    %96 = vector.load %arg8[%c0_32, %c0_33, %c0_34] : memref<2x32x32xbf16, #tpu.memory_space<vmem>>, vector<1x32x32xbf16>
    %97 = vector.shape_cast %96 : vector<1x32x32xbf16> to vector<32x32xbf16>
    %c0_35 = arith.constant 0 : index
    %c0_36 = arith.constant 0 : index
    %c0_37 = arith.constant 0 : index
    %98 = vector.load %arg9[%c0_35, %c0_36, %c0_37] : memref<2x1x32xf32, #tpu.memory_space<vmem>>, vector<1x1x32xf32>
    %99 = vector.shape_cast %98 : vector<1x1x32xf32> to vector<1x32xf32>
    "tpu.trace_start"() <{level = 10 : i32, message = "bqd,bkd->bqk"}> : () -> ()
    %cst_38 = arith.constant dense<0.000000e+00> : vector<8x8x8xf32>
    %100 = tpu.matmul %71, %83, %cst_38 {dimension_numbers = #tpu.dot_dimension_numbers<[2], [2], [1], [1], [0, 0, 0, 1, 1, 1], [0], [0]>} : vector<8x8x8xbf16>, vector<8x8x8xbf16>, vector<8x8x8xf32> -> vector<8x8x8xf32>
    "tpu.trace_stop"() : () -> ()
    %cst_39 = arith.constant 0.353553385 : f32
    %101 = vector.broadcast %cst_39 : f32 to vector<8x8x8xf32>
    %102 = arith.mulf %100, %101 : vector<8x8x8xf32>
    %103 = arith.addf %102, %20 : vector<8x8x8xf32>
    %cst_40 = arith.constant dense<0xFF800000> : vector<8x8xf32>
    %104 = vector.multi_reduction <maximumf>, %103, %cst_40 [2] : vector<8x8x8xf32> to vector<8x8xf32>
    %105 = vector.shape_cast %104 : vector<8x8xf32> to vector<8x8x1xf32>
    %106 = vector.broadcast %105 : vector<8x8x1xf32> to vector<8x8x8xf32>
    %107 = arith.subf %103, %106 : vector<8x8x8xf32>
    %108 = math.exp %107 : vector<8x8x8xf32>
    %cst_41 = arith.constant dense<0.000000e+00> : vector<8x8xf32>
    %109 = vector.multi_reduction <add>, %108, %cst_41 [2] : vector<8x8x8xf32> to vector<8x8xf32>
    %110 = vector.shape_cast %109 : vector<8x8xf32> to vector<8x8x1xf32>
    %111 = tpu.reciprocal %110 {approx = true} : vector<8x8x1xf32> -> vector<8x8x1xf32>
    %112 = vector.broadcast %111 : vector<8x8x1xf32> to vector<8x8x8xf32>
    %113 = arith.mulf %108, %112 : vector<8x8x8xf32>
    %114 = arith.truncf %113 : vector<8x8x8xf32> to vector<8x8x8xbf16>
    "tpu.trace_start"() <{level = 10 : i32, message = "bqk,bkd->bqd"}> : () -> ()
    %cst_42 = arith.constant dense<0.000000e+00> : vector<8x8x8xf32>
    %115 = tpu.matmul %114, %95, %cst_42 {dimension_numbers = #tpu.dot_dimension_numbers<[2], [1], [1], [2], [0, 0, 0, 1, 1, 2], [0], [0]>} : vector<8x8x8xbf16>, vector<8x8x8xbf16>, vector<8x8x8xf32> -> vector<8x8x8xf32>
    "tpu.trace_stop"() : () -> ()
    %116 = vector.shape_cast %115 : vector<8x8x8xf32> to vector<2x4x8x8xf32>
    %117 = vector.extract_strided_slice %116 {offsets = [0, 0, 0, 0], sizes = [2, 1, 8, 8], strides = [1, 1, 1, 1]} : vector<2x4x8x8xf32> to vector<2x1x8x8xf32>
    %118 = vector.shape_cast %117 : vector<2x1x8x8xf32> to vector<2x8x8xf32>
    %119 = vector.extract_strided_slice %116 {offsets = [0, 1, 0, 0], sizes = [2, 1, 8, 8], strides = [1, 1, 1, 1]} : vector<2x4x8x8xf32> to vector<2x1x8x8xf32>
    %120 = vector.shape_cast %119 : vector<2x1x8x8xf32> to vector<2x8x8xf32>
    %121 = vector.extract_strided_slice %116 {offsets = [0, 2, 0, 0], sizes = [2, 1, 8, 8], strides = [1, 1, 1, 1]} : vector<2x4x8x8xf32> to vector<2x1x8x8xf32>
    %122 = vector.shape_cast %121 : vector<2x1x8x8xf32> to vector<2x8x8xf32>
    %123 = vector.extract_strided_slice %116 {offsets = [0, 3, 0, 0], sizes = [2, 1, 8, 8], strides = [1, 1, 1, 1]} : vector<2x4x8x8xf32> to vector<2x1x8x8xf32>
    %124 = vector.shape_cast %123 : vector<2x1x8x8xf32> to vector<2x8x8xf32>
    %125 = tpu.concatenate %118, %120, %122, %124 in 2 : vector<2x8x8xf32>, vector<2x8x8xf32>, vector<2x8x8xf32>, vector<2x8x8xf32> -> vector<2x8x32xf32>
    %126 = vector.shape_cast %125 : vector<2x8x32xf32> to vector<16x32xf32>
    %127 = arith.truncf %126 : vector<16x32xf32> to vector<16x32xbf16>
    %cst_43 = arith.constant dense<0.000000e+00> : vector<16x32xf32>
    %128 = tpu.matmul %127, %97, %cst_43 {dimension_numbers = #tpu.dot_dimension_numbers<[1], [0], [0], [1], [0, 0, 1, 1], [], []>} : vector<16x32xbf16>, vector<32x32xbf16>, vector<16x32xf32> -> vector<16x32xf32>
    %129 = vector.broadcast %99 : vector<1x32xf32> to vector<16x32xf32>
    %130 = arith.addf %128, %129 : vector<16x32xf32>
    %131 = arith.addf %0, %130 : vector<16x32xf32>
    %132 = vector.extract_strided_slice %26 {offsets = [1, 0], sizes = [1, 32], strides = [1, 1]} : vector<3x32xf32> to vector<1x32xf32>
    %133 = vector.extract_strided_slice %28 {offsets = [1, 0], sizes = [1, 32], strides = [1, 1]} : vector<3x32xf32> to vector<1x32xf32>
    %cst_44 = arith.constant dense<0.000000e+00> : vector<16xf32>
    %134 = vector.multi_reduction <add>, %131, %cst_44 [1] : vector<16x32xf32> to vector<16xf32>
    %135 = vector.shape_cast %134 : vector<16xf32> to vector<16x1xf32>
    %cst_45 = arith.constant 3.200000e+01 : f32
    %136 = vector.broadcast %cst_45 : f32 to vector<16x1xf32>
    %137 = arith.divf %135, %136 : vector<16x1xf32>
    %138 = vector.broadcast %137 : vector<16x1xf32> to vector<16x32xf32>
    %139 = arith.subf %131, %138 : vector<16x32xf32>
    %140 = arith.mulf %139, %139 : vector<16x32xf32>
    %cst_46 = arith.constant dense<0.000000e+00> : vector<16xf32>
    %141 = vector.multi_reduction <add>, %140, %cst_46 [1] : vector<16x32xf32> to vector<16xf32>
    %142 = vector.shape_cast %141 : vector<16xf32> to vector<16x1xf32>
    %cst_47 = arith.constant 0.0322580636 : f32
    %143 = vector.broadcast %cst_47 : f32 to vector<16x1xf32>
    %144 = arith.mulf %142, %143 : vector<16x1xf32>
    %145 = math.sqrt %144 : vector<16x1xf32>
    %cst_48 = arith.constant 9.99999997E-7 : f32
    %146 = vector.broadcast %cst_48 : f32 to vector<16x1xf32>
    %147 = arith.addf %145, %146 : vector<16x1xf32>
    %148 = tpu.reciprocal %147 {approx = true} : vector<16x1xf32> -> vector<16x1xf32>
    %149 = vector.broadcast %148 : vector<16x1xf32> to vector<16x32xf32>
    %150 = arith.mulf %139, %149 : vector<16x32xf32>
    %151 = vector.broadcast %132 : vector<1x32xf32> to vector<16x32xf32>
    %152 = arith.mulf %151, %150 : vector<16x32xf32>
    %153 = vector.broadcast %133 : vector<1x32xf32> to vector<16x32xf32>
    %154 = arith.addf %152, %153 : vector<16x32xf32>
    %155 = arith.truncf %154 : vector<16x32xf32> to vector<16x32xbf16>
    %c0_49 = arith.constant 0 : index
    %c0_50 = arith.constant 0 : index
    %c0_51 = arith.constant 0 : index
    %156 = vector.load %arg10[%c0_49, %c0_50, %c0_51] : memref<2x32x32xbf16, #tpu.memory_space<vmem>>, vector<1x32x32xbf16>
    %157 = vector.shape_cast %156 : vector<1x32x32xbf16> to vector<32x32xbf16>
    %cst_52 = arith.constant dense<0.000000e+00> : vector<16x32xf32>
    %158 = tpu.matmul %155, %157, %cst_52 {dimension_numbers = #tpu.dot_dimension_numbers<[1], [0], [0], [1], [0, 0, 1, 1], [], []>} : vector<16x32xbf16>, vector<32x32xbf16>, vector<16x32xf32> -> vector<16x32xf32>
    %c0_53 = arith.constant 0 : index
    %c0_54 = arith.constant 0 : index
    %c0_55 = arith.constant 0 : index
    %159 = vector.load %arg11[%c0_53, %c0_54, %c0_55] : memref<2x1x32xf32, #tpu.memory_space<vmem>>, vector<1x1x32xf32>
    %160 = vector.shape_cast %159 : vector<1x1x32xf32> to vector<1x32xf32>
    %161 = vector.broadcast %160 : vector<1x32xf32> to vector<16x32xf32>
    %162 = arith.addf %158, %161 : vector<16x32xf32>
    %c0_56 = arith.constant 0 : index
    %c0_57 = arith.constant 0 : index
    %c0_58 = arith.constant 0 : index
    %163 = vector.load %arg12[%c0_56, %c0_57, %c0_58] : memref<2x32x64xbf16, #tpu.memory_space<vmem>>, vector<1x32x64xbf16>
    %164 = vector.shape_cast %163 : vector<1x32x64xbf16> to vector<32x64xbf16>
    %cst_59 = arith.constant dense<0.000000e+00> : vector<16x64xf32>
    %165 = tpu.matmul %2, %164, %cst_59 {dimension_numbers = #tpu.dot_dimension_numbers<[1], [0], [0], [1], [0, 0, 1, 1], [], []>} : vector<16x32xbf16>, vector<32x64xbf16>, vector<16x64xf32> -> vector<16x64xf32>
    %c0_60 = arith.constant 0 : index
    %c0_61 = arith.constant 0 : index
    %c0_62 = arith.constant 0 : index
    %166 = vector.load %arg13[%c0_60, %c0_61, %c0_62] : memref<2x1x64xf32, #tpu.memory_space<vmem>>, vector<1x1x64xf32>
    %167 = vector.shape_cast %166 : vector<1x1x64xf32> to vector<1x64xf32>
    %168 = vector.broadcast %167 : vector<1x64xf32> to vector<16x64xf32>
    %169 = arith.addf %165, %168 : vector<16x64xf32>
    %170 = vector.shape_cast %162 : vector<16x32xf32> to vector<2x8x32xf32>
    %171 = vector.extract_strided_slice %170 {offsets = [0, 0, 0], sizes = [2, 8, 8], strides = [1, 1, 1]} : vector<2x8x32xf32> to vector<2x8x8xf32>
    %172 = vector.shape_cast %171 : vector<2x8x8xf32> to vector<2x1x8x8xf32>
    %173 = vector.extract_strided_slice %170 {offsets = [0, 0, 8], sizes = [2, 8, 8], strides = [1, 1, 1]} : vector<2x8x32xf32> to vector<2x8x8xf32>
    %174 = vector.shape_cast %173 : vector<2x8x8xf32> to vector<2x1x8x8xf32>
    %175 = vector.extract_strided_slice %170 {offsets = [0, 0, 16], sizes = [2, 8, 8], strides = [1, 1, 1]} : vector<2x8x32xf32> to vector<2x8x8xf32>
    %176 = vector.shape_cast %175 : vector<2x8x8xf32> to vector<2x1x8x8xf32>
    %177 = vector.extract_strided_slice %170 {offsets = [0, 0, 24], sizes = [2, 8, 8], strides = [1, 1, 1]} : vector<2x8x32xf32> to vector<2x8x8xf32>
    %178 = vector.shape_cast %177 : vector<2x8x8xf32> to vector<2x1x8x8xf32>
    %179 = tpu.concatenate %172, %174, %176, %178 in 1 : vector<2x1x8x8xf32>, vector<2x1x8x8xf32>, vector<2x1x8x8xf32>, vector<2x1x8x8xf32> -> vector<2x4x8x8xf32>
    %180 = vector.shape_cast %179 : vector<2x4x8x8xf32> to vector<8x8x8xf32>
    %181 = arith.truncf %180 : vector<8x8x8xf32> to vector<8x8x8xbf16>
    %182 = vector.shape_cast %169 : vector<16x64xf32> to vector<2x8x64xf32>
    %183 = vector.extract_strided_slice %182 {offsets = [0, 0, 0], sizes = [2, 8, 8], strides = [1, 1, 1]} : vector<2x8x64xf32> to vector<2x8x8xf32>
    %184 = vector.shape_cast %183 : vector<2x8x8xf32> to vector<2x1x8x8xf32>
    %185 = vector.extract_strided_slice %182 {offsets = [0, 0, 8], sizes = [2, 8, 8], strides = [1, 1, 1]} : vector<2x8x64xf32> to vector<2x8x8xf32>
    %186 = vector.shape_cast %185 : vector<2x8x8xf32> to vector<2x1x8x8xf32>
    %187 = vector.extract_strided_slice %182 {offsets = [0, 0, 16], sizes = [2, 8, 8], strides = [1, 1, 1]} : vector<2x8x64xf32> to vector<2x8x8xf32>
    %188 = vector.shape_cast %187 : vector<2x8x8xf32> to vector<2x1x8x8xf32>
    %189 = vector.extract_strided_slice %182 {offsets = [0, 0, 24], sizes = [2, 8, 8], strides = [1, 1, 1]} : vector<2x8x64xf32> to vector<2x8x8xf32>
    %190 = vector.shape_cast %189 : vector<2x8x8xf32> to vector<2x1x8x8xf32>
    %191 = tpu.concatenate %184, %186, %188, %190 in 1 : vector<2x1x8x8xf32>, vector<2x1x8x8xf32>, vector<2x1x8x8xf32>, vector<2x1x8x8xf32> -> vector<2x4x8x8xf32>
    %192 = vector.shape_cast %191 : vector<2x4x8x8xf32> to vector<8x8x8xf32>
    %193 = arith.truncf %192 : vector<8x8x8xf32> to vector<8x8x8xbf16>
    %194 = vector.shape_cast %169 : vector<16x64xf32> to vector<2x8x64xf32>
    %195 = vector.extract_strided_slice %194 {offsets = [0, 0, 32], sizes = [2, 8, 8], strides = [1, 1, 1]} : vector<2x8x64xf32> to vector<2x8x8xf32>
    %196 = vector.shape_cast %195 : vector<2x8x8xf32> to vector<2x1x8x8xf32>
    %197 = vector.extract_strided_slice %194 {offsets = [0, 0, 40], sizes = [2, 8, 8], strides = [1, 1, 1]} : vector<2x8x64xf32> to vector<2x8x8xf32>
    %198 = vector.shape_cast %197 : vector<2x8x8xf32> to vector<2x1x8x8xf32>
    %199 = vector.extract_strided_slice %194 {offsets = [0, 0, 48], sizes = [2, 8, 8], strides = [1, 1, 1]} : vector<2x8x64xf32> to vector<2x8x8xf32>
    %200 = vector.shape_cast %199 : vector<2x8x8xf32> to vector<2x1x8x8xf32>
    %201 = vector.extract_strided_slice %194 {offsets = [0, 0, 56], sizes = [2, 8, 8], strides = [1, 1, 1]} : vector<2x8x64xf32> to vector<2x8x8xf32>
    %202 = vector.shape_cast %201 : vector<2x8x8xf32> to vector<2x1x8x8xf32>
    %203 = tpu.concatenate %196, %198, %200, %202 in 1 : vector<2x1x8x8xf32>, vector<2x1x8x8xf32>, vector<2x1x8x8xf32>, vector<2x1x8x8xf32> -> vector<2x4x8x8xf32>
    %204 = vector.shape_cast %203 : vector<2x4x8x8xf32> to vector<8x8x8xf32>
    %205 = arith.truncf %204 : vector<8x8x8xf32> to vector<8x8x8xbf16>
    %c0_63 = arith.constant 0 : index
    %c0_64 = arith.constant 0 : index
    %c0_65 = arith.constant 0 : index
    %206 = vector.load %arg14[%c0_63, %c0_64, %c0_65] : memref<2x32x32xbf16, #tpu.memory_space<vmem>>, vector<1x32x32xbf16>
    %207 = vector.shape_cast %206 : vector<1x32x32xbf16> to vector<32x32xbf16>
    %c0_66 = arith.constant 0 : index
    %c0_67 = arith.constant 0 : index
    %c0_68 = arith.constant 0 : index
    %208 = vector.load %arg15[%c0_66, %c0_67, %c0_68] : memref<2x1x32xf32, #tpu.memory_space<vmem>>, vector<1x1x32xf32>
    %209 = vector.shape_cast %208 : vector<1x1x32xf32> to vector<1x32xf32>
    "tpu.trace_start"() <{level = 10 : i32, message = "bqd,bkd->bqk"}> : () -> ()
    %cst_69 = arith.constant dense<0.000000e+00> : vector<8x8x8xf32>
    %210 = tpu.matmul %181, %193, %cst_69 {dimension_numbers = #tpu.dot_dimension_numbers<[2], [2], [1], [1], [0, 0, 0, 1, 1, 1], [0], [0]>} : vector<8x8x8xbf16>, vector<8x8x8xbf16>, vector<8x8x8xf32> -> vector<8x8x8xf32>
    "tpu.trace_stop"() : () -> ()
    %cst_70 = arith.constant 0.353553385 : f32
    %211 = vector.broadcast %cst_70 : f32 to vector<8x8x8xf32>
    %212 = arith.mulf %210, %211 : vector<8x8x8xf32>
    %213 = vector.broadcast %24 : vector<8x1x8xf32> to vector<8x8x8xf32>
    %214 = arith.addf %212, %213 : vector<8x8x8xf32>
    %cst_71 = arith.constant dense<0xFF800000> : vector<8x8xf32>
    %215 = vector.multi_reduction <maximumf>, %214, %cst_71 [2] : vector<8x8x8xf32> to vector<8x8xf32>
    %216 = vector.shape_cast %215 : vector<8x8xf32> to vector<8x8x1xf32>
    %217 = vector.broadcast %216 : vector<8x8x1xf32> to vector<8x8x8xf32>
    %218 = arith.subf %214, %217 : vector<8x8x8xf32>
    %219 = math.exp %218 : vector<8x8x8xf32>
    %cst_72 = arith.constant dense<0.000000e+00> : vector<8x8xf32>
    %220 = vector.multi_reduction <add>, %219, %cst_72 [2] : vector<8x8x8xf32> to vector<8x8xf32>
    %221 = vector.shape_cast %220 : vector<8x8xf32> to vector<8x8x1xf32>
    %222 = tpu.reciprocal %221 {approx = true} : vector<8x8x1xf32> -> vector<8x8x1xf32>
    %223 = vector.broadcast %222 : vector<8x8x1xf32> to vector<8x8x8xf32>
    %224 = arith.mulf %219, %223 : vector<8x8x8xf32>
    %225 = arith.truncf %224 : vector<8x8x8xf32> to vector<8x8x8xbf16>
    "tpu.trace_start"() <{level = 10 : i32, message = "bqk,bkd->bqd"}> : () -> ()
    %cst_73 = arith.constant dense<0.000000e+00> : vector<8x8x8xf32>
    %226 = tpu.matmul %225, %205, %cst_73 {dimension_numbers = #tpu.dot_dimension_numbers<[2], [1], [1], [2], [0, 0, 0, 1, 1, 2], [0], [0]>} : vector<8x8x8xbf16>, vector<8x8x8xbf16>, vector<8x8x8xf32> -> vector<8x8x8xf32>
    "tpu.trace_stop"() : () -> ()
    %227 = vector.shape_cast %226 : vector<8x8x8xf32> to vector<2x4x8x8xf32>
    %228 = vector.extract_strided_slice %227 {offsets = [0, 0, 0, 0], sizes = [2, 1, 8, 8], strides = [1, 1, 1, 1]} : vector<2x4x8x8xf32> to vector<2x1x8x8xf32>
    %229 = vector.shape_cast %228 : vector<2x1x8x8xf32> to vector<2x8x8xf32>
    %230 = vector.extract_strided_slice %227 {offsets = [0, 1, 0, 0], sizes = [2, 1, 8, 8], strides = [1, 1, 1, 1]} : vector<2x4x8x8xf32> to vector<2x1x8x8xf32>
    %231 = vector.shape_cast %230 : vector<2x1x8x8xf32> to vector<2x8x8xf32>
    %232 = vector.extract_strided_slice %227 {offsets = [0, 2, 0, 0], sizes = [2, 1, 8, 8], strides = [1, 1, 1, 1]} : vector<2x4x8x8xf32> to vector<2x1x8x8xf32>
    %233 = vector.shape_cast %232 : vector<2x1x8x8xf32> to vector<2x8x8xf32>
    %234 = vector.extract_strided_slice %227 {offsets = [0, 3, 0, 0], sizes = [2, 1, 8, 8], strides = [1, 1, 1, 1]} : vector<2x4x8x8xf32> to vector<2x1x8x8xf32>
    %235 = vector.shape_cast %234 : vector<2x1x8x8xf32> to vector<2x8x8xf32>
    %236 = tpu.concatenate %229, %231, %233, %235 in 2 : vector<2x8x8xf32>, vector<2x8x8xf32>, vector<2x8x8xf32>, vector<2x8x8xf32> -> vector<2x8x32xf32>
    %237 = vector.shape_cast %236 : vector<2x8x32xf32> to vector<16x32xf32>
    %238 = arith.truncf %237 : vector<16x32xf32> to vector<16x32xbf16>
    %cst_74 = arith.constant dense<0.000000e+00> : vector<16x32xf32>
    %239 = tpu.matmul %238, %207, %cst_74 {dimension_numbers = #tpu.dot_dimension_numbers<[1], [0], [0], [1], [0, 0, 1, 1], [], []>} : vector<16x32xbf16>, vector<32x32xbf16>, vector<16x32xf32> -> vector<16x32xf32>
    %240 = vector.broadcast %209 : vector<1x32xf32> to vector<16x32xf32>
    %241 = arith.addf %239, %240 : vector<16x32xf32>
    %242 = arith.addf %131, %241 : vector<16x32xf32>
    %243 = vector.extract_strided_slice %26 {offsets = [2, 0], sizes = [1, 32], strides = [1, 1]} : vector<3x32xf32> to vector<1x32xf32>
    %244 = vector.extract_strided_slice %28 {offsets = [2, 0], sizes = [1, 32], strides = [1, 1]} : vector<3x32xf32> to vector<1x32xf32>
    %cst_75 = arith.constant dense<0.000000e+00> : vector<16xf32>
    %245 = vector.multi_reduction <add>, %242, %cst_75 [1] : vector<16x32xf32> to vector<16xf32>
    %246 = vector.shape_cast %245 : vector<16xf32> to vector<16x1xf32>
    %cst_76 = arith.constant 3.200000e+01 : f32
    %247 = vector.broadcast %cst_76 : f32 to vector<16x1xf32>
    %248 = arith.divf %246, %247 : vector<16x1xf32>
    %249 = vector.broadcast %248 : vector<16x1xf32> to vector<16x32xf32>
    %250 = arith.subf %242, %249 : vector<16x32xf32>
    %251 = arith.mulf %250, %250 : vector<16x32xf32>
    %cst_77 = arith.constant dense<0.000000e+00> : vector<16xf32>
    %252 = vector.multi_reduction <add>, %251, %cst_77 [1] : vector<16x32xf32> to vector<16xf32>
    %253 = vector.shape_cast %252 : vector<16xf32> to vector<16x1xf32>
    %cst_78 = arith.constant 0.0322580636 : f32
    %254 = vector.broadcast %cst_78 : f32 to vector<16x1xf32>
    %255 = arith.mulf %253, %254 : vector<16x1xf32>
    %256 = math.sqrt %255 : vector<16x1xf32>
    %cst_79 = arith.constant 9.99999997E-7 : f32
    %257 = vector.broadcast %cst_79 : f32 to vector<16x1xf32>
    %258 = arith.addf %256, %257 : vector<16x1xf32>
    %259 = tpu.reciprocal %258 {approx = true} : vector<16x1xf32> -> vector<16x1xf32>
    %260 = vector.broadcast %259 : vector<16x1xf32> to vector<16x32xf32>
    %261 = arith.mulf %250, %260 : vector<16x32xf32>
    %262 = vector.broadcast %243 : vector<1x32xf32> to vector<16x32xf32>
    %263 = arith.mulf %262, %261 : vector<16x32xf32>
    %264 = vector.broadcast %244 : vector<1x32xf32> to vector<16x32xf32>
    %265 = arith.addf %263, %264 : vector<16x32xf32>
    %266 = arith.truncf %265 : vector<16x32xf32> to vector<16x32xbf16>
    %c0_80 = arith.constant 0 : index
    %c0_81 = arith.constant 0 : index
    %c0_82 = arith.constant 0 : index
    %267 = vector.load %arg16[%c0_80, %c0_81, %c0_82] : memref<2x32x2048xbf16, #tpu.memory_space<vmem>>, vector<1x32x2048xbf16>
    %268 = vector.shape_cast %267 : vector<1x32x2048xbf16> to vector<32x2048xbf16>
    %cst_83 = arith.constant dense<0.000000e+00> : vector<16x2048xf32>
    %269 = tpu.matmul %266, %268, %cst_83 {dimension_numbers = #tpu.dot_dimension_numbers<[1], [0], [0], [1], [0, 0, 1, 1], [], []>} : vector<16x32xbf16>, vector<32x2048xbf16>, vector<16x2048xf32> -> vector<16x2048xf32>
    %c0_84 = arith.constant 0 : index
    %c0_85 = arith.constant 0 : index
    %c0_86 = arith.constant 0 : index
    %270 = vector.load %arg17[%c0_84, %c0_85, %c0_86] : memref<2x1x2048xf32, #tpu.memory_space<vmem>>, vector<1x1x2048xf32>
    %271 = vector.shape_cast %270 : vector<1x1x2048xf32> to vector<1x2048xf32>
    %272 = vector.broadcast %271 : vector<1x2048xf32> to vector<16x2048xf32>
    %273 = arith.addf %269, %272 : vector<16x2048xf32>
    %cst_87 = arith.constant 0.000000e+00 : f32
    %274 = vector.broadcast %cst_87 : f32 to vector<16x2048xf32>
    %275 = arith.maximumf %273, %274 : vector<16x2048xf32>
    %276 = arith.truncf %275 : vector<16x2048xf32> to vector<16x2048xbf16>
    %c0_88 = arith.constant 0 : index
    %c0_89 = arith.constant 0 : index
    %c0_90 = arith.constant 0 : index
    %277 = vector.load %arg18[%c0_88, %c0_89, %c0_90] : memref<2x2048x32xbf16, #tpu.memory_space<vmem>>, vector<1x2048x32xbf16>
    %278 = vector.shape_cast %277 : vector<1x2048x32xbf16> to vector<2048x32xbf16>
    %cst_91 = arith.constant dense<0.000000e+00> : vector<16x32xf32>
    %279 = tpu.matmul %276, %278, %cst_91 {dimension_numbers = #tpu.dot_dimension_numbers<[1], [0], [0], [1], [0, 0, 1, 1], [], []>} : vector<16x2048xbf16>, vector<2048x32xbf16>, vector<16x32xf32> -> vector<16x32xf32>
    %c0_92 = arith.constant 0 : index
    %c0_93 = arith.constant 0 : index
    %c0_94 = arith.constant 0 : index
    %280 = vector.load %arg19[%c0_92, %c0_93, %c0_94] : memref<2x1x32xf32, #tpu.memory_space<vmem>>, vector<1x1x32xf32>
    %281 = vector.shape_cast %280 : vector<1x1x32xf32> to vector<1x32xf32>
    %282 = vector.broadcast %281 : vector<1x32xf32> to vector<16x32xf32>
    %283 = arith.addf %279, %282 : vector<16x32xf32>
    %284 = arith.addf %242, %283 : vector<16x32xf32>
    %c1 = arith.constant 1 : index
    %c0_95 = arith.constant 0 : index
    %c0_96 = arith.constant 0 : index
    %285 = vector.load %arg4[%c1, %c0_95, %c0_96] : memref<2x3x32xf32, #tpu.memory_space<vmem>>, vector<1x3x32xf32>
    %286 = vector.shape_cast %285 : vector<1x3x32xf32> to vector<3x32xf32>
    %c1_97 = arith.constant 1 : index
    %c0_98 = arith.constant 0 : index
    %c0_99 = arith.constant 0 : index
    %287 = vector.load %arg5[%c1_97, %c0_98, %c0_99] : memref<2x3x32xf32, #tpu.memory_space<vmem>>, vector<1x3x32xf32>
    %288 = vector.shape_cast %287 : vector<1x3x32xf32> to vector<3x32xf32>
    %289 = vector.extract_strided_slice %286 {offsets = [0, 0], sizes = [1, 32], strides = [1, 1]} : vector<3x32xf32> to vector<1x32xf32>
    %290 = vector.extract_strided_slice %288 {offsets = [0, 0], sizes = [1, 32], strides = [1, 1]} : vector<3x32xf32> to vector<1x32xf32>
    %cst_100 = arith.constant dense<0.000000e+00> : vector<16xf32>
    %291 = vector.multi_reduction <add>, %284, %cst_100 [1] : vector<16x32xf32> to vector<16xf32>
    %292 = vector.shape_cast %291 : vector<16xf32> to vector<16x1xf32>
    %cst_101 = arith.constant 3.200000e+01 : f32
    %293 = vector.broadcast %cst_101 : f32 to vector<16x1xf32>
    %294 = arith.divf %292, %293 : vector<16x1xf32>
    %295 = vector.broadcast %294 : vector<16x1xf32> to vector<16x32xf32>
    %296 = arith.subf %284, %295 : vector<16x32xf32>
    %297 = arith.mulf %296, %296 : vector<16x32xf32>
    %cst_102 = arith.constant dense<0.000000e+00> : vector<16xf32>
    %298 = vector.multi_reduction <add>, %297, %cst_102 [1] : vector<16x32xf32> to vector<16xf32>
    %299 = vector.shape_cast %298 : vector<16xf32> to vector<16x1xf32>
    %cst_103 = arith.constant 0.0322580636 : f32
    %300 = vector.broadcast %cst_103 : f32 to vector<16x1xf32>
    %301 = arith.mulf %299, %300 : vector<16x1xf32>
    %302 = math.sqrt %301 : vector<16x1xf32>
    %cst_104 = arith.constant 9.99999997E-7 : f32
    %303 = vector.broadcast %cst_104 : f32 to vector<16x1xf32>
    %304 = arith.addf %302, %303 : vector<16x1xf32>
    %305 = tpu.reciprocal %304 {approx = true} : vector<16x1xf32> -> vector<16x1xf32>
    %306 = vector.broadcast %305 : vector<16x1xf32> to vector<16x32xf32>
    %307 = arith.mulf %296, %306 : vector<16x32xf32>
    %308 = vector.broadcast %289 : vector<1x32xf32> to vector<16x32xf32>
    %309 = arith.mulf %308, %307 : vector<16x32xf32>
    %310 = vector.broadcast %290 : vector<1x32xf32> to vector<16x32xf32>
    %311 = arith.addf %309, %310 : vector<16x32xf32>
    %312 = arith.truncf %311 : vector<16x32xf32> to vector<16x32xbf16>
    %c1_105 = arith.constant 1 : index
    %c0_106 = arith.constant 0 : index
    %c0_107 = arith.constant 0 : index
    %313 = vector.load %arg6[%c1_105, %c0_106, %c0_107] : memref<2x32x96xbf16, #tpu.memory_space<vmem>>, vector<1x32x96xbf16>
    %314 = vector.shape_cast %313 : vector<1x32x96xbf16> to vector<32x96xbf16>
    %cst_108 = arith.constant dense<0.000000e+00> : vector<16x96xf32>
    %315 = tpu.matmul %312, %314, %cst_108 {dimension_numbers = #tpu.dot_dimension_numbers<[1], [0], [0], [1], [0, 0, 1, 1], [], []>} : vector<16x32xbf16>, vector<32x96xbf16>, vector<16x96xf32> -> vector<16x96xf32>
    %c1_109 = arith.constant 1 : index
    %c0_110 = arith.constant 0 : index
    %c0_111 = arith.constant 0 : index
    %316 = vector.load %arg7[%c1_109, %c0_110, %c0_111] : memref<2x1x96xf32, #tpu.memory_space<vmem>>, vector<1x1x96xf32>
    %317 = vector.shape_cast %316 : vector<1x1x96xf32> to vector<1x96xf32>
    %318 = vector.broadcast %317 : vector<1x96xf32> to vector<16x96xf32>
    %319 = arith.addf %315, %318 : vector<16x96xf32>
    %320 = vector.shape_cast %319 : vector<16x96xf32> to vector<2x8x96xf32>
    %321 = vector.extract_strided_slice %320 {offsets = [0, 0, 0], sizes = [2, 8, 8], strides = [1, 1, 1]} : vector<2x8x96xf32> to vector<2x8x8xf32>
    %322 = vector.shape_cast %321 : vector<2x8x8xf32> to vector<2x1x8x8xf32>
    %323 = vector.extract_strided_slice %320 {offsets = [0, 0, 8], sizes = [2, 8, 8], strides = [1, 1, 1]} : vector<2x8x96xf32> to vector<2x8x8xf32>
    %324 = vector.shape_cast %323 : vector<2x8x8xf32> to vector<2x1x8x8xf32>
    %325 = vector.extract_strided_slice %320 {offsets = [0, 0, 16], sizes = [2, 8, 8], strides = [1, 1, 1]} : vector<2x8x96xf32> to vector<2x8x8xf32>
    %326 = vector.shape_cast %325 : vector<2x8x8xf32> to vector<2x1x8x8xf32>
    %327 = vector.extract_strided_slice %320 {offsets = [0, 0, 24], sizes = [2, 8, 8], strides = [1, 1, 1]} : vector<2x8x96xf32> to vector<2x8x8xf32>
    %328 = vector.shape_cast %327 : vector<2x8x8xf32> to vector<2x1x8x8xf32>
    %329 = tpu.concatenate %322, %324, %326, %328 in 1 : vector<2x1x8x8xf32>, vector<2x1x8x8xf32>, vector<2x1x8x8xf32>, vector<2x1x8x8xf32> -> vector<2x4x8x8xf32>
    %330 = vector.shape_cast %329 : vector<2x4x8x8xf32> to vector<8x8x8xf32>
    %331 = arith.truncf %330 : vector<8x8x8xf32> to vector<8x8x8xbf16>
    %332 = vector.shape_cast %319 : vector<16x96xf32> to vector<2x8x96xf32>
    %333 = vector.extract_strided_slice %332 {offsets = [0, 0, 32], sizes = [2, 8, 8], strides = [1, 1, 1]} : vector<2x8x96xf32> to vector<2x8x8xf32>
    %334 = vector.shape_cast %333 : vector<2x8x8xf32> to vector<2x1x8x8xf32>
    %335 = vector.extract_strided_slice %332 {offsets = [0, 0, 40], sizes = [2, 8, 8], strides = [1, 1, 1]} : vector<2x8x96xf32> to vector<2x8x8xf32>
    %336 = vector.shape_cast %335 : vector<2x8x8xf32> to vector<2x1x8x8xf32>
    %337 = vector.extract_strided_slice %332 {offsets = [0, 0, 48], sizes = [2, 8, 8], strides = [1, 1, 1]} : vector<2x8x96xf32> to vector<2x8x8xf32>
    %338 = vector.shape_cast %337 : vector<2x8x8xf32> to vector<2x1x8x8xf32>
    %339 = vector.extract_strided_slice %332 {offsets = [0, 0, 56], sizes = [2, 8, 8], strides = [1, 1, 1]} : vector<2x8x96xf32> to vector<2x8x8xf32>
    %340 = vector.shape_cast %339 : vector<2x8x8xf32> to vector<2x1x8x8xf32>
    %341 = tpu.concatenate %334, %336, %338, %340 in 1 : vector<2x1x8x8xf32>, vector<2x1x8x8xf32>, vector<2x1x8x8xf32>, vector<2x1x8x8xf32> -> vector<2x4x8x8xf32>
    %342 = vector.shape_cast %341 : vector<2x4x8x8xf32> to vector<8x8x8xf32>
    %343 = arith.truncf %342 : vector<8x8x8xf32> to vector<8x8x8xbf16>
    %344 = vector.shape_cast %319 : vector<16x96xf32> to vector<2x8x96xf32>
    %345 = vector.extract_strided_slice %344 {offsets = [0, 0, 64], sizes = [2, 8, 8], strides = [1, 1, 1]} : vector<2x8x96xf32> to vector<2x8x8xf32>
    %346 = vector.shape_cast %345 : vector<2x8x8xf32> to vector<2x1x8x8xf32>
    %347 = vector.extract_strided_slice %344 {offsets = [0, 0, 72], sizes = [2, 8, 8], strides = [1, 1, 1]} : vector<2x8x96xf32> to vector<2x8x8xf32>
    %348 = vector.shape_cast %347 : vector<2x8x8xf32> to vector<2x1x8x8xf32>
    %349 = vector.extract_strided_slice %344 {offsets = [0, 0, 80], sizes = [2, 8, 8], strides = [1, 1, 1]} : vector<2x8x96xf32> to vector<2x8x8xf32>
    %350 = vector.shape_cast %349 : vector<2x8x8xf32> to vector<2x1x8x8xf32>
    %351 = vector.extract_strided_slice %344 {offsets = [0, 0, 88], sizes = [2, 8, 8], strides = [1, 1, 1]} : vector<2x8x96xf32> to vector<2x8x8xf32>
    %352 = vector.shape_cast %351 : vector<2x8x8xf32> to vector<2x1x8x8xf32>
    %353 = tpu.concatenate %346, %348, %350, %352 in 1 : vector<2x1x8x8xf32>, vector<2x1x8x8xf32>, vector<2x1x8x8xf32>, vector<2x1x8x8xf32> -> vector<2x4x8x8xf32>
    %354 = vector.shape_cast %353 : vector<2x4x8x8xf32> to vector<8x8x8xf32>
    %355 = arith.truncf %354 : vector<8x8x8xf32> to vector<8x8x8xbf16>
    %c1_112 = arith.constant 1 : index
    %c0_113 = arith.constant 0 : index
    %c0_114 = arith.constant 0 : index
    %356 = vector.load %arg8[%c1_112, %c0_113, %c0_114] : memref<2x32x32xbf16, #tpu.memory_space<vmem>>, vector<1x32x32xbf16>
    %357 = vector.shape_cast %356 : vector<1x32x32xbf16> to vector<32x32xbf16>
    %c1_115 = arith.constant 1 : index
    %c0_116 = arith.constant 0 : index
    %c0_117 = arith.constant 0 : index
    %358 = vector.load %arg9[%c1_115, %c0_116, %c0_117] : memref<2x1x32xf32, #tpu.memory_space<vmem>>, vector<1x1x32xf32>
    %359 = vector.shape_cast %358 : vector<1x1x32xf32> to vector<1x32xf32>
    "tpu.trace_start"() <{level = 10 : i32, message = "bqd,bkd->bqk"}> : () -> ()
    %cst_118 = arith.constant dense<0.000000e+00> : vector<8x8x8xf32>
    %360 = tpu.matmul %331, %343, %cst_118 {dimension_numbers = #tpu.dot_dimension_numbers<[2], [2], [1], [1], [0, 0, 0, 1, 1, 1], [0], [0]>} : vector<8x8x8xbf16>, vector<8x8x8xbf16>, vector<8x8x8xf32> -> vector<8x8x8xf32>
    "tpu.trace_stop"() : () -> ()
    %cst_119 = arith.constant 0.353553385 : f32
    %361 = vector.broadcast %cst_119 : f32 to vector<8x8x8xf32>
    %362 = arith.mulf %360, %361 : vector<8x8x8xf32>
    %363 = arith.addf %362, %20 : vector<8x8x8xf32>
    %cst_120 = arith.constant dense<0xFF800000> : vector<8x8xf32>
    %364 = vector.multi_reduction <maximumf>, %363, %cst_120 [2] : vector<8x8x8xf32> to vector<8x8xf32>
    %365 = vector.shape_cast %364 : vector<8x8xf32> to vector<8x8x1xf32>
    %366 = vector.broadcast %365 : vector<8x8x1xf32> to vector<8x8x8xf32>
    %367 = arith.subf %363, %366 : vector<8x8x8xf32>
    %368 = math.exp %367 : vector<8x8x8xf32>
    %cst_121 = arith.constant dense<0.000000e+00> : vector<8x8xf32>
    %369 = vector.multi_reduction <add>, %368, %cst_121 [2] : vector<8x8x8xf32> to vector<8x8xf32>
    %370 = vector.shape_cast %369 : vector<8x8xf32> to vector<8x8x1xf32>
    %371 = tpu.reciprocal %370 {approx = true} : vector<8x8x1xf32> -> vector<8x8x1xf32>
    %372 = vector.broadcast %371 : vector<8x8x1xf32> to vector<8x8x8xf32>
    %373 = arith.mulf %368, %372 : vector<8x8x8xf32>
    %374 = arith.truncf %373 : vector<8x8x8xf32> to vector<8x8x8xbf16>
    "tpu.trace_start"() <{level = 10 : i32, message = "bqk,bkd->bqd"}> : () -> ()
    %cst_122 = arith.constant dense<0.000000e+00> : vector<8x8x8xf32>
    %375 = tpu.matmul %374, %355, %cst_122 {dimension_numbers = #tpu.dot_dimension_numbers<[2], [1], [1], [2], [0, 0, 0, 1, 1, 2], [0], [0]>} : vector<8x8x8xbf16>, vector<8x8x8xbf16>, vector<8x8x8xf32> -> vector<8x8x8xf32>
    "tpu.trace_stop"() : () -> ()
    %376 = vector.shape_cast %375 : vector<8x8x8xf32> to vector<2x4x8x8xf32>
    %377 = vector.extract_strided_slice %376 {offsets = [0, 0, 0, 0], sizes = [2, 1, 8, 8], strides = [1, 1, 1, 1]} : vector<2x4x8x8xf32> to vector<2x1x8x8xf32>
    %378 = vector.shape_cast %377 : vector<2x1x8x8xf32> to vector<2x8x8xf32>
    %379 = vector.extract_strided_slice %376 {offsets = [0, 1, 0, 0], sizes = [2, 1, 8, 8], strides = [1, 1, 1, 1]} : vector<2x4x8x8xf32> to vector<2x1x8x8xf32>
    %380 = vector.shape_cast %379 : vector<2x1x8x8xf32> to vector<2x8x8xf32>
    %381 = vector.extract_strided_slice %376 {offsets = [0, 2, 0, 0], sizes = [2, 1, 8, 8], strides = [1, 1, 1, 1]} : vector<2x4x8x8xf32> to vector<2x1x8x8xf32>
    %382 = vector.shape_cast %381 : vector<2x1x8x8xf32> to vector<2x8x8xf32>
    %383 = vector.extract_strided_slice %376 {offsets = [0, 3, 0, 0], sizes = [2, 1, 8, 8], strides = [1, 1, 1, 1]} : vector<2x4x8x8xf32> to vector<2x1x8x8xf32>
    %384 = vector.shape_cast %383 : vector<2x1x8x8xf32> to vector<2x8x8xf32>
    %385 = tpu.concatenate %378, %380, %382, %384 in 2 : vector<2x8x8xf32>, vector<2x8x8xf32>, vector<2x8x8xf32>, vector<2x8x8xf32> -> vector<2x8x32xf32>
    %386 = vector.shape_cast %385 : vector<2x8x32xf32> to vector<16x32xf32>
    %387 = arith.truncf %386 : vector<16x32xf32> to vector<16x32xbf16>
    %cst_123 = arith.constant dense<0.000000e+00> : vector<16x32xf32>
    %388 = tpu.matmul %387, %357, %cst_123 {dimension_numbers = #tpu.dot_dimension_numbers<[1], [0], [0], [1], [0, 0, 1, 1], [], []>} : vector<16x32xbf16>, vector<32x32xbf16>, vector<16x32xf32> -> vector<16x32xf32>
    %389 = vector.broadcast %359 : vector<1x32xf32> to vector<16x32xf32>
    %390 = arith.addf %388, %389 : vector<16x32xf32>
    %391 = arith.addf %284, %390 : vector<16x32xf32>
    %392 = vector.extract_strided_slice %286 {offsets = [1, 0], sizes = [1, 32], strides = [1, 1]} : vector<3x32xf32> to vector<1x32xf32>
    %393 = vector.extract_strided_slice %288 {offsets = [1, 0], sizes = [1, 32], strides = [1, 1]} : vector<3x32xf32> to vector<1x32xf32>
    %cst_124 = arith.constant dense<0.000000e+00> : vector<16xf32>
    %394 = vector.multi_reduction <add>, %391, %cst_124 [1] : vector<16x32xf32> to vector<16xf32>
    %395 = vector.shape_cast %394 : vector<16xf32> to vector<16x1xf32>
    %cst_125 = arith.constant 3.200000e+01 : f32
    %396 = vector.broadcast %cst_125 : f32 to vector<16x1xf32>
    %397 = arith.divf %395, %396 : vector<16x1xf32>
    %398 = vector.broadcast %397 : vector<16x1xf32> to vector<16x32xf32>
    %399 = arith.subf %391, %398 : vector<16x32xf32>
    %400 = arith.mulf %399, %399 : vector<16x32xf32>
    %cst_126 = arith.constant dense<0.000000e+00> : vector<16xf32>
    %401 = vector.multi_reduction <add>, %400, %cst_126 [1] : vector<16x32xf32> to vector<16xf32>
    %402 = vector.shape_cast %401 : vector<16xf32> to vector<16x1xf32>
    %cst_127 = arith.constant 0.0322580636 : f32
    %403 = vector.broadcast %cst_127 : f32 to vector<16x1xf32>
    %404 = arith.mulf %402, %403 : vector<16x1xf32>
    %405 = math.sqrt %404 : vector<16x1xf32>
    %cst_128 = arith.constant 9.99999997E-7 : f32
    %406 = vector.broadcast %cst_128 : f32 to vector<16x1xf32>
    %407 = arith.addf %405, %406 : vector<16x1xf32>
    %408 = tpu.reciprocal %407 {approx = true} : vector<16x1xf32> -> vector<16x1xf32>
    %409 = vector.broadcast %408 : vector<16x1xf32> to vector<16x32xf32>
    %410 = arith.mulf %399, %409 : vector<16x32xf32>
    %411 = vector.broadcast %392 : vector<1x32xf32> to vector<16x32xf32>
    %412 = arith.mulf %411, %410 : vector<16x32xf32>
    %413 = vector.broadcast %393 : vector<1x32xf32> to vector<16x32xf32>
    %414 = arith.addf %412, %413 : vector<16x32xf32>
    %415 = arith.truncf %414 : vector<16x32xf32> to vector<16x32xbf16>
    %c1_129 = arith.constant 1 : index
    %c0_130 = arith.constant 0 : index
    %c0_131 = arith.constant 0 : index
    %416 = vector.load %arg10[%c1_129, %c0_130, %c0_131] : memref<2x32x32xbf16, #tpu.memory_space<vmem>>, vector<1x32x32xbf16>
    %417 = vector.shape_cast %416 : vector<1x32x32xbf16> to vector<32x32xbf16>
    %cst_132 = arith.constant dense<0.000000e+00> : vector<16x32xf32>
    %418 = tpu.matmul %415, %417, %cst_132 {dimension_numbers = #tpu.dot_dimension_numbers<[1], [0], [0], [1], [0, 0, 1, 1], [], []>} : vector<16x32xbf16>, vector<32x32xbf16>, vector<16x32xf32> -> vector<16x32xf32>
    %c1_133 = arith.constant 1 : index
    %c0_134 = arith.constant 0 : index
    %c0_135 = arith.constant 0 : index
    %419 = vector.load %arg11[%c1_133, %c0_134, %c0_135] : memref<2x1x32xf32, #tpu.memory_space<vmem>>, vector<1x1x32xf32>
    %420 = vector.shape_cast %419 : vector<1x1x32xf32> to vector<1x32xf32>
    %421 = vector.broadcast %420 : vector<1x32xf32> to vector<16x32xf32>
    %422 = arith.addf %418, %421 : vector<16x32xf32>
    %c1_136 = arith.constant 1 : index
    %c0_137 = arith.constant 0 : index
    %c0_138 = arith.constant 0 : index
    %423 = vector.load %arg12[%c1_136, %c0_137, %c0_138] : memref<2x32x64xbf16, #tpu.memory_space<vmem>>, vector<1x32x64xbf16>
    %424 = vector.shape_cast %423 : vector<1x32x64xbf16> to vector<32x64xbf16>
    %cst_139 = arith.constant dense<0.000000e+00> : vector<16x64xf32>
    %425 = tpu.matmul %2, %424, %cst_139 {dimension_numbers = #tpu.dot_dimension_numbers<[1], [0], [0], [1], [0, 0, 1, 1], [], []>} : vector<16x32xbf16>, vector<32x64xbf16>, vector<16x64xf32> -> vector<16x64xf32>
    %c1_140 = arith.constant 1 : index
    %c0_141 = arith.constant 0 : index
    %c0_142 = arith.constant 0 : index
    %426 = vector.load %arg13[%c1_140, %c0_141, %c0_142] : memref<2x1x64xf32, #tpu.memory_space<vmem>>, vector<1x1x64xf32>
    %427 = vector.shape_cast %426 : vector<1x1x64xf32> to vector<1x64xf32>
    %428 = vector.broadcast %427 : vector<1x64xf32> to vector<16x64xf32>
    %429 = arith.addf %425, %428 : vector<16x64xf32>
    %430 = vector.shape_cast %422 : vector<16x32xf32> to vector<2x8x32xf32>
    %431 = vector.extract_strided_slice %430 {offsets = [0, 0, 0], sizes = [2, 8, 8], strides = [1, 1, 1]} : vector<2x8x32xf32> to vector<2x8x8xf32>
    %432 = vector.shape_cast %431 : vector<2x8x8xf32> to vector<2x1x8x8xf32>
    %433 = vector.extract_strided_slice %430 {offsets = [0, 0, 8], sizes = [2, 8, 8], strides = [1, 1, 1]} : vector<2x8x32xf32> to vector<2x8x8xf32>
    %434 = vector.shape_cast %433 : vector<2x8x8xf32> to vector<2x1x8x8xf32>
    %435 = vector.extract_strided_slice %430 {offsets = [0, 0, 16], sizes = [2, 8, 8], strides = [1, 1, 1]} : vector<2x8x32xf32> to vector<2x8x8xf32>
    %436 = vector.shape_cast %435 : vector<2x8x8xf32> to vector<2x1x8x8xf32>
    %437 = vector.extract_strided_slice %430 {offsets = [0, 0, 24], sizes = [2, 8, 8], strides = [1, 1, 1]} : vector<2x8x32xf32> to vector<2x8x8xf32>
    %438 = vector.shape_cast %437 : vector<2x8x8xf32> to vector<2x1x8x8xf32>
    %439 = tpu.concatenate %432, %434, %436, %438 in 1 : vector<2x1x8x8xf32>, vector<2x1x8x8xf32>, vector<2x1x8x8xf32>, vector<2x1x8x8xf32> -> vector<2x4x8x8xf32>
    %440 = vector.shape_cast %439 : vector<2x4x8x8xf32> to vector<8x8x8xf32>
    %441 = arith.truncf %440 : vector<8x8x8xf32> to vector<8x8x8xbf16>
    %442 = vector.shape_cast %429 : vector<16x64xf32> to vector<2x8x64xf32>
    %443 = vector.extract_strided_slice %442 {offsets = [0, 0, 0], sizes = [2, 8, 8], strides = [1, 1, 1]} : vector<2x8x64xf32> to vector<2x8x8xf32>
    %444 = vector.shape_cast %443 : vector<2x8x8xf32> to vector<2x1x8x8xf32>
    %445 = vector.extract_strided_slice %442 {offsets = [0, 0, 8], sizes = [2, 8, 8], strides = [1, 1, 1]} : vector<2x8x64xf32> to vector<2x8x8xf32>
    %446 = vector.shape_cast %445 : vector<2x8x8xf32> to vector<2x1x8x8xf32>
    %447 = vector.extract_strided_slice %442 {offsets = [0, 0, 16], sizes = [2, 8, 8], strides = [1, 1, 1]} : vector<2x8x64xf32> to vector<2x8x8xf32>
    %448 = vector.shape_cast %447 : vector<2x8x8xf32> to vector<2x1x8x8xf32>
    %449 = vector.extract_strided_slice %442 {offsets = [0, 0, 24], sizes = [2, 8, 8], strides = [1, 1, 1]} : vector<2x8x64xf32> to vector<2x8x8xf32>
    %450 = vector.shape_cast %449 : vector<2x8x8xf32> to vector<2x1x8x8xf32>
    %451 = tpu.concatenate %444, %446, %448, %450 in 1 : vector<2x1x8x8xf32>, vector<2x1x8x8xf32>, vector<2x1x8x8xf32>, vector<2x1x8x8xf32> -> vector<2x4x8x8xf32>
    %452 = vector.shape_cast %451 : vector<2x4x8x8xf32> to vector<8x8x8xf32>
    %453 = arith.truncf %452 : vector<8x8x8xf32> to vector<8x8x8xbf16>
    %454 = vector.shape_cast %429 : vector<16x64xf32> to vector<2x8x64xf32>
    %455 = vector.extract_strided_slice %454 {offsets = [0, 0, 32], sizes = [2, 8, 8], strides = [1, 1, 1]} : vector<2x8x64xf32> to vector<2x8x8xf32>
    %456 = vector.shape_cast %455 : vector<2x8x8xf32> to vector<2x1x8x8xf32>
    %457 = vector.extract_strided_slice %454 {offsets = [0, 0, 40], sizes = [2, 8, 8], strides = [1, 1, 1]} : vector<2x8x64xf32> to vector<2x8x8xf32>
    %458 = vector.shape_cast %457 : vector<2x8x8xf32> to vector<2x1x8x8xf32>
    %459 = vector.extract_strided_slice %454 {offsets = [0, 0, 48], sizes = [2, 8, 8], strides = [1, 1, 1]} : vector<2x8x64xf32> to vector<2x8x8xf32>
    %460 = vector.shape_cast %459 : vector<2x8x8xf32> to vector<2x1x8x8xf32>
    %461 = vector.extract_strided_slice %454 {offsets = [0, 0, 56], sizes = [2, 8, 8], strides = [1, 1, 1]} : vector<2x8x64xf32> to vector<2x8x8xf32>
    %462 = vector.shape_cast %461 : vector<2x8x8xf32> to vector<2x1x8x8xf32>
    %463 = tpu.concatenate %456, %458, %460, %462 in 1 : vector<2x1x8x8xf32>, vector<2x1x8x8xf32>, vector<2x1x8x8xf32>, vector<2x1x8x8xf32> -> vector<2x4x8x8xf32>
    %464 = vector.shape_cast %463 : vector<2x4x8x8xf32> to vector<8x8x8xf32>
    %465 = arith.truncf %464 : vector<8x8x8xf32> to vector<8x8x8xbf16>
    %c1_143 = arith.constant 1 : index
    %c0_144 = arith.constant 0 : index
    %c0_145 = arith.constant 0 : index
    %466 = vector.load %arg14[%c1_143, %c0_144, %c0_145] : memref<2x32x32xbf16, #tpu.memory_space<vmem>>, vector<1x32x32xbf16>
    %467 = vector.shape_cast %466 : vector<1x32x32xbf16> to vector<32x32xbf16>
    %c1_146 = arith.constant 1 : index
    %c0_147 = arith.constant 0 : index
    %c0_148 = arith.constant 0 : index
    %468 = vector.load %arg15[%c1_146, %c0_147, %c0_148] : memref<2x1x32xf32, #tpu.memory_space<vmem>>, vector<1x1x32xf32>
    %469 = vector.shape_cast %468 : vector<1x1x32xf32> to vector<1x32xf32>
    "tpu.trace_start"() <{level = 10 : i32, message = "bqd,bkd->bqk"}> : () -> ()
    %cst_149 = arith.constant dense<0.000000e+00> : vector<8x8x8xf32>
    %470 = tpu.matmul %441, %453, %cst_149 {dimension_numbers = #tpu.dot_dimension_numbers<[2], [2], [1], [1], [0, 0, 0, 1, 1, 1], [0], [0]>} : vector<8x8x8xbf16>, vector<8x8x8xbf16>, vector<8x8x8xf32> -> vector<8x8x8xf32>
    "tpu.trace_stop"() : () -> ()
    %cst_150 = arith.constant 0.353553385 : f32
    %471 = vector.broadcast %cst_150 : f32 to vector<8x8x8xf32>
    %472 = arith.mulf %470, %471 : vector<8x8x8xf32>
    %473 = vector.broadcast %24 : vector<8x1x8xf32> to vector<8x8x8xf32>
    %474 = arith.addf %472, %473 : vector<8x8x8xf32>
    %cst_151 = arith.constant dense<0xFF800000> : vector<8x8xf32>
    %475 = vector.multi_reduction <maximumf>, %474, %cst_151 [2] : vector<8x8x8xf32> to vector<8x8xf32>
    %476 = vector.shape_cast %475 : vector<8x8xf32> to vector<8x8x1xf32>
    %477 = vector.broadcast %476 : vector<8x8x1xf32> to vector<8x8x8xf32>
    %478 = arith.subf %474, %477 : vector<8x8x8xf32>
    %479 = math.exp %478 : vector<8x8x8xf32>
    %cst_152 = arith.constant dense<0.000000e+00> : vector<8x8xf32>
    %480 = vector.multi_reduction <add>, %479, %cst_152 [2] : vector<8x8x8xf32> to vector<8x8xf32>
    %481 = vector.shape_cast %480 : vector<8x8xf32> to vector<8x8x1xf32>
    %482 = tpu.reciprocal %481 {approx = true} : vector<8x8x1xf32> -> vector<8x8x1xf32>
    %483 = vector.broadcast %482 : vector<8x8x1xf32> to vector<8x8x8xf32>
    %484 = arith.mulf %479, %483 : vector<8x8x8xf32>
    %485 = arith.truncf %484 : vector<8x8x8xf32> to vector<8x8x8xbf16>
    "tpu.trace_start"() <{level = 10 : i32, message = "bqk,bkd->bqd"}> : () -> ()
    %cst_153 = arith.constant dense<0.000000e+00> : vector<8x8x8xf32>
    %486 = tpu.matmul %485, %465, %cst_153 {dimension_numbers = #tpu.dot_dimension_numbers<[2], [1], [1], [2], [0, 0, 0, 1, 1, 2], [0], [0]>} : vector<8x8x8xbf16>, vector<8x8x8xbf16>, vector<8x8x8xf32> -> vector<8x8x8xf32>
    "tpu.trace_stop"() : () -> ()
    %487 = vector.shape_cast %486 : vector<8x8x8xf32> to vector<2x4x8x8xf32>
    %488 = vector.extract_strided_slice %487 {offsets = [0, 0, 0, 0], sizes = [2, 1, 8, 8], strides = [1, 1, 1, 1]} : vector<2x4x8x8xf32> to vector<2x1x8x8xf32>
    %489 = vector.shape_cast %488 : vector<2x1x8x8xf32> to vector<2x8x8xf32>
    %490 = vector.extract_strided_slice %487 {offsets = [0, 1, 0, 0], sizes = [2, 1, 8, 8], strides = [1, 1, 1, 1]} : vector<2x4x8x8xf32> to vector<2x1x8x8xf32>
    %491 = vector.shape_cast %490 : vector<2x1x8x8xf32> to vector<2x8x8xf32>
    %492 = vector.extract_strided_slice %487 {offsets = [0, 2, 0, 0], sizes = [2, 1, 8, 8], strides = [1, 1, 1, 1]} : vector<2x4x8x8xf32> to vector<2x1x8x8xf32>
    %493 = vector.shape_cast %492 : vector<2x1x8x8xf32> to vector<2x8x8xf32>
    %494 = vector.extract_strided_slice %487 {offsets = [0, 3, 0, 0], sizes = [2, 1, 8, 8], strides = [1, 1, 1, 1]} : vector<2x4x8x8xf32> to vector<2x1x8x8xf32>
    %495 = vector.shape_cast %494 : vector<2x1x8x8xf32> to vector<2x8x8xf32>
    %496 = tpu.concatenate %489, %491, %493, %495 in 2 : vector<2x8x8xf32>, vector<2x8x8xf32>, vector<2x8x8xf32>, vector<2x8x8xf32> -> vector<2x8x32xf32>
    %497 = vector.shape_cast %496 : vector<2x8x32xf32> to vector<16x32xf32>
    %498 = arith.truncf %497 : vector<16x32xf32> to vector<16x32xbf16>
    %cst_154 = arith.constant dense<0.000000e+00> : vector<16x32xf32>
    %499 = tpu.matmul %498, %467, %cst_154 {dimension_numbers = #tpu.dot_dimension_numbers<[1], [0], [0], [1], [0, 0, 1, 1], [], []>} : vector<16x32xbf16>, vector<32x32xbf16>, vector<16x32xf32> -> vector<16x32xf32>
    %500 = vector.broadcast %469 : vector<1x32xf32> to vector<16x32xf32>
    %501 = arith.addf %499, %500 : vector<16x32xf32>
    %502 = arith.addf %391, %501 : vector<16x32xf32>
    %503 = vector.extract_strided_slice %286 {offsets = [2, 0], sizes = [1, 32], strides = [1, 1]} : vector<3x32xf32> to vector<1x32xf32>
    %504 = vector.extract_strided_slice %288 {offsets = [2, 0], sizes = [1, 32], strides = [1, 1]} : vector<3x32xf32> to vector<1x32xf32>
    %cst_155 = arith.constant dense<0.000000e+00> : vector<16xf32>
    %505 = vector.multi_reduction <add>, %502, %cst_155 [1] : vector<16x32xf32> to vector<16xf32>
    %506 = vector.shape_cast %505 : vector<16xf32> to vector<16x1xf32>
    %cst_156 = arith.constant 3.200000e+01 : f32
    %507 = vector.broadcast %cst_156 : f32 to vector<16x1xf32>
    %508 = arith.divf %506, %507 : vector<16x1xf32>
    %509 = vector.broadcast %508 : vector<16x1xf32> to vector<16x32xf32>
    %510 = arith.subf %502, %509 : vector<16x32xf32>
    %511 = arith.mulf %510, %510 : vector<16x32xf32>
    %cst_157 = arith.constant dense<0.000000e+00> : vector<16xf32>
    %512 = vector.multi_reduction <add>, %511, %cst_157 [1] : vector<16x32xf32> to vector<16xf32>
    %513 = vector.shape_cast %512 : vector<16xf32> to vector<16x1xf32>
    %cst_158 = arith.constant 0.0322580636 : f32
    %514 = vector.broadcast %cst_158 : f32 to vector<16x1xf32>
    %515 = arith.mulf %513, %514 : vector<16x1xf32>
    %516 = math.sqrt %515 : vector<16x1xf32>
    %cst_159 = arith.constant 9.99999997E-7 : f32
    %517 = vector.broadcast %cst_159 : f32 to vector<16x1xf32>
    %518 = arith.addf %516, %517 : vector<16x1xf32>
    %519 = tpu.reciprocal %518 {approx = true} : vector<16x1xf32> -> vector<16x1xf32>
    %520 = vector.broadcast %519 : vector<16x1xf32> to vector<16x32xf32>
    %521 = arith.mulf %510, %520 : vector<16x32xf32>
    %522 = vector.broadcast %503 : vector<1x32xf32> to vector<16x32xf32>
    %523 = arith.mulf %522, %521 : vector<16x32xf32>
    %524 = vector.broadcast %504 : vector<1x32xf32> to vector<16x32xf32>
    %525 = arith.addf %523, %524 : vector<16x32xf32>
    %526 = arith.truncf %525 : vector<16x32xf32> to vector<16x32xbf16>
    %c1_160 = arith.constant 1 : index
    %c0_161 = arith.constant 0 : index
    %c0_162 = arith.constant 0 : index
    %527 = vector.load %arg16[%c1_160, %c0_161, %c0_162] : memref<2x32x2048xbf16, #tpu.memory_space<vmem>>, vector<1x32x2048xbf16>
    %528 = vector.shape_cast %527 : vector<1x32x2048xbf16> to vector<32x2048xbf16>
    %cst_163 = arith.constant dense<0.000000e+00> : vector<16x2048xf32>
    %529 = tpu.matmul %526, %528, %cst_163 {dimension_numbers = #tpu.dot_dimension_numbers<[1], [0], [0], [1], [0, 0, 1, 1], [], []>} : vector<16x32xbf16>, vector<32x2048xbf16>, vector<16x2048xf32> -> vector<16x2048xf32>
    %c1_164 = arith.constant 1 : index
    %c0_165 = arith.constant 0 : index
    %c0_166 = arith.constant 0 : index
    %530 = vector.load %arg17[%c1_164, %c0_165, %c0_166] : memref<2x1x2048xf32, #tpu.memory_space<vmem>>, vector<1x1x2048xf32>
    %531 = vector.shape_cast %530 : vector<1x1x2048xf32> to vector<1x2048xf32>
    %532 = vector.broadcast %531 : vector<1x2048xf32> to vector<16x2048xf32>
    %533 = arith.addf %529, %532 : vector<16x2048xf32>
    %cst_167 = arith.constant 0.000000e+00 : f32
    %534 = vector.broadcast %cst_167 : f32 to vector<16x2048xf32>
    %535 = arith.maximumf %533, %534 : vector<16x2048xf32>
    %536 = arith.truncf %535 : vector<16x2048xf32> to vector<16x2048xbf16>
    %c1_168 = arith.constant 1 : index
    %c0_169 = arith.constant 0 : index
    %c0_170 = arith.constant 0 : index
    %537 = vector.load %arg18[%c1_168, %c0_169, %c0_170] : memref<2x2048x32xbf16, #tpu.memory_space<vmem>>, vector<1x2048x32xbf16>
    %538 = vector.shape_cast %537 : vector<1x2048x32xbf16> to vector<2048x32xbf16>
    %cst_171 = arith.constant dense<0.000000e+00> : vector<16x32xf32>
    %539 = tpu.matmul %536, %538, %cst_171 {dimension_numbers = #tpu.dot_dimension_numbers<[1], [0], [0], [1], [0, 0, 1, 1], [], []>} : vector<16x2048xbf16>, vector<2048x32xbf16>, vector<16x32xf32> -> vector<16x32xf32>
    %c1_172 = arith.constant 1 : index
    %c0_173 = arith.constant 0 : index
    %c0_174 = arith.constant 0 : index
    %540 = vector.load %arg19[%c1_172, %c0_173, %c0_174] : memref<2x1x32xf32, #tpu.memory_space<vmem>>, vector<1x1x32xf32>
    %541 = vector.shape_cast %540 : vector<1x1x32xf32> to vector<1x32xf32>
    %542 = vector.broadcast %541 : vector<1x32xf32> to vector<16x32xf32>
    %543 = arith.addf %539, %542 : vector<16x32xf32>
    %544 = arith.addf %502, %543 : vector<16x32xf32>
    %c0_175 = arith.constant 0 : index
    %c0_176 = arith.constant 0 : index
    %545 = vector.load %arg20[%c0_175, %c0_176] : memref<1x32xf32, #tpu.memory_space<vmem>>, vector<1x32xf32>
    %c0_177 = arith.constant 0 : index
    %c0_178 = arith.constant 0 : index
    %546 = vector.load %arg21[%c0_177, %c0_178] : memref<1x32xf32, #tpu.memory_space<vmem>>, vector<1x32xf32>
    %cst_179 = arith.constant dense<0.000000e+00> : vector<16xf32>
    %547 = vector.multi_reduction <add>, %544, %cst_179 [1] : vector<16x32xf32> to vector<16xf32>
    %548 = vector.shape_cast %547 : vector<16xf32> to vector<16x1xf32>
    %cst_180 = arith.constant 3.200000e+01 : f32
    %549 = vector.broadcast %cst_180 : f32 to vector<16x1xf32>
    %550 = arith.divf %548, %549 : vector<16x1xf32>
    %551 = vector.broadcast %550 : vector<16x1xf32> to vector<16x32xf32>
    %552 = arith.subf %544, %551 : vector<16x32xf32>
    %553 = arith.mulf %552, %552 : vector<16x32xf32>
    %cst_181 = arith.constant dense<0.000000e+00> : vector<16xf32>
    %554 = vector.multi_reduction <add>, %553, %cst_181 [1] : vector<16x32xf32> to vector<16xf32>
    %555 = vector.shape_cast %554 : vector<16xf32> to vector<16x1xf32>
    %cst_182 = arith.constant 0.0322580636 : f32
    %556 = vector.broadcast %cst_182 : f32 to vector<16x1xf32>
    %557 = arith.mulf %555, %556 : vector<16x1xf32>
    %558 = math.sqrt %557 : vector<16x1xf32>
    %cst_183 = arith.constant 9.99999997E-7 : f32
    %559 = vector.broadcast %cst_183 : f32 to vector<16x1xf32>
    %560 = arith.addf %558, %559 : vector<16x1xf32>
    %561 = tpu.reciprocal %560 {approx = true} : vector<16x1xf32> -> vector<16x1xf32>
    %562 = vector.broadcast %561 : vector<16x1xf32> to vector<16x32xf32>
    %563 = arith.mulf %552, %562 : vector<16x32xf32>
    %564 = vector.broadcast %545 : vector<1x32xf32> to vector<16x32xf32>
    %565 = arith.mulf %564, %563 : vector<16x32xf32>
    %566 = vector.broadcast %546 : vector<1x32xf32> to vector<16x32xf32>
    %567 = arith.addf %565, %566 : vector<16x32xf32>
    %c0_184 = arith.constant 0 : index
    %c0_185 = arith.constant 0 : index
    %568 = vector.load %arg22[%c0_184, %c0_185] : memref<16x32xf32, #tpu.memory_space<vmem>>, vector<16x32xf32>
    tpu.vector_store %arg22[%c0_184, %c0_185], %567 {strides = array<i32>} : memref<16x32xf32, #tpu.memory_space<vmem>>, vector<16x32xf32>,
    return
  }
}

</mosaic_0001>

<bundles_post_ra>
// kernel: decoder_forward.1
= control target key start
LH: loop header
LB: loop body
LE: loop exit
PB: predicated region body
PF: predicated region fallthrough
CT: control target
= control target key end

     0   :  { %s13900_s0 = inlined_call_operand.vmem [shape: f32[16,32], index: 0, kind: input, shape index: {}]   ;;  %s13901_s1 = inlined_call_operand.vmem [shape: f32[16,32], index: 1, kind: input, shape index: {}]   ;;  %s13902_s2 = inlined_call_operand.vmem [shape: s8[2,8,8], index: 2, kind: input, shape index: {}]   ;;  %s13903_s3 = inlined_call_operand.vmem [shape: s8[2,1,8], index: 3, kind: input, shape index: {}]   ;;  %s13904_s4 = inlined_call_operand.vmem [shape: f32[2,3,32], index: 4, kind: input, shape index: {}]   ;;  %s13905_s5 = inlined_call_operand.vmem [shape: f32[2,3,32], index: 5, kind: input, shape index: {}]   ;;  %s13906_s6 = inlined_call_operand.vmem [shape: bf16[2,32,96], index: 6, kind: input, shape index: {}]   ;;  %s13907_s7 = inlined_call_operand.vmem [shape: f32[2,1,96], index: 7, kind: input, shape index: {}]   ;;  %s13908_s8 = inlined_call_operand.vmem [shape: bf16[2,32,32], index: 8, kind: input, shape index: {}]   ;;  %s13909_s9 = inlined_call_operand.vmem [shape: f32[2,1,32], index: 9, kind: input, shape index: {}]   ;;  %s13910_s10 = inlined_call_operand.vmem [shape: bf16[2,32,32], index: 10, kind: input, shape index: {}]   ;;  %s13911_s11 = inlined_call_operand.vmem [shape: f32[2,1,32], index: 11, kind: input, shape index: {}]   ;;  %s13912_s12 = inlined_call_operand.vmem [shape: bf16[2,32,64], index: 12, kind: input, shape index: {}]   ;;  %s13913_s13 = inlined_call_operand.vmem [shape: f32[2,1,64], index: 13, kind: input, shape index: {}]   ;;  %s13914_s14 = inlined_call_operand.vmem [shape: bf16[2,32,32], index: 14, kind: input, shape index: {}]   ;;  %s13915_s15 = inlined_call_operand.vmem [shape: f32[2,1,32], index: 15, kind: input, shape index: {}]   ;;  %s13916_s16 = inlined_call_operand.vmem [shape: bf16[2,32,2048], index: 16, kind: input, shape index: {}]   ;;  %s13917_s17 = inlined_call_operand.vmem [shape: f32[2,1,2048], index: 17, kind: input, shape index: {}]   ;;  %s13918_s18 = inlined_call_operand.vmem [shape: bf16[2,2048,32], index: 18, kind: input, shape index: {}]   ;;  %s13919_s19 = inlined_call_operand.vmem [shape: f32[2,1,32], index: 19, kind: input, shape index: {}]   ;;  %s13920_s20 = inlined_call_operand.vmem [shape: f32[1,32], index: 20, kind: input, shape index: {}]   ;;  %s13921_s21 = inlined_call_operand.vmem [shape: f32[1,32], index: 21, kind: input, shape index: {}]   ;;  %s13922_s22 = inlined_call_operand.hbm [shape: f32[16,32], index: 22, kind: output, shape index: {}]  }
   0x1   :  { %13948 = sst [smem:[#allocation5_spill]] %s13900_s0 }
   0x2   :  { %13949 = sst [smem:[#allocation6_spill]] %s13901_s1 }
   0x3   :  { %13950 = sst [smem:[#allocation7_spill]] %s13902_s2 }
   0x4   :  { %13951 = sst [smem:[#allocation8_spill]] %s13903_s3 }
   0x5   :  { %13952 = sst [smem:[#allocation9_spill]] %s13904_s4 }
   0x6   :  { %13953 = sst [smem:[#allocation10_spill]] %s13905_s5 }
   0x7   :  { %13954 = sst [smem:[#allocation11_spill]] %s13906_s6 }
   0x8   :  { %13955 = sst [smem:[#allocation12_spill]] %s13916_s16 }
   0x9   :  { %13956 = sst [smem:[#allocation13_spill]] %s13920_s20 }
   0xa   :  { %13957 = sst [smem:[#allocation14_spill]] %s13921_s21 }
   0xb   :  { %13958 = sst [smem:[#allocation15_spill]] %s13922_s22 }
   0xc   :  { %s13959_s29 = sld [smem:[#allocation5_spill]]  ;;  %vm100_vm0 = vcmask 261120  }
  0x12   :  { %v73_v0 = vld [vmem:[%s13959_s29] sm:$0xff]  ;;  %v74_v1 = vld [vmem:[%s13959_s29 + $0x8] sm:$0xff] }
  0x13   :  { %v101_v2 = vsel %vm100_vm0, %v73_v0, 0.0  ;;  %v104_v3 = vsel %vm100_vm0, %v74_v1, 0.0 }
  0x14   :  { %102 = vadd.xlane.f32.xlu0 %v101_v2 }
  0x18   :  { %105 = vadd.xlane.f32.xlu0 %v104_v3 }
  0xa1   :  { %v103_v4 = vpop.xlane.xlu0 %102 }
  0xa2   :  { %v108_v5 = vmul.f32 0.03125, %v103_v4 }
  0xa4   :  { %v110_v6 = vsub.f32 %v73_v0, %v108_v5 }
  0xa5   :  { %v106_v7 = vpop.xlane.xlu0 %105 }
  0xa6   :  { %v109_v8 = vmul.f32 0.03125, %v106_v7  ;;  %v112_v9 = vmul.f32 %v110_v6, %v110_v6 }
  0xa8   :  { %v111_v10 = vsub.f32 %v74_v1, %v109_v8  ;;  %v114_v11 = vsel %vm100_vm0, %v112_v9, 0.0 }
  0xa9   :  { %115 = vadd.xlane.f32.xlu1 %v114_v11 }
  0xaa   :  { %v113_v12 = vmul.f32 %v111_v10, %v111_v10 }
  0xac   :  { %v117_v13 = vsel %vm100_vm0, %v113_v12, 0.0 }
  0xad   :  { %118 = vadd.xlane.f32.xlu1 %v117_v13 }
  0xae   :  { %27 = vsyncpa [#allocation3], 0  ;;  %s13960_s1 = sld [smem:[#allocation11_spill]]  ;;  %v11380_v15 = vmov 0.0   ;;  %vm11381_vm1 = vmmov 0   ;;  %v142_v30 = vlaneseq  ;;  %s13961_s26 = sld [smem:[#allocation9_spill]] }
  0xaf   :  { %10353 = vmatprep.subr.bf16.mxu0 %v11380_v15  ;;  %10357 = vmatprep.mubr.msk.bf16.mxu0 %vm11381_vm1, %v11380_v15  ;;  %s13962_s3 = sld [smem:[#allocation10_spill]]  ;;  %v9077_v49 = vld [vmem:[%s13907_s7] ss:$0 sm:$0xff]  ;;  %s13941_s4 = smov 112   ;;  %vm258_vm6 = vcmask 64512   ;;  %vm765_vm9 = vcmask 1043456  }
  0xb0   :  { %10361 = vmatprep.subr.bf16.mxu1 %v11380_v15  ;;  %10363 = vmatprep.mubr.msk.bf16.mxu1 %vm11381_vm1, %v11380_v15  ;;  %v11532_v34 = vshrl.u32 %v142_v30, 7  ;;  %s13943_s0 = smov 120   ;;  %s13939_s23 = smov 104   ;;  %vm1171_vm10 = vcmask 130048   ;;  %vm1174_vm11 = vcmask 195584  }
  0xb1   :  { %s13937_s5 = smov 96   ;;  %s13963_s25 = sld [smem:[#allocation7_spill]] }
  0xb2   :  { %v11535_v35 = vsub.s32 0, %v11532_v34  ;;  %s13929_s2 = smov 64   ;;  %s13935_s30 = smov 16  }
  0xb3   :  { %s13933_s24 = smov 8   ;;  %s13931_s27 = smov 24  }
  0xb4   :  { %v10890_v14 = vld [vmem:[%s13960_s1] sm:$0xff]   ;;  %v10891_v16 = vld [vmem:[%s13960_s1 + $0x8] sm:$0xff]   ;;  %s13967_s28 = smov 96   ;;  %s13972_s20 = smov 120  }
  0xb5   :  { %10354 = vmatpush3.bf16.msra.mxu0 %v10890_v14  ;;  %v11540_v36 = vld [vmem:[%s13961_s26] sm:$0x7] }
  0xb6   :  { %10355 = vmatprep.subr.bf16.mxu0 %v11380_v15  ;;  %v145_v39 = vrot.slane %v11540_v36, %v11535_v35  ;;  %v11547_v40 = vld [vmem:[%s13962_s3] sm:$0x7] }
  0xb7   :  { %v151_v44 = vrot.slane %v11547_v40, %v11535_v35 }
  0xb9   :  { %10356 = vmatpush3.bf16.msra.mxu0 %v10891_v16 }
  0xba   :  { %10367 = vmatprep.subr.bf16.mxu0 %v11380_v15 }
 0x136   :  { %v116_v17 = vpop.xlane.xlu1 %115 }
 0x137   :  { %v120_v18 = vmul.f32 0.032258064, %v116_v17 }
 0x139   :  { %11166 = vrsqrt.f32 %v120_v18  ;;  %vm124_vm2 = vcmp.eq.f32.partialorder %v120_v18, inf  ;;  %v127_v23 = vand.u32 2147483648, %v120_v18  ;;  %vm126_vm3 = vcmp.eq.f32.partialorder %v120_v18, 0.0 }
 0x13a   :  { %v119_v19 = vpop.xlane.xlu1 %118 }
 0x13b   :  { %v121_v20 = vmul.f32 0.032258064, %v119_v19 }
 0x13d   :  { %11168 = vrsqrt.f32 %v121_v20  ;;  %vm131_vm4 = vcmp.eq.f32.partialorder %v121_v20, inf  ;;  %v134_v29 = vand.u32 2147483648, %v121_v20  ;;  %vm133_vm5 = vcmp.eq.f32.partialorder %v121_v20, 0.0 }
 0x143   :  { %v11167_v21 = vpop.eup %11166 }
 0x144   :  { %v123_v22 = vmul.f32 %v11167_v21, %v120_v18 }
 0x146   :  { %v125_v24 = vsel %vm124_vm2, %v120_v18, %v123_v22 }
 0x147   :  { %v11169_v25 = vpop.eup %11168  ;;  %v128_v26 = vsel %vm126_vm3, %v127_v23, %v125_v24  ;;  %v9840_v23 = vld [vmem:[%s13963_s25] sm:$0xf]   ;;  %s13975_s25 = sld [smem:[#allocation13_spill]] }
 0x148   :  { %v136_v27 = vadd.f32 1e-06, %v128_v26  ;;  %v130_v28 = vmul.f32 %v11169_v25, %v121_v20  ;;  %v9841_v24 = vunpack.c.0.s8 %v9840_v23 }
 0x14a   :  { %11170 = vrcp.f32 %v136_v27  ;;  %v132_v31 = vsel %vm131_vm4, %v121_v20, %v130_v28  ;;  %v82_v25 = vcvt.s32.f32 %v9841_v24 }
 0x14b   :  { %v135_v32 = vsel %vm133_vm5, %v134_v29, %v132_v31 }
 0x14c   :  { %v137_v33 = vadd.f32 1e-06, %v135_v32  ;;  %vm84_vm7 = vcmp.eq.f32.partialorder %v82_v25, 0.0 }
 0x14d   :  { %v11647_v27 = vsel %vm84_vm7, -1e+09, %v11380_v15 }
 0x14e   :  { %11172 = vrcp.f32 %v137_v33 }
 0x154   :  { %v11171_v37 = vpop.eup %11170 }
 0x155   :  { %v140_v38 = vmul.f32 %v11171_v37, %v110_v6  ;;  %v9842_v37 = vunpack.c.1.s8 %v9840_v23 }
 0x157   :  { %v146_v43 = vmul.f32 %v145_v39, %v140_v38 }
 0x158   :  { %v11173_v41 = vpop.eup %11172 }
 0x159   :  { %v141_v42 = vmul.f32 %v11173_v41, %v111_v10  ;;  %v152_v46 = vadd.f32 %v151_v44, %v146_v43 }
 0x15b   :  { %v147_v45 = vmul.f32 %v145_v39, %v141_v42 }
 0x15d   :  { %v153_v47 = vadd.f32 %v151_v44, %v147_v45  ;;  %v83_v45 = vcvt.s32.f32 %v9842_v37 }
 0x15f   :  { %v154_v48 = vpack.c.bf16 %v153_v47, %v152_v46  ;;  %vm85_vm8 = vcmp.eq.f32.partialorder %v83_v45, 0.0 }
 0x161   :  { %10358 = vmatmul.mubr.msk.bf16.vlgmr.msra.gmra.mrb[0].mxu0 %vm100_vm0, %v154_v48 }
 0x162   :  { %10369 = vmatprep.mubr.msk.bf16.mxu0 %vm11381_vm1, %v11380_v15 }
 0x234   :  { %v215_v50 = vpop.f32.mrb[0].mxu0 }
 0x235   :  { %v216_v51 = vadd.f32 %v9077_v49, %v215_v50  ;;  %v10359_v52 = vpop.f32.mrb[1].mxu0 }
 0x236   :  { %v218_v53 = vpop.f32.mrb[2].mxu0 }
 0x237   :  { %230 = vrot.lane.b32.xlu1 %v216_v51, %s13941_s4  ;;  %224 = vrot.lane.b32.xlu0 %v216_v51, %s13943_s0  ;;  %v10360_v54 = vpop.f32.mrb[3].mxu0  ;;  %v219_v55 = vadd.f32 %v9077_v49, %v218_v53  ;;  %v11561_v56 = vpack.c.bf16 %v216_v51, %v216_v51 }
 0x239   :  { %v11577_v0 = vpack.c.bf16 %v219_v55, %v219_v55 }
 0x23b   :  { %236 = vrot.lane.b32.xlu1 %v216_v51, %s13939_s23  ;;  %232 = vrot.lane.b32.xlu0 %v219_v55, %s13941_s4 }
 0x23f   :  { %256 = vrot.lane.b32.xlu0 %v11561_v56, %s13937_s5  ;;  %226 = vrot.lane.b32.xlu1 %v219_v55, %s13943_s0 }
 0x243   :  { %238 = vrot.lane.b32.xlu1 %v219_v55, %s13939_s23  ;;  %s13969_s23 = smov 16  }
 0x2a9   :  { %v231_v57 = vpop.permute.xlu1 %230  ;;  %v225_v58 = vpop.permute.xlu0 %224 }
 0x2aa   :  { %v11567_v59 = vpack.c.bf16 %v231_v57, %v231_v57  ;;  %v11569_v60 = vpack.c.bf16 %v225_v58, %v225_v58  ;;  %v11665_v57 = vsel %vm85_vm8, -1e+09, %v11380_v15 }
 0x2ac   :  { %355 = vrot.lane.b32.xlu0 %v11567_v59, %s13937_s5  ;;  %306 = vrot.lane.b32.xlu1 %v11569_v60, %s13937_s5 }
 0x2ad   :  { %v237_v61 = vpop.permute.xlu1 %236  ;;  %v233_v62 = vpop.permute.xlu0 %232 }
 0x2ae   :  { %v11575_v63 = vpack.c.bf16 %v237_v61, %v237_v61  ;;  %v11583_v3 = vpack.c.bf16 %v233_v62, %v233_v62 }
 0x2b0   :  { %404 = vrot.lane.b32.xlu1 %v11575_v63, %s13937_s5  ;;  %453 = vrot.lane.b32.xlu0 %v11577_v0, %s13937_s5 }
 0x2b1   :  { %v257_v1 = vpop.permute.xlu0 %256  ;;  %v227_v2 = vpop.permute.xlu1 %226 }
 0x2b2   :  { %v11585_v4 = vpack.c.bf16 %v227_v2, %v227_v2  ;;  %v263_v5 = vsel %vm258_vm6, %v257_v1, 0 }
 0x2b3   :  { %10362 = vmatpush3.bf16.xpose.msra.mxu1 %v263_v5 }
 0x2b4   :  { %502 = vrot.lane.b32.xlu1 %v11585_v4, %s13937_s5  ;;  %551 = vrot.lane.b32.xlu0 %v11583_v3, %s13937_s5 }
 0x2b5   :  { %v239_v6 = vpop.permute.xlu1 %238  ;;  %10373 = vmatprep.subr.bf16.mxu1 %v11380_v15 }
 0x2b6   :  { %v11593_v7 = vpack.c.bf16 %v239_v6, %v239_v6 }
 0x2b8   :  { %600 = vrot.lane.b32.xlu1 %v11593_v7, %s13937_s5  ;;  %s13964_s5 = sld [smem:[#allocation6_spill]] }
 0x2ba   :  { %10364 = vmatmul.mubr.msk.bf16.vlgmr.msra.gmra.mrb[0].mxu1 %vm258_vm6, %v11561_v56 }
 0x2bb   :  { %10375 = vmatprep.mubr.msk.bf16.mxu1 %vm11381_vm1, %v11380_v15 }
 0x31e   :  { %v356_v8 = vpop.permute.xlu0 %355  ;;  %v307_v9 = vpop.permute.xlu1 %306 }
 0x31f   :  { %v361_v10 = vsel %vm258_vm6, %v356_v8, 0  ;;  %v312_v11 = vsel %vm258_vm6, %v307_v9, 0 }
 0x320   :  { %10368 = vmatpush3.bf16.xpose.msra.mxu0 %v312_v11  ;;  %10374 = vmatpush3.bf16.xpose.msra.mxu1 %v361_v10 }
 0x321   :  { %10379 = vmatprep.subr.bf16.mxu0 %v11380_v15  ;;  %10385 = vmatprep.subr.bf16.mxu1 %v11380_v15 }
 0x322   :  { %v405_v12 = vpop.permute.xlu1 %404  ;;  %v454_v13 = vpop.permute.xlu0 %453 }
 0x323   :  { %v410_v14 = vsel %vm258_vm6, %v405_v12, 0  ;;  %v459_v16 = vsel %vm258_vm6, %v454_v13, 0 }
 0x326   :  { %v503_v17 = vpop.permute.xlu1 %502  ;;  %v552_v18 = vpop.permute.xlu0 %551 }
 0x327   :  { %10370 = vmatmul.mubr.msk.bf16.vlgmr.msra.gmra.mrb[4].mxu0 %vm258_vm6, %v11569_v60  ;;  %10376 = vmatmul.mubr.msk.bf16.vlgmr.msra.gmra.mrb[4].mxu1 %vm258_vm6, %v11567_v59  ;;  %v508_v19 = vsel %vm258_vm6, %v503_v17, 0  ;;  %v557_v20 = vsel %vm258_vm6, %v552_v18, 0 }
 0x328   :  { %10380 = vmatpush3.bf16.xpose.msra.mxu0 %v410_v14  ;;  %10386 = vmatpush3.bf16.xpose.msra.mxu1 %v459_v16 }
 0x329   :  { %10381 = vmatprep.mubr.msk.bf16.mxu0 %vm11381_vm1, %v11380_v15  ;;  %10387 = vmatprep.mubr.msk.bf16.mxu1 %vm11381_vm1, %v11380_v15 }
 0x32a   :  { %10391 = vmatprep.subr.bf16.mxu0 %v11380_v15  ;;  %10397 = vmatprep.subr.bf16.mxu1 %v11380_v15  ;;  %v601_v21 = vpop.permute.xlu1 %600 }
 0x32b   :  { %v606_v22 = vsel %vm258_vm6, %v601_v21, 0 }
 0x32f   :  { %10382 = vmatmul.mubr.msk.bf16.vlgmr.msra.gmra.mrb[8].mxu0 %vm258_vm6, %v11575_v63  ;;  %10388 = vmatmul.mubr.msk.bf16.vlgmr.msra.gmra.mrb[8].mxu1 %vm258_vm6, %v11577_v0 }
 0x330   :  { %10392 = vmatpush3.bf16.xpose.msra.mxu0 %v508_v19  ;;  %10398 = vmatpush3.bf16.xpose.msra.mxu1 %v557_v20 }
 0x331   :  { %10393 = vmatprep.mubr.msk.bf16.mxu0 %vm11381_vm1, %v11380_v15  ;;  %10399 = vmatprep.mubr.msk.bf16.mxu1 %vm11381_vm1, %v11380_v15 }
 0x332   :  { %10403 = vmatprep.subr.bf16.mxu0 %v11380_v15  ;;  %10409 = vmatprep.subr.bf16.mxu1 %v11380_v15 }
 0x337   :  { %10394 = vmatmul.mubr.msk.bf16.vlgmr.msra.gmra.mrb[12].mxu0 %vm258_vm6, %v11585_v4  ;;  %10400 = vmatmul.mubr.msk.bf16.vlgmr.msra.gmra.mrb[12].mxu1 %vm258_vm6, %v11583_v3 }
 0x338   :  { %10404 = vmatpush3.bf16.xpose.msra.mxu0 %v606_v22  ;;  %10405 = vmatprep.mubr.msk.bf16.mxu0 %vm11381_vm1, %v11380_v15 }
 0x339   :  { %10415 = vmatprep.subr.bf16.mxu0 %v11380_v15  ;;  %10411 = vmatprep.mubr.msk.bf16.mxu1 %vm11381_vm1, %v11380_v15 }
 0x33f   :  { %10406 = vmatmul.mubr.msk.bf16.vlgmr.msra.gmra.mrb[16].mxu0 %vm258_vm6, %v11593_v7 }
 0x340   :  { %10417 = vmatprep.mubr.msk.bf16.mxu0 %vm11381_vm1, %v11380_v15 }
 0x38d   :  { %v299_v26 = vpop.f32.mrb[0].mxu1 }
 0x38e   :  { %v648_v28 = vmul.f32 0.35355338, %v299_v26  ;;  %v10365_v29 = vpop.f32.mrb[1].mxu1 }
 0x38f   :  { %v302_v30 = vpop.f32.mrb[2].mxu1 }
 0x390   :  { %v10366_v31 = vpop.f32.mrb[3].mxu1  ;;  %v11650_v32 = vadd.f32 %v648_v28, %v11647_v27 }
 0x392   :  { %v664_v33 = vsel %vm258_vm6, %v11650_v32, -inf }
 0x393   :  { %665 = vmax.xlane.f32.xlu0 %v664_v33 }
 0x3fa   :  { %v348_v38 = vpop.f32.mrb[4].mxu0  ;;  %v397_v39 = vpop.f32.mrb[4].mxu1 }
 0x3fb   :  { %v649_v41 = vmul.f32 0.35355338, %v348_v38  ;;  %v650_v42 = vmul.f32 0.35355338, %v397_v39  ;;  %v10371_v43 = vpop.f32.mrb[5].mxu0  ;;  %v10377_v44 = vpop.f32.mrb[5].mxu1 }
 0x3fc   :  { %v351_v46 = vpop.f32.mrb[6].mxu0  ;;  %v400_v47 = vpop.f32.mrb[6].mxu1 }
 0x3fd   :  { %v10372_v48 = vpop.f32.mrb[7].mxu0  ;;  %v10378_v49 = vpop.f32.mrb[7].mxu1  ;;  %v11655_v50 = vadd.f32 %v650_v42, %v11647_v27  ;;  %v11658_v51 = vadd.f32 %v649_v41, %v11647_v27 }
 0x3ff   :  { %v670_v52 = vsel %vm258_vm6, %v11655_v50, -inf  ;;  %v667_v53 = vsel %vm258_vm6, %v11658_v51, -inf }
 0x400   :  { %671 = vmax.xlane.f32.xlu0 %v670_v52  ;;  %668 = vmax.xlane.f32.xlu1 %v667_v53 }
 0x402   :  { %v446_v54 = vpop.f32.mrb[8].mxu0  ;;  %v495_v55 = vpop.f32.mrb[8].mxu1 }
 0x403   :  { %v651_v58 = vmul.f32 0.35355338, %v446_v54  ;;  %v652_v61 = vmul.f32 0.35355338, %v495_v55  ;;  %v10383_v62 = vpop.f32.mrb[9].mxu0  ;;  %v10389_v1 = vpop.f32.mrb[9].mxu1 }
 0x404   :  { %v449_v2 = vpop.f32.mrb[10].mxu0  ;;  %v498_v5 = vpop.f32.mrb[10].mxu1 }
 0x405   :  { %v10384_v6 = vpop.f32.mrb[11].mxu0  ;;  %v10390_v8 = vpop.f32.mrb[11].mxu1  ;;  %v11668_v9 = vadd.f32 %v651_v58, %v11647_v27  ;;  %v11671_v10 = vadd.f32 %v652_v61, %v11665_v57 }
 0x407   :  { %v673_v11 = vsel %vm258_vm6, %v11668_v9, -inf  ;;  %v676_v14 = vsel %vm258_vm6, %v11671_v10, -inf }
 0x408   :  { %674 = vmax.xlane.f32.xlu0 %v673_v11 }
 0x40a   :  { %v544_v12 = vpop.f32.mrb[12].mxu0  ;;  %v593_v13 = vpop.f32.mrb[12].mxu1 }
 0x40b   :  { %v653_v16 = vmul.f32 0.35355338, %v544_v12  ;;  %v654_v17 = vmul.f32 0.35355338, %v593_v13  ;;  %v10395_v18 = vpop.f32.mrb[13].mxu0  ;;  %v10401_v19 = vpop.f32.mrb[13].mxu1 }
 0x40c   :  { %v596_v20 = vpop.f32.mrb[14].mxu1  ;;  %677 = vmax.xlane.f32.xlu0 %v676_v14  ;;  %v547_v21 = vpop.f32.mrb[14].mxu0 }
 0x40d   :  { %v10396_v22 = vpop.f32.mrb[15].mxu0  ;;  %v10402_v23 = vpop.f32.mrb[15].mxu1  ;;  %v662_v24 = vadd.f32 %v654_v17, %v11665_v57  ;;  %v11679_v25 = vadd.f32 %v653_v16, %v11665_v57 }
 0x40f   :  { %v682_v26 = vsel %vm258_vm6, %v662_v24, -inf  ;;  %v679_v28 = vsel %vm258_vm6, %v11679_v25, -inf }
 0x410   :  { %683 = vmax.xlane.f32.xlu0 %v682_v26  ;;  %680 = vmax.xlane.f32.xlu1 %v679_v28 }
 0x412   :  { %v642_v29 = vpop.f32.mrb[16].mxu0 }
 0x413   :  { %v10407_v30 = vpop.f32.mrb[17].mxu0  ;;  %v655_v41 = vmul.f32 0.35355338, %v642_v29 }
 0x414   :  { %v645_v31 = vpop.f32.mrb[18].mxu0 }
 0x415   :  { %v10408_v33 = vpop.f32.mrb[19].mxu0  ;;  %v11696_v44 = vadd.f32 %v655_v41, %v11665_v57 }
 0x420   :  { %v666_v37 = vpop.xlane.xlu0 %665 }
 0x421   :  { %809 = vrot.lane.b32.xlu1 %v11569_v60, %s13929_s2  ;;  %v688_v38 = vsub.f32 %v11650_v32, %v666_v37 }
 0x423   :  { %v696_v39 = vmul.f32 1.442695, %v688_v38 }
 0x425   :  { %857 = vrot.lane.b32.xlu1 %v11567_v59, %s13929_s2  ;;  %11174 = vpow2.f32 %v696_v39  ;;  %v685_v59 = vsel %vm258_vm6, %v11696_v44, -inf }
 0x426   :  { %760 = vrot.lane.b32.xlu0 %v11561_v56, %s13929_s2 }
 0x42f   :  { %v11691_v42 = vpop.eup %11174 }
 0x430   :  { %v712_v43 = vsel %vm258_vm6, %v11691_v42, 0.0 }
 0x445   :  { %713 = vadd.xlane.f32.xlu0 %v712_v43 }
 0x449   :  { %686 = vmax.xlane.f32.xlu1 %v685_v59 }
 0x45a   :  { %905 = vrot.lane.b32.xlu1 %v11575_v63, %s13929_s2 }
 0x48d   :  { %v672_v56 = vpop.xlane.xlu0 %671  ;;  %v669_v60 = vpop.xlane.xlu1 %668 }
 0x48e   :  { %v690_v32 = vsub.f32 %v11655_v50, %v672_v56  ;;  %v689_v45 = vsub.f32 %v11658_v51, %v669_v60 }
 0x490   :  { %v700_v46 = vmul.f32 1.442695, %v690_v32  ;;  %v698_v47 = vmul.f32 1.442695, %v689_v45 }
 0x492   :  { %11176 = vpow2.f32 %v700_v46 }
 0x493   :  { %11178 = vpow2.f32 %v698_v47 }
 0x495   :  { %v675_v48 = vpop.xlane.xlu0 %674 }
 0x496   :  { %v691_v2 = vsub.f32 %v11668_v9, %v675_v48 }
 0x498   :  { %v702_v8 = vmul.f32 1.442695, %v691_v2 }
 0x499   :  { %v678_v49 = vpop.xlane.xlu0 %677 }
 0x49a   :  { %v692_v1 = vsub.f32 %v11671_v10, %v678_v49 }
 0x49c   :  { %v11704_v52 = vpop.eup %11176  ;;  %v704_v5 = vmul.f32 1.442695, %v692_v1 }
 0x49d   :  { %v11706_v53 = vpop.eup %11178  ;;  %v684_v54 = vpop.xlane.xlu0 %683  ;;  %v718_v63 = vsel %vm258_vm6, %v11704_v52, 0.0 }
 0x49e   :  { %v681_v55 = vpop.xlane.xlu1 %680  ;;  %719 = vadd.xlane.f32.xlu0 %v718_v63  ;;  %v715_v50 = vsel %vm258_vm6, %v11706_v53, 0.0  ;;  %v694_v6 = vsub.f32 %v662_v24, %v684_v54  ;;  %11180 = vpow2.f32 %v704_v5 }
 0x49f   :  { %716 = vadd.xlane.f32.xlu1 %v715_v50  ;;  %v693_v11 = vsub.f32 %v11679_v25, %v681_v55  ;;  %11182 = vpow2.f32 %v702_v8 }
 0x4a0   :  { %v708_v12 = vmul.f32 1.442695, %v694_v6 }
 0x4a1   :  { %v761_v51 = vpop.permute.xlu0 %760  ;;  %v706_v13 = vmul.f32 1.442695, %v693_v11 }
 0x4a2   :  { %v810_v58 = vpop.permute.xlu1 %809  ;;  %v767_v61 = vsel %vm765_vm9, %v761_v51, 0  ;;  %11184 = vpow2.f32 %v708_v12 }
 0x4a3   :  { %v815_v62 = vsel %vm765_vm9, %v810_v58, 0  ;;  %10410 = vmatpush3.bf16.msra.mxu1 %v767_v61  ;;  %11186 = vpow2.f32 %v706_v13 }
 0x4a4   :  { %10416 = vmatpush3.bf16.msra.mxu0 %v815_v62  ;;  %10421 = vmatprep.subr.bf16.mxu1 %v11380_v15 }
 0x4a5   :  { %10427 = vmatprep.subr.bf16.mxu0 %v11380_v15 }
 0x4a8   :  { %v11723_v14 = vpop.eup %11180 }
 0x4a9   :  { %v724_v9 = vsel %vm258_vm6, %v11723_v14, 0.0 }
 0x4b0   :  { %1001 = vrot.lane.b32.xlu1 %v11585_v4, %s13929_s2  ;;  %v11725_v4 = vpop.eup %11182 }
 0x4b1   :  { %v11729_v10 = vpop.eup %11184  ;;  %v721_v17 = vsel %vm258_vm6, %v11725_v4, 0.0 }
 0x4b2   :  { %v11733_v18 = vpop.eup %11186  ;;  %v730_v20 = vsel %vm258_vm6, %v11729_v10, 0.0 }
 0x4b3   :  { %v727_v22 = vsel %vm258_vm6, %v11733_v18, 0.0 }
 0x4b4   :  { %953 = vrot.lane.b32.xlu0 %v11577_v0, %s13929_s2  ;;  %v858_v0 = vpop.permute.xlu1 %857 }
 0x4b5   :  { %v863_v28 = vsel %vm765_vm9, %v858_v0, 0 }
 0x4d2   :  { %v714_v16 = vpop.xlane.xlu0 %713 }
 0x4d3   :  { %11188 = vrcp.f32 %v714_v16  ;;  %725 = vadd.xlane.f32.xlu0 %v724_v9 }
 0x4d4   :  { %722 = vadd.xlane.f32.xlu1 %v721_v17 }
 0x4d6   :  { %v687_v19 = vpop.xlane.xlu1 %686 }
 0x4d7   :  { %v695_v21 = vsub.f32 %v11696_v44, %v687_v19  ;;  %731 = vadd.xlane.f32.xlu0 %v730_v20 }
 0x4d8   :  { %728 = vadd.xlane.f32.xlu1 %v727_v22 }
 0x4d9   :  { %v710_v23 = vmul.f32 1.442695, %v695_v21 }
 0x4da   :  { %v906_v31 = vpop.permute.xlu1 %905 }
 0x4db   :  { %11190 = vpow2.f32 %v710_v23 }
 0x4dd   :  { %v11189_v24 = vpop.eup %11188 }
 0x4de   :  { %v744_v25 = vmul.f32 %v11189_v24, %v11691_v42 }
 0x4e0   :  { %v752_v26 = vpack.c.bf16 %v744_v25, %v744_v25 }
 0x4e2   :  { %10412 = vmatmul.mubr.msk.bf16.vlgmr.msra.gmra.mrb[16].mxu1 %vm258_vm6, %v752_v26  ;;  %v10892_v26 = vld [vmem:[%s13908_s8] sm:$0xff]  }
 0x4e3   :  { %10422 = vmatpush3.bf16.msra.mxu1 %v863_v28  ;;  %10423 = vmatprep.mubr.msk.bf16.mxu1 %vm11381_vm1, %v11380_v15 }
 0x4e4   :  { %10433 = vmatprep.subr.bf16.mxu1 %v11380_v15 }
 0x4e5   :  { %v11746_v29 = vpop.eup %11190 }
 0x4e6   :  { %v733_v30 = vsel %vm258_vm6, %v11746_v29, 0.0 }
 0x4e7   :  { %734 = vadd.xlane.f32.xlu1 %v733_v30 }
 0x4ed   :  { %1049 = vrot.lane.b32.xlu0 %v11583_v3, %s13929_s2  ;;  %v911_v3 = vsel %vm765_vm9, %v906_v31, 0 }
 0x4f8   :  { %1097 = vrot.lane.b32.xlu1 %v11593_v7, %s13929_s2  ;;  %s13971_s2 = smov 24  }
 0x52b   :  { %v720_v33 = vpop.xlane.xlu0 %719 }
 0x52c   :  { %11192 = vrcp.f32 %v720_v33  ;;  %v717_v37 = vpop.xlane.xlu1 %716 }
 0x52d   :  { %11194 = vrcp.f32 %v717_v37 }
 0x52f   :  { %v954_v42 = vpop.permute.xlu0 %953 }
 0x530   :  { %v959_v56 = vsel %vm765_vm9, %v954_v42, 0  ;;  %v1002_v7 = vpop.permute.xlu1 %1001 }
 0x531   :  { %v1007_v58 = vsel %vm765_vm9, %v1002_v7, 0  ;;  %v10893_v7 = vld [vmem:[%s13908_s8 + $0x8] sm:$0xff]  }
 0x536   :  { %v11193_v38 = vpop.eup %11192 }
 0x537   :  { %v11195_v39 = vpop.eup %11194  ;;  %v746_v41 = vmul.f32 %v11193_v38, %v11704_v52 }
 0x538   :  { %v745_v43 = vmul.f32 %v11195_v39, %v11706_v53 }
 0x539   :  { %v754_v44 = vpack.c.bf16 %v746_v41, %v746_v41 }
 0x53a   :  { %v753_v59 = vpack.c.bf16 %v745_v43, %v745_v43 }
 0x53b   :  { %10424 = vmatmul.mubr.msk.bf16.vlgmr.msra.gmra.mrb[20].mxu1 %vm258_vm6, %v754_v44 }
 0x53c   :  { %10418 = vmatmul.mubr.msk.bf16.vlgmr.msra.gmra.mrb[20].mxu0 %vm258_vm6, %v753_v59  ;;  %10434 = vmatpush3.bf16.msra.mxu1 %v959_v56 }
 0x53d   :  { %10428 = vmatpush3.bf16.msra.mxu0 %v911_v3  ;;  %10429 = vmatprep.mubr.msk.bf16.mxu0 %vm11381_vm1, %v11380_v15 }
 0x53e   :  { %10435 = vmatprep.mubr.msk.bf16.mxu1 %vm11381_vm1, %v11380_v15  ;;  %10439 = vmatprep.subr.bf16.mxu0 %v11380_v15 }
 0x53f   :  { %10445 = vmatprep.subr.bf16.mxu1 %v11380_v15 }
 0x560   :  { %v726_v60 = vpop.xlane.xlu0 %725 }
 0x561   :  { %11196 = vrcp.f32 %v726_v60  ;;  %v723_v32 = vpop.xlane.xlu1 %722 }
 0x562   :  { %11198 = vrcp.f32 %v723_v32 }
 0x564   :  { %v732_v45 = vpop.xlane.xlu0 %731 }
 0x565   :  { %11200 = vrcp.f32 %v732_v45  ;;  %v729_v46 = vpop.xlane.xlu1 %728 }
 0x566   :  { %11202 = vrcp.f32 %v729_v46 }
 0x568   :  { %v1050_v52 = vpop.permute.xlu0 %1049 }
 0x569   :  { %v1055_v51 = vsel %vm765_vm9, %v1050_v52, 0 }
 0x56b   :  { %v11197_v47 = vpop.eup %11196 }
 0x56c   :  { %v11199_v48 = vpop.eup %11198  ;;  %v748_v49 = vmul.f32 %v11197_v47, %v11723_v14 }
 0x56d   :  { %v747_v53 = vmul.f32 %v11199_v48, %v11725_v4 }
 0x56e   :  { %v756_v54 = vpack.c.bf16 %v748_v49, %v748_v49 }
 0x56f   :  { %v11201_v55 = vpop.eup %11200  ;;  %v755_v63 = vpack.c.bf16 %v747_v53, %v747_v53 }
 0x570   :  { %v11203_v50 = vpop.eup %11202  ;;  %10436 = vmatmul.mubr.msk.bf16.vlgmr.msra.gmra.mrb[24].mxu1 %vm258_vm6, %v756_v54  ;;  %v750_v61 = vmul.f32 %v11201_v55, %v11729_v10 }
 0x571   :  { %10430 = vmatmul.mubr.msk.bf16.vlgmr.msra.gmra.mrb[24].mxu0 %vm258_vm6, %v755_v63  ;;  %10446 = vmatpush3.bf16.msra.mxu1 %v1055_v51  ;;  %v749_v62 = vmul.f32 %v11203_v50, %v11733_v18 }
 0x572   :  { %10440 = vmatpush3.bf16.msra.mxu0 %v1007_v58  ;;  %10441 = vmatprep.mubr.msk.bf16.mxu0 %vm11381_vm1, %v11380_v15  ;;  %v758_v2 = vpack.c.bf16 %v750_v61, %v750_v61 }
 0x573   :  { %10447 = vmatprep.mubr.msk.bf16.mxu1 %vm11381_vm1, %v11380_v15  ;;  %10451 = vmatprep.subr.bf16.mxu0 %v11380_v15  ;;  %v757_v5 = vpack.c.bf16 %v749_v62, %v749_v62 }
 0x574   :  { %v735_v1 = vpop.xlane.xlu1 %734  ;;  %10457 = vmatprep.subr.bf16.mxu1 %v11380_v15 }
 0x575   :  { %11204 = vrcp.f32 %v735_v1 }
 0x578   :  { %10448 = vmatmul.mubr.msk.bf16.vlgmr.msra.gmra.mrb[28].mxu1 %vm258_vm6, %v758_v2  ;;  %v1098_v6 = vpop.permute.xlu1 %1097 }
 0x579   :  { %10442 = vmatmul.mubr.msk.bf16.vlgmr.msra.gmra.mrb[28].mxu0 %vm258_vm6, %v757_v5  ;;  %v1103_v8 = vsel %vm765_vm9, %v1098_v6, 0  ;;  %10461 = vmatprep.mubr.msk.bf16.mxu1 %vm11381_vm1, %v11380_v15 }
 0x57a   :  { %10452 = vmatpush3.bf16.msra.mxu0 %v1103_v8  ;;  %10453 = vmatprep.mubr.msk.bf16.mxu0 %vm11381_vm1, %v11380_v15  ;;  %v9097_v8 = vld [vmem:[%s13909_s9] ss:$0 sm:$0xff] }
 0x57b   :  { %10465 = vmatprep.subr.bf16.mxu0 %v11380_v15  ;;  %10458 = vmatpush3.bf16.msra.mxu1 %v10892_v26 }
 0x57c   :  { %10459 = vmatprep.subr.bf16.mxu1 %v11380_v15 }
 0x57f   :  { %v11205_v11 = vpop.eup %11204  ;;  %10460 = vmatpush3.bf16.msra.mxu1 %v10893_v7 }
 0x580   :  { %v751_v12 = vmul.f32 %v11205_v11, %v11746_v29  ;;  %10473 = vmatprep.subr.bf16.mxu1 %v11380_v15 }
 0x582   :  { %v759_v13 = vpack.c.bf16 %v751_v12, %v751_v12 }
 0x584   :  { %10454 = vmatmul.mubr.msk.bf16.vlgmr.msra.gmra.mrb[32].mxu0 %vm258_vm6, %v759_v13 }
 0x585   :  { %10469 = vmatprep.mubr.msk.bf16.mxu0 %vm11381_vm1, %v11380_v15 }
 0x5b5   :  { %v803_v14 = vpop.f32.mrb[16].mxu1 }
 0x5b6   :  { %v10413_v4 = vpop.f32.mrb[17].mxu1 }
 0x5b7   :  { %v806_v0 = vpop.f32.mrb[18].mxu1  ;;  %v11350_v4 = vld [vmem:[%s13959_s29] sm:$0xff] }
 0x5b8   :  { %v10414_v16 = vpop.f32.mrb[19].mxu1 }
 0x60e   :  { %v899_v9 = vpop.f32.mrb[20].mxu1 }
 0x60f   :  { %v851_v10 = vpop.f32.mrb[20].mxu0  ;;  %v10425_v17 = vpop.f32.mrb[21].mxu1 }
 0x610   :  { %v10419_v18 = vpop.f32.mrb[21].mxu0  ;;  %v902_v19 = vpop.f32.mrb[22].mxu1 }
 0x611   :  { %v854_v20 = vpop.f32.mrb[22].mxu0  ;;  %v10426_v21 = vpop.f32.mrb[23].mxu1 }
 0x612   :  { %v10420_v22 = vpop.f32.mrb[23].mxu0 }
 0x643   :  { %v995_v23 = vpop.f32.mrb[24].mxu1 }
 0x644   :  { %v947_v24 = vpop.f32.mrb[24].mxu0  ;;  %v10437_v25 = vpop.f32.mrb[25].mxu1 }
 0x645   :  { %v10431_v28 = vpop.f32.mrb[25].mxu0  ;;  %v998_v29 = vpop.f32.mrb[26].mxu1 }
 0x646   :  { %v950_v30 = vpop.f32.mrb[26].mxu0  ;;  %v10438_v31 = vpop.f32.mrb[27].mxu1 }
 0x647   :  { %v10432_v33 = vpop.f32.mrb[27].mxu0  ;;  %v10894_v31 = vld [vmem:[%s13912_s12] sm:$0xff]  }
 0x648   :  { %v10896_v33 = vld [vmem:[%s13910_s10] sm:$0xff]  }
 0x649   :  { %10466 = vmatpush3.bf16.msra.mxu0 %v10896_v33 }
 0x64a   :  { %10467 = vmatprep.subr.bf16.mxu0 %v11380_v15 }
 0x64b   :  { %v1091_v37 = vpop.f32.mrb[28].mxu1 }
 0x64c   :  { %v1043_v38 = vpop.f32.mrb[28].mxu0  ;;  %v10835_v39 = vpack.i.bf16 %v1091_v37, %v899_v9  ;;  %v10449_v41 = vpop.f32.mrb[29].mxu1  ;;  %v10895_v37 = vld [vmem:[%s13912_s12 + $0x8] sm:$0xff]  }
 0x64d   :  { %v10830_v42 = vpack.i.bf16 %v1043_v38, %v851_v10  ;;  %v10443_v43 = vpop.f32.mrb[29].mxu0  ;;  %v1094_v44 = vpop.f32.mrb[30].mxu1  ;;  %v11351_v10 = vld [vmem:[%s13959_s29 + $0x8] sm:$0xff]  ;;  %v75_v38 = vld [vmem:[%s13964_s5] sm:$0xff]  ;;  %s13968_s29 = sld [smem:[#allocation8_spill]] }
 0x64e   :  { %v1046_v59 = vpop.f32.mrb[30].mxu0  ;;  %v10450_v56 = vpop.f32.mrb[31].mxu1  ;;  %10836 = vrot.lane.b32.xlu1 %v10835_v39, %s13935_s30  ;;  %v76_v39 = vld [vmem:[%s13964_s5 + $0x8] sm:$0xff]  ;;  %s13965_s5 = smov 112   ;;  %s13966_s30 = smov 104  }
 0x64f   :  { %10831 = vrot.lane.b32.xlu0 %v10830_v42, %s13933_s24  ;;  %v10444_v3 = vpop.f32.mrb[31].mxu0  ;;  %v10897_v41 = vld [vmem:[%s13910_s10 + $0x8] sm:$0xff]   ;;  %v11853_v42 = vpack.c.bf16 %v76_v39, %v75_v38 }
 0x650   :  { %10468 = vmatpush3.bf16.msra.mxu0 %v10897_v41 }
 0x651   :  { %10481 = vmatprep.subr.bf16.mxu0 %v11380_v15 }
 0x657   :  { %v1139_v60 = vpop.f32.mrb[32].mxu0 }
 0x658   :  { %v10840_v32 = vpack.i.bf16 %v1139_v60, %v947_v24  ;;  %v10455_v45 = vpop.f32.mrb[33].mxu0 }
 0x659   :  { %v1142_v46 = vpop.f32.mrb[34].mxu0 }
 0x65a   :  { %10841 = vrot.lane.b32.xlu0 %v10840_v32, %s13931_s27  ;;  %v10456_v47 = vpop.f32.mrb[35].mxu0 }
 0x6c0   :  { %v10837_v49 = vpop.permute.xlu1 %10836 }
 0x6c1   :  { %v10832_v48 = vpop.permute.xlu0 %10831  ;;  %v10839_v54 = vunpack.i.h.bf16 %v10837_v49  ;;  %v10838_v55 = vunpack.i.l.bf16 %v10837_v49 }
 0x6c2   :  { %v10834_v52 = vunpack.i.h.bf16 %v10832_v48  ;;  %v10833_v53 = vunpack.i.l.bf16 %v10832_v48 }
 0x6c4   :  { %v1170_v63 = vsel %vm258_vm6, %v995_v23, %v10834_v52  ;;  %v1169_v50 = vsel %vm258_vm6, %v803_v14, %v10833_v53 }
 0x6c5   :  { %v1172_v62 = vsel %vm1171_vm10, %v1169_v50, %v10838_v55  ;;  %v1173_v1 = vsel %vm1171_vm10, %v1170_v63, %v10839_v54  ;;  %v11862_v55 = vsub.s32 1, %v11532_v34 }
 0x6cc   :  { %v10842_v51 = vpop.permute.xlu0 %10841 }
 0x6cd   :  { %v10844_v58 = vunpack.i.h.bf16 %v10842_v51  ;;  %v10843_v61 = vunpack.i.l.bf16 %v10842_v51  ;;  %v1285_v51 = vrot.slane %v11540_v36, %v11862_v55 }
 0x6cf   :  { %v1176_v2 = vsel %vm1174_vm11, %v1173_v1, %v10844_v58  ;;  %v1175_v5 = vsel %vm1174_vm11, %v1172_v62, %v10843_v61  ;;  %v1291_v1 = vrot.slane %v11547_v40, %v11862_v55 }
 0x6d0   :  { %v1177_v6 = vpack.c.bf16 %v1176_v2, %v1175_v5 }
 0x6d2   :  { %10462 = vmatmul.mubr.msk.bf16.vlgmr.msra.gmra.mrb[32].mxu1 %vm100_vm0, %v1177_v6 }
 0x6d3   :  { %10477 = vmatprep.mubr.msk.bf16.mxu1 %vm11381_vm1, %v11380_v15  ;;  %10474 = vmatpush3.bf16.msra.mxu1 %v10894_v31 }
 0x6d4   :  { %10475 = vmatprep.subr.bf16.mxu1 %v11380_v15 }
 0x6d7   :  { %10476 = vmatpush3.bf16.msra.mxu1 %v10895_v37 }
 0x6d8   :  { %10487 = vmatprep.subr.bf16.mxu1 %v11380_v15 }
 0x6da   :  { %10478 = vmatmul.mubr.msk.bf16.vlgmr.msra.gmra.mrb[36].mxu1 %vm100_vm0, %v11853_v42 }
 0x6db   :  { %10489 = vmatprep.mubr.msk.bf16.mxu1 %vm11381_vm1, %v11380_v15 }
 0x7a5   :  { %v1233_v11 = vpop.f32.mrb[32].mxu1 }
 0x7a6   :  { %v1234_v12 = vadd.f32 %v9097_v8, %v1233_v11  ;;  %v10463_v13 = vpop.f32.mrb[33].mxu1  ;;  %v9105_v11 = vld [vmem:[%s13913_s13] ss:$0 sm:$0xff] }
 0x7a7   :  { %v1236_v14 = vpop.f32.mrb[34].mxu1 }
 0x7a8   :  { %v11818_v0 = vadd.f32 %v11350_v4, %v1234_v12  ;;  %v1237_v16 = vadd.f32 %v9097_v8, %v1236_v14  ;;  %v10464_v9 = vpop.f32.mrb[35].mxu1 }
 0x7aa   :  { %v11823_v17 = vadd.f32 %v11351_v10, %v1237_v16  ;;  %v1242_v18 = vsel %vm100_vm0, %v11818_v0, 0.0 }
 0x7ab   :  { %1243 = vadd.xlane.f32.xlu1 %v1242_v18 }
 0x7ac   :  { %v1245_v19 = vsel %vm100_vm0, %v11823_v17, 0.0 }
 0x7ad   :  { %1246 = vadd.xlane.f32.xlu0 %v1245_v19  ;;  %v1422_v36 = vpop.f32.mrb[36].mxu1 }
 0x7ae   :  { %v1423_v12 = vadd.f32 %v9105_v11, %v1422_v36  ;;  %v10479_v13 = vpop.f32.mrb[37].mxu1 }
 0x7af   :  { %v1425_v14 = vpop.f32.mrb[38].mxu1 }
 0x7b0   :  { %v1426_v40 = vadd.f32 %v9105_v11, %v1425_v14  ;;  %v10480_v4 = vpop.f32.mrb[39].mxu1  ;;  %v1477_v16 = vpack.c.bf16 %v1423_v12, %v1423_v12 }
 0x7b2   :  { %v1494_v9 = vsel %vm258_vm6, %v1477_v16, 0 }
 0x7bc   :  { %1459 = vrot.lane.b32.xlu1 %v1423_v12, %s13943_s0 }
 0x7c0   :  { %1471 = vrot.lane.b32.xlu1 %v1423_v12, %s13966_s30 }
 0x838   :  { %v1244_v20 = vpop.xlane.xlu1 %1243 }
 0x839   :  { %v1248_v21 = vmul.f32 0.03125, %v1244_v20 }
 0x83a   :  { %v1247_v22 = vpop.xlane.xlu0 %1246 }
 0x83b   :  { %v1250_v23 = vsub.f32 %v11818_v0, %v1248_v21  ;;  %v1249_v24 = vmul.f32 0.03125, %v1247_v22  ;;  %v9101_v21 = vld [vmem:[%s13911_s11] ss:$0 sm:$0xff] }
 0x83c   :  { %v1460_v10 = vpop.permute.xlu1 %1459 }
 0x83d   :  { %v1251_v25 = vsub.f32 %v11823_v17, %v1249_v24  ;;  %v1252_v26 = vmul.f32 %v1250_v23, %v1250_v23  ;;  %v11879_v18 = vpack.c.bf16 %v1460_v10, %v1460_v10  ;;  %v89_v10 = vld [vmem:[%s13968_s29 + $0x1] sm:$0x1] }
 0x83f   :  { %v1254_v28 = vsel %vm100_vm0, %v1252_v26, 0.0  ;;  %v1253_v29 = vmul.f32 %v1251_v25, %v1251_v25  ;;  %v1540_v19 = vsel %vm258_vm6, %v11879_v18, 0 }
 0x840   :  { %1255 = vadd.xlane.f32.xlu0 %v1254_v28  ;;  %10488 = vmatpush3.bf16.xpose.msra.mxu1 %v1540_v19  ;;  %v1472_v33 = vpop.permute.xlu1 %1471  ;;  %v91_v19 = vunpack.c.0.s8 %v89_v10 }
 0x841   :  { %v1257_v30 = vsel %vm100_vm0, %v1253_v29, 0.0  ;;  %10499 = vmatprep.subr.bf16.mxu1 %v11380_v15  ;;  %v11905_v37 = vpack.c.bf16 %v1472_v33, %v1472_v33 }
 0x844   :  { %1258 = vadd.xlane.f32.xlu0 %v1257_v30 }
 0x85a   :  { %1465 = vrot.lane.b32.xlu0 %v1423_v12, %s13965_s5 }
 0x8cd   :  { %v1256_v43 = vpop.xlane.xlu0 %1255 }
 0x8ce   :  { %v1260_v44 = vmul.f32 0.032258064, %v1256_v43  ;;  %v1632_v43 = vsel %vm258_vm6, %v11905_v37, 0 }
 0x8d0   :  { %11206 = vrsqrt.f32 %v1260_v44  ;;  %vm1264_vm12 = vcmp.eq.f32.partialorder %v1260_v44, inf  ;;  %v1267_v60 = vand.u32 2147483648, %v1260_v44  ;;  %vm1266_vm13 = vcmp.eq.f32.partialorder %v1260_v44, 0.0 }
 0x8d1   :  { %v1259_v59 = vpop.xlane.xlu0 %1258 }
 0x8d2   :  { %v1261_v56 = vmul.f32 0.032258064, %v1259_v59 }
 0x8d4   :  { %11208 = vrsqrt.f32 %v1261_v56  ;;  %vm1271_vm14 = vcmp.eq.f32.partialorder %v1261_v56, inf  ;;  %v1274_v49 = vand.u32 2147483648, %v1261_v56  ;;  %vm1273_vm15 = vcmp.eq.f32.partialorder %v1261_v56, 0.0 }
 0x8d5   :  { %v1466_v20 = vpop.permute.xlu0 %1465 }
 0x8d6   :  { %v11887_v22 = vpack.c.bf16 %v1466_v20, %v1466_v20 }
 0x8d8   :  { %v1586_v30 = vsel %vm258_vm6, %v11887_v22, 0 }
 0x8da   :  { %v11207_v3 = vpop.eup %11206 }
 0x8db   :  { %v1263_v7 = vmul.f32 %v11207_v3, %v1260_v44 }
 0x8dd   :  { %v1265_v32 = vsel %vm1264_vm12, %v1260_v44, %v1263_v7  ;;  %v11910_v44 = vpack.c.bf16 %v1426_v40, %v1426_v40 }
 0x8de   :  { %v11209_v45 = vpop.eup %11208  ;;  %v1268_v46 = vsel %vm1266_vm13, %v1267_v60, %v1265_v32 }
 0x8df   :  { %v1276_v47 = vadd.f32 1e-06, %v1268_v46  ;;  %v1270_v48 = vmul.f32 %v11209_v45, %v1261_v56  ;;  %v1678_v7 = vsel %vm258_vm6, %v11910_v44, 0 }
 0x8e1   :  { %11210 = vrcp.f32 %v1276_v47  ;;  %v1272_v52 = vsel %vm1271_vm14, %v1261_v56, %v1270_v48 }
 0x8e2   :  { %v1275_v53 = vsel %vm1273_vm15, %v1274_v49, %v1272_v52 }
 0x8e3   :  { %v1277_v54 = vadd.f32 1e-06, %v1275_v53 }
 0x8e5   :  { %11212 = vrcp.f32 %v1277_v54 }
 0x8eb   :  { %v11211_v63 = vpop.eup %11210 }
 0x8ec   :  { %v1280_v50 = vmul.f32 %v11211_v63, %v1250_v23 }
 0x8ee   :  { %v1286_v62 = vmul.f32 %v1285_v51, %v1280_v50 }
 0x8ef   :  { %v11213_v58 = vpop.eup %11212 }
 0x8f0   :  { %v1281_v61 = vmul.f32 %v11213_v58, %v1251_v25  ;;  %v1292_v5 = vadd.f32 %v1291_v1, %v1286_v62 }
 0x8f2   :  { %v1287_v2 = vmul.f32 %v1285_v51, %v1281_v61 }
 0x8f4   :  { %v1293_v6 = vadd.f32 %v1291_v1, %v1287_v2 }
 0x8f6   :  { %v1294_v8 = vpack.c.bf16 %v1293_v6, %v1292_v5  ;;  %v88_v5 = vld [vmem:[%s13968_s29] sm:$0x1]  ;;  %s13970_s29 = smov 8  }
 0x8f7   :  { %v90_v6 = vunpack.c.0.s8 %v88_v5 }
 0x8f8   :  { %10470 = vmatmul.mubr.msk.bf16.vlgmr.msra.gmra.mrb[36].mxu0 %vm100_vm0, %v1294_v8 }
 0x8f9   :  { %10483 = vmatprep.mubr.msk.bf16.mxu0 %vm11381_vm1, %v11380_v15  ;;  %10482 = vmatpush3.bf16.xpose.msra.mxu0 %v1494_v9  ;;  %v92_v8 = vcvt.s32.f32 %v90_v6 }
 0x8fa   :  { %10493 = vmatprep.subr.bf16.mxu0 %v11380_v15 }
 0x8fb   :  { %vm94_vm2 = vcmp.eq.f32.partialorder %v92_v8, 0.0 }
 0x8fc   :  { %v96_v11 = vsel %vm94_vm2, -1e+09, %v11380_v15 }
 0x8fd   :  { %v11958_v36 = vrot.slane %v96_v11, %v11535_v35 }
 0x9cb   :  { %v1355_v23 = vpop.f32.mrb[36].mxu0 }
 0x9cc   :  { %v1356_v24 = vadd.f32 %v9101_v21, %v1355_v23  ;;  %v10471_v25 = vpop.f32.mrb[37].mxu0 }
 0x9cd   :  { %v1358_v26 = vpop.f32.mrb[38].mxu0 }
 0x9ce   :  { %v1449_v28 = vpack.c.bf16 %v1356_v24, %v1356_v24  ;;  %1443 = vrot.lane.b32.xlu0 %v1356_v24, %s13966_s30  ;;  %1431 = vrot.lane.b32.xlu1 %v1356_v24, %s13943_s0  ;;  %v10472_v29 = vpop.f32.mrb[39].mxu0  ;;  %v1359_v31 = vadd.f32 %v9101_v21, %v1358_v26 }
 0x9d0   :  { %10484 = vmatmul.mubr.msk.bf16.vlgmr.msra.gmra.mrb[40].mxu0 %vm258_vm6, %v1449_v28  ;;  %v1453_v52 = vpack.c.bf16 %v1359_v31, %v1359_v31 }
 0x9d1   :  { %10494 = vmatpush3.bf16.xpose.msra.mxu0 %v1586_v30  ;;  %10495 = vmatprep.mubr.msk.bf16.mxu0 %vm11381_vm1, %v11380_v15 }
 0x9d2   :  { %1467 = vrot.lane.b32.xlu0 %v1426_v40, %s13965_s5  ;;  %1437 = vrot.lane.b32.xlu1 %v1356_v24, %s13965_s5  ;;  %v93_v24 = vcvt.s32.f32 %v91_v19 }
 0x9d3   :  { %10505 = vmatprep.subr.bf16.mxu0 %v11380_v15 }
 0x9d4   :  { %vm95_vm3 = vcmp.eq.f32.partialorder %v93_v24, 0.0 }
 0x9d6   :  { %1473 = vrot.lane.b32.xlu0 %v1426_v40, %s13966_s30  ;;  %1461 = vrot.lane.b32.xlu1 %v1426_v40, %s13943_s0 }
 0x9da   :  { %1445 = vrot.lane.b32.xlu0 %v1359_v31, %s13966_s30  ;;  %1433 = vrot.lane.b32.xlu1 %v1359_v31, %s13943_s0 }
 0x9de   :  { %1439 = vrot.lane.b32.xlu1 %v1359_v31, %s13965_s5 }
 0x9e2   :  { %1979 = vrot.lane.b32.xlu1 %v1477_v16, %s13967_s28 }
 0xa40   :  { %v1444_v38 = vpop.permute.xlu0 %1443  ;;  %v1432_v39 = vpop.permute.xlu1 %1431 }
 0xa41   :  { %v1450_v41 = vpack.c.bf16 %v1432_v39, %v1432_v39  ;;  %v1452_v32 = vpack.c.bf16 %v1444_v38, %v1444_v38 }
 0xa43   :  { %10490 = vmatmul.mubr.msk.bf16.vlgmr.msra.gmra.mrb[40].mxu1 %vm258_vm6, %v1450_v41 }
 0xa44   :  { %10500 = vmatpush3.bf16.xpose.msra.mxu1 %v1632_v43  ;;  %v1438_v59 = vpop.permute.xlu1 %1437  ;;  %10501 = vmatprep.mubr.msk.bf16.mxu1 %vm11381_vm1, %v11380_v15  ;;  %v1468_v3 = vpop.permute.xlu0 %1467 }
 0xa45   :  { %v1451_v56 = vpack.c.bf16 %v1438_v59, %v1438_v59  ;;  %10511 = vmatprep.subr.bf16.mxu1 %v11380_v15  ;;  %v11923_v46 = vpack.c.bf16 %v1468_v3, %v1468_v3  ;;  %v97_v59 = vsel %vm95_vm3, -1e+09, %v11380_v15 }
 0xa47   :  { %10496 = vmatmul.mubr.msk.bf16.vlgmr.msra.gmra.mrb[44].mxu0 %vm258_vm6, %v1451_v56  ;;  %v1770_v54 = vsel %vm258_vm6, %v11923_v46, 0 }
 0xa48   :  { %10506 = vmatpush3.bf16.xpose.msra.mxu0 %v1678_v7  ;;  %v1462_v60 = vpop.permute.xlu1 %1461  ;;  %10507 = vmatprep.mubr.msk.bf16.mxu0 %vm11381_vm1, %v11380_v15  ;;  %v1474_v48 = vpop.permute.xlu0 %1473 }
 0xa49   :  { %v11920_v45 = vpack.c.bf16 %v1462_v60, %v1462_v60  ;;  %10517 = vmatprep.subr.bf16.mxu0 %v11380_v15  ;;  %v11931_v53 = vpack.c.bf16 %v1474_v48, %v1474_v48  ;;  %v11978_v48 = vrot.slane %v97_v59, %v11535_v35 }
 0xa4b   :  { %10502 = vmatmul.mubr.msk.bf16.vlgmr.msra.gmra.mrb[44].mxu1 %vm258_vm6, %v1452_v32  ;;  %v1724_v47 = vsel %vm258_vm6, %v11920_v45, 0  ;;  %v1816_v51 = vsel %vm258_vm6, %v11931_v53, 0 }
 0xa4c   :  { %10512 = vmatpush3.bf16.xpose.msra.mxu1 %v1724_v47  ;;  %v1434_v49 = vpop.permute.xlu1 %1433  ;;  %10513 = vmatprep.mubr.msk.bf16.mxu1 %vm11381_vm1, %v11380_v15  ;;  %v1446_v1 = vpop.permute.xlu0 %1445 }
 0xa4d   :  { %10523 = vmatprep.subr.bf16.mxu1 %v11380_v15  ;;  %v1454_v50 = vpack.c.bf16 %v1434_v49, %v1434_v49  ;;  %v1456_v2 = vpack.c.bf16 %v1446_v1, %v1446_v1 }
 0xa4f   :  { %10508 = vmatmul.mubr.msk.bf16.vlgmr.msra.gmra.mrb[48].mxu0 %vm258_vm6, %v1453_v52 }
 0xa50   :  { %10518 = vmatpush3.bf16.xpose.msra.mxu0 %v1770_v54  ;;  %v1440_v63 = vpop.permute.xlu1 %1439  ;;  %10519 = vmatprep.mubr.msk.bf16.mxu0 %vm11381_vm1, %v11380_v15 }
 0xa51   :  { %10529 = vmatprep.subr.bf16.mxu0 %v11380_v15  ;;  %v1455_v61 = vpack.c.bf16 %v1440_v63, %v1440_v63 }
 0xa53   :  { %10514 = vmatmul.mubr.msk.bf16.vlgmr.msra.gmra.mrb[48].mxu1 %vm258_vm6, %v1454_v50 }
 0xa54   :  { %10524 = vmatpush3.bf16.xpose.msra.mxu1 %v1816_v51  ;;  %v1980_v58 = vpop.permute.xlu1 %1979  ;;  %10525 = vmatprep.mubr.msk.bf16.mxu1 %vm11381_vm1, %v11380_v15 }
 0xa55   :  { %v1985_v62 = vsel %vm765_vm9, %v1980_v58, 0  ;;  %10535 = vmatprep.subr.bf16.mxu1 %v11380_v15 }
 0xa57   :  { %10520 = vmatmul.mubr.msk.bf16.vlgmr.msra.gmra.mrb[52].mxu0 %vm258_vm6, %v1455_v61 }
 0xa58   :  { %10530 = vmatpush3.bf16.msra.mxu0 %v1985_v62  ;;  %10531 = vmatprep.mubr.msk.bf16.mxu0 %vm11381_vm1, %v11380_v15 }
 0xa59   :  { %10541 = vmatprep.subr.bf16.mxu0 %v11380_v15 }
 0xa5b   :  { %10526 = vmatmul.mubr.msk.bf16.vlgmr.msra.gmra.mrb[52].mxu1 %vm258_vm6, %v1456_v2 }
 0xa5c   :  { %10537 = vmatprep.mubr.msk.bf16.mxu1 %vm11381_vm1, %v11380_v15 }
 0xaa3   :  { %v1530_v12 = vpop.f32.mrb[40].mxu0 }
 0xaa4   :  { %v1858_v13 = vmul.f32 0.35355338, %v1530_v12  ;;  %v10485_v14 = vpop.f32.mrb[41].mxu0 }
 0xaa5   :  { %v1533_v40 = vpop.f32.mrb[42].mxu0 }
 0xaa6   :  { %v10486_v4 = vpop.f32.mrb[43].mxu0  ;;  %v11961_v16 = vadd.f32 %v11958_v36, %v1858_v13 }
 0xaa8   :  { %v1882_v9 = vsel %vm258_vm6, %v11961_v16, -inf }
 0xaa9   :  { %1883 = vmax.xlane.f32.xlu1 %v1882_v9 }
 0xb16   :  { %v1576_v20 = vpop.f32.mrb[40].mxu1 }
 0xb17   :  { %v1859_v21 = vmul.f32 0.35355338, %v1576_v20  ;;  %v10491_v23 = vpop.f32.mrb[41].mxu1 }
 0xb18   :  { %v1579_v25 = vpop.f32.mrb[42].mxu1 }
 0xb19   :  { %v10492_v26 = vpop.f32.mrb[43].mxu1  ;;  %v11969_v28 = vadd.f32 %v11958_v36, %v1859_v21 }
 0xb1a   :  { %v1622_v29 = vpop.f32.mrb[44].mxu0 }
 0xb1b   :  { %v1860_v30 = vmul.f32 0.35355338, %v1622_v29  ;;  %v10497_v31 = vpop.f32.mrb[45].mxu0  ;;  %v1885_v33 = vsel %vm258_vm6, %v11969_v28, -inf }
 0xb1c   :  { %1886 = vmax.xlane.f32.xlu0 %v1885_v33  ;;  %v1625_v38 = vpop.f32.mrb[46].mxu0 }
 0xb1d   :  { %v10498_v39 = vpop.f32.mrb[47].mxu0  ;;  %v1876_v41 = vadd.f32 %v11958_v36, %v1860_v30 }
 0xb1e   :  { %v1668_v43 = vpop.f32.mrb[44].mxu1 }
 0xb1f   :  { %v1861_v56 = vmul.f32 0.35355338, %v1668_v43  ;;  %v10503_v3 = vpop.f32.mrb[45].mxu1  ;;  %v1888_v7 = vsel %vm258_vm6, %v1876_v41, -inf }
 0xb20   :  { %v1671_v60 = vpop.f32.mrb[46].mxu1  ;;  %1889 = vmax.xlane.f32.xlu0 %v1888_v7 }
 0xb21   :  { %v10504_v32 = vpop.f32.mrb[47].mxu1  ;;  %v1877_v47 = vadd.f32 %v11958_v36, %v1861_v56 }
 0xb22   :  { %v1714_v49 = vpop.f32.mrb[48].mxu0 }
 0xb23   :  { %v1862_v52 = vmul.f32 0.35355338, %v1714_v49  ;;  %v10509_v54 = vpop.f32.mrb[49].mxu0  ;;  %v1891_v63 = vsel %vm258_vm6, %v1877_v47, -inf }
 0xb24   :  { %1892 = vmax.xlane.f32.xlu0 %v1891_v63  ;;  %v1717_v50 = vpop.f32.mrb[50].mxu0 }
 0xb25   :  { %v10510_v51 = vpop.f32.mrb[51].mxu0  ;;  %v1878_v58 = vadd.f32 %v11978_v48, %v1862_v52 }
 0xb26   :  { %v1760_v61 = vpop.f32.mrb[48].mxu1 }
 0xb27   :  { %v1863_v62 = vmul.f32 0.35355338, %v1760_v61  ;;  %v10515_v1 = vpop.f32.mrb[49].mxu1  ;;  %v1894_v2 = vsel %vm258_vm6, %v1878_v58, -inf }
 0xb28   :  { %v1763_v5 = vpop.f32.mrb[50].mxu1  ;;  %1895 = vmax.xlane.f32.xlu1 %v1894_v2 }
 0xb29   :  { %v10516_v6 = vpop.f32.mrb[51].mxu1  ;;  %v11984_v8 = vadd.f32 %v11978_v48, %v1863_v62 }
 0xb2a   :  { %v1806_v11 = vpop.f32.mrb[52].mxu0 }
 0xb2b   :  { %v1864_v12 = vmul.f32 0.35355338, %v1806_v11  ;;  %v10521_v13 = vpop.f32.mrb[53].mxu0  ;;  %v1897_v14 = vsel %vm258_vm6, %v11984_v8, -inf }
 0xb2c   :  { %1898 = vmax.xlane.f32.xlu0 %v1897_v14  ;;  %v1809_v40 = vpop.f32.mrb[54].mxu0 }
 0xb2d   :  { %v10522_v4 = vpop.f32.mrb[55].mxu0  ;;  %v1880_v9 = vadd.f32 %v11978_v48, %v1864_v12 }
 0xb2e   :  { %v1852_v10 = vpop.f32.mrb[52].mxu1 }
 0xb2f   :  { %v1865_v19 = vmul.f32 0.35355338, %v1852_v10  ;;  %v10527_v20 = vpop.f32.mrb[53].mxu1  ;;  %v1900_v21 = vsel %vm258_vm6, %v1880_v9, -inf }
 0xb30   :  { %v1855_v23 = vpop.f32.mrb[54].mxu1  ;;  %1901 = vmax.xlane.f32.xlu1 %v1900_v21 }
 0xb31   :  { %v10528_v24 = vpop.f32.mrb[55].mxu1  ;;  %v1881_v25 = vadd.f32 %v11978_v48, %v1865_v19 }
 0xb33   :  { %v1903_v26 = vsel %vm258_vm6, %v1881_v25, -inf }
 0xb34   :  { %1904 = vmax.xlane.f32.xlu0 %v1903_v26 }
 0xb36   :  { %v1884_v29 = vpop.xlane.xlu1 %1883 }
 0xb37   :  { %v1906_v30 = vsub.f32 %v11961_v16, %v1884_v29 }
 0xb39   :  { %v1914_v31 = vmul.f32 1.442695, %v1906_v30 }
 0xb3b   :  { %11214 = vpow2.f32 %v1914_v31 }
 0xb41   :  { %2077 = vrot.lane.b32.xlu1 %v11887_v22, %s13967_s28 }
 0xb45   :  { %2126 = vrot.lane.b32.xlu1 %v11905_v37, %s13967_s28  ;;  %v11999_v33 = vpop.eup %11214 }
 0xb46   :  { %v1930_v38 = vsel %vm258_vm6, %v11999_v33, 0.0 }
 0xb4a   :  { %2028 = vrot.lane.b32.xlu0 %v11879_v18, %s13967_s28 }
 0xb69   :  { %1931 = vadd.xlane.f32.xlu1 %v1930_v38 }
 0xb7a   :  { %2175 = vrot.lane.b32.xlu1 %v11910_v44, %s13967_s28 }
 0xba9   :  { %v1887_v22 = vpop.xlane.xlu0 %1886 }
 0xbaa   :  { %v1907_v37 = vsub.f32 %v11969_v28, %v1887_v22 }
 0xbac   :  { %v1916_v39 = vmul.f32 1.442695, %v1907_v37 }
 0xbad   :  { %v1890_v43 = vpop.xlane.xlu0 %1889 }
 0xbae   :  { %11216 = vpow2.f32 %v1916_v39  ;;  %v1908_v18 = vsub.f32 %v1876_v41, %v1890_v43 }
 0xbb0   :  { %v1918_v59 = vmul.f32 1.442695, %v1908_v18 }
 0xbb1   :  { %v1893_v16 = vpop.xlane.xlu0 %1892 }
 0xbb2   :  { %11218 = vpow2.f32 %v1918_v59  ;;  %v1909_v56 = vsub.f32 %v1877_v47, %v1893_v16 }
 0xbb4   :  { %v1920_v3 = vmul.f32 1.442695, %v1909_v56 }
 0xbb5   :  { %v1896_v7 = vpop.xlane.xlu1 %1895 }
 0xbb6   :  { %11220 = vpow2.f32 %v1920_v3  ;;  %v1910_v60 = vsub.f32 %v1878_v58, %v1896_v7 }
 0xbb8   :  { %v12006_v32 = vpop.eup %11216  ;;  %v1922_v49 = vmul.f32 1.442695, %v1910_v60 }
 0xbb9   :  { %v1933_v44 = vsel %vm258_vm6, %v12006_v32, 0.0  ;;  %v1899_v52 = vpop.xlane.xlu0 %1898 }
 0xbba   :  { %11222 = vpow2.f32 %v1922_v49  ;;  %1934 = vadd.xlane.f32.xlu0 %v1933_v44  ;;  %v1911_v11 = vsub.f32 %v11984_v8, %v1899_v52 }
 0xbbc   :  { %v12010_v28 = vpop.eup %11218  ;;  %v1924_v12 = vmul.f32 1.442695, %v1911_v11 }
 0xbbd   :  { %v1902_v41 = vpop.xlane.xlu1 %1901  ;;  %v1936_v54 = vsel %vm258_vm6, %v12010_v28, 0.0 }
 0xbbe   :  { %v1912_v47 = vsub.f32 %v1880_v9, %v1902_v41  ;;  %1937 = vadd.xlane.f32.xlu1 %v1936_v54 }
 0xbc0   :  { %v12014_v63 = vpop.eup %11220  ;;  %v1926_v50 = vmul.f32 1.442695, %v1912_v47 }
 0xbc1   :  { %v1905_v51 = vpop.xlane.xlu0 %1904  ;;  %v1939_v58 = vsel %vm258_vm6, %v12014_v63, 0.0  ;;  %v2078_v40 = vpop.permute.xlu1 %2077 }
 0xbc2   :  { %11224 = vpow2.f32 %v1926_v50  ;;  %1940 = vadd.xlane.f32.xlu0 %v1939_v58  ;;  %v1913_v13 = vsub.f32 %v1881_v25, %v1905_v51  ;;  %v2083_v23 = vsel %vm765_vm9, %v2078_v40, 0 }
 0xbc3   :  { %11226 = vpow2.f32 %v1924_v12 }
 0xbc4   :  { %v12018_v61 = vpop.eup %11222  ;;  %v1928_v14 = vmul.f32 1.442695, %v1913_v13 }
 0xbc5   :  { %v2029_v62 = vpop.permute.xlu0 %2028  ;;  %v1942_v1 = vsel %vm258_vm6, %v12018_v61, 0.0  ;;  %v2127_v4 = vpop.permute.xlu1 %2126 }
 0xbc6   :  { %v2034_v2 = vsel %vm765_vm9, %v2029_v62, 0  ;;  %1943 = vadd.xlane.f32.xlu1 %v1942_v1  ;;  %11228 = vpow2.f32 %v1928_v14  ;;  %v2132_v37 = vsel %vm765_vm9, %v2127_v4, 0 }
 0xbc7   :  { %10536 = vmatpush3.bf16.msra.mxu1 %v2034_v2 }
 0xbc8   :  { %10547 = vmatprep.subr.bf16.mxu1 %v11380_v15 }
 0xbcc   :  { %v12024_v5 = vpop.eup %11224 }
 0xbcd   :  { %v1948_v6 = vsel %vm258_vm6, %v12024_v5, 0.0  ;;  %v12033_v9 = vpop.eup %11226 }
 0xbce   :  { %1949 = vadd.xlane.f32.xlu1 %v1948_v6  ;;  %v1945_v19 = vsel %vm258_vm6, %v12033_v9, 0.0 }
 0xbd0   :  { %v12037_v20 = vpop.eup %11228 }
 0xbd8   :  { %2224 = vrot.lane.b32.xlu0 %v11920_v45, %s13967_s28  ;;  %v1951_v45 = vsel %vm258_vm6, %v12037_v20, 0.0 }
 0xbdf   :  { %2273 = vrot.lane.b32.xlu1 %v11923_v46, %s13967_s28 }
 0xbf6   :  { %v1932_v10 = vpop.xlane.xlu1 %1931 }
 0xbf7   :  { %11230 = vrcp.f32 %v1932_v10  ;;  %1946 = vadd.xlane.f32.xlu0 %v1945_v19 }
 0xbfa   :  { %v2176_v24 = vpop.permute.xlu1 %2175 }
 0xbfb   :  { %1952 = vadd.xlane.f32.xlu0 %v1951_v45  ;;  %v2181_v18 = vsel %vm765_vm9, %v2176_v24, 0 }
 0xc01   :  { %v11231_v46 = vpop.eup %11230 }
 0xc02   :  { %v1962_v8 = vmul.f32 %v11231_v46, %v11999_v33 }
 0xc04   :  { %v1970_v21 = vpack.c.bf16 %v1962_v8, %v1962_v8 }
 0xc06   :  { %10532 = vmatmul.mubr.msk.bf16.vlgmr.msra.gmra.mrb[56].mxu0 %vm258_vm6, %v1970_v21 }
 0xc07   :  { %10542 = vmatpush3.bf16.msra.mxu0 %v2083_v23  ;;  %10543 = vmatprep.mubr.msk.bf16.mxu0 %vm11381_vm1, %v11380_v15 }
 0xc08   :  { %10553 = vmatprep.subr.bf16.mxu0 %v11380_v15 }
 0xc11   :  { %2322 = vrot.lane.b32.xlu0 %v11931_v53, %s13967_s28 }
 0xc47   :  { %v1935_v25 = vpop.xlane.xlu0 %1934 }
 0xc48   :  { %11232 = vrcp.f32 %v1935_v25 }
 0xc4b   :  { %v1938_v26 = vpop.xlane.xlu1 %1937 }
 0xc4c   :  { %11234 = vrcp.f32 %v1938_v26 }
 0xc4f   :  { %v1941_v29 = vpop.xlane.xlu0 %1940 }
 0xc50   :  { %11236 = vrcp.f32 %v1941_v29 }
 0xc52   :  { %v11233_v30 = vpop.eup %11232 }
 0xc53   :  { %v1944_v31 = vpop.xlane.xlu1 %1943  ;;  %v1963_v33 = vmul.f32 %v11233_v30, %v12006_v32  ;;  %v2225_v56 = vpop.permute.xlu0 %2224 }
 0xc54   :  { %11238 = vrcp.f32 %v1944_v31  ;;  %v2230_v60 = vsel %vm765_vm9, %v2225_v56, 0 }
 0xc55   :  { %v1971_v38 = vpack.c.bf16 %v1963_v33, %v1963_v33 }
 0xc56   :  { %v11235_v22 = vpop.eup %11234 }
 0xc57   :  { %10538 = vmatmul.mubr.msk.bf16.vlgmr.msra.gmra.mrb[56].mxu1 %vm258_vm6, %v1971_v38  ;;  %v1964_v53 = vmul.f32 %v11235_v22, %v12010_v28 }
 0xc58   :  { %10548 = vmatpush3.bf16.msra.mxu1 %v2132_v37  ;;  %10549 = vmatprep.mubr.msk.bf16.mxu1 %vm11381_vm1, %v11380_v15  ;;  %v10898_v37 = vld [vmem:[%s13914_s14] sm:$0xff]  }
 0xc59   :  { %v1972_v39 = vpack.c.bf16 %v1964_v53, %v1964_v53  ;;  %10559 = vmatprep.subr.bf16.mxu1 %v11380_v15 }
 0xc5a   :  { %v11237_v43 = vpop.eup %11236 }
 0xc5b   :  { %10544 = vmatmul.mubr.msk.bf16.vlgmr.msra.gmra.mrb[60].mxu0 %vm258_vm6, %v1972_v39  ;;  %v1950_v59 = vpop.xlane.xlu1 %1949  ;;  %v1965_v16 = vmul.f32 %v11237_v43, %v12014_v63  ;;  %v10899_v39 = vld [vmem:[%s13914_s14 + $0x8] sm:$0xff]  }
 0xc5c   :  { %10554 = vmatpush3.bf16.msra.mxu0 %v2181_v18  ;;  %11240 = vrcp.f32 %v1950_v59  ;;  %10555 = vmatprep.mubr.msk.bf16.mxu0 %vm11381_vm1, %v11380_v15 }
 0xc5d   :  { %v1973_v3 = vpack.c.bf16 %v1965_v16, %v1965_v16  ;;  %10565 = vmatprep.subr.bf16.mxu0 %v11380_v15 }
 0xc5e   :  { %v11239_v7 = vpop.eup %11238 }
 0xc5f   :  { %10550 = vmatmul.mubr.msk.bf16.vlgmr.msra.gmra.mrb[60].mxu1 %vm258_vm6, %v1973_v3  ;;  %v1966_v32 = vmul.f32 %v11239_v7, %v12018_v61  ;;  %v2274_v49 = vpop.permute.xlu1 %2273 }
 0xc60   :  { %10560 = vmatpush3.bf16.msra.mxu1 %v2230_v60  ;;  %10561 = vmatprep.mubr.msk.bf16.mxu1 %vm11381_vm1, %v11380_v15  ;;  %v2279_v28 = vsel %vm765_vm9, %v2274_v49, 0 }
 0xc61   :  { %v1974_v44 = vpack.c.bf16 %v1966_v32, %v1966_v32  ;;  %10571 = vmatprep.subr.bf16.mxu1 %v11380_v15 }
 0xc63   :  { %10556 = vmatmul.mubr.msk.bf16.vlgmr.msra.gmra.mrb[64].mxu0 %vm258_vm6, %v1974_v44 }
 0xc64   :  { %10566 = vmatpush3.bf16.msra.mxu0 %v2279_v28  ;;  %10567 = vmatprep.mubr.msk.bf16.mxu0 %vm11381_vm1, %v11380_v15 }
 0xc65   :  { %10577 = vmatprep.subr.bf16.mxu0 %v11380_v15 }
 0xc66   :  { %v11241_v52 = vpop.eup %11240 }
 0xc67   :  { %v1968_v41 = vmul.f32 %v11241_v52, %v12024_v5 }
 0xc69   :  { %v1976_v54 = vpack.c.bf16 %v1968_v41, %v1968_v41 }
 0xc6b   :  { %10568 = vmatmul.mubr.msk.bf16.vlgmr.msra.gmra.mrb[68].mxu0 %vm258_vm6, %v1976_v54 }
 0xc6c   :  { %10581 = vmatprep.mubr.msk.bf16.mxu0 %vm11381_vm1, %v11380_v15  ;;  %10578 = vmatpush3.bf16.msra.mxu0 %v10898_v37 }
 0xc6d   :  { %10579 = vmatprep.subr.bf16.mxu0 %v11380_v15 }
 0xc70   :  { %10580 = vmatpush3.bf16.msra.mxu0 %v10899_v39  ;;  %v2534_v39 = vld [vmem:[%s13916_s16 + $0x80] sm:$0xff] }
 0xc84   :  { %v1947_v47 = vpop.xlane.xlu0 %1946 }
 0xc85   :  { %11242 = vrcp.f32 %v1947_v47 }
 0xc88   :  { %v1953_v63 = vpop.xlane.xlu0 %1952 }
 0xc89   :  { %11244 = vrcp.f32 %v1953_v63 }
 0xc8c   :  { %v2323_v58 = vpop.permute.xlu0 %2322 }
 0xc8d   :  { %v2328_v1 = vsel %vm765_vm9, %v2323_v58, 0 }
 0xc8f   :  { %v11243_v50 = vpop.eup %11242 }
 0xc90   :  { %v1967_v51 = vmul.f32 %v11243_v50, %v12033_v9 }
 0xc92   :  { %v1975_v61 = vpack.c.bf16 %v1967_v51, %v1967_v51 }
 0xc93   :  { %v11245_v62 = vpop.eup %11244 }
 0xc94   :  { %10562 = vmatmul.mubr.msk.bf16.vlgmr.msra.gmra.mrb[64].mxu1 %vm258_vm6, %v1975_v61  ;;  %v1969_v2 = vmul.f32 %v11245_v62, %v12037_v20 }
 0xc95   :  { %10572 = vmatpush3.bf16.msra.mxu1 %v2328_v1  ;;  %10573 = vmatprep.mubr.msk.bf16.mxu1 %vm11381_vm1, %v11380_v15 }
 0xc96   :  { %v1977_v5 = vpack.c.bf16 %v1969_v2, %v1969_v2 }
 0xc9c   :  { %10574 = vmatmul.mubr.msk.bf16.vlgmr.msra.gmra.mrb[68].mxu1 %vm258_vm6, %v1977_v5 }
 0xcd9   :  { %v2021_v6 = vpop.f32.mrb[56].mxu0 }
 0xcda   :  { %v10533_v11 = vpop.f32.mrb[57].mxu0 }
 0xcdb   :  { %v2024_v12 = vpop.f32.mrb[58].mxu0 }
 0xcdc   :  { %v10534_v13 = vpop.f32.mrb[59].mxu0 }
 0xd2a   :  { %v2070_v14 = vpop.f32.mrb[56].mxu1 }
 0xd2b   :  { %v10539_v40 = vpop.f32.mrb[57].mxu1 }
 0xd2c   :  { %v2073_v4 = vpop.f32.mrb[58].mxu1 }
 0xd2d   :  { %v10540_v9 = vpop.f32.mrb[59].mxu1 }
 0xd2e   :  { %v2119_v10 = vpop.f32.mrb[60].mxu0 }
 0xd2f   :  { %v10545_v19 = vpop.f32.mrb[61].mxu0 }
 0xd30   :  { %v2122_v45 = vpop.f32.mrb[62].mxu0 }
 0xd31   :  { %v10546_v46 = vpop.f32.mrb[63].mxu0 }
 0xd32   :  { %v2168_v8 = vpop.f32.mrb[60].mxu1 }
 0xd33   :  { %v10551_v21 = vpop.f32.mrb[61].mxu1 }
 0xd34   :  { %v2171_v23 = vpop.f32.mrb[62].mxu1 }
 0xd35   :  { %v10552_v24 = vpop.f32.mrb[63].mxu1 }
 0xd36   :  { %v2217_v20 = vpop.f32.mrb[64].mxu0 }
 0xd37   :  { %v10557_v25 = vpop.f32.mrb[65].mxu0 }
 0xd38   :  { %v2220_v26 = vpop.f32.mrb[66].mxu0 }
 0xd39   :  { %v10558_v29 = vpop.f32.mrb[67].mxu0 }
 0xd3a   :  { %v2518_v29 = vld [vmem:[%s13916_s16] sm:$0xff] }
 0xd3e   :  { %v2315_v30 = vpop.f32.mrb[68].mxu0 }
 0xd3f   :  { %v10850_v31 = vpack.i.bf16 %v2315_v30, %v2119_v10  ;;  %v10569_v33 = vpop.f32.mrb[69].mxu0  ;;  %v2526_v30 = vld [vmem:[%s13916_s16 + $0x40] sm:$0xff] }
 0xd40   :  { %v2318_v38 = vpop.f32.mrb[70].mxu0  ;;  %v9130_v33 = vcombine.high %v2518_v29, %v2526_v30 }
 0xd41   :  { %10851 = vrot.lane.b32.xlu0 %v10850_v31, %s13969_s23  ;;  %v10570_v22 = vpop.f32.mrb[71].mxu0  ;;  %v2519_v31 = vld [vmem:[%s13916_s16 + $0x8] sm:$0xff] }
 0xd42   :  { %v2527_v38 = vld [vmem:[%s13916_s16 + $0x48] sm:$0xff]  ;;  %v9129_v22 = vcombine.low %v2518_v29, %v2526_v30  ;;  %2797 = vmatprep.subr.bf16.mxu1 %v9130_v33  ;;  %v2536_v30 = vld [vmem:[%s13916_s16 + $0x90] sm:$0xff]  ;;  %v2545_v33 = vld [vmem:[%s13916_s16 + $0xd8] sm:$0xff] }
 0xd43   :  { %v9131_v37 = vcombine.low %v2519_v31, %v2527_v38 }
 0xd44   :  { %2798 = vmatpush1.bf16.msra.mxu1 %v9129_v22 }
 0xd67   :  { %v2266_v53 = vpop.f32.mrb[64].mxu1 }
 0xd68   :  { %v10845_v43 = vpack.i.bf16 %v2266_v53, %v2070_v14  ;;  %v10563_v18 = vpop.f32.mrb[65].mxu1  ;;  %v9132_v53 = vcombine.high %v2519_v31, %v2527_v38  ;;  %v2544_v31 = vld [vmem:[%s13916_s16 + $0xd0] sm:$0xff] }
 0xd69   :  { %v2269_v59 = vpop.f32.mrb[66].mxu1  ;;  %v2535_v18 = vld [vmem:[%s13916_s16 + $0x88] sm:$0xff] }
 0xd6a   :  { %10846 = vrot.lane.b32.xlu1 %v10845_v43, %s13970_s29  ;;  %v10564_v16 = vpop.f32.mrb[67].mxu1  ;;  %v2542_v43 = vld [vmem:[%s13916_s16 + $0xc0] sm:$0xff]  ;;  %2840 = vmatprep.subr.bf16.mxu0 %v9132_v53 }
 0xd6b   :  { %v9145_v59 = vcombine.low %v2534_v39, %v2542_v43  ;;  %v9146_v16 = vcombine.high %v2534_v39, %v2542_v43  ;;  %v2522_v39 = vld [vmem:[%s13916_s16 + $0x20] sm:$0xff] }
 0xd6c   :  { %v2530_v43 = vld [vmem:[%s13916_s16 + $0x60] sm:$0xff] }
 0xd6d   :  { %2799 = vmatprep.subr.bf16.mxu1 %v9146_v16  ;;  %v9149_v16 = vcombine.low %v2536_v30, %v2544_v31 }
 0xd6e   :  { %2800 = vmatpush1.bf16.msra.mxu1 %v9145_v59  ;;  %v2531_v59 = vld [vmem:[%s13916_s16 + $0x68] sm:$0xff] }
 0xd6f   :  { %v2364_v56 = vpop.f32.mrb[68].mxu1 }
 0xd70   :  { %v10855_v3 = vpack.i.bf16 %v2364_v56, %v2168_v8  ;;  %v10575_v7 = vpop.f32.mrb[69].mxu1  ;;  %v2543_v56 = vld [vmem:[%s13916_s16 + $0xc8] sm:$0xff] }
 0xd71   :  { %v2367_v60 = vpop.f32.mrb[70].mxu1  ;;  %v9148_v7 = vcombine.high %v2535_v18, %v2543_v56 }
 0xd72   :  { %10856 = vrot.lane.b32.xlu1 %v10855_v3, %s13971_s2  ;;  %v10576_v32 = vpop.f32.mrb[71].mxu1  ;;  %v9147_v3 = vcombine.low %v2535_v18, %v2543_v56  ;;  %v11390_v60 = vmov 0   ;;  %v2523_v18 = vld [vmem:[%s13916_s16 + $0x28] sm:$0xff] }
 0xd73   :  { %2829 = vmatprep.mubr.bf16.mxu1 %v11390_v60  ;;  %v2520_v32 = vld [vmem:[%s13916_s16 + $0x10] sm:$0xff] }
 0xdb3   :  { %v10852_v52 = vpop.permute.xlu0 %10851 }
 0xdb4   :  { %v10854_v47 = vunpack.i.h.bf16 %v10852_v52  ;;  %v10853_v63 = vunpack.i.l.bf16 %v10852_v52 }
 0xddc   :  { %v10847_v49 = vpop.permute.xlu1 %10846 }
 0xddd   :  { %v10849_v44 = vunpack.i.h.bf16 %v10847_v49  ;;  %v10848_v28 = vunpack.i.l.bf16 %v10847_v49  ;;  %v2528_v49 = vld [vmem:[%s13916_s16 + $0x50] sm:$0xff] }
 0xdde   :  { %v9134_v52 = vcombine.high %v2520_v32, %v2528_v49 }
 0xddf   :  { %v2394_v41 = vsel %vm258_vm6, %v2021_v6, %v10848_v28  ;;  %v2395_v54 = vsel %vm258_vm6, %v2217_v20, %v10849_v44  ;;  %v9125_v6 = vld [vmem:[%s13915_s15] ss:$0 sm:$0xff]  ;;  %v2521_v44 = vld [vmem:[%s13916_s16 + $0x18] sm:$0xff]  ;;  %v9133_v28 = vcombine.low %v2520_v32, %v2528_v49 }
 0xde0   :  { %v2396_v61 = vsel %vm1171_vm10, %v2394_v41, %v10853_v63  ;;  %v2397_v62 = vsel %vm1171_vm10, %v2395_v54, %v10854_v47  ;;  %v2529_v41 = vld [vmem:[%s13916_s16 + $0x58] sm:$0xff]  ;;  %2883 = vmatprep.subr.bf16.mxu1 %v9134_v52  ;;  %v2538_v32 = vld [vmem:[%s13916_s16 + $0xa0] sm:$0xff]  ;;  %v9137_v52 = vcombine.low %v2522_v39, %v2530_v43 }
 0xde1   :  { %v9135_v54 = vcombine.low %v2521_v44, %v2529_v41  ;;  %v9136_v47 = vcombine.high %v2521_v44, %v2529_v41  ;;  %v2546_v49 = vld [vmem:[%s13916_s16 + $0xe0] sm:$0xff]  ;;  %v2539_v44 = vld [vmem:[%s13916_s16 + $0xa8] sm:$0xff]  ;;  %v9139_v41 = vcombine.low %v2523_v18, %v2531_v59 }
 0xde4   :  { %v10857_v50 = vpop.permute.xlu1 %10856 }
 0xde5   :  { %v10859_v51 = vunpack.i.h.bf16 %v10857_v50  ;;  %v10858_v58 = vunpack.i.l.bf16 %v10857_v50 }
 0xde7   :  { %v2398_v1 = vsel %vm1174_vm11, %v2396_v61, %v10858_v58  ;;  %v2399_v2 = vsel %vm1174_vm11, %v2397_v62, %v10859_v51 }
 0xde8   :  { %v2400_v5 = vpack.c.bf16 %v2399_v2, %v2398_v1 }
 0xdea   :  { %10582 = vmatmul.mubr.msk.bf16.vlgmr.msra.gmra.mrb[72].mxu0 %vm100_vm0, %v2400_v5 }
 0xdeb   :  { %2841 = vmatpush1.bf16.msra.mxu0 %v9131_v37  ;;  %2872 = vmatprep.mubr.bf16.mxu0 %v11390_v60  ;;  %v9150_v37 = vcombine.high %v2536_v30, %v2544_v31  ;;  %v10908_v30 = vld [vmem:[%s13918_s18 + $0x50] sm:$0xff]  }
 0xdec   :  { %2842 = vmatprep.subr.bf16.mxu0 %v9148_v7  ;;  %v9140_v7 = vcombine.high %v2523_v18, %v2531_v59  ;;  %v10909_v31 = vld [vmem:[%s13918_s18 + $0xd0] sm:$0xff]   ;;  %v10919_v18 = vld [vmem:[%s13918_s18 + $0xa0] sm:$0xff]   ;;  %v10920_v59 = vld [vmem:[%s13918_s18 + $0x68] sm:$0xff]  }
 0xdef   :  { %2843 = vmatpush1.bf16.msra.mxu0 %v9147_v3  ;;  %v9138_v3 = vcombine.high %v2522_v39, %v2530_v43  ;;  %v10917_v39 = vld [vmem:[%s13918_s18 + $0xe0] sm:$0xff]  }
 0xdf0   :  { %2926 = vmatprep.subr.bf16.mxu0 %v9136_v47  ;;  %v10918_v43 = vld [vmem:[%s13918_s18 + $0x20] sm:$0xff]  }
 0xebd   :  { %v2456_v11 = vpop.f32.mrb[72].mxu0 }
 0xebe   :  { %v2457_v12 = vadd.f32 %v9125_v6, %v2456_v11  ;;  %v10583_v13 = vpop.f32.mrb[73].mxu0 }
 0xebf   :  { %v2459_v14 = vpop.f32.mrb[74].mxu0 }
 0xec0   :  { %v12105_v40 = vadd.f32 %v2457_v12, %v11818_v0  ;;  %v2460_v4 = vadd.f32 %v9125_v6, %v2459_v14  ;;  %v10584_v9 = vpop.f32.mrb[75].mxu0 }
 0xec2   :  { %v12108_v10 = vadd.f32 %v2460_v4, %v11823_v17  ;;  %v2465_v19 = vsel %vm100_vm0, %v12105_v40, 0.0 }
 0xec3   :  { %2466 = vadd.xlane.f32.xlu0 %v2465_v19  ;;  %v12165_v19 = vsub.s32 2, %v11532_v34 }
 0xec4   :  { %v2468_v45 = vsel %vm100_vm0, %v12108_v10, 0.0 }
 0xec5   :  { %2469 = vadd.xlane.f32.xlu1 %v2468_v45 }
 0xf50   :  { %v2467_v46 = vpop.xlane.xlu0 %2466 }
 0xf51   :  { %v2471_v8 = vmul.f32 0.03125, %v2467_v46  ;;  %v11352_v46 = vld [vmem:[%s13961_s26] sm:$0x7] }
 0xf52   :  { %v2470_v21 = vpop.xlane.xlu1 %2469 }
 0xf53   :  { %v12115_v23 = vsub.f32 %v12105_v40, %v2471_v8  ;;  %v2472_v0 = vmul.f32 0.03125, %v2470_v21  ;;  %v2508_v8 = vrot.slane %v11352_v46, %v12165_v19 }
 0xf55   :  { %v12118_v24 = vsub.f32 %v12108_v10, %v2472_v0  ;;  %v2475_v17 = vmul.f32 %v12115_v23, %v12115_v23 }
 0xf57   :  { %v2477_v20 = vsel %vm100_vm0, %v2475_v17, 0.0  ;;  %v2476_v25 = vmul.f32 %v12118_v24, %v12118_v24  ;;  %v11353_v17 = vld [vmem:[%s13962_s3] sm:$0x7] }
 0xf58   :  { %2478 = vadd.xlane.f32.xlu0 %v2477_v20  ;;  %v2514_v20 = vrot.slane %v11353_v17, %v12165_v19  ;;  %v10903_v17 = vld [vmem:[%s13918_s18 + $0x80] sm:$0xff]  }
 0xf59   :  { %v2480_v26 = vsel %vm100_vm0, %v2476_v25, 0.0 }
 0xf5c   :  { %2481 = vadd.xlane.f32.xlu0 %v2480_v26 }
 0xfe5   :  { %v2479_v63 = vpop.xlane.xlu0 %2478 }
 0xfe6   :  { %v2483_v50 = vmul.f32 0.032258064, %v2479_v63  ;;  %v2524_v63 = vld [vmem:[%s13916_s16 + $0x30] sm:$0xff] }
 0xfe8   :  { %11246 = vrsqrt.f32 %v2483_v50  ;;  %vm2487_vm4 = vcmp.eq.f32.partialorder %v2483_v50, inf  ;;  %v2490_v1 = vand.u32 2147483648, %v2483_v50  ;;  %vm2489_vm5 = vcmp.eq.f32.partialorder %v2483_v50, 0.0 }
 0xfe9   :  { %v2482_v51 = vpop.xlane.xlu0 %2481 }
 0xfea   :  { %v2484_v58 = vmul.f32 0.032258064, %v2482_v51  ;;  %v2525_v51 = vld [vmem:[%s13916_s16 + $0x38] sm:$0xff] }
 0xfec   :  { %11248 = vrsqrt.f32 %v2484_v58  ;;  %vm2494_vm7 = vcmp.eq.f32.partialorder %v2484_v58, inf  ;;  %v2497_v13 = vand.u32 2147483648, %v2484_v58  ;;  %vm2496_vm8 = vcmp.eq.f32.partialorder %v2484_v58, 0.0 }
 0xff2   :  { %v11247_v61 = vpop.eup %11246 }
 0xff3   :  { %v2486_v62 = vmul.f32 %v11247_v61, %v2483_v50  ;;  %v9153_v61 = vcombine.low %v2538_v32, %v2546_v49 }
 0xff5   :  { %v2488_v2 = vsel %vm2487_vm4, %v2483_v50, %v2486_v62  ;;  %v2532_v50 = vld [vmem:[%s13916_s16 + $0x70] sm:$0xff] }
 0xff6   :  { %v11249_v5 = vpop.eup %11248  ;;  %v2491_v6 = vsel %vm2489_vm5, %v2490_v1, %v2488_v2  ;;  %v9142_v1 = vcombine.high %v2524_v63, %v2532_v50 }
 0xff7   :  { %v2499_v11 = vadd.f32 1e-06, %v2491_v6  ;;  %v2493_v12 = vmul.f32 %v11249_v5, %v2484_v58  ;;  %v2540_v5 = vld [vmem:[%s13916_s16 + $0xb0] sm:$0xff] }
 0xff8   :  { %v2548_v6 = vld [vmem:[%s13916_s16 + $0xf0] sm:$0xff] }
 0xff9   :  { %11250 = vrcp.f32 %v2499_v11  ;;  %v2495_v14 = vsel %vm2494_vm7, %v2484_v58, %v2493_v12  ;;  %v2533_v58 = vld [vmem:[%s13916_s16 + $0x78] sm:$0xff] }
 0xffa   :  { %v2498_v4 = vsel %vm2496_vm8, %v2497_v13, %v2495_v14  ;;  %v9144_v2 = vcombine.high %v2525_v51, %v2533_v58  ;;  %v2541_v11 = vld [vmem:[%s13916_s16 + $0xb8] sm:$0xff]  ;;  %v9141_v13 = vcombine.low %v2524_v63, %v2532_v50  ;;  %v9143_v14 = vcombine.low %v2525_v51, %v2533_v58  ;;  %v10933_v63 = vld [vmem:[%s13918_s18 + $0x1c0] sm:$0xff]  }
 0xffb   :  { %v2500_v9 = vadd.f32 1e-06, %v2498_v4  ;;  %v2549_v12 = vld [vmem:[%s13916_s16 + $0xf8] sm:$0xff]  ;;  %v9158_v4 = vcombine.high %v2540_v5, %v2548_v6  ;;  %v2550_v50 = vld [vmem:[%s13917_s17] sm:$0xff]  ;;  %v12367_v51 = vsub.s32 3, %v11532_v34 }
 0xffc   :  { %v9159_v46 = vcombine.low %v2541_v11, %v2549_v12  ;;  %v2557_v58 = vrot.slane %v2550_v50, %v11535_v35 }
 0xffd   :  { %11252 = vrcp.f32 %v2500_v9  ;;  %v9160_v9 = vcombine.high %v2541_v11, %v2549_v12  ;;  %v12380_v12 = vsub.s32 5, %v11532_v34 }
0x1003   :  { %v11251_v45 = vpop.eup %11250 }
0x1004   :  { %v2503_v21 = vmul.f32 %v11251_v45, %v12115_v23  ;;  %v2537_v23 = vld [vmem:[%s13916_s16 + $0x98] sm:$0xff]  ;;  %v9157_v45 = vcombine.low %v2540_v5, %v2548_v6  ;;  %v12377_v5 = vsub.s32 6, %v11532_v34 }
0x1005   :  { %v9152_v53 = vcombine.high %v2537_v23, %v2545_v33  ;;  %v9151_v56 = vcombine.low %v2537_v23, %v2545_v33  ;;  %v10910_v23 = vld [vmem:[%s13918_s18 + $0x10] sm:$0xff]  }
0x1006   :  { %v2509_v26 = vmul.f32 %v2508_v8, %v2503_v21  ;;  %v10901_v21 = vld [vmem:[%s13918_s18 + $0xc0] sm:$0xff]   ;;  %v10911_v33 = vld [vmem:[%s13918_s18 + $0x90] sm:$0xff]  }
0x1007   :  { %v11253_v0 = vpop.eup %11252 }
0x1008   :  { %v2504_v25 = vmul.f32 %v11253_v0, %v12118_v24  ;;  %v2515_v38 = vadd.f32 %v2514_v20, %v2509_v26  ;;  %v10902_v0 = vld [vmem:[%s13918_s18] sm:$0xff]   ;;  %v10906_v26 = vld [vmem:[%s13918_s18 + $0x8] sm:$0xff]  }
0x100a   :  { %v2510_v29 = vmul.f32 %v2508_v8, %v2504_v25  ;;  %v10900_v8 = vld [vmem:[%s13918_s18 + $0x40] sm:$0xff]   ;;  %v10905_v25 = vld [vmem:[%s13918_s18 + $0xc8] sm:$0xff]  }
0x100c   :  { %v2516_v24 = vadd.f32 %v2514_v20, %v2510_v29  ;;  %v10904_v20 = vld [vmem:[%s13918_s18 + $0x48] sm:$0xff]  }
0x100d   :  { %v10907_v29 = vld [vmem:[%s13918_s18 + $0x88] sm:$0xff]  }
0x100e   :  { %v12189_v22 = vpack.c.bf16 %v2516_v24, %v2515_v38  ;;  %v10912_v38 = vld [vmem:[%s13918_s18 + $0x58] sm:$0xff]  }
0x100f   :  { %v10913_v24 = vld [vmem:[%s13918_s18 + $0xd8] sm:$0xff]  }
0x1010   :  { %9161 = vmatmul.mubr.msk.bf16.vlgmr.msra.gmra.mrb[72].mxu1 %vm100_vm0, %v12189_v22  ;;  %9162 = vmatmul.mubr.msk.bf16.vlgmr.msra.gmra.mrb[76].mxu0 %vm100_vm0, %v12189_v22 }
0x1011   :  { %2884 = vmatpush1.bf16.msra.mxu1 %v9133_v28  ;;  %2927 = vmatpush1.bf16.msra.mxu0 %v9135_v54  ;;  %v2547_v28 = vld [vmem:[%s13916_s16 + $0xe8] sm:$0xff]  ;;  %v9154_v54 = vcombine.high %v2538_v32, %v2546_v49  ;;  %v10925_v32 = vld [vmem:[%s13918_s18 + $0xf0] sm:$0xff]  }
0x1012   :  { %2885 = vmatprep.subr.bf16.mxu1 %v9150_v37  ;;  %2928 = vmatprep.subr.bf16.mxu0 %v9152_v53  ;;  %v9156_v47 = vcombine.high %v2539_v44, %v2547_v28  ;;  %v9155_v62 = vcombine.low %v2539_v44, %v2547_v28  ;;  %v10915_v37 = vld [vmem:[%s13918_s18 + $0x98] sm:$0xff]   ;;  %v10916_v53 = vld [vmem:[%s13918_s18 + $0x60] sm:$0xff]   ;;  %v10926_v49 = vld [vmem:[%s13918_s18 + $0x30] sm:$0xff]  }
0x1013   :  { %2915 = vmatprep.mubr.bf16.mxu1 %v11390_v60  ;;  %2958 = vmatprep.mubr.bf16.mxu0 %v11390_v60  ;;  %v10927_v44 = vld [vmem:[%s13918_s18 + $0xb0] sm:$0xff]   ;;  %v10928_v28 = vld [vmem:[%s13918_s18 + $0x78] sm:$0xff]  }
0x1015   :  { %2886 = vmatpush1.bf16.msra.mxu1 %v9149_v16  ;;  %2929 = vmatpush1.bf16.msra.mxu0 %v9151_v56  ;;  %v10921_v16 = vld [vmem:[%s13918_s18 + $0xe8] sm:$0xff]  }
0x1016   :  { %2969 = vmatprep.subr.bf16.mxu1 %v9138_v3  ;;  %3012 = vmatprep.subr.bf16.mxu0 %v9140_v7  ;;  %v10922_v56 = vld [vmem:[%s13918_s18 + $0x28] sm:$0xff]   ;;  %v10924_v7 = vld [vmem:[%s13918_s18 + $0x70] sm:$0xff]  }
0x1017   :  { %v10923_v3 = vld [vmem:[%s13918_s18 + $0xa8] sm:$0xff]  }
0x1018   :  { %9163 = vmatmul.mubr.msk.bf16.vlgmr.msra.gmra.mrb[76].mxu1 %vm100_vm0, %v12189_v22  ;;  %9164 = vmatmul.mubr.msk.bf16.vlgmr.msra.gmra.mrb[80].mxu0 %vm100_vm0, %v12189_v22 }
0x1019   :  { %2970 = vmatpush1.bf16.msra.mxu1 %v9137_v52  ;;  %3013 = vmatpush1.bf16.msra.mxu0 %v9139_v41  ;;  %v10929_v52 = vld [vmem:[%s13918_s18 + $0xf8] sm:$0xff]  }
0x101a   :  { %2971 = vmatprep.subr.bf16.mxu1 %v9154_v54  ;;  %3014 = vmatprep.subr.bf16.mxu0 %v9156_v47  ;;  %v10930_v41 = vld [vmem:[%s13918_s18 + $0x38] sm:$0xff]   ;;  %v10932_v47 = vld [vmem:[%s13918_s18 + $0x140] sm:$0xff]  }
0x101b   :  { %3001 = vmatprep.mubr.bf16.mxu1 %v11390_v60  ;;  %3044 = vmatprep.mubr.bf16.mxu0 %v11390_v60  ;;  %v10931_v54 = vld [vmem:[%s13918_s18 + $0xb8] sm:$0xff]  }
0x101d   :  { %2972 = vmatpush1.bf16.msra.mxu1 %v9153_v61  ;;  %3015 = vmatpush1.bf16.msra.mxu0 %v9155_v62  ;;  %v2565_v61 = vrot.slane %v2550_v50, %v12165_v19  ;;  %v2561_v62 = vrot.slane %v2550_v50, %v11862_v55 }
0x101e   :  { %3055 = vmatprep.subr.bf16.mxu1 %v9142_v1  ;;  %3098 = vmatprep.subr.bf16.mxu0 %v9144_v2  ;;  %v2569_v1 = vrot.slane %v2550_v50, %v12367_v51  ;;  %v12374_v2 = vsub.s32 4, %v11532_v34 }
0x1020   :  { %9165 = vmatmul.mubr.msk.bf16.vlgmr.msra.gmra.mrb[80].mxu1 %vm100_vm0, %v12189_v22  ;;  %9166 = vmatmul.mubr.msk.bf16.vlgmr.msra.gmra.mrb[84].mxu0 %vm100_vm0, %v12189_v22 }
0x1021   :  { %3056 = vmatpush1.bf16.msra.mxu1 %v9141_v13  ;;  %3099 = vmatpush1.bf16.msra.mxu0 %v9143_v14  ;;  %v12383_v13 = vsub.s32 7, %v11532_v34  ;;  %v2577_v34 = vrot.slane %v2550_v50, %v12380_v12 }
0x1022   :  { %3057 = vmatprep.subr.bf16.mxu1 %v9158_v4  ;;  %3100 = vmatprep.subr.bf16.mxu0 %v9160_v9 }
0x1023   :  { %3087 = vmatprep.mubr.bf16.mxu1 %v11390_v60  ;;  %3130 = vmatprep.mubr.bf16.mxu0 %v11390_v60 }
0x1025   :  { %3058 = vmatpush1.bf16.msra.mxu1 %v9157_v45  ;;  %3101 = vmatpush1.bf16.msra.mxu0 %v9159_v46 }
0x1026   :  { %9922 = vmatprep.subr.bf16.mxu1 %v10900_v8  ;;  %9944 = vmatprep.subr.bf16.mxu0 %v10901_v21 }
0x1028   :  { %9167 = vmatmul.mubr.msk.bf16.vlgmr.msra.gmra.mrb[84].mxu1 %vm100_vm0, %v12189_v22  ;;  %9168 = vmatmul.mubr.msk.bf16.vlgmr.msra.gmra.mrb[88].mxu0 %vm100_vm0, %v12189_v22  ;;  %v10914_v22 = vld [vmem:[%s13918_s18 + $0x18] sm:$0xff]  }
0x1029   :  { %9923 = vmatpush3.bf16.msra.mxu1 %v10902_v0  ;;  %9945 = vmatpush3.bf16.msra.mxu0 %v10903_v17 }
0x102a   :  { %9924 = vmatprep.subr.bf16.mxu1 %v10904_v20  ;;  %9946 = vmatprep.subr.bf16.mxu0 %v10905_v25 }
0x102d   :  { %9925 = vmatpush3.bf16.msra.mxu1 %v10906_v26  ;;  %9947 = vmatpush3.bf16.msra.mxu0 %v10907_v29  ;;  %v2573_v29 = vrot.slane %v2550_v50, %v12374_v2 }
0x102e   :  { %9926 = vmatprep.subr.bf16.mxu1 %v10908_v30  ;;  %9948 = vmatprep.subr.bf16.mxu0 %v10909_v31  ;;  %v2581_v30 = vrot.slane %v2550_v50, %v12377_v5 }
0x1031   :  { %9927 = vmatpush3.bf16.msra.mxu1 %v10910_v23  ;;  %9949 = vmatpush3.bf16.msra.mxu0 %v10911_v33  ;;  %v2585_v33 = vrot.slane %v2550_v50, %v12383_v13  ;;  %v10937_v50 = vld [vmem:[%s13918_s18 + $0x1c8] sm:$0xff]  }
0x1032   :  { %9928 = vmatprep.subr.bf16.mxu1 %v10912_v38  ;;  %9950 = vmatprep.subr.bf16.mxu0 %v10913_v24 }
0x1035   :  { %9929 = vmatpush3.bf16.msra.mxu1 %v10914_v22  ;;  %9951 = vmatpush3.bf16.msra.mxu0 %v10915_v37 }
0x1036   :  { %9930 = vmatprep.subr.bf16.mxu1 %v10916_v53  ;;  %9952 = vmatprep.subr.bf16.mxu0 %v10917_v39 }
0x1039   :  { %9931 = vmatpush3.bf16.msra.mxu1 %v10918_v43  ;;  %9953 = vmatpush3.bf16.msra.mxu0 %v10919_v18 }
0x103a   :  { %9932 = vmatprep.subr.bf16.mxu1 %v10920_v59  ;;  %9954 = vmatprep.subr.bf16.mxu0 %v10921_v16  ;;  %v12392_v59 = vld [vmem:[%s13917_s17 + $0x8] sm:$0xff] }
0x103d   :  { %9933 = vmatpush3.bf16.msra.mxu1 %v10922_v56  ;;  %9955 = vmatpush3.bf16.msra.mxu0 %v10923_v3 }
0x103e   :  { %9934 = vmatprep.subr.bf16.mxu1 %v10924_v7  ;;  %9956 = vmatprep.subr.bf16.mxu0 %v10925_v32 }
0x1041   :  { %9935 = vmatpush3.bf16.msra.mxu1 %v10926_v49  ;;  %9957 = vmatpush3.bf16.msra.mxu0 %v10927_v44  ;;  %v10934_v44 = vld [vmem:[%s13918_s18 + $0x100] sm:$0xff]  }
0x1042   :  { %9936 = vmatprep.subr.bf16.mxu1 %v10928_v28  ;;  %9958 = vmatprep.subr.bf16.mxu0 %v10929_v52  ;;  %v10935_v28 = vld [vmem:[%s13918_s18 + $0x180] sm:$0xff]  }
0x1045   :  { %9937 = vmatpush3.bf16.msra.mxu1 %v10930_v41  ;;  %9959 = vmatpush3.bf16.msra.mxu0 %v10931_v54 }
0x1046   :  { %9966 = vmatprep.subr.bf16.mxu1 %v10932_v47  ;;  %9988 = vmatprep.subr.bf16.mxu0 %v10933_v63  ;;  %v10936_v63 = vld [vmem:[%s13918_s18 + $0x148] sm:$0xff]  }
0x10e3   :  { %v2831_v6 = vpop.f32.mrb[72].mxu1  ;;  %v2874_v11 = vpop.f32.mrb[76].mxu0 }
0x10e4   :  { %v2832_v14 = vadd.f32 %v2831_v6, %v2557_v58  ;;  %v2875_v4 = vadd.f32 %v2874_v11, %v2565_v61  ;;  %v2833_v9 = vpop.f32.mrb[73].mxu1  ;;  %v2876_v45 = vpop.f32.mrb[77].mxu0  ;;  %v2597_v11 = vrot.slane %v12392_v59, %v12165_v19 }
0x10e5   :  { %v2834_v46 = vadd.f32 %v2833_v9, %v2561_v62  ;;  %v2877_v8 = vadd.f32 %v2876_v45, %v2569_v1  ;;  %v2835_v21 = vpop.f32.mrb[74].mxu1  ;;  %v2878_v0 = vpop.f32.mrb[78].mxu0 }
0x10e6   :  { %v2836_v17 = vadd.f32 %v2835_v21, %v2557_v58  ;;  %v2879_v20 = vadd.f32 %v2878_v0, %v2565_v61  ;;  %v2837_v25 = vpop.f32.mrb[75].mxu1  ;;  %v2880_v26 = vpop.f32.mrb[79].mxu0  ;;  %v3141_v38 = vmax.f32 %v2832_v14, 0.0  ;;  %v3143_v24 = vmax.f32 %v2875_v4, 0.0  ;;  %v10938_v0 = vld [vmem:[%s13918_s18 + $0x108] sm:$0xff]  }
0x10e7   :  { %v2838_v31 = vadd.f32 %v2837_v25, %v2561_v62  ;;  %v2881_v23 = vadd.f32 %v2880_v26, %v2569_v1  ;;  %v3142_v53 = vmax.f32 %v2834_v46, 0.0  ;;  %v3144_v39 = vmax.f32 %v2877_v8, 0.0 }
0x10e8   :  { %v3157_v22 = vmax.f32 %v2836_v17, 0.0  ;;  %v3159_v37 = vmax.f32 %v2879_v20, 0.0  ;;  %v2589_v58 = vrot.slane %v12392_v59, %v11535_v35  ;;  %v2593_v46 = vrot.slane %v12392_v59, %v11862_v55  ;;  %v10939_v17 = vld [vmem:[%s13918_s18 + $0x188] sm:$0xff]  }
0x10e9   :  { %v3158_v43 = vmax.f32 %v2838_v31, 0.0  ;;  %v3160_v18 = vmax.f32 %v2881_v23, 0.0  ;;  %v2601_v20 = vrot.slane %v12392_v59, %v12367_v51  ;;  %v10940_v31 = vld [vmem:[%s13918_s18 + $0x150] sm:$0xff]  }
0x10ea   :  { %v3173_v16 = vpack.c.bf16 %v3157_v22, %v3141_v38  ;;  %v3175_v56 = vpack.c.bf16 %v3159_v37, %v3143_v24  ;;  %v10941_v23 = vld [vmem:[%s13918_s18 + $0x1d0] sm:$0xff]  }
0x10eb   :  { %v3174_v3 = vpack.c.bf16 %v3158_v43, %v3142_v53  ;;  %v3176_v7 = vpack.c.bf16 %v3160_v18, %v3144_v39  ;;  %v2917_v32 = vpop.f32.mrb[76].mxu1  ;;  %v2960_v49 = vpop.f32.mrb[80].mxu0 }
0x10ec   :  { %v2918_v52 = vadd.f32 %v2917_v32, %v2573_v29  ;;  %v2961_v41 = vadd.f32 %v2960_v49, %v2581_v30  ;;  %v2919_v54 = vpop.f32.mrb[77].mxu1  ;;  %v2962_v47 = vpop.f32.mrb[81].mxu0 }
0x10ed   :  { %v2920_v61 = vadd.f32 %v2919_v54, %v2577_v34  ;;  %v2963_v62 = vadd.f32 %v2962_v47, %v2585_v33  ;;  %v2921_v1 = vpop.f32.mrb[78].mxu1  ;;  %v2964_v6 = vpop.f32.mrb[82].mxu0  ;;  %4252 = vmatprep.mubr.bf16.mxu1 %v3174_v3  ;;  %4293 = vmatprep.mubr.bf16.mxu0 %v3176_v7 }
0x10ee   :  { %v2922_v14 = vadd.f32 %v2921_v1, %v2573_v29  ;;  %v2965_v4 = vadd.f32 %v2964_v6, %v2581_v30  ;;  %v2923_v9 = vpop.f32.mrb[79].mxu1  ;;  %v2966_v45 = vpop.f32.mrb[83].mxu0  ;;  %4253 = vmatmul.mubr.bf16.vlgmr.msra.gmra.mrb[88].mxu1 %v3173_v16  ;;  %4294 = vmatmul.mubr.bf16.vlgmr.msra.gmra.mrb[92].mxu0 %v3175_v56  ;;  %v3145_v25 = vmax.f32 %v2918_v52, 0.0  ;;  %v3147_v26 = vmax.f32 %v2961_v41, 0.0  ;;  %v10942_v16 = vld [vmem:[%s13918_s18 + $0x110] sm:$0xff]  }
0x10ef   :  { %v2924_v8 = vadd.f32 %v2923_v9, %v2577_v34  ;;  %v2967_v21 = vadd.f32 %v2966_v45, %v2585_v33  ;;  %9967 = vmatpush3.bf16.msra.mxu1 %v10934_v44  ;;  %9989 = vmatpush3.bf16.msra.mxu0 %v10935_v28  ;;  %v3146_v34 = vmax.f32 %v2920_v61, 0.0  ;;  %v3148_v33 = vmax.f32 %v2963_v62, 0.0  ;;  %v10943_v56 = vld [vmem:[%s13918_s18 + $0x190] sm:$0xff]   ;;  %v10944_v44 = vld [vmem:[%s13918_s18 + $0x158] sm:$0xff]  }
0x10f0   :  { %v3161_v29 = vmax.f32 %v2922_v14, 0.0  ;;  %v3163_v30 = vmax.f32 %v2965_v4, 0.0  ;;  %9968 = vmatprep.subr.bf16.mxu1 %v10936_v63  ;;  %9990 = vmatprep.subr.bf16.mxu0 %v10937_v50  ;;  %v10945_v28 = vld [vmem:[%s13918_s18 + $0x1d8] sm:$0xff]   ;;  %v2605_v63 = vrot.slane %v12392_v59, %v12374_v2  ;;  %v2613_v6 = vrot.slane %v12392_v59, %v12377_v5 }
0x10f1   :  { %v3162_v38 = vmax.f32 %v2924_v8, 0.0  ;;  %v3164_v24 = vmax.f32 %v2967_v21, 0.0  ;;  %v2609_v14 = vrot.slane %v12392_v59, %v12380_v12  ;;  %v10946_v45 = vld [vmem:[%s13918_s18 + $0x118] sm:$0xff]  }
0x10f2   :  { %v12426_v22 = vpack.c.bf16 %v3161_v29, %v3145_v25  ;;  %v12428_v37 = vpack.c.bf16 %v3163_v30, %v3147_v26 }
0x10f3   :  { %v3178_v53 = vpack.c.bf16 %v3162_v38, %v3146_v34  ;;  %v3180_v39 = vpack.c.bf16 %v3164_v24, %v3148_v33  ;;  %9969 = vmatpush3.bf16.msra.mxu1 %v10938_v0  ;;  %9991 = vmatpush3.bf16.msra.mxu0 %v10939_v17  ;;  %v3003_v43 = vpop.f32.mrb[80].mxu1  ;;  %v3046_v18 = vpop.f32.mrb[84].mxu0  ;;  %v10950_v24 = vld [vmem:[%s13918_s18 + $0x120] sm:$0xff]  }
0x10f4   :  { %v3004_v3 = vadd.f32 %v3003_v43, %v2589_v58  ;;  %v3047_v7 = vadd.f32 %v3046_v18, %v2597_v11  ;;  %v3005_v32 = vpop.f32.mrb[81].mxu1  ;;  %v3048_v49 = vpop.f32.mrb[85].mxu0  ;;  %9970 = vmatprep.subr.bf16.mxu1 %v10940_v31  ;;  %9992 = vmatprep.subr.bf16.mxu0 %v10941_v23 }
0x10f5   :  { %v3006_v52 = vadd.f32 %v3005_v32, %v2593_v46  ;;  %v3049_v41 = vadd.f32 %v3048_v49, %v2601_v20  ;;  %v3007_v54 = vpop.f32.mrb[82].mxu1  ;;  %v3050_v47 = vpop.f32.mrb[86].mxu0  ;;  %4334 = vmatprep.mubr.bf16.mxu1 %v3178_v53  ;;  %4375 = vmatprep.mubr.bf16.mxu0 %v3180_v39  ;;  %v10951_v53 = vld [vmem:[%s13918_s18 + $0x1a0] sm:$0xff]  }
0x10f6   :  { %v3008_v50 = vadd.f32 %v3007_v54, %v2589_v58  ;;  %v3051_v61 = vadd.f32 %v3050_v47, %v2597_v11  ;;  %v3009_v62 = vpop.f32.mrb[83].mxu1  ;;  %v3052_v1 = vpop.f32.mrb[87].mxu0  ;;  %v10947_v58 = vld [vmem:[%s13918_s18 + $0x198] sm:$0xff]   ;;  %v2617_v11 = vrot.slane %v12392_v59, %v12383_v13  ;;  %v3149_v8 = vmax.f32 %v3004_v3, 0.0  ;;  %v10953_v3 = vld [vmem:[%s13918_s18 + $0x1e8] sm:$0xff]  }
0x10f7   :  { %v3010_v4 = vadd.f32 %v3009_v62, %v2593_v46  ;;  %v3053_v9 = vadd.f32 %v3052_v1, %v2601_v20  ;;  %9971 = vmatpush3.bf16.msra.mxu1 %v10942_v16  ;;  %9993 = vmatpush3.bf16.msra.mxu0 %v10943_v56  ;;  %v3151_v21 = vmax.f32 %v3047_v7, 0.0  ;;  %v10948_v46 = vld [vmem:[%s13918_s18 + $0x160] sm:$0xff]   ;;  %v3150_v25 = vmax.f32 %v3006_v52, 0.0  ;;  %v10952_v56 = vld [vmem:[%s13918_s18 + $0x168] sm:$0xff]  }
0x10f8   :  { %v3165_v0 = vmax.f32 %v3008_v50, 0.0  ;;  %v3167_v17 = vmax.f32 %v3051_v61, 0.0  ;;  %9972 = vmatprep.subr.bf16.mxu1 %v10944_v44  ;;  %9994 = vmatprep.subr.bf16.mxu0 %v10945_v28  ;;  %v10949_v20 = vld [vmem:[%s13918_s18 + $0x1e0] sm:$0xff]   ;;  %v3152_v26 = vmax.f32 %v3049_v41, 0.0  ;;  %v10954_v61 = vld [vmem:[%s13918_s18 + $0x128] sm:$0xff]  }
0x10f9   :  { %v3166_v29 = vmax.f32 %v3010_v4, 0.0  ;;  %v3168_v30 = vmax.f32 %v3053_v9, 0.0  ;;  %v10955_v62 = vld [vmem:[%s13918_s18 + $0x1a8] sm:$0xff]  }
0x10fa   :  { %v12462_v31 = vpack.c.bf16 %v3165_v0, %v3149_v8  ;;  %v12464_v59 = vpack.c.bf16 %v3167_v17, %v3151_v21 }
0x10fb   :  { %v12466_v23 = vpack.c.bf16 %v3166_v29, %v3150_v25  ;;  %v12468_v34 = vpack.c.bf16 %v3168_v30, %v3152_v26  ;;  %9973 = vmatpush3.bf16.msra.mxu1 %v10946_v45  ;;  %9995 = vmatpush3.bf16.msra.mxu0 %v10947_v58  ;;  %v3089_v33 = vpop.f32.mrb[84].mxu1  ;;  %v3132_v38 = vpop.f32.mrb[88].mxu0  ;;  %v10959_v25 = vld [vmem:[%s13918_s18 + $0x1b0] sm:$0xff]   ;;  %v10960_v26 = vld [vmem:[%s13918_s18 + $0x178] sm:$0xff]  }
0x10fc   :  { %v3090_v39 = vadd.f32 %v3089_v33, %v2605_v63  ;;  %v3133_v43 = vadd.f32 %v3132_v38, %v2613_v6  ;;  %v3091_v18 = vpop.f32.mrb[85].mxu1  ;;  %v3134_v16 = vpop.f32.mrb[89].mxu0  ;;  %9974 = vmatprep.subr.bf16.mxu1 %v10948_v46  ;;  %9996 = vmatprep.subr.bf16.mxu0 %v10949_v20  ;;  %v10958_v20 = vld [vmem:[%s13918_s18 + $0x130] sm:$0xff]   ;;  %v10961_v29 = vld [vmem:[%s13918_s18 + $0x1f8] sm:$0xff]   ;;  %v10964_v38 = vld [vmem:[%s13918_s18 + $0x240] sm:$0xff]  }
0x10fd   :  { %v3092_v7 = vadd.f32 %v3091_v18, %v2609_v14  ;;  %v3135_v32 = vadd.f32 %v3134_v16, %v2617_v11  ;;  %v3093_v49 = vpop.f32.mrb[86].mxu1  ;;  %v3136_v44 = vpop.f32.mrb[90].mxu0  ;;  %v10962_v30 = vld [vmem:[%s13918_s18 + $0x138] sm:$0xff]   ;;  %v10969_v18 = vld [vmem:[%s13918_s18 + $0x2c8] sm:$0xff]  }
0x10fe   :  { %v3094_v28 = vadd.f32 %v3093_v49, %v2605_v63  ;;  %v3137_v52 = vadd.f32 %v3136_v44, %v2613_v6  ;;  %v3095_v41 = vpop.f32.mrb[87].mxu1  ;;  %v3138_v54 = vpop.f32.mrb[91].mxu0  ;;  %v3153_v1 = vmax.f32 %v3090_v39, 0.0  ;;  %v3155_v4 = vmax.f32 %v3133_v43, 0.0  ;;  %v10956_v63 = vld [vmem:[%s13918_s18 + $0x170] sm:$0xff]   ;;  %v10963_v33 = vld [vmem:[%s13918_s18 + $0x1b8] sm:$0xff]  }
0x10ff   :  { %v3096_v47 = vadd.f32 %v3095_v41, %v2609_v14  ;;  %v3139_v50 = vadd.f32 %v3138_v54, %v2617_v11  ;;  %9975 = vmatpush3.bf16.msra.mxu1 %v10950_v24  ;;  %9997 = vmatpush3.bf16.msra.mxu0 %v10951_v53  ;;  %v10957_v6 = vld [vmem:[%s13918_s18 + $0x1f0] sm:$0xff]   ;;  %v3154_v14 = vmax.f32 %v3092_v7, 0.0  ;;  %v3156_v58 = vmax.f32 %v3135_v32, 0.0  ;;  %v10965_v24 = vld [vmem:[%s13918_s18 + $0x2c0] sm:$0xff]   ;;  %v10968_v43 = vld [vmem:[%s13918_s18 + $0x248] sm:$0xff]  }
0x1100   :  { %v3169_v9 = vmax.f32 %v3094_v28, 0.0  ;;  %v3171_v45 = vmax.f32 %v3137_v52, 0.0  ;;  %9976 = vmatprep.subr.bf16.mxu1 %v10952_v56  ;;  %9998 = vmatprep.subr.bf16.mxu0 %v10953_v3  ;;  %v10966_v53 = vld [vmem:[%s13918_s18 + $0x200] sm:$0xff]   ;;  %v10970_v16 = vld [vmem:[%s13918_s18 + $0x208] sm:$0xff]   ;;  %v10976_v3 = vld [vmem:[%s13918_s18 + $0x258] sm:$0xff]  }
0x1101   :  { %v3170_v11 = vmax.f32 %v3096_v47, 0.0  ;;  %v3172_v8 = vmax.f32 %v3139_v50, 0.0  ;;  %v10967_v39 = vld [vmem:[%s13918_s18 + $0x280] sm:$0xff]   ;;  %v10971_v56 = vld [vmem:[%s13918_s18 + $0x288] sm:$0xff]   ;;  %v10977_v7 = vld [vmem:[%s13918_s18 + $0x2d8] sm:$0xff]  }
0x1102   :  { %v12494_v21 = vpack.c.bf16 %v3169_v9, %v3153_v1  ;;  %v12496_v0 = vpack.c.bf16 %v3171_v45, %v3155_v4  ;;  %v10978_v32 = vld [vmem:[%s13918_s18 + $0x218] sm:$0xff]   ;;  %v10980_v44 = vld [vmem:[%s13918_s18 + $0x260] sm:$0xff]   ;;  %v10984_v54 = vld [vmem:[%s13918_s18 + $0x268] sm:$0xff]  }
0x1103   :  { %v12498_v17 = vpack.c.bf16 %v3170_v11, %v3154_v14  ;;  %v12500_v46 = vpack.c.bf16 %v3172_v8, %v3156_v58  ;;  %9977 = vmatpush3.bf16.msra.mxu1 %v10954_v61  ;;  %9999 = vmatpush3.bf16.msra.mxu0 %v10955_v62  ;;  %v10979_v49 = vld [vmem:[%s13918_s18 + $0x298] sm:$0xff]   ;;  %v10981_v28 = vld [vmem:[%s13918_s18 + $0x2e0] sm:$0xff]   ;;  %v10985_v47 = vld [vmem:[%s13918_s18 + $0x2e8] sm:$0xff]  }
0x1104   :  { %9978 = vmatprep.subr.bf16.mxu1 %v10956_v63  ;;  %10000 = vmatprep.subr.bf16.mxu0 %v10957_v6  ;;  %v10982_v52 = vld [vmem:[%s13918_s18 + $0x220] sm:$0xff]   ;;  %v10986_v50 = vld [vmem:[%s13918_s18 + $0x228] sm:$0xff]   ;;  %v10988_v62 = vld [vmem:[%s13918_s18 + $0x270] sm:$0xff]  }
0x1105   :  { %v10983_v41 = vld [vmem:[%s13918_s18 + $0x2a0] sm:$0xff]   ;;  %v10987_v61 = vld [vmem:[%s13918_s18 + $0x2a8] sm:$0xff]   ;;  %v10989_v1 = vld [vmem:[%s13918_s18 + $0x2f0] sm:$0xff]  }
0x1106   :  { %v10990_v4 = vld [vmem:[%s13918_s18 + $0x230] sm:$0xff]   ;;  %v10992_v45 = vld [vmem:[%s13918_s18 + $0x278] sm:$0xff]   ;;  %v10996_v58 = vld [vmem:[%s13918_s18 + $0x340] sm:$0xff]  }
0x1107   :  { %9979 = vmatpush3.bf16.msra.mxu1 %v10958_v20  ;;  %10001 = vmatpush3.bf16.msra.mxu0 %v10959_v25  ;;  %v10991_v9 = vld [vmem:[%s13918_s18 + $0x2b0] sm:$0xff]   ;;  %v10993_v63 = vld [vmem:[%s13918_s18 + $0x2f8] sm:$0xff]   ;;  %v10997_v11 = vld [vmem:[%s13918_s18 + $0x3c0] sm:$0xff]  }
0x1108   :  { %9980 = vmatprep.subr.bf16.mxu1 %v10960_v26  ;;  %10002 = vmatprep.subr.bf16.mxu0 %v10961_v29  ;;  %v10994_v6 = vld [vmem:[%s13918_s18 + $0x238] sm:$0xff]   ;;  %v10998_v8 = vld [vmem:[%s13918_s18 + $0x300] sm:$0xff]   ;;  %v11000_v25 = vld [vmem:[%s13918_s18 + $0x348] sm:$0xff]  }
0x1109   :  { %v10995_v14 = vld [vmem:[%s13918_s18 + $0x2b8] sm:$0xff]   ;;  %v10999_v20 = vld [vmem:[%s13918_s18 + $0x380] sm:$0xff]   ;;  %v11001_v26 = vld [vmem:[%s13918_s18 + $0x3c8] sm:$0xff]  }
0x110a   :  { %v11002_v29 = vld [vmem:[%s13918_s18 + $0x308] sm:$0xff]  }
0x110b   :  { %9981 = vmatpush3.bf16.msra.mxu1 %v10962_v30  ;;  %10003 = vmatpush3.bf16.msra.mxu0 %v10963_v33  ;;  %v11003_v30 = vld [vmem:[%s13918_s18 + $0x388] sm:$0xff]   ;;  %v11007_v33 = vld [vmem:[%s13918_s18 + $0x390] sm:$0xff]  }
0x110c   :  { %10010 = vmatprep.subr.bf16.mxu1 %v10964_v38  ;;  %10032 = vmatprep.subr.bf16.mxu0 %v10965_v24  ;;  %v11009_v38 = vld [vmem:[%s13918_s18 + $0x3d8] sm:$0xff]  }
0x110d   :  { %v11010_v24 = vld [vmem:[%s13918_s18 + $0x318] sm:$0xff]  }
0x110e   :  { %4335 = vmatmul.mubr.bf16.vlgmr.msra.gmra.mrb[92].mxu1 %v12426_v22  ;;  %4376 = vmatmul.mubr.bf16.vlgmr.msra.gmra.mrb[96].mxu0 %v12428_v37  ;;  %v10972_v22 = vld [vmem:[%s13918_s18 + $0x250] sm:$0xff]  }
0x110f   :  { %10011 = vmatpush3.bf16.msra.mxu1 %v10966_v53  ;;  %4416 = vmatprep.mubr.bf16.mxu1 %v12466_v23  ;;  %v10973_v37 = vld [vmem:[%s13918_s18 + $0x2d0] sm:$0xff]   ;;  %v11011_v53 = vld [vmem:[%s13918_s18 + $0x398] sm:$0xff]  }
0x1110   :  { %10033 = vmatpush3.bf16.msra.mxu0 %v10967_v39  ;;  %4457 = vmatprep.mubr.bf16.mxu0 %v12468_v34  ;;  %v10974_v23 = vld [vmem:[%s13918_s18 + $0x210] sm:$0xff]   ;;  %v11012_v39 = vld [vmem:[%s13918_s18 + $0x360] sm:$0xff]  }
0x1111   :  { %10012 = vmatprep.subr.bf16.mxu1 %v10968_v43  ;;  %10034 = vmatprep.subr.bf16.mxu0 %v10969_v18  ;;  %v10975_v34 = vld [vmem:[%s13918_s18 + $0x290] sm:$0xff]   ;;  %v11013_v43 = vld [vmem:[%s13918_s18 + $0x3e0] sm:$0xff]  }
0x1112   :  { %v11014_v18 = vld [vmem:[%s13918_s18 + $0x320] sm:$0xff]  }
0x1113   :  { %10013 = vmatpush3.bf16.msra.mxu1 %v10970_v16  ;;  %v11015_v16 = vld [vmem:[%s13918_s18 + $0x3a0] sm:$0xff]  }
0x1114   :  { %10035 = vmatpush3.bf16.msra.mxu0 %v10971_v56  ;;  %10014 = vmatprep.subr.bf16.mxu1 %v10972_v22  ;;  %v11016_v56 = vld [vmem:[%s13918_s18 + $0x368] sm:$0xff]  }
0x1115   :  { %10036 = vmatprep.subr.bf16.mxu0 %v10973_v37  ;;  %v11017_v22 = vld [vmem:[%s13918_s18 + $0x3e8] sm:$0xff]  }
0x1116   :  { %v11018_v37 = vld [vmem:[%s13918_s18 + $0x328] sm:$0xff]  }
0x1117   :  { %10015 = vmatpush3.bf16.msra.mxu1 %v10974_v23  ;;  %v11019_v23 = vld [vmem:[%s13918_s18 + $0x3a8] sm:$0xff]  }
0x1118   :  { %10037 = vmatpush3.bf16.msra.mxu0 %v10975_v34  ;;  %10016 = vmatprep.subr.bf16.mxu1 %v10976_v3  ;;  %v11020_v34 = vld [vmem:[%s13918_s18 + $0x370] sm:$0xff]  }
0x1119   :  { %10038 = vmatprep.subr.bf16.mxu0 %v10977_v7  ;;  %v11021_v3 = vld [vmem:[%s13918_s18 + $0x3f0] sm:$0xff]  }
0x111a   :  { %v11022_v7 = vld [vmem:[%s13918_s18 + $0x330] sm:$0xff]  }
0x111b   :  { %10017 = vmatpush3.bf16.msra.mxu1 %v10978_v32  ;;  %v11023_v32 = vld [vmem:[%s13918_s18 + $0x3b0] sm:$0xff]  }
0x111c   :  { %10039 = vmatpush3.bf16.msra.mxu0 %v10979_v49  ;;  %10018 = vmatprep.subr.bf16.mxu1 %v10980_v44  ;;  %v11024_v49 = vld [vmem:[%s13918_s18 + $0x378] sm:$0xff]  }
0x111d   :  { %10040 = vmatprep.subr.bf16.mxu0 %v10981_v28  ;;  %v11025_v44 = vld [vmem:[%s13918_s18 + $0x3f8] sm:$0xff]  }
0x111e   :  { %v11026_v28 = vld [vmem:[%s13918_s18 + $0x338] sm:$0xff]  }
0x111f   :  { %10019 = vmatpush3.bf16.msra.mxu1 %v10982_v52  ;;  %v11027_v52 = vld [vmem:[%s13918_s18 + $0x3b8] sm:$0xff]  }
0x1120   :  { %10041 = vmatpush3.bf16.msra.mxu0 %v10983_v41  ;;  %10020 = vmatprep.subr.bf16.mxu1 %v10984_v54 }
0x1121   :  { %10042 = vmatprep.subr.bf16.mxu0 %v10985_v47  ;;  %v9169_v47 = vld [vmem:[%s13919_s19] ss:$0 sm:$0xff] }
0x1123   :  { %10021 = vmatpush3.bf16.msra.mxu1 %v10986_v50 }
0x1124   :  { %10043 = vmatpush3.bf16.msra.mxu0 %v10987_v61  ;;  %10022 = vmatprep.subr.bf16.mxu1 %v10988_v62 }
0x1125   :  { %10044 = vmatprep.subr.bf16.mxu0 %v10989_v1 }
0x1127   :  { %10023 = vmatpush3.bf16.msra.mxu1 %v10990_v4 }
0x1128   :  { %10045 = vmatpush3.bf16.msra.mxu0 %v10991_v9  ;;  %10024 = vmatprep.subr.bf16.mxu1 %v10992_v45 }
0x1129   :  { %10046 = vmatprep.subr.bf16.mxu0 %v10993_v63 }
0x112b   :  { %10025 = vmatpush3.bf16.msra.mxu1 %v10994_v6 }
0x112c   :  { %10047 = vmatpush3.bf16.msra.mxu0 %v10995_v14  ;;  %10054 = vmatprep.subr.bf16.mxu1 %v10996_v58 }
0x112d   :  { %10076 = vmatprep.subr.bf16.mxu0 %v10997_v11 }
0x112e   :  { %4417 = vmatmul.mubr.bf16.vlgmr.msra.gmra.mrb[96].mxu1 %v12462_v31  ;;  %v11004_v31 = vld [vmem:[%s13918_s18 + $0x350] sm:$0xff]  }
0x112f   :  { %4458 = vmatmul.mubr.bf16.vlgmr.msra.gmra.mrb[100].mxu0 %v12464_v59  ;;  %10055 = vmatpush3.bf16.msra.mxu1 %v10998_v8  ;;  %v11005_v59 = vld [vmem:[%s13918_s18 + $0x3d0] sm:$0xff]  }
0x1130   :  { %4498 = vmatprep.mubr.bf16.mxu1 %v12498_v17  ;;  %10077 = vmatpush3.bf16.msra.mxu0 %v10999_v20  ;;  %v11006_v17 = vld [vmem:[%s13918_s18 + $0x310] sm:$0xff]  }
0x1131   :  { %4539 = vmatprep.mubr.bf16.mxu0 %v12500_v46  ;;  %10056 = vmatprep.subr.bf16.mxu1 %v11000_v25  ;;  %v11008_v46 = vld [vmem:[%s13918_s18 + $0x358] sm:$0xff]  }
0x1132   :  { %10078 = vmatprep.subr.bf16.mxu0 %v11001_v26 }
0x1133   :  { %10057 = vmatpush3.bf16.msra.mxu1 %v11002_v29 }
0x1134   :  { %10079 = vmatpush3.bf16.msra.mxu0 %v11003_v30  ;;  %10058 = vmatprep.subr.bf16.mxu1 %v11004_v31 }
0x1135   :  { %10080 = vmatprep.subr.bf16.mxu0 %v11005_v59 }
0x1137   :  { %10059 = vmatpush3.bf16.msra.mxu1 %v11006_v17 }
0x1138   :  { %10081 = vmatpush3.bf16.msra.mxu0 %v11007_v33  ;;  %10060 = vmatprep.subr.bf16.mxu1 %v11008_v46 }
0x1139   :  { %10082 = vmatprep.subr.bf16.mxu0 %v11009_v38 }
0x113b   :  { %10061 = vmatpush3.bf16.msra.mxu1 %v11010_v24 }
0x113c   :  { %10083 = vmatpush3.bf16.msra.mxu0 %v11011_v53  ;;  %10062 = vmatprep.subr.bf16.mxu1 %v11012_v39 }
0x113d   :  { %10084 = vmatprep.subr.bf16.mxu0 %v11013_v43 }
0x113f   :  { %10063 = vmatpush3.bf16.msra.mxu1 %v11014_v18 }
0x1140   :  { %10085 = vmatpush3.bf16.msra.mxu0 %v11015_v16  ;;  %10064 = vmatprep.subr.bf16.mxu1 %v11016_v56 }
0x1141   :  { %10086 = vmatprep.subr.bf16.mxu0 %v11017_v22 }
0x1143   :  { %10065 = vmatpush3.bf16.msra.mxu1 %v11018_v37 }
0x1144   :  { %10087 = vmatpush3.bf16.msra.mxu0 %v11019_v23  ;;  %10066 = vmatprep.subr.bf16.mxu1 %v11020_v34 }
0x1145   :  { %10088 = vmatprep.subr.bf16.mxu0 %v11021_v3 }
0x1147   :  { %10067 = vmatpush3.bf16.msra.mxu1 %v11022_v7 }
0x1148   :  { %10089 = vmatpush3.bf16.msra.mxu0 %v11023_v32  ;;  %10068 = vmatprep.subr.bf16.mxu1 %v11024_v49 }
0x1149   :  { %10090 = vmatprep.subr.bf16.mxu0 %v11025_v44 }
0x114b   :  { %10069 = vmatpush3.bf16.msra.mxu1 %v11026_v28 }
0x114c   :  { %10091 = vmatpush3.bf16.msra.mxu0 %v11027_v52  ;;  %10585 = vmatprep.subr.bf16.mxu1 %v11380_v15 }
0x114d   :  { %10593 = vmatprep.subr.bf16.mxu0 %v11380_v15 }
0x114e   :  { %4499 = vmatmul.mubr.bf16.vlgmr.msra.gmra.mrb[100].mxu1 %v12494_v21 }
0x114f   :  { %4540 = vmatmul.mubr.bf16.vlgmr.msra.gmra.mrb[104].mxu0 %v12496_v0  ;;  %10589 = vmatprep.mubr.msk.bf16.mxu1 %vm11381_vm1, %v11380_v15 }
0x1150   :  { %10595 = vmatprep.mubr.msk.bf16.mxu0 %vm11381_vm1, %v11380_v15 }
0x11c1   :  { %v9938_v41 = vpop.f32.mrb[88].mxu1  ;;  %v9960_v54 = vpop.f32.mrb[92].mxu0 }
0x11c2   :  { %v9939_v50 = vpop.f32.mrb[89].mxu1  ;;  %v9961_v61 = vpop.f32.mrb[93].mxu0 }
0x11c3   :  { %v9940_v62 = vadd.f32 %v9939_v50, %v9938_v41  ;;  %v9962_v1 = vadd.f32 %v9961_v61, %v9960_v54  ;;  %v9941_v4 = vpop.f32.mrb[90].mxu1  ;;  %v9963_v21 = vpop.f32.mrb[94].mxu0 }
0x11c4   :  { %v9942_v9 = vpop.f32.mrb[91].mxu1  ;;  %v9964_v0 = vpop.f32.mrb[95].mxu0 }
0x11c5   :  { %v4255_v45 = vadd.f32 %v9940_v62, %v9169_v47  ;;  %v9943_v63 = vadd.f32 %v9942_v9, %v9941_v4  ;;  %v9965_v6 = vadd.f32 %v9964_v0, %v9963_v21 }
0x11c7   :  { %v4296_v14 = vadd.f32 %v9962_v1, %v4255_v45  ;;  %v4258_v58 = vadd.f32 %v9943_v63, %v9169_v47 }
0x11c9   :  { %v4299_v11 = vadd.f32 %v9965_v6, %v4258_v58 }
0x11e1   :  { %v9982_v8 = vpop.f32.mrb[92].mxu1  ;;  %v10004_v20 = vpop.f32.mrb[96].mxu0 }
0x11e2   :  { %v9983_v25 = vpop.f32.mrb[93].mxu1  ;;  %v10005_v26 = vpop.f32.mrb[97].mxu0 }
0x11e3   :  { %v9984_v29 = vadd.f32 %v9983_v25, %v9982_v8  ;;  %v10006_v30 = vadd.f32 %v10005_v26, %v10004_v20  ;;  %v9985_v31 = vpop.f32.mrb[94].mxu1  ;;  %v10007_v59 = vpop.f32.mrb[98].mxu0 }
0x11e4   :  { %v9986_v17 = vpop.f32.mrb[95].mxu1  ;;  %v10008_v33 = vpop.f32.mrb[99].mxu0 }
0x11e5   :  { %v4337_v46 = vadd.f32 %v9984_v29, %v4296_v14  ;;  %v9987_v38 = vadd.f32 %v9986_v17, %v9985_v31  ;;  %v10009_v24 = vadd.f32 %v10008_v33, %v10007_v59 }
0x11e7   :  { %v4378_v53 = vadd.f32 %v10006_v30, %v4337_v46  ;;  %v4340_v39 = vadd.f32 %v9987_v38, %v4299_v11 }
0x11e9   :  { %v4381_v43 = vadd.f32 %v10009_v24, %v4340_v39  ;;  %v11029_v39 = vld [vmem:[%s13960_s1 + $0x18] sm:$0xff]  }
0x1201   :  { %v10026_v18 = vpop.f32.mrb[96].mxu1 }
0x1202   :  { %v10048_v16 = vpop.f32.mrb[100].mxu0  ;;  %v10027_v56 = vpop.f32.mrb[97].mxu1 }
0x1203   :  { %v10028_v22 = vadd.f32 %v10027_v56, %v10026_v18  ;;  %v10049_v37 = vpop.f32.mrb[101].mxu0  ;;  %v10029_v23 = vpop.f32.mrb[98].mxu1 }
0x1204   :  { %v10050_v34 = vadd.f32 %v10049_v37, %v10048_v16  ;;  %v10051_v3 = vpop.f32.mrb[102].mxu0  ;;  %v10030_v7 = vpop.f32.mrb[99].mxu1 }
0x1205   :  { %v4419_v32 = vadd.f32 %v10028_v22, %v4378_v53  ;;  %v10031_v49 = vadd.f32 %v10030_v7, %v10029_v23  ;;  %v10052_v44 = vpop.f32.mrb[103].mxu0  ;;  %v11028_v53 = vld [vmem:[%s13960_s1 + $0x10] sm:$0xff]  }
0x1206   :  { %v10053_v28 = vadd.f32 %v10052_v44, %v10051_v3  ;;  %10586 = vmatpush3.bf16.msra.mxu1 %v11028_v53 }
0x1207   :  { %v4460_v52 = vadd.f32 %v10050_v34, %v4419_v32  ;;  %v4422_v41 = vadd.f32 %v10031_v49, %v4381_v43  ;;  %10587 = vmatprep.subr.bf16.mxu1 %v11380_v15 }
0x1209   :  { %v4463_v54 = vadd.f32 %v10053_v28, %v4422_v41 }
0x120a   :  { %10588 = vmatpush3.bf16.msra.mxu1 %v11029_v39 }
0x120b   :  { %10599 = vmatprep.subr.bf16.mxu1 %v11380_v15 }
0x1221   :  { %v10070_v47 = vpop.f32.mrb[100].mxu1 }
0x1222   :  { %v10092_v50 = vpop.f32.mrb[104].mxu0  ;;  %v10071_v61 = vpop.f32.mrb[101].mxu1 }
0x1223   :  { %v10072_v62 = vadd.f32 %v10071_v61, %v10070_v47  ;;  %v10093_v1 = vpop.f32.mrb[105].mxu0  ;;  %v10073_v4 = vpop.f32.mrb[102].mxu1  ;;  %v12763_v61 = vld [vmem:[%s13962_s3 + $0x4] sm:$0x7] }
0x1224   :  { %v10094_v21 = vadd.f32 %v10093_v1, %v10092_v50  ;;  %v10095_v9 = vpop.f32.mrb[106].mxu0  ;;  %v10074_v0 = vpop.f32.mrb[103].mxu1 }
0x1225   :  { %v4501_v45 = vadd.f32 %v10072_v62, %v4460_v52  ;;  %v10075_v63 = vadd.f32 %v10074_v0, %v10073_v4  ;;  %v10096_v6 = vpop.f32.mrb[107].mxu0 }
0x1226   :  { %v10097_v14 = vadd.f32 %v10096_v6, %v10095_v9  ;;  %v4603_v9 = vrot.slane %v12763_v61, %v11535_v35 }
0x1227   :  { %v4542_v58 = vadd.f32 %v10094_v21, %v4501_v45  ;;  %v4504_v11 = vadd.f32 %v10075_v63, %v4463_v54  ;;  %v12756_v54 = vld [vmem:[%s13961_s26 + $0x4] sm:$0x7] }
0x1228   :  { %v4597_v50 = vrot.slane %v12756_v54, %v11535_v35 }
0x1229   :  { %v12732_v8 = vadd.f32 %v4542_v58, %v12105_v40  ;;  %v4545_v20 = vadd.f32 %v10097_v14, %v4504_v11  ;;  %v9305_v14 = vld [vmem:[%s13907_s7 + $0x1] ss:$0 sm:$0xff]  ;;  %s13973_s7 = smov 64  }
0x122b   :  { %v12735_v25 = vadd.f32 %v4545_v20, %v12108_v10  ;;  %v4554_v26 = vsel %vm100_vm0, %v12732_v8, 0.0 }
0x122c   :  { %4555 = vadd.xlane.f32.xlu0 %v4554_v26 }
0x122d   :  { %v4557_v29 = vsel %vm100_vm0, %v12735_v25, 0.0 }
0x122e   :  { %4558 = vadd.xlane.f32.xlu1 %v4557_v29 }
0x12b9   :  { %v4556_v30 = vpop.xlane.xlu0 %4555 }
0x12ba   :  { %v4560_v31 = vmul.f32 0.03125, %v4556_v30 }
0x12bb   :  { %v4559_v59 = vpop.xlane.xlu1 %4558 }
0x12bc   :  { %v4562_v17 = vsub.f32 %v12732_v8, %v4560_v31  ;;  %v4561_v33 = vmul.f32 0.03125, %v4559_v59 }
0x12be   :  { %v4563_v40 = vsub.f32 %v12735_v25, %v4561_v33  ;;  %v4564_v46 = vmul.f32 %v4562_v17, %v4562_v17 }
0x12c0   :  { %v4566_v10 = vsel %vm100_vm0, %v4564_v46, 0.0  ;;  %v4565_v38 = vmul.f32 %v4563_v40, %v4563_v40 }
0x12c1   :  { %4567 = vadd.xlane.f32.xlu0 %v4566_v10 }
0x12c2   :  { %v4569_v24 = vsel %vm100_vm0, %v4565_v38, 0.0 }
0x12c3   :  { %4570 = vadd.xlane.f32.xlu1 %v4569_v24 }
0x134e   :  { %v4568_v43 = vpop.xlane.xlu0 %4567 }
0x134f   :  { %v4572_v18 = vmul.f32 0.032258064, %v4568_v43 }
0x1350   :  { %v4571_v16 = vpop.xlane.xlu1 %4570 }
0x1351   :  { %11254 = vrsqrt.f32 %v4572_v18  ;;  %v4573_v56 = vmul.f32 0.032258064, %v4571_v16  ;;  %vm4576_vm12 = vcmp.eq.f32.partialorder %v4572_v18, inf  ;;  %v4579_v23 = vand.u32 2147483648, %v4572_v18 }
0x1352   :  { %vm4578_vm13 = vcmp.eq.f32.partialorder %v4572_v18, 0.0 }
0x1353   :  { %11256 = vrsqrt.f32 %v4573_v56  ;;  %vm4583_vm14 = vcmp.eq.f32.partialorder %v4573_v56, inf  ;;  %v4586_v44 = vand.u32 2147483648, %v4573_v56  ;;  %vm4585_vm15 = vcmp.eq.f32.partialorder %v4573_v56, 0.0 }
0x135b   :  { %v11255_v22 = vpop.eup %11254 }
0x135c   :  { %v4575_v37 = vmul.f32 %v11255_v22, %v4572_v18 }
0x135d   :  { %v11257_v34 = vpop.eup %11256 }
0x135e   :  { %v4577_v3 = vsel %vm4576_vm12, %v4572_v18, %v4575_v37  ;;  %v4582_v32 = vmul.f32 %v11257_v34, %v4573_v56 }
0x135f   :  { %v4580_v7 = vsel %vm4578_vm13, %v4579_v23, %v4577_v3 }
0x1360   :  { %v4588_v49 = vadd.f32 1e-06, %v4580_v7  ;;  %v4584_v28 = vsel %vm4583_vm14, %v4573_v56, %v4582_v32 }
0x1361   :  { %v4587_v52 = vsel %vm4585_vm15, %v4586_v44, %v4584_v28 }
0x1362   :  { %11258 = vrcp.f32 %v4588_v49  ;;  %v4589_v41 = vadd.f32 1e-06, %v4587_v52 }
0x1364   :  { %11260 = vrcp.f32 %v4589_v41 }
0x136c   :  { %v11259_v47 = vpop.eup %11258 }
0x136d   :  { %v4592_v62 = vmul.f32 %v11259_v47, %v4562_v17 }
0x136e   :  { %v11261_v1 = vpop.eup %11260 }
0x136f   :  { %v4593_v4 = vmul.f32 %v11261_v1, %v4563_v40  ;;  %v4598_v21 = vmul.f32 %v4597_v50, %v4592_v62 }
0x1371   :  { %v4599_v0 = vmul.f32 %v4597_v50, %v4593_v4  ;;  %v4604_v45 = vadd.f32 %v4603_v9, %v4598_v21 }
0x1373   :  { %v4605_v63 = vadd.f32 %v4603_v9, %v4599_v0 }
0x1375   :  { %v4606_v6 = vpack.c.bf16 %v4605_v63, %v4604_v45 }
0x1377   :  { %10590 = vmatmul.mubr.msk.bf16.vlgmr.msra.gmra.mrb[104].mxu1 %vm100_vm0, %v4606_v6 }
0x1378   :  { %10601 = vmatprep.mubr.msk.bf16.mxu1 %vm11381_vm1, %v11380_v15 }
0x144a   :  { %v4669_v58 = vpop.f32.mrb[104].mxu1 }
0x144b   :  { %v4670_v11 = vadd.f32 %v9305_v14, %v4669_v58  ;;  %v10591_v20 = vpop.f32.mrb[105].mxu1 }
0x144c   :  { %v4672_v26 = vpop.f32.mrb[106].mxu1 }
0x144d   :  { %4684 = vrot.lane.b32.xlu1 %v4670_v11, %s13965_s5  ;;  %4678 = vrot.lane.b32.xlu0 %v4670_v11, %s13972_s20  ;;  %v10592_v29 = vpop.f32.mrb[107].mxu1  ;;  %v4673_v30 = vadd.f32 %v9305_v14, %v4672_v26  ;;  %v12777_v31 = vpack.c.bf16 %v4670_v11, %v4670_v11 }
0x144f   :  { %v12793_v24 = vpack.c.bf16 %v4673_v30, %v4673_v30 }
0x1451   :  { %4690 = vrot.lane.b32.xlu1 %v4670_v11, %s13966_s30  ;;  %4686 = vrot.lane.b32.xlu0 %v4673_v30, %s13965_s5 }
0x1455   :  { %4712 = vrot.lane.b32.xlu0 %v12777_v31, %s13967_s28  ;;  %4680 = vrot.lane.b32.xlu1 %v4673_v30, %s13972_s20 }
0x1459   :  { %4692 = vrot.lane.b32.xlu1 %v4673_v30, %s13966_s30 }
0x14bf   :  { %v4685_v59 = vpop.permute.xlu1 %4684  ;;  %v4679_v17 = vpop.permute.xlu0 %4678 }
0x14c0   :  { %v12783_v33 = vpack.c.bf16 %v4685_v59, %v4685_v59  ;;  %v12785_v40 = vpack.c.bf16 %v4679_v17, %v4679_v17 }
0x14c2   :  { %4810 = vrot.lane.b32.xlu0 %v12783_v33, %s13967_s28  ;;  %4761 = vrot.lane.b32.xlu1 %v12785_v40, %s13967_s28 }
0x14c3   :  { %v4691_v46 = vpop.permute.xlu1 %4690  ;;  %v4687_v10 = vpop.permute.xlu0 %4686 }
0x14c4   :  { %v12791_v38 = vpack.c.bf16 %v4691_v46, %v4691_v46  ;;  %v12799_v43 = vpack.c.bf16 %v4687_v10, %v4687_v10 }
0x14c6   :  { %4859 = vrot.lane.b32.xlu1 %v12791_v38, %s13967_s28  ;;  %4908 = vrot.lane.b32.xlu0 %v12793_v24, %s13967_s28 }
0x14c7   :  { %v4713_v53 = vpop.permute.xlu0 %4712  ;;  %v4681_v39 = vpop.permute.xlu1 %4680 }
0x14c8   :  { %v4718_v18 = vsel %vm258_vm6, %v4713_v53, 0  ;;  %v12802_v16 = vpack.c.bf16 %v4681_v39, %v4681_v39 }
0x14c9   :  { %10594 = vmatpush3.bf16.xpose.msra.mxu0 %v4718_v18 }
0x14ca   :  { %4957 = vrot.lane.b32.xlu1 %v12802_v16, %s13967_s28  ;;  %5006 = vrot.lane.b32.xlu0 %v12799_v43, %s13967_s28 }
0x14cb   :  { %v4693_v56 = vpop.permute.xlu1 %4692  ;;  %10605 = vmatprep.subr.bf16.mxu0 %v11380_v15 }
0x14cc   :  { %v12809_v22 = vpack.c.bf16 %v4693_v56, %v4693_v56 }
0x14ce   :  { %5055 = vrot.lane.b32.xlu1 %v12809_v22, %s13967_s28 }
0x14d0   :  { %10596 = vmatmul.mubr.msk.bf16.vlgmr.msra.gmra.mrb[108].mxu0 %vm258_vm6, %v12777_v31 }
0x14d1   :  { %10607 = vmatprep.mubr.msk.bf16.mxu0 %vm11381_vm1, %v11380_v15 }
0x1534   :  { %v4811_v37 = vpop.permute.xlu0 %4810  ;;  %v4762_v23 = vpop.permute.xlu1 %4761 }
0x1535   :  { %v4816_v34 = vsel %vm258_vm6, %v4811_v37, 0  ;;  %v4767_v3 = vsel %vm258_vm6, %v4762_v23, 0 }
0x1536   :  { %10600 = vmatpush3.bf16.xpose.msra.mxu1 %v4767_v3  ;;  %10606 = vmatpush3.bf16.xpose.msra.mxu0 %v4816_v34 }
0x1537   :  { %10611 = vmatprep.subr.bf16.mxu1 %v11380_v15  ;;  %10617 = vmatprep.subr.bf16.mxu0 %v11380_v15 }
0x1538   :  { %v4860_v7 = vpop.permute.xlu1 %4859  ;;  %v4909_v32 = vpop.permute.xlu0 %4908 }
0x1539   :  { %v4865_v49 = vsel %vm258_vm6, %v4860_v7, 0  ;;  %v4914_v44 = vsel %vm258_vm6, %v4909_v32, 0 }
0x153c   :  { %v4958_v28 = vpop.permute.xlu1 %4957  ;;  %v5007_v52 = vpop.permute.xlu0 %5006 }
0x153d   :  { %10602 = vmatmul.mubr.msk.bf16.vlgmr.msra.gmra.mrb[108].mxu1 %vm258_vm6, %v12785_v40  ;;  %10608 = vmatmul.mubr.msk.bf16.vlgmr.msra.gmra.mrb[112].mxu0 %vm258_vm6, %v12783_v33  ;;  %v4963_v41 = vsel %vm258_vm6, %v4958_v28, 0  ;;  %v5012_v47 = vsel %vm258_vm6, %v5007_v52, 0 }
0x153e   :  { %10612 = vmatpush3.bf16.xpose.msra.mxu1 %v4865_v49  ;;  %10618 = vmatpush3.bf16.xpose.msra.mxu0 %v4914_v44 }
0x153f   :  { %10613 = vmatprep.mubr.msk.bf16.mxu1 %vm11381_vm1, %v11380_v15  ;;  %10619 = vmatprep.mubr.msk.bf16.mxu0 %vm11381_vm1, %v11380_v15 }
0x1540   :  { %10623 = vmatprep.subr.bf16.mxu1 %v11380_v15  ;;  %10629 = vmatprep.subr.bf16.mxu0 %v11380_v15  ;;  %v5056_v50 = vpop.permute.xlu1 %5055 }
0x1541   :  { %v5061_v62 = vsel %vm258_vm6, %v5056_v50, 0 }
0x1545   :  { %10614 = vmatmul.mubr.msk.bf16.vlgmr.msra.gmra.mrb[112].mxu1 %vm258_vm6, %v12791_v38  ;;  %10620 = vmatmul.mubr.msk.bf16.vlgmr.msra.gmra.mrb[116].mxu0 %vm258_vm6, %v12793_v24 }
0x1546   :  { %10624 = vmatpush3.bf16.xpose.msra.mxu1 %v4963_v41  ;;  %10630 = vmatpush3.bf16.xpose.msra.mxu0 %v5012_v47 }
0x1547   :  { %10625 = vmatprep.mubr.msk.bf16.mxu1 %vm11381_vm1, %v11380_v15  ;;  %10631 = vmatprep.mubr.msk.bf16.mxu0 %vm11381_vm1, %v11380_v15 }
0x1548   :  { %10635 = vmatprep.subr.bf16.mxu1 %v11380_v15  ;;  %10641 = vmatprep.subr.bf16.mxu0 %v11380_v15 }
0x154d   :  { %10626 = vmatmul.mubr.msk.bf16.vlgmr.msra.gmra.mrb[116].mxu1 %vm258_vm6, %v12802_v16  ;;  %10632 = vmatmul.mubr.msk.bf16.vlgmr.msra.gmra.mrb[120].mxu0 %vm258_vm6, %v12799_v43 }
0x154e   :  { %10636 = vmatpush3.bf16.xpose.msra.mxu1 %v5061_v62  ;;  %10637 = vmatprep.mubr.msk.bf16.mxu1 %vm11381_vm1, %v11380_v15 }
0x154f   :  { %10647 = vmatprep.subr.bf16.mxu1 %v11380_v15  ;;  %10643 = vmatprep.mubr.msk.bf16.mxu0 %vm11381_vm1, %v11380_v15 }
0x1555   :  { %10638 = vmatmul.mubr.msk.bf16.vlgmr.msra.gmra.mrb[120].mxu1 %vm258_vm6, %v12809_v22 }
0x1556   :  { %10649 = vmatprep.mubr.msk.bf16.mxu1 %vm11381_vm1, %v11380_v15 }
0x15a3   :  { %v4754_v1 = vpop.f32.mrb[108].mxu0 }
0x15a4   :  { %v5103_v4 = vmul.f32 0.35355338, %v4754_v1  ;;  %v10597_v21 = vpop.f32.mrb[109].mxu0 }
0x15a5   :  { %v4757_v9 = vpop.f32.mrb[110].mxu0 }
0x15a6   :  { %v5111_v0 = vadd.f32 %v5103_v4, %v11647_v27  ;;  %v10598_v45 = vpop.f32.mrb[111].mxu0 }
0x15a8   :  { %v5119_v63 = vsel %vm258_vm6, %v5111_v0, -inf }
0x15a9   :  { %5120 = vmax.xlane.f32.xlu0 %v5119_v63 }
0x1610   :  { %v4803_v6 = vpop.f32.mrb[108].mxu1  ;;  %v4852_v14 = vpop.f32.mrb[112].mxu0 }
0x1611   :  { %v5104_v58 = vmul.f32 0.35355338, %v4803_v6  ;;  %v5105_v11 = vmul.f32 0.35355338, %v4852_v14  ;;  %v10603_v20 = vpop.f32.mrb[109].mxu1  ;;  %v10609_v26 = vpop.f32.mrb[113].mxu0 }
0x1612   :  { %v4806_v29 = vpop.f32.mrb[110].mxu1  ;;  %v4855_v30 = vpop.f32.mrb[114].mxu0 }
0x1613   :  { %v12862_v59 = vadd.f32 %v5104_v58, %v11647_v27  ;;  %v5113_v17 = vadd.f32 %v5105_v11, %v11647_v27  ;;  %v10604_v46 = vpop.f32.mrb[111].mxu1  ;;  %v10610_v10 = vpop.f32.mrb[115].mxu0 }
0x1615   :  { %v5125_v53 = vsel %vm258_vm6, %v5113_v17, -inf  ;;  %v5122_v39 = vsel %vm258_vm6, %v12862_v59, -inf }
0x1616   :  { %5126 = vmax.xlane.f32.xlu0 %v5125_v53  ;;  %5123 = vmax.xlane.f32.xlu1 %v5122_v39 }
0x1618   :  { %v4901_v18 = vpop.f32.mrb[112].mxu1  ;;  %v4950_v56 = vpop.f32.mrb[116].mxu0 }
0x1619   :  { %v5106_v37 = vmul.f32 0.35355338, %v4901_v18  ;;  %v5107_v23 = vmul.f32 0.35355338, %v4950_v56  ;;  %v10615_v34 = vpop.f32.mrb[113].mxu1  ;;  %v10621_v3 = vpop.f32.mrb[117].mxu0 }
0x161a   :  { %v4904_v7 = vpop.f32.mrb[114].mxu1  ;;  %v4953_v32 = vpop.f32.mrb[118].mxu0 }
0x161b   :  { %v12869_v49 = vadd.f32 %v5106_v37, %v11647_v27  ;;  %v10616_v44 = vpop.f32.mrb[115].mxu1  ;;  %v10622_v28 = vpop.f32.mrb[119].mxu0  ;;  %v12872_v52 = vadd.f32 %v5107_v23, %v11665_v57 }
0x161d   :  { %v5128_v41 = vsel %vm258_vm6, %v12869_v49, -inf  ;;  %v5131_v62 = vsel %vm258_vm6, %v12872_v52, -inf }
0x161e   :  { %5129 = vmax.xlane.f32.xlu0 %v5128_v41 }
0x1620   :  { %v4999_v47 = vpop.f32.mrb[116].mxu1  ;;  %v5048_v50 = vpop.f32.mrb[120].mxu0 }
0x1621   :  { %v5108_v1 = vmul.f32 0.35355338, %v4999_v47  ;;  %v5109_v4 = vmul.f32 0.35355338, %v5048_v50  ;;  %v10627_v21 = vpop.f32.mrb[117].mxu1  ;;  %v10633_v9 = vpop.f32.mrb[121].mxu0 }
0x1622   :  { %v5051_v27 = vpop.f32.mrb[122].mxu0  ;;  %5132 = vmax.xlane.f32.xlu0 %v5131_v62  ;;  %v5002_v45 = vpop.f32.mrb[118].mxu1 }
0x1623   :  { %v12879_v63 = vadd.f32 %v5108_v1, %v11665_v57  ;;  %v5117_v6 = vadd.f32 %v5109_v4, %v11665_v57  ;;  %v10628_v14 = vpop.f32.mrb[119].mxu1  ;;  %v10634_v58 = vpop.f32.mrb[123].mxu0 }
0x1625   :  { %v5137_v11 = vsel %vm258_vm6, %v5117_v6, -inf  ;;  %v5134_v20 = vsel %vm258_vm6, %v12879_v63, -inf }
0x1626   :  { %5138 = vmax.xlane.f32.xlu0 %v5137_v11  ;;  %5135 = vmax.xlane.f32.xlu1 %v5134_v20 }
0x1628   :  { %v5097_v26 = vpop.f32.mrb[120].mxu1 }
0x1629   :  { %v10639_v29 = vpop.f32.mrb[121].mxu1  ;;  %v5110_v18 = vmul.f32 0.35355338, %v5097_v26 }
0x162a   :  { %v5100_v30 = vpop.f32.mrb[122].mxu1 }
0x162b   :  { %v10640_v46 = vpop.f32.mrb[123].mxu1  ;;  %v12894_v37 = vadd.f32 %v5110_v18, %v11665_v57 }
0x1636   :  { %v5121_v10 = vpop.xlane.xlu0 %5120 }
0x1637   :  { %5263 = vrot.lane.b32.xlu1 %v12785_v40, %s13973_s7  ;;  %v5143_v53 = vsub.f32 %v5111_v0, %v5121_v10 }
0x1639   :  { %v5151_v39 = vmul.f32 1.442695, %v5143_v53 }
0x163b   :  { %5311 = vrot.lane.b32.xlu1 %v12783_v33, %s13973_s7  ;;  %11262 = vpow2.f32 %v5151_v39  ;;  %v5140_v33 = vsel %vm258_vm6, %v12894_v37, -inf }
0x163c   :  { %5215 = vrot.lane.b32.xlu0 %v12777_v31, %s13973_s7 }
0x1645   :  { %v12891_v56 = vpop.eup %11262 }
0x1646   :  { %v5167_v23 = vsel %vm258_vm6, %v12891_v56, 0.0 }
0x165b   :  { %5168 = vadd.xlane.f32.xlu0 %v5167_v23 }
0x165f   :  { %5141 = vmax.xlane.f32.xlu1 %v5140_v33 }
0x1670   :  { %5359 = vrot.lane.b32.xlu1 %v12791_v38, %s13973_s7 }
0x16a3   :  { %v5127_v31 = vpop.xlane.xlu0 %5126  ;;  %v5124_v40 = vpop.xlane.xlu1 %5123 }
0x16a4   :  { %v5145_v0 = vsub.f32 %v5113_v17, %v5127_v31  ;;  %v5144_v34 = vsub.f32 %v12862_v59, %v5124_v40 }
0x16a6   :  { %v5155_v3 = vmul.f32 1.442695, %v5145_v0  ;;  %v5153_v7 = vmul.f32 1.442695, %v5144_v34 }
0x16a8   :  { %11264 = vpow2.f32 %v5155_v3 }
0x16a9   :  { %11266 = vpow2.f32 %v5153_v7 }
0x16ab   :  { %v5130_v57 = vpop.xlane.xlu0 %5129 }
0x16ac   :  { %v5146_v21 = vsub.f32 %v12869_v49, %v5130_v57 }
0x16ae   :  { %v5157_v45 = vmul.f32 1.442695, %v5146_v21 }
0x16af   :  { %v5133_v32 = vpop.xlane.xlu0 %5132 }
0x16b0   :  { %v5147_v4 = vsub.f32 %v12872_v52, %v5133_v32 }
0x16b2   :  { %v12903_v44 = vpop.eup %11264  ;;  %v5159_v9 = vmul.f32 1.442695, %v5147_v4 }
0x16b3   :  { %v12905_v28 = vpop.eup %11266  ;;  %v5139_v41 = vpop.xlane.xlu0 %5138  ;;  %v5173_v38 = vsel %vm258_vm6, %v12903_v44, 0.0 }
0x16b4   :  { %v5136_v47 = vpop.xlane.xlu1 %5135  ;;  %5174 = vadd.xlane.f32.xlu0 %v5173_v38  ;;  %v5170_v17 = vsel %vm258_vm6, %v12905_v28, 0.0  ;;  %v5149_v27 = vsub.f32 %v5117_v6, %v5139_v41  ;;  %11268 = vpow2.f32 %v5159_v9 }
0x16b5   :  { %5171 = vadd.xlane.f32.xlu1 %v5170_v17  ;;  %v5148_v14 = vsub.f32 %v12879_v63, %v5136_v47  ;;  %11270 = vpow2.f32 %v5157_v45 }
0x16b6   :  { %v5163_v58 = vmul.f32 1.442695, %v5149_v27 }
0x16b7   :  { %v5216_v59 = vpop.permute.xlu0 %5215  ;;  %v5161_v11 = vmul.f32 1.442695, %v5148_v14 }
0x16b8   :  { %v5264_v50 = vpop.permute.xlu1 %5263  ;;  %v5221_v62 = vsel %vm765_vm9, %v5216_v59, 0  ;;  %11272 = vpow2.f32 %v5163_v58 }
0x16b9   :  { %v5269_v1 = vsel %vm765_vm9, %v5264_v50, 0  ;;  %10642 = vmatpush3.bf16.msra.mxu0 %v5221_v62  ;;  %11274 = vpow2.f32 %v5161_v11 }
0x16ba   :  { %10648 = vmatpush3.bf16.msra.mxu1 %v5269_v1  ;;  %10653 = vmatprep.subr.bf16.mxu0 %v11380_v15 }
0x16bb   :  { %10659 = vmatprep.subr.bf16.mxu1 %v11380_v15 }
0x16be   :  { %v12922_v20 = vpop.eup %11268 }
0x16bf   :  { %v5179_v49 = vsel %vm258_vm6, %v12922_v20, 0.0 }
0x16c6   :  { %5455 = vrot.lane.b32.xlu1 %v12802_v16, %s13973_s7  ;;  %v12924_v16 = vpop.eup %11270 }
0x16c7   :  { %v12928_v52 = vpop.eup %11272  ;;  %v5176_v63 = vsel %vm258_vm6, %v12924_v16, 0.0 }
0x16c8   :  { %v12932_v6 = vpop.eup %11274  ;;  %v5185_v30 = vsel %vm258_vm6, %v12928_v52, 0.0 }
0x16c9   :  { %v5182_v10 = vsel %vm258_vm6, %v12932_v6, 0.0 }
0x16ca   :  { %5407 = vrot.lane.b32.xlu0 %v12793_v24, %s13973_s7  ;;  %v5312_v24 = vpop.permute.xlu1 %5311 }
0x16cb   :  { %v5317_v33 = vsel %vm765_vm9, %v5312_v24, 0 }
0x16e8   :  { %v5169_v26 = vpop.xlane.xlu0 %5168 }
0x16e9   :  { %11276 = vrcp.f32 %v5169_v26  ;;  %5180 = vadd.xlane.f32.xlu0 %v5179_v49 }
0x16ea   :  { %5177 = vadd.xlane.f32.xlu1 %v5176_v63 }
0x16ec   :  { %v5142_v29 = vpop.xlane.xlu1 %5141 }
0x16ed   :  { %v5150_v46 = vsub.f32 %v12894_v37, %v5142_v29  ;;  %5186 = vadd.xlane.f32.xlu0 %v5185_v30 }
0x16ee   :  { %5183 = vadd.xlane.f32.xlu1 %v5182_v10 }
0x16ef   :  { %v5165_v53 = vmul.f32 1.442695, %v5150_v46 }
0x16f1   :  { %11278 = vpow2.f32 %v5165_v53 }
0x16f3   :  { %v11277_v39 = vpop.eup %11276 }
0x16f4   :  { %v5199_v18 = vmul.f32 %v11277_v39, %v12891_v56  ;;  %v5360_v56 = vpop.permute.xlu1 %5359 }
0x16f6   :  { %v5207_v23 = vpack.c.bf16 %v5199_v18, %v5199_v18 }
0x16f8   :  { %10644 = vmatmul.mubr.msk.bf16.vlgmr.msra.gmra.mrb[124].mxu0 %vm258_vm6, %v5207_v23 }
0x16f9   :  { %10654 = vmatpush3.bf16.msra.mxu0 %v5317_v33  ;;  %10655 = vmatprep.mubr.msk.bf16.mxu0 %vm11381_vm1, %v11380_v15 }
0x16fa   :  { %10665 = vmatprep.subr.bf16.mxu0 %v11380_v15 }
0x16fb   :  { %v12945_v37 = vpop.eup %11278 }
0x16fc   :  { %v5188_v31 = vsel %vm258_vm6, %v12945_v37, 0.0 }
0x16fd   :  { %5189 = vadd.xlane.f32.xlu1 %v5188_v31 }
0x1703   :  { %5503 = vrot.lane.b32.xlu0 %v12799_v43, %s13973_s7  ;;  %v5365_v43 = vsel %vm765_vm9, %v5360_v56, 0 }
0x170e   :  { %5551 = vrot.lane.b32.xlu1 %v12809_v22, %s13973_s7 }
0x1741   :  { %v5175_v40 = vpop.xlane.xlu0 %5174 }
0x1742   :  { %11280 = vrcp.f32 %v5175_v40  ;;  %v5172_v0 = vpop.xlane.xlu1 %5171 }
0x1743   :  { %11282 = vrcp.f32 %v5172_v0 }
0x1745   :  { %v5408_v32 = vpop.permute.xlu0 %5407 }
0x1746   :  { %v5413_v38 = vsel %vm765_vm9, %v5408_v32, 0  ;;  %v5456_v22 = vpop.permute.xlu1 %5455 }
0x1747   :  { %v5461_v11 = vsel %vm765_vm9, %v5456_v22, 0 }
0x174c   :  { %v11281_v34 = vpop.eup %11280 }
0x174d   :  { %v11283_v3 = vpop.eup %11282  ;;  %v5201_v7 = vmul.f32 %v11281_v34, %v12903_v44 }
0x174e   :  { %v5200_v57 = vmul.f32 %v11283_v3, %v12905_v28 }
0x174f   :  { %v5209_v41 = vpack.c.bf16 %v5201_v7, %v5201_v7 }
0x1750   :  { %v5208_v47 = vpack.c.bf16 %v5200_v57, %v5200_v57  ;;  %v11030_v57 = vld [vmem:[%s13908_s8 + $0x10] sm:$0xff]  }
0x1751   :  { %10656 = vmatmul.mubr.msk.bf16.vlgmr.msra.gmra.mrb[128].mxu0 %vm258_vm6, %v5209_v41 }
0x1752   :  { %10650 = vmatmul.mubr.msk.bf16.vlgmr.msra.gmra.mrb[124].mxu1 %vm258_vm6, %v5208_v47  ;;  %10666 = vmatpush3.bf16.msra.mxu0 %v5413_v38 }
0x1753   :  { %10660 = vmatpush3.bf16.msra.mxu1 %v5365_v43  ;;  %10661 = vmatprep.mubr.msk.bf16.mxu1 %vm11381_vm1, %v11380_v15 }
0x1754   :  { %10667 = vmatprep.mubr.msk.bf16.mxu0 %vm11381_vm1, %v11380_v15  ;;  %10671 = vmatprep.subr.bf16.mxu1 %v11380_v15 }
0x1755   :  { %10677 = vmatprep.subr.bf16.mxu0 %v11380_v15 }
0x1776   :  { %v5181_v44 = vpop.xlane.xlu0 %5180 }
0x1777   :  { %11284 = vrcp.f32 %v5181_v44  ;;  %v5178_v28 = vpop.xlane.xlu1 %5177 }
0x1778   :  { %11286 = vrcp.f32 %v5178_v28 }
0x177a   :  { %v5187_v17 = vpop.xlane.xlu0 %5186 }
0x177b   :  { %11288 = vrcp.f32 %v5187_v17  ;;  %v5184_v59 = vpop.xlane.xlu1 %5183 }
0x177c   :  { %11290 = vrcp.f32 %v5184_v59 }
0x177e   :  { %v5504_v21 = vpop.permute.xlu0 %5503 }
0x177f   :  { %v5509_v58 = vsel %vm765_vm9, %v5504_v21, 0 }
0x1781   :  { %v11285_v50 = vpop.eup %11284 }
0x1782   :  { %v11287_v62 = vpop.eup %11286  ;;  %v5203_v1 = vmul.f32 %v11285_v50, %v12922_v20 }
0x1783   :  { %v5202_v4 = vmul.f32 %v11287_v62, %v12924_v16 }
0x1784   :  { %v5211_v9 = vpack.c.bf16 %v5203_v1, %v5203_v1 }
0x1785   :  { %v11289_v27 = vpop.eup %11288  ;;  %v5210_v45 = vpack.c.bf16 %v5202_v4, %v5202_v4 }
0x1786   :  { %v11291_v14 = vpop.eup %11290  ;;  %10668 = vmatmul.mubr.msk.bf16.vlgmr.msra.gmra.mrb[132].mxu0 %vm258_vm6, %v5211_v9  ;;  %v5205_v24 = vmul.f32 %v11289_v27, %v12928_v52  ;;  %v11031_v9 = vld [vmem:[%s13908_s8 + $0x18] sm:$0xff]  }
0x1787   :  { %10662 = vmatmul.mubr.msk.bf16.vlgmr.msra.gmra.mrb[128].mxu1 %vm258_vm6, %v5210_v45  ;;  %10678 = vmatpush3.bf16.msra.mxu0 %v5509_v58  ;;  %v5204_v20 = vmul.f32 %v11291_v14, %v12932_v6 }
0x1788   :  { %10672 = vmatpush3.bf16.msra.mxu1 %v5461_v11  ;;  %10673 = vmatprep.mubr.msk.bf16.mxu1 %vm11381_vm1, %v11380_v15  ;;  %v5213_v26 = vpack.c.bf16 %v5205_v24, %v5205_v24 }
0x1789   :  { %10679 = vmatprep.mubr.msk.bf16.mxu0 %vm11381_vm1, %v11380_v15  ;;  %10683 = vmatprep.subr.bf16.mxu1 %v11380_v15  ;;  %v5212_v49 = vpack.c.bf16 %v5204_v20, %v5204_v20 }
0x178a   :  { %v5190_v16 = vpop.xlane.xlu1 %5189  ;;  %10689 = vmatprep.subr.bf16.mxu0 %v11380_v15 }
0x178b   :  { %11292 = vrcp.f32 %v5190_v16 }
0x178e   :  { %10680 = vmatmul.mubr.msk.bf16.vlgmr.msra.gmra.mrb[136].mxu0 %vm258_vm6, %v5213_v26  ;;  %v5552_v52 = vpop.permute.xlu1 %5551 }
0x178f   :  { %10674 = vmatmul.mubr.msk.bf16.vlgmr.msra.gmra.mrb[132].mxu1 %vm258_vm6, %v5212_v49  ;;  %v5557_v63 = vsel %vm765_vm9, %v5552_v52, 0  ;;  %10693 = vmatprep.mubr.msk.bf16.mxu0 %vm11381_vm1, %v11380_v15 }
0x1790   :  { %10684 = vmatpush3.bf16.msra.mxu1 %v5557_v63  ;;  %10685 = vmatprep.mubr.msk.bf16.mxu1 %vm11381_vm1, %v11380_v15 }
0x1791   :  { %10697 = vmatprep.subr.bf16.mxu1 %v11380_v15  ;;  %10690 = vmatpush3.bf16.msra.mxu0 %v11030_v57 }
0x1792   :  { %10691 = vmatprep.subr.bf16.mxu0 %v11380_v15 }
0x1795   :  { %v11293_v6 = vpop.eup %11292  ;;  %10692 = vmatpush3.bf16.msra.mxu0 %v11031_v9 }
0x1796   :  { %v5206_v29 = vmul.f32 %v11293_v6, %v12945_v37  ;;  %10705 = vmatprep.subr.bf16.mxu0 %v11380_v15 }
0x1798   :  { %v5214_v30 = vpack.c.bf16 %v5206_v29, %v5206_v29 }
0x179a   :  { %10686 = vmatmul.mubr.msk.bf16.vlgmr.msra.gmra.mrb[136].mxu1 %vm258_vm6, %v5214_v30 }
0x179b   :  { %10701 = vmatprep.mubr.msk.bf16.mxu1 %vm11381_vm1, %v11380_v15 }
0x17cb   :  { %v5257_v46 = vpop.f32.mrb[124].mxu0 }
0x17cc   :  { %v10645_v10 = vpop.f32.mrb[125].mxu0 }
0x17cd   :  { %v5260_v53 = vpop.f32.mrb[126].mxu0 }
0x17ce   :  { %v10646_v39 = vpop.f32.mrb[127].mxu0 }
0x1824   :  { %v5353_v18 = vpop.f32.mrb[128].mxu0 }
0x1825   :  { %v5305_v23 = vpop.f32.mrb[124].mxu1  ;;  %v10657_v33 = vpop.f32.mrb[129].mxu0 }
0x1826   :  { %v10651_v31 = vpop.f32.mrb[125].mxu1  ;;  %v5356_v56 = vpop.f32.mrb[130].mxu0 }
0x1827   :  { %v5308_v40 = vpop.f32.mrb[126].mxu1  ;;  %v10658_v0 = vpop.f32.mrb[131].mxu0 }
0x1828   :  { %v10652_v34 = vpop.f32.mrb[127].mxu1 }
0x1859   :  { %v5449_v3 = vpop.f32.mrb[132].mxu0 }
0x185a   :  { %v5401_v37 = vpop.f32.mrb[128].mxu1  ;;  %v10669_v7 = vpop.f32.mrb[133].mxu0 }
0x185b   :  { %v10663_v32 = vpop.f32.mrb[129].mxu1  ;;  %v5452_v41 = vpop.f32.mrb[134].mxu0 }
0x185c   :  { %v5404_v47 = vpop.f32.mrb[130].mxu1  ;;  %v10670_v38 = vpop.f32.mrb[135].mxu0 }
0x185d   :  { %v10664_v43 = vpop.f32.mrb[131].mxu1 }
0x1861   :  { %v5545_v22 = vpop.f32.mrb[136].mxu0 }
0x1862   :  { %v5497_v44 = vpop.f32.mrb[132].mxu1  ;;  %v10865_v28 = vpack.i.bf16 %v5545_v22, %v5353_v18  ;;  %v10681_v17 = vpop.f32.mrb[137].mxu0 }
0x1863   :  { %v10860_v59 = vpack.i.bf16 %v5497_v44, %v5305_v23  ;;  %v10675_v50 = vpop.f32.mrb[133].mxu1  ;;  %v5548_v62 = vpop.f32.mrb[138].mxu0 }
0x1864   :  { %v5500_v1 = vpop.f32.mrb[134].mxu1  ;;  %v10682_v4 = vpop.f32.mrb[139].mxu0  ;;  %10866 = vrot.lane.b32.xlu1 %v10865_v28, %s13969_s23  ;;  %v11034_v50 = vld [vmem:[%s13910_s10 + $0x10] sm:$0xff]   ;;  %v11033_v62 = vld [vmem:[%s13912_s12 + $0x18] sm:$0xff]  }
0x1865   :  { %10861 = vrot.lane.b32.xlu0 %v10860_v59, %s13970_s29  ;;  %v10676_v21 = vpop.f32.mrb[135].mxu1  ;;  %v11032_v59 = vld [vmem:[%s13912_s12 + $0x10] sm:$0xff]   ;;  %10698 = vmatpush3.bf16.msra.mxu1 %v11034_v50  ;;  %v11035_v1 = vld [vmem:[%s13910_s10 + $0x18] sm:$0xff]  }
0x1866   :  { %10699 = vmatprep.subr.bf16.mxu1 %v11380_v15 }
0x1869   :  { %10700 = vmatpush3.bf16.msra.mxu1 %v11035_v1 }
0x186a   :  { %10713 = vmatprep.subr.bf16.mxu1 %v11380_v15 }
0x186d   :  { %v5593_v27 = vpop.f32.mrb[136].mxu1 }
0x186e   :  { %v10870_v45 = vpack.i.bf16 %v5593_v27, %v5401_v37  ;;  %v10687_v14 = vpop.f32.mrb[137].mxu1 }
0x186f   :  { %v5596_v58 = vpop.f32.mrb[138].mxu1 }
0x1870   :  { %10871 = vrot.lane.b32.xlu0 %v10870_v45, %s13971_s2  ;;  %v10688_v11 = vpop.f32.mrb[139].mxu1 }
0x18d6   :  { %v10867_v20 = vpop.permute.xlu1 %10866 }
0x18d7   :  { %v10862_v24 = vpop.permute.xlu0 %10861  ;;  %v10869_v49 = vunpack.i.h.bf16 %v10867_v20  ;;  %v10868_v52 = vunpack.i.l.bf16 %v10867_v20 }
0x18d8   :  { %v10864_v16 = vunpack.i.h.bf16 %v10862_v24  ;;  %v10863_v26 = vunpack.i.l.bf16 %v10862_v24 }
0x18da   :  { %v5624_v63 = vsel %vm258_vm6, %v5449_v3, %v10864_v16  ;;  %v5623_v6 = vsel %vm258_vm6, %v5257_v46, %v10863_v26  ;;  %v9330_v46 = vld [vmem:[%s13909_s9 + $0x1] ss:$0 sm:$0xff]  ;;  %s11391_s9 = smov [#allocation2]  }
0x18db   :  { %v5625_v53 = vsel %vm1171_vm10, %v5623_v6, %v10868_v52  ;;  %v5626_v39 = vsel %vm1171_vm10, %v5624_v63, %v10869_v49  ;;  %s9066_s4 = sshll.u32 %s11391_s9, 4  ;;  %s9067_s4 = int_to_ptr.vmem [resolvable:$true] %s9066_s4 }
0x18dc   :  { %s11356_s0 = scalar_lea.vmem %s9067_s4, 256  ;;  %p11361_p1 = scmp.lt.s32.totalorder %s9067_s4, %s9067_s4 }
0x18dd   :  { %p11357_p0 = scmp.ne.s32.totalorder %s9067_s4, %s11356_s0  ;;  %p11362_p2 = scmp.lt.s32.totalorder %s11356_s0, %s11356_s0 }
0x18df   :  { %p11363_p3 = por %p11362_p2, %p11361_p1 }
0x18e1   :  { %p11364_p4 = pnand %p11363_p3, %p11357_p0 }
0x18e2   :  { %v10872_v29 = vpop.permute.xlu0 %10871 }
0x18e3   :  { %v10874_v30 = vunpack.i.h.bf16 %v10872_v29  ;;  %v10873_v10 = vunpack.i.l.bf16 %v10872_v29 }
0x18e5   :  { %v5628_v18 = vsel %vm1174_vm11, %v5626_v39, %v10874_v30  ;;  %v5627_v23 = vsel %vm1174_vm11, %v5625_v53, %v10873_v10  ;;  %v5737_v30 = vrot.slane %v12756_v54, %v11862_v55 }
0x18e6   :  { %v5629_v33 = vpack.c.bf16 %v5628_v18, %v5627_v23  ;;  %v5743_v18 = vrot.slane %v12763_v61, %v11862_v55 }
0x18e8   :  { %10694 = vmatmul.mubr.msk.bf16.vlgmr.msra.gmra.mrb[140].mxu0 %vm100_vm0, %v5629_v33 }
0x18e9   :  { %10709 = vmatprep.mubr.msk.bf16.mxu0 %vm11381_vm1, %v11380_v15  ;;  %10706 = vmatpush3.bf16.msra.mxu0 %v11032_v59 }
0x18ea   :  { %10707 = vmatprep.subr.bf16.mxu0 %v11380_v15 }
0x18ed   :  { %10708 = vmatpush3.bf16.msra.mxu0 %v11033_v62 }
0x18ee   :  { %10719 = vmatprep.subr.bf16.mxu0 %v11380_v15 }
0x18f0   :  { %10710 = vmatmul.mubr.msk.bf16.vlgmr.msra.gmra.mrb[144].mxu0 %vm100_vm0, %v11853_v42 }
0x18f1   :  { %10721 = vmatprep.mubr.msk.bf16.mxu0 %vm11381_vm1, %v11380_v15 }
0x19bb   :  { %v5685_v31 = vpop.f32.mrb[140].mxu0 }
0x19bc   :  { %v5686_v56 = vadd.f32 %v9330_v46, %v5685_v31  ;;  %v10695_v40 = vpop.f32.mrb[141].mxu0 }
0x19bd   :  { %v5688_v0 = vpop.f32.mrb[142].mxu0 }
0x19be   :  { %v13015_v34 = vadd.f32 %v5686_v56, %v12732_v8  ;;  %v5689_v3 = vadd.f32 %v9330_v46, %v5688_v0  ;;  %v10696_v37 = vpop.f32.mrb[143].mxu0  ;;  %v9348_v56 = vld [vmem:[%s13913_s13 + $0x1] ss:$0 sm:$0xff] }
0x19c0   :  { %v13018_v7 = vadd.f32 %v5689_v3, %v12735_v25  ;;  %v5694_v57 = vsel %vm100_vm0, %v13015_v34, 0.0 }
0x19c1   :  { %5695 = vadd.xlane.f32.xlu1 %v5694_v57 }
0x19c2   :  { %v5697_v32 = vsel %vm100_vm0, %v13018_v7, 0.0 }
0x19c3   :  { %5698 = vadd.xlane.f32.xlu0 %v5697_v32  ;;  %v5875_v54 = vpop.f32.mrb[144].mxu0 }
0x19c4   :  { %v5876_v40 = vadd.f32 %v9348_v56, %v5875_v54  ;;  %v10711_v0 = vpop.f32.mrb[145].mxu0 }
0x19c5   :  { %v5878_v3 = vpop.f32.mrb[146].mxu0 }
0x19c6   :  { %v5879_v61 = vadd.f32 %v9348_v56, %v5878_v3  ;;  %v10712_v37 = vpop.f32.mrb[147].mxu0  ;;  %v5930_v57 = vpack.c.bf16 %v5876_v40, %v5876_v40 }
0x19c8   :  { %v5949_v32 = vsel %vm258_vm6, %v5930_v57, 0 }
0x19d2   :  { %5912 = vrot.lane.b32.xlu1 %v5876_v40, %s13972_s20 }
0x19d6   :  { %5924 = vrot.lane.b32.xlu1 %v5876_v40, %s13966_s30 }
0x1a4e   :  { %v5696_v41 = vpop.xlane.xlu1 %5695 }
0x1a4f   :  { %v5700_v47 = vmul.f32 0.03125, %v5696_v41 }
0x1a50   :  { %v5699_v38 = vpop.xlane.xlu0 %5698 }
0x1a51   :  { %v5702_v43 = vsub.f32 %v13015_v34, %v5700_v47  ;;  %v5701_v8 = vmul.f32 0.03125, %v5699_v38 }
0x1a52   :  { %v5913_v41 = vpop.permute.xlu1 %5912 }
0x1a53   :  { %v5703_v22 = vsub.f32 %v13018_v7, %v5701_v8  ;;  %v5704_v44 = vmul.f32 %v5702_v43, %v5702_v43  ;;  %v13063_v47 = vpack.c.bf16 %v5913_v41, %v5913_v41  ;;  %v9339_v8 = vld [vmem:[%s13911_s11 + $0x1] ss:$0 sm:$0xff] }
0x1a55   :  { %v5706_v25 = vsel %vm100_vm0, %v5704_v44, 0.0  ;;  %v5705_v28 = vmul.f32 %v5703_v22, %v5703_v22  ;;  %v5995_v38 = vsel %vm258_vm6, %v13063_v47, 0 }
0x1a56   :  { %5707 = vadd.xlane.f32.xlu0 %v5706_v25  ;;  %10720 = vmatpush3.bf16.xpose.msra.mxu0 %v5995_v38 }
0x1a57   :  { %v5709_v17 = vsel %vm100_vm0, %v5705_v28, 0.0  ;;  %10731 = vmatprep.subr.bf16.mxu0 %v11380_v15 }
0x1a5a   :  { %5710 = vadd.xlane.f32.xlu0 %v5709_v17 }
0x1a70   :  { %5918 = vrot.lane.b32.xlu0 %v5876_v40, %s13965_s5 }
0x1ae3   :  { %v5708_v4 = vpop.xlane.xlu0 %5707 }
0x1ae4   :  { %v5712_v21 = vmul.f32 0.032258064, %v5708_v4  ;;  %v5925_v4 = vpop.permute.xlu1 %5924 }
0x1ae6   :  { %11294 = vrsqrt.f32 %v5712_v21  ;;  %vm5716_vm2 = vcmp.eq.f32.partialorder %v5712_v21, inf  ;;  %v5719_v58 = vand.u32 2147483648, %v5712_v21  ;;  %vm5718_vm3 = vcmp.eq.f32.partialorder %v5712_v21, 0.0 }
0x1ae7   :  { %v5711_v9 = vpop.xlane.xlu0 %5710 }
0x1ae8   :  { %v5713_v27 = vmul.f32 0.032258064, %v5711_v9 }
0x1aea   :  { %11296 = vrsqrt.f32 %v5713_v27  ;;  %vm5723_vm4 = vcmp.eq.f32.partialorder %v5713_v27, inf  ;;  %v5726_v42 = vand.u32 2147483648, %v5713_v27  ;;  %vm5725_vm5 = vcmp.eq.f32.partialorder %v5713_v27, 0.0 }
0x1af0   :  { %v11295_v45 = vpop.eup %11294 }
0x1af1   :  { %v5715_v14 = vmul.f32 %v11295_v45, %v5712_v21 }
0x1af3   :  { %v5717_v11 = vsel %vm5716_vm2, %v5712_v21, %v5715_v14  ;;  %v13089_v21 = vpack.c.bf16 %v5925_v4, %v5925_v4 }
0x1af4   :  { %v11297_v24 = vpop.eup %11296  ;;  %v5720_v20 = vsel %vm5718_vm3, %v5719_v58, %v5717_v11  ;;  %v13094_v58 = vpack.c.bf16 %v5879_v61, %v5879_v61 }
0x1af5   :  { %v5728_v16 = vadd.f32 1e-06, %v5720_v20  ;;  %v5722_v26 = vmul.f32 %v11297_v24, %v5713_v27  ;;  %v6087_v14 = vsel %vm258_vm6, %v13089_v21, 0 }
0x1af7   :  { %11298 = vrcp.f32 %v5728_v16  ;;  %v5724_v49 = vsel %vm5723_vm4, %v5713_v27, %v5722_v26  ;;  %v6133_v16 = vsel %vm258_vm6, %v13094_v58, 0 }
0x1af8   :  { %v5727_v52 = vsel %vm5725_vm5, %v5726_v42, %v5724_v49 }
0x1af9   :  { %v5729_v63 = vadd.f32 1e-06, %v5727_v52 }
0x1afb   :  { %11300 = vrcp.f32 %v5729_v63 }
0x1b01   :  { %v11299_v6 = vpop.eup %11298 }
0x1b02   :  { %v5732_v29 = vmul.f32 %v11299_v6, %v5702_v43  ;;  %v5919_v43 = vpop.permute.xlu0 %5918 }
0x1b04   :  { %v5738_v39 = vmul.f32 %v5737_v30, %v5732_v29 }
0x1b05   :  { %v11301_v10 = vpop.eup %11300 }
0x1b06   :  { %v5733_v53 = vmul.f32 %v11301_v10, %v5703_v22  ;;  %v5744_v33 = vadd.f32 %v5743_v18, %v5738_v39  ;;  %v13071_v22 = vpack.c.bf16 %v5919_v43, %v5919_v43 }
0x1b08   :  { %v5739_v23 = vmul.f32 %v5737_v30, %v5733_v53  ;;  %v6041_v62 = vsel %vm258_vm6, %v13071_v22, 0 }
0x1b0a   :  { %v5745_v46 = vadd.f32 %v5743_v18, %v5739_v23 }
0x1b0c   :  { %v5746_v31 = vpack.c.bf16 %v5745_v46, %v5744_v33 }
0x1b0e   :  { %10702 = vmatmul.mubr.msk.bf16.vlgmr.msra.gmra.mrb[140].mxu1 %vm100_vm0, %v5746_v31 }
0x1b0f   :  { %10715 = vmatprep.mubr.msk.bf16.mxu1 %vm11381_vm1, %v11380_v15  ;;  %10714 = vmatpush3.bf16.xpose.msra.mxu1 %v5949_v32 }
0x1b10   :  { %10725 = vmatprep.subr.bf16.mxu1 %v11380_v15 }
0x1be1   :  { %v5809_v44 = vpop.f32.mrb[140].mxu1 }
0x1be2   :  { %v5810_v25 = vadd.f32 %v9339_v8, %v5809_v44  ;;  %v10703_v28 = vpop.f32.mrb[141].mxu1 }
0x1be3   :  { %v5812_v17 = vpop.f32.mrb[142].mxu1 }
0x1be4   :  { %v5902_v59 = vpack.c.bf16 %v5810_v25, %v5810_v25  ;;  %5896 = vrot.lane.b32.xlu0 %v5810_v25, %s13966_s30  ;;  %5884 = vrot.lane.b32.xlu1 %v5810_v25, %s13972_s20  ;;  %v10704_v50 = vpop.f32.mrb[143].mxu1  ;;  %v5813_v1 = vadd.f32 %v9339_v8, %v5812_v17 }
0x1be6   :  { %10716 = vmatmul.mubr.msk.bf16.vlgmr.msra.gmra.mrb[144].mxu1 %vm258_vm6, %v5902_v59  ;;  %v5906_v30 = vpack.c.bf16 %v5813_v1, %v5813_v1 }
0x1be7   :  { %10726 = vmatpush3.bf16.xpose.msra.mxu1 %v6041_v62  ;;  %10727 = vmatprep.mubr.msk.bf16.mxu1 %vm11381_vm1, %v11380_v15 }
0x1be8   :  { %5920 = vrot.lane.b32.xlu0 %v5879_v61, %s13965_s5  ;;  %5890 = vrot.lane.b32.xlu1 %v5810_v25, %s13965_s5 }
0x1be9   :  { %10737 = vmatprep.subr.bf16.mxu1 %v11380_v15 }
0x1bec   :  { %5926 = vrot.lane.b32.xlu0 %v5879_v61, %s13966_s30  ;;  %5914 = vrot.lane.b32.xlu1 %v5879_v61, %s13972_s20 }
0x1bf0   :  { %5898 = vrot.lane.b32.xlu0 %v5813_v1, %s13966_s30  ;;  %5886 = vrot.lane.b32.xlu1 %v5813_v1, %s13972_s20  ;;  %s13974_s20 = sld [smem:[#allocation12_spill]] }
0x1bf4   :  { %5892 = vrot.lane.b32.xlu1 %v5813_v1, %s13965_s5 }
0x1bf8   :  { %6426 = vrot.lane.b32.xlu1 %v5930_v57, %s13967_s28 }
0x1c56   :  { %v5897_v9 = vpop.permute.xlu0 %5896  ;;  %v5885_v27 = vpop.permute.xlu1 %5884 }
0x1c57   :  { %v5903_v45 = vpack.c.bf16 %v5885_v27, %v5885_v27  ;;  %v5905_v42 = vpack.c.bf16 %v5897_v9, %v5897_v9 }
0x1c59   :  { %10722 = vmatmul.mubr.msk.bf16.vlgmr.msra.gmra.mrb[148].mxu0 %vm258_vm6, %v5903_v45 }
0x1c5a   :  { %10732 = vmatpush3.bf16.xpose.msra.mxu0 %v6087_v14  ;;  %v5891_v11 = vpop.permute.xlu1 %5890  ;;  %10733 = vmatprep.mubr.msk.bf16.mxu0 %vm11381_vm1, %v11380_v15  ;;  %v5921_v20 = vpop.permute.xlu0 %5920 }
0x1c5b   :  { %v5904_v24 = vpack.c.bf16 %v5891_v11, %v5891_v11  ;;  %10743 = vmatprep.subr.bf16.mxu0 %v11380_v15  ;;  %v13107_v52 = vpack.c.bf16 %v5921_v20, %v5921_v20 }
0x1c5d   :  { %10728 = vmatmul.mubr.msk.bf16.vlgmr.msra.gmra.mrb[148].mxu1 %vm258_vm6, %v5904_v24  ;;  %v6225_v10 = vsel %vm258_vm6, %v13107_v52, 0 }
0x1c5e   :  { %10738 = vmatpush3.bf16.xpose.msra.mxu1 %v6133_v16  ;;  %v5915_v26 = vpop.permute.xlu1 %5914  ;;  %10739 = vmatprep.mubr.msk.bf16.mxu1 %vm11381_vm1, %v11380_v15  ;;  %v5927_v6 = vpop.permute.xlu0 %5926 }
0x1c5f   :  { %v13104_v49 = vpack.c.bf16 %v5915_v26, %v5915_v26  ;;  %10749 = vmatprep.subr.bf16.mxu1 %v11380_v15  ;;  %v13117_v53 = vpack.c.bf16 %v5927_v6, %v5927_v6 }
0x1c61   :  { %v6179_v63 = vsel %vm258_vm6, %v13104_v49, 0  ;;  %10734 = vmatmul.mubr.msk.bf16.vlgmr.msra.gmra.mrb[152].mxu0 %vm258_vm6, %v5905_v42  ;;  %v6271_v23 = vsel %vm258_vm6, %v13117_v53, 0 }
0x1c62   :  { %10744 = vmatpush3.bf16.xpose.msra.mxu0 %v6179_v63  ;;  %v5887_v29 = vpop.permute.xlu1 %5886  ;;  %10745 = vmatprep.mubr.msk.bf16.mxu0 %vm11381_vm1, %v11380_v15  ;;  %v5899_v56 = vpop.permute.xlu0 %5898 }
0x1c63   :  { %10755 = vmatprep.subr.bf16.mxu0 %v11380_v15  ;;  %v5907_v18 = vpack.c.bf16 %v5887_v29, %v5887_v29  ;;  %v5909_v54 = vpack.c.bf16 %v5899_v56, %v5899_v56 }
0x1c65   :  { %10740 = vmatmul.mubr.msk.bf16.vlgmr.msra.gmra.mrb[152].mxu1 %vm258_vm6, %v5906_v30 }
0x1c66   :  { %10750 = vmatpush3.bf16.xpose.msra.mxu1 %v6225_v10  ;;  %v5893_v39 = vpop.permute.xlu1 %5892  ;;  %10751 = vmatprep.mubr.msk.bf16.mxu1 %vm11381_vm1, %v11380_v15 }
0x1c67   :  { %10761 = vmatprep.subr.bf16.mxu1 %v11380_v15  ;;  %v5908_v46 = vpack.c.bf16 %v5893_v39, %v5893_v39 }
0x1c69   :  { %10746 = vmatmul.mubr.msk.bf16.vlgmr.msra.gmra.mrb[156].mxu0 %vm258_vm6, %v5907_v18 }
0x1c6a   :  { %10756 = vmatpush3.bf16.xpose.msra.mxu0 %v6271_v23  ;;  %v6427_v33 = vpop.permute.xlu1 %6426  ;;  %10757 = vmatprep.mubr.msk.bf16.mxu0 %vm11381_vm1, %v11380_v15 }
0x1c6b   :  { %v6432_v31 = vsel %vm765_vm9, %v6427_v33, 0  ;;  %10767 = vmatprep.subr.bf16.mxu0 %v11380_v15 }
0x1c6d   :  { %10752 = vmatmul.mubr.msk.bf16.vlgmr.msra.gmra.mrb[156].mxu1 %vm258_vm6, %v5908_v46 }
0x1c6e   :  { %10762 = vmatpush3.bf16.msra.mxu1 %v6432_v31  ;;  %10763 = vmatprep.mubr.msk.bf16.mxu1 %vm11381_vm1, %v11380_v15 }
0x1c6f   :  { %10773 = vmatprep.subr.bf16.mxu1 %v11380_v15 }
0x1c71   :  { %10758 = vmatmul.mubr.msk.bf16.vlgmr.msra.gmra.mrb[160].mxu0 %vm258_vm6, %v5909_v54 }
0x1c72   :  { %10769 = vmatprep.mubr.msk.bf16.mxu0 %vm11381_vm1, %v11380_v15 }
0x1cb9   :  { %v5985_v40 = vpop.f32.mrb[144].mxu1 }
0x1cba   :  { %v6313_v0 = vmul.f32 0.35355338, %v5985_v40  ;;  %v10717_v3 = vpop.f32.mrb[145].mxu1 }
0x1cbb   :  { %v5988_v61 = vpop.f32.mrb[146].mxu1 }
0x1cbc   :  { %v13138_v37 = vadd.f32 %v6313_v0, %v11958_v36  ;;  %v10718_v57 = vpop.f32.mrb[147].mxu1 }
0x1cbe   :  { %v6329_v32 = vsel %vm258_vm6, %v13138_v37, -inf }
0x1cbf   :  { %6330 = vmax.xlane.f32.xlu1 %v6329_v32 }
0x1d2c   :  { %v6031_v41 = vpop.f32.mrb[148].mxu0 }
0x1d2d   :  { %v6314_v38 = vmul.f32 0.35355338, %v6031_v41  ;;  %v10723_v43 = vpop.f32.mrb[149].mxu0 }
0x1d2e   :  { %v6034_v8 = vpop.f32.mrb[150].mxu0 }
0x1d2f   :  { %v13143_v44 = vadd.f32 %v6314_v38, %v11958_v36  ;;  %v10724_v25 = vpop.f32.mrb[151].mxu0 }
0x1d30   :  { %v6077_v28 = vpop.f32.mrb[148].mxu1 }
0x1d31   :  { %v6315_v17 = vmul.f32 0.35355338, %v6077_v28  ;;  %v10729_v59 = vpop.f32.mrb[149].mxu1  ;;  %v6332_v50 = vsel %vm258_vm6, %v13143_v44, -inf }
0x1d32   :  { %6333 = vmax.xlane.f32.xlu0 %v6332_v50  ;;  %v6080_v62 = vpop.f32.mrb[150].mxu1 }
0x1d33   :  { %v6323_v1 = vadd.f32 %v6315_v17, %v11958_v36  ;;  %v10730_v4 = vpop.f32.mrb[151].mxu1 }
0x1d34   :  { %v6123_v9 = vpop.f32.mrb[152].mxu0 }
0x1d35   :  { %v6316_v27 = vmul.f32 0.35355338, %v6123_v9  ;;  %v10735_v45 = vpop.f32.mrb[153].mxu0  ;;  %v6335_v14 = vsel %vm258_vm6, %v6323_v1, -inf }
0x1d36   :  { %v6126_v11 = vpop.f32.mrb[154].mxu0  ;;  %6336 = vmax.xlane.f32.xlu0 %v6335_v14 }
0x1d37   :  { %v6324_v24 = vadd.f32 %v6316_v27, %v11958_v36  ;;  %v10736_v20 = vpop.f32.mrb[155].mxu0 }
0x1d38   :  { %v6169_v16 = vpop.f32.mrb[152].mxu1 }
0x1d39   :  { %v6317_v26 = vmul.f32 0.35355338, %v6169_v16  ;;  %v10741_v42 = vpop.f32.mrb[153].mxu1  ;;  %v6338_v63 = vsel %vm258_vm6, %v6324_v24, -inf }
0x1d3a   :  { %6339 = vmax.xlane.f32.xlu0 %v6338_v63  ;;  %v6172_v6 = vpop.f32.mrb[154].mxu1 }
0x1d3b   :  { %v6325_v29 = vadd.f32 %v6317_v26, %v11978_v48  ;;  %v10742_v30 = vpop.f32.mrb[155].mxu1 }
0x1d3c   :  { %v6215_v10 = vpop.f32.mrb[156].mxu0 }
0x1d3d   :  { %v6318_v39 = vmul.f32 0.35355338, %v6215_v10  ;;  %v10747_v18 = vpop.f32.mrb[157].mxu0  ;;  %v6341_v23 = vsel %vm258_vm6, %v6325_v29, -inf }
0x1d3e   :  { %v6218_v33 = vpop.f32.mrb[158].mxu0  ;;  %6342 = vmax.xlane.f32.xlu1 %v6341_v23 }
0x1d3f   :  { %v13154_v36 = vadd.f32 %v6318_v39, %v11978_v48  ;;  %v10748_v46 = vpop.f32.mrb[159].mxu0 }
0x1d40   :  { %v6261_v31 = vpop.f32.mrb[156].mxu1 }
0x1d41   :  { %v6319_v56 = vmul.f32 0.35355338, %v6261_v31  ;;  %v10753_v54 = vpop.f32.mrb[157].mxu1  ;;  %v6344_v40 = vsel %vm258_vm6, %v13154_v36, -inf }
0x1d42   :  { %6345 = vmax.xlane.f32.xlu0 %v6344_v40  ;;  %v6264_v0 = vpop.f32.mrb[158].mxu1 }
0x1d43   :  { %v6327_v3 = vadd.f32 %v6319_v56, %v11978_v48  ;;  %v10754_v61 = vpop.f32.mrb[159].mxu1 }
0x1d44   :  { %v6307_v57 = vpop.f32.mrb[160].mxu0 }
0x1d45   :  { %v6320_v32 = vmul.f32 0.35355338, %v6307_v57  ;;  %v10759_v41 = vpop.f32.mrb[161].mxu0  ;;  %v6347_v38 = vsel %vm258_vm6, %v6327_v3, -inf }
0x1d46   :  { %v6310_v43 = vpop.f32.mrb[162].mxu0  ;;  %6348 = vmax.xlane.f32.xlu1 %v6347_v38 }
0x1d47   :  { %v6328_v8 = vadd.f32 %v6320_v32, %v11978_v48  ;;  %v10760_v25 = vpop.f32.mrb[163].mxu0 }
0x1d49   :  { %v6350_v28 = vsel %vm258_vm6, %v6328_v8, -inf }
0x1d4a   :  { %6351 = vmax.xlane.f32.xlu0 %v6350_v28 }
0x1d4c   :  { %v6331_v17 = vpop.xlane.xlu1 %6330 }
0x1d4d   :  { %v6353_v59 = vsub.f32 %v13138_v37, %v6331_v17 }
0x1d4f   :  { %v6361_v50 = vmul.f32 1.442695, %v6353_v59 }
0x1d51   :  { %11302 = vpow2.f32 %v6361_v50 }
0x1d57   :  { %6524 = vrot.lane.b32.xlu1 %v13071_v22, %s13967_s28 }
0x1d5b   :  { %6573 = vrot.lane.b32.xlu1 %v13089_v21, %s13967_s28  ;;  %v13169_v62 = vpop.eup %11302 }
0x1d5c   :  { %v6377_v48 = vsel %vm258_vm6, %v13169_v62, 0.0 }
0x1d60   :  { %6475 = vrot.lane.b32.xlu0 %v13063_v47, %s13967_s28 }
0x1d7f   :  { %6378 = vadd.xlane.f32.xlu1 %v6377_v48 }
0x1d90   :  { %6622 = vrot.lane.b32.xlu1 %v13094_v58, %s13967_s28 }
0x1dbf   :  { %v6334_v22 = vpop.xlane.xlu0 %6333 }
0x1dc0   :  { %v6354_v21 = vsub.f32 %v13143_v44, %v6334_v22 }
0x1dc2   :  { %v6363_v4 = vmul.f32 1.442695, %v6354_v21 }
0x1dc3   :  { %v6337_v9 = vpop.xlane.xlu0 %6336 }
0x1dc4   :  { %11304 = vpow2.f32 %v6363_v4  ;;  %v6355_v47 = vsub.f32 %v6323_v1, %v6337_v9 }
0x1dc6   :  { %v6365_v27 = vmul.f32 1.442695, %v6355_v47 }
0x1dc7   :  { %v6340_v37 = vpop.xlane.xlu0 %6339 }
0x1dc8   :  { %11306 = vpow2.f32 %v6365_v27  ;;  %v6356_v45 = vsub.f32 %v6324_v24, %v6340_v37 }
0x1dca   :  { %v6367_v14 = vmul.f32 1.442695, %v6356_v45 }
0x1dcb   :  { %v6343_v11 = vpop.xlane.xlu1 %6342 }
0x1dcc   :  { %11308 = vpow2.f32 %v6367_v14  ;;  %v6357_v20 = vsub.f32 %v6325_v29, %v6343_v11 }
0x1dce   :  { %v11305_v16 = vpop.eup %11304  ;;  %v6369_v26 = vmul.f32 1.442695, %v6357_v20 }
0x1dcf   :  { %v6380_v42 = vsel %vm258_vm6, %v11305_v16, 0.0  ;;  %v6346_v44 = vpop.xlane.xlu0 %6345 }
0x1dd0   :  { %11310 = vpow2.f32 %v6369_v26  ;;  %6381 = vadd.xlane.f32.xlu0 %v6380_v42  ;;  %v6358_v56 = vsub.f32 %v13154_v36, %v6346_v44 }
0x1dd2   :  { %v13177_v58 = vpop.eup %11306  ;;  %v6371_v54 = vmul.f32 1.442695, %v6358_v56 }
0x1dd3   :  { %v6349_v63 = vpop.xlane.xlu1 %6348  ;;  %v6383_v1 = vsel %vm258_vm6, %v13177_v58, 0.0 }
0x1dd4   :  { %v6359_v6 = vsub.f32 %v6327_v3, %v6349_v63  ;;  %6384 = vadd.xlane.f32.xlu1 %v6383_v1 }
0x1dd6   :  { %v13181_v24 = vpop.eup %11308  ;;  %v6373_v30 = vmul.f32 1.442695, %v6359_v6 }
0x1dd7   :  { %v6352_v10 = vpop.xlane.xlu0 %6351  ;;  %v6386_v29 = vsel %vm258_vm6, %v13181_v24, 0.0  ;;  %v6525_v3 = vpop.permute.xlu1 %6524 }
0x1dd8   :  { %11312 = vpow2.f32 %v6373_v30  ;;  %6387 = vadd.xlane.f32.xlu0 %v6386_v29  ;;  %v6360_v40 = vsub.f32 %v6328_v8, %v6352_v10  ;;  %v6530_v8 = vsel %vm765_vm9, %v6525_v3, 0 }
0x1dd9   :  { %11314 = vpow2.f32 %v6371_v54 }
0x1dda   :  { %v13185_v39 = vpop.eup %11310  ;;  %v6375_v0 = vmul.f32 1.442695, %v6360_v40 }
0x1ddb   :  { %v6476_v18 = vpop.permute.xlu0 %6475  ;;  %v6389_v23 = vsel %vm258_vm6, %v13185_v39, 0.0  ;;  %v6574_v61 = vpop.permute.xlu1 %6573 }
0x1ddc   :  { %v6481_v33 = vsel %vm765_vm9, %v6476_v18, 0  ;;  %6390 = vadd.xlane.f32.xlu1 %v6389_v23  ;;  %11316 = vpow2.f32 %v6375_v0  ;;  %v6579_v4 = vsel %vm765_vm9, %v6574_v61, 0 }
0x1ddd   :  { %10768 = vmatpush3.bf16.msra.mxu0 %v6481_v33 }
0x1dde   :  { %10779 = vmatprep.subr.bf16.mxu0 %v11380_v15 }
0x1de2   :  { %v13191_v46 = vpop.eup %11312 }
0x1de3   :  { %v6395_v31 = vsel %vm258_vm6, %v13191_v46, 0.0  ;;  %v13200_v57 = vpop.eup %11314 }
0x1de4   :  { %6396 = vadd.xlane.f32.xlu1 %v6395_v31  ;;  %v6392_v41 = vsel %vm258_vm6, %v13200_v57, 0.0 }
0x1de6   :  { %v13204_v38 = vpop.eup %11316 }
0x1dee   :  { %6671 = vrot.lane.b32.xlu0 %v13104_v49, %s13967_s28  ;;  %v6398_v49 = vsel %vm258_vm6, %v13204_v38, 0.0 }
0x1df5   :  { %6720 = vrot.lane.b32.xlu1 %v13107_v52, %s13967_s28 }
0x1e0c   :  { %v6379_v32 = vpop.xlane.xlu1 %6378 }
0x1e0d   :  { %11318 = vrcp.f32 %v6379_v32  ;;  %6393 = vadd.xlane.f32.xlu0 %v6392_v41 }
0x1e10   :  { %v6623_v25 = vpop.permute.xlu1 %6622 }
0x1e11   :  { %6399 = vadd.xlane.f32.xlu0 %v6398_v49  ;;  %v6628_v27 = vsel %vm765_vm9, %v6623_v25, 0 }
0x1e17   :  { %v11319_v52 = vpop.eup %11318 }
0x1e18   :  { %v6409_v36 = vmul.f32 %v11319_v52, %v13169_v62 }
0x1e1a   :  { %v6417_v43 = vpack.c.bf16 %v6409_v36, %v6409_v36 }
0x1e1c   :  { %10764 = vmatmul.mubr.msk.bf16.vlgmr.msra.gmra.mrb[160].mxu1 %vm258_vm6, %v6417_v43 }
0x1e1d   :  { %10774 = vmatpush3.bf16.msra.mxu1 %v6530_v8  ;;  %10775 = vmatprep.mubr.msk.bf16.mxu1 %vm11381_vm1, %v11380_v15 }
0x1e1e   :  { %10785 = vmatprep.subr.bf16.mxu1 %v11380_v15 }
0x1e27   :  { %6769 = vrot.lane.b32.xlu0 %v13117_v53, %s13967_s28 }
0x1e5d   :  { %v6382_v28 = vpop.xlane.xlu0 %6381 }
0x1e5e   :  { %11320 = vrcp.f32 %v6382_v28 }
0x1e61   :  { %v6385_v17 = vpop.xlane.xlu1 %6384 }
0x1e62   :  { %11322 = vrcp.f32 %v6385_v17 }
0x1e65   :  { %v6388_v59 = vpop.xlane.xlu0 %6387 }
0x1e66   :  { %11324 = vrcp.f32 %v6388_v59 }
0x1e68   :  { %v11321_v50 = vpop.eup %11320 }
0x1e69   :  { %v6410_v62 = vmul.f32 %v11321_v50, %v11305_v16  ;;  %v6391_v48 = vpop.xlane.xlu1 %6390  ;;  %v6672_v14 = vpop.permute.xlu0 %6671 }
0x1e6a   :  { %11326 = vrcp.f32 %v6391_v48  ;;  %v6677_v16 = vsel %vm765_vm9, %v6672_v14, 0 }
0x1e6b   :  { %v6418_v22 = vpack.c.bf16 %v6410_v62, %v6410_v62 }
0x1e6c   :  { %v11323_v21 = vpop.eup %11322 }
0x1e6d   :  { %v6411_v9 = vmul.f32 %v11323_v21, %v13177_v58  ;;  %10770 = vmatmul.mubr.msk.bf16.vlgmr.msra.gmra.mrb[164].mxu0 %vm258_vm6, %v6418_v22 }
0x1e6e   :  { %10780 = vmatpush3.bf16.msra.mxu0 %v6579_v4  ;;  %10781 = vmatprep.mubr.msk.bf16.mxu0 %vm11381_vm1, %v11380_v15 }
0x1e6f   :  { %v6419_v53 = vpack.c.bf16 %v6411_v9, %v6411_v9  ;;  %10791 = vmatprep.subr.bf16.mxu0 %v11380_v15  ;;  %v11036_v9 = vld [vmem:[%s13914_s14 + $0x10] sm:$0xff]  }
0x1e70   :  { %v11325_v47 = vpop.eup %11324 }
0x1e71   :  { %v6412_v37 = vmul.f32 %v11325_v47, %v13181_v24  ;;  %10776 = vmatmul.mubr.msk.bf16.vlgmr.msra.gmra.mrb[164].mxu1 %vm258_vm6, %v6419_v53  ;;  %v6397_v45 = vpop.xlane.xlu1 %6396  ;;  %v11037_v47 = vld [vmem:[%s13914_s14 + $0x18] sm:$0xff]  }
0x1e72   :  { %10786 = vmatpush3.bf16.msra.mxu1 %v6628_v27  ;;  %11328 = vrcp.f32 %v6397_v45  ;;  %10787 = vmatprep.mubr.msk.bf16.mxu1 %vm11381_vm1, %v11380_v15 }
0x1e73   :  { %v6420_v11 = vpack.c.bf16 %v6412_v37, %v6412_v37  ;;  %10797 = vmatprep.subr.bf16.mxu1 %v11380_v15 }
0x1e74   :  { %v11327_v20 = vpop.eup %11326 }
0x1e75   :  { %v6413_v26 = vmul.f32 %v11327_v20, %v13185_v39  ;;  %10782 = vmatmul.mubr.msk.bf16.vlgmr.msra.gmra.mrb[168].mxu0 %vm258_vm6, %v6420_v11  ;;  %v6721_v42 = vpop.permute.xlu1 %6720 }
0x1e76   :  { %10792 = vmatpush3.bf16.msra.mxu0 %v6677_v16  ;;  %10793 = vmatprep.mubr.msk.bf16.mxu0 %vm11381_vm1, %v11380_v15  ;;  %v6726_v44 = vsel %vm765_vm9, %v6721_v42, 0 }
0x1e77   :  { %v6421_v58 = vpack.c.bf16 %v6413_v26, %v6413_v26  ;;  %10803 = vmatprep.subr.bf16.mxu0 %v11380_v15 }
0x1e79   :  { %10788 = vmatmul.mubr.msk.bf16.vlgmr.msra.gmra.mrb[168].mxu1 %vm258_vm6, %v6421_v58 }
0x1e7a   :  { %10798 = vmatpush3.bf16.msra.mxu1 %v6726_v44  ;;  %10799 = vmatprep.mubr.msk.bf16.mxu1 %vm11381_vm1, %v11380_v15 }
0x1e7b   :  { %10809 = vmatprep.subr.bf16.mxu1 %v11380_v15 }
0x1e7c   :  { %v11329_v63 = vpop.eup %11328 }
0x1e7d   :  { %v6415_v1 = vmul.f32 %v11329_v63, %v13191_v46 }
0x1e7f   :  { %v6423_v6 = vpack.c.bf16 %v6415_v1, %v6415_v1 }
0x1e81   :  { %10800 = vmatmul.mubr.msk.bf16.vlgmr.msra.gmra.mrb[172].mxu1 %vm258_vm6, %v6423_v6 }
0x1e82   :  { %10813 = vmatprep.mubr.msk.bf16.mxu1 %vm11381_vm1, %v11380_v15  ;;  %10810 = vmatpush3.bf16.msra.mxu1 %v11036_v9 }
0x1e83   :  { %10811 = vmatprep.subr.bf16.mxu1 %v11380_v15 }
0x1e86   :  { %10812 = vmatpush3.bf16.msra.mxu1 %v11037_v47  ;;  %v9393_v47 = vld [vmem:[%s13974_s20 + $0x180] sm:$0xff] }
0x1e9a   :  { %v6394_v24 = vpop.xlane.xlu0 %6393 }
0x1e9b   :  { %11330 = vrcp.f32 %v6394_v24 }
0x1e9e   :  { %v6400_v30 = vpop.xlane.xlu0 %6399 }
0x1e9f   :  { %11332 = vrcp.f32 %v6400_v30 }
0x1ea2   :  { %v6770_v39 = vpop.permute.xlu0 %6769 }
0x1ea3   :  { %v6775_v33 = vsel %vm765_vm9, %v6770_v39, 0 }
0x1ea5   :  { %v11331_v10 = vpop.eup %11330 }
0x1ea6   :  { %v6414_v29 = vmul.f32 %v11331_v10, %v13200_v57 }
0x1ea8   :  { %v6422_v18 = vpack.c.bf16 %v6414_v29, %v6414_v29 }
0x1ea9   :  { %v11333_v23 = vpop.eup %11332 }
0x1eaa   :  { %10794 = vmatmul.mubr.msk.bf16.vlgmr.msra.gmra.mrb[172].mxu0 %vm258_vm6, %v6422_v18  ;;  %v6416_v46 = vmul.f32 %v11333_v23, %v13204_v38 }
0x1eab   :  { %10804 = vmatpush3.bf16.msra.mxu0 %v6775_v33  ;;  %10805 = vmatprep.mubr.msk.bf16.mxu0 %vm11381_vm1, %v11380_v15 }
0x1eac   :  { %v6424_v31 = vpack.c.bf16 %v6416_v46, %v6416_v46 }
0x1eb2   :  { %10806 = vmatmul.mubr.msk.bf16.vlgmr.msra.gmra.mrb[176].mxu0 %vm258_vm6, %v6424_v31 }
0x1eb3   :  { %7278 = vmatprep.mubr.bf16.mxu0 %v11390_v60 }
0x1eef   :  { %v6468_v56 = vpop.f32.mrb[160].mxu1 }
0x1ef0   :  { %v10765_v54 = vpop.f32.mrb[161].mxu1 }
0x1ef1   :  { %v6471_v40 = vpop.f32.mrb[162].mxu1 }
0x1ef2   :  { %v10766_v0 = vpop.f32.mrb[163].mxu1 }
0x1f40   :  { %v6517_v3 = vpop.f32.mrb[164].mxu0 }
0x1f41   :  { %v10771_v61 = vpop.f32.mrb[165].mxu0 }
0x1f42   :  { %v6520_v57 = vpop.f32.mrb[166].mxu0 }
0x1f43   :  { %v10772_v32 = vpop.f32.mrb[167].mxu0 }
0x1f44   :  { %v6566_v41 = vpop.f32.mrb[164].mxu1 }
0x1f45   :  { %v10777_v49 = vpop.f32.mrb[165].mxu1 }
0x1f46   :  { %v6569_v52 = vpop.f32.mrb[166].mxu1 }
0x1f47   :  { %v10778_v36 = vpop.f32.mrb[167].mxu1 }
0x1f48   :  { %v6615_v43 = vpop.f32.mrb[168].mxu0 }
0x1f49   :  { %v10783_v8 = vpop.f32.mrb[169].mxu0 }
0x1f4a   :  { %v6618_v38 = vpop.f32.mrb[170].mxu0 }
0x1f4b   :  { %v10784_v25 = vpop.f32.mrb[171].mxu0 }
0x1f4c   :  { %v6664_v28 = vpop.f32.mrb[168].mxu1 }
0x1f4d   :  { %v10789_v17 = vpop.f32.mrb[169].mxu1 }
0x1f4e   :  { %v6667_v59 = vpop.f32.mrb[170].mxu1 }
0x1f4f   :  { %v10790_v50 = vpop.f32.mrb[171].mxu1 }
0x1f50   :  { %v9377_v50 = vld [vmem:[%s13974_s20 + $0x100] sm:$0xff] }
0x1f54   :  { %v6762_v62 = vpop.f32.mrb[172].mxu1 }
0x1f55   :  { %v10880_v48 = vpack.i.bf16 %v6762_v62, %v6566_v41  ;;  %v10801_v22 = vpop.f32.mrb[173].mxu1  ;;  %v9385_v62 = vld [vmem:[%s13974_s20 + $0x140] sm:$0xff] }
0x1f56   :  { %v6765_v21 = vpop.f32.mrb[174].mxu1  ;;  %v9412_v22 = vcombine.high %v9377_v50, %v9385_v62 }
0x1f57   :  { %10881 = vrot.lane.b32.xlu0 %v10880_v48, %s13969_s23  ;;  %v10802_v4 = vpop.f32.mrb[175].mxu1  ;;  %v9378_v48 = vld [vmem:[%s13974_s20 + $0x108] sm:$0xff] }
0x1f58   :  { %v9386_v21 = vld [vmem:[%s13974_s20 + $0x148] sm:$0xff]  ;;  %v9411_v4 = vcombine.low %v9377_v50, %v9385_v62  ;;  %7246 = vmatprep.subr.bf16.mxu0 %v9412_v22  ;;  %v9403_v50 = vld [vmem:[%s13974_s20 + $0x1d0] sm:$0xff]  ;;  %v9404_v62 = vld [vmem:[%s13974_s20 + $0x1d8] sm:$0xff] }
0x1f59   :  { %v9413_v9 = vcombine.low %v9378_v48, %v9386_v21 }
0x1f5a   :  { %7247 = vmatpush1.bf16.msra.mxu0 %v9411_v4 }
0x1f7d   :  { %v6713_v53 = vpop.f32.mrb[172].mxu0 }
0x1f7e   :  { %v10875_v27 = vpack.i.bf16 %v6713_v53, %v6517_v3  ;;  %v10795_v37 = vpop.f32.mrb[173].mxu0  ;;  %v9414_v53 = vcombine.high %v9378_v48, %v9386_v21 }
0x1f7f   :  { %v6716_v45 = vpop.f32.mrb[174].mxu0  ;;  %v9394_v37 = vld [vmem:[%s13974_s20 + $0x188] sm:$0xff] }
0x1f80   :  { %10876 = vrot.lane.b32.xlu1 %v10875_v27, %s13970_s29  ;;  %v10796_v14 = vpop.f32.mrb[175].mxu0  ;;  %v9401_v27 = vld [vmem:[%s13974_s20 + $0x1c0] sm:$0xff]  ;;  %7289 = vmatprep.subr.bf16.mxu1 %v9414_v53 }
0x1f81   :  { %v9427_v45 = vcombine.low %v9393_v47, %v9401_v27  ;;  %v9428_v14 = vcombine.high %v9393_v47, %v9401_v27  ;;  %v9389_v53 = vld [vmem:[%s13974_s20 + $0x160] sm:$0xff]  ;;  %v9382_v47 = vld [vmem:[%s13974_s20 + $0x128] sm:$0xff] }
0x1f82   :  { %v9390_v27 = vld [vmem:[%s13974_s20 + $0x168] sm:$0xff] }
0x1f83   :  { %7248 = vmatprep.subr.bf16.mxu0 %v9428_v14 }
0x1f84   :  { %7249 = vmatpush1.bf16.msra.mxu0 %v9427_v45 }
0x1f85   :  { %v6811_v11 = vpop.f32.mrb[176].mxu0 }
0x1f86   :  { %v10885_v20 = vpack.i.bf16 %v6811_v11, %v6615_v43  ;;  %v10807_v16 = vpop.f32.mrb[177].mxu0  ;;  %v9402_v11 = vld [vmem:[%s13974_s20 + $0x1c8] sm:$0xff] }
0x1f87   :  { %v6814_v26 = vpop.f32.mrb[178].mxu0  ;;  %v9430_v16 = vcombine.high %v9394_v37, %v9402_v11 }
0x1f88   :  { %10886 = vrot.lane.b32.xlu1 %v10885_v20, %s13971_s2  ;;  %v10808_v42 = vpop.f32.mrb[179].mxu0  ;;  %v9429_v20 = vcombine.low %v9394_v37, %v9402_v11  ;;  %v9379_v26 = vld [vmem:[%s13974_s20 + $0x110] sm:$0xff]  ;;  %v9422_v11 = vcombine.high %v9382_v47, %v9390_v27 }
0x1f89   :  { %v9387_v42 = vld [vmem:[%s13974_s20 + $0x150] sm:$0xff] }
0x1fc9   :  { %v10882_v63 = vpop.permute.xlu0 %10881 }
0x1fca   :  { %v10884_v24 = vunpack.i.h.bf16 %v10882_v63  ;;  %v10883_v30 = vunpack.i.l.bf16 %v10882_v63  ;;  %v9388_v63 = vld [vmem:[%s13974_s20 + $0x158] sm:$0xff] }
0x1ff2   :  { %v10877_v15 = vpop.permute.xlu1 %10876 }
0x1ff3   :  { %v10879_v58 = vunpack.i.h.bf16 %v10877_v15  ;;  %v10878_v44 = vunpack.i.l.bf16 %v10877_v15  ;;  %v9380_v15 = vld [vmem:[%s13974_s20 + $0x118] sm:$0xff] }
0x1ff5   :  { %v6841_v1 = vsel %vm258_vm6, %v6468_v56, %v10878_v44  ;;  %v6842_v6 = vsel %vm258_vm6, %v6664_v28, %v10879_v58  ;;  %v9373_v56 = vld [vmem:[%s13915_s15 + $0x1] ss:$0 sm:$0xff]  ;;  %v9415_v58 = vcombine.low %v9379_v26, %v9387_v42  ;;  %v9416_v44 = vcombine.high %v9379_v26, %v9387_v42  ;;  %v9398_v26 = vld [vmem:[%s13974_s20 + $0x1a8] sm:$0xff] }
0x1ff6   :  { %v6843_v18 = vsel %vm1171_vm10, %v6841_v1, %v10883_v30  ;;  %v6844_v23 = vsel %vm1171_vm10, %v6842_v6, %v10884_v24  ;;  %v9417_v1 = vcombine.low %v9380_v15, %v9388_v63  ;;  %v9418_v6 = vcombine.high %v9380_v15, %v9388_v63  ;;  %v9406_v42 = vld [vmem:[%s13974_s20 + $0x1e8] sm:$0xff] }
0x1ff7   :  { %7332 = vmatprep.subr.bf16.mxu0 %v9416_v44  ;;  %v9438_v63 = vcombine.high %v9398_v26, %v9406_v42 }
0x1ffa   :  { %v10887_v10 = vpop.permute.xlu1 %10886 }
0x1ffb   :  { %v10889_v29 = vunpack.i.h.bf16 %v10887_v10  ;;  %v10888_v39 = vunpack.i.l.bf16 %v10887_v10 }
0x1ffd   :  { %v6845_v33 = vsel %vm1174_vm11, %v6843_v18, %v10888_v39  ;;  %v6846_v46 = vsel %vm1174_vm11, %v6844_v23, %v10889_v29 }
0x1ffe   :  { %v6847_v31 = vpack.c.bf16 %v6846_v46, %v6845_v33 }
0x2000   :  { %10814 = vmatmul.mubr.msk.bf16.vlgmr.msra.gmra.mrb[176].mxu1 %vm100_vm0, %v6847_v31 }
0x2001   :  { %7321 = vmatprep.mubr.bf16.mxu1 %v11390_v60  ;;  %7290 = vmatpush1.bf16.msra.mxu1 %v9413_v9  ;;  %v9381_v9 = vld [vmem:[%s13974_s20 + $0x120] sm:$0xff] }
0x2002   :  { %7291 = vmatprep.subr.bf16.mxu1 %v9430_v16  ;;  %v9420_v14 = vcombine.high %v9381_v9, %v9389_v53  ;;  %v9405_v16 = vld [vmem:[%s13974_s20 + $0x1e0] sm:$0xff]  ;;  %v9419_v15 = vcombine.low %v9381_v9, %v9389_v53  ;;  %v11058_v9 = vld [vmem:[%s13918_s18 + $0x468] sm:$0xff]  }
0x2003   :  { %v11059_v53 = vld [vmem:[%s13918_s18 + $0x4e8] sm:$0xff]  }
0x2005   :  { %7292 = vmatpush1.bf16.msra.mxu1 %v9429_v20  ;;  %v9397_v20 = vld [vmem:[%s13974_s20 + $0x1a0] sm:$0xff] }
0x2006   :  { %7375 = vmatprep.subr.bf16.mxu1 %v9418_v6  ;;  %v9436_v44 = vcombine.high %v9397_v20, %v9405_v16  ;;  %v9391_v6 = vld [vmem:[%s13974_s20 + $0x170] sm:$0xff] }
0x20d3   :  { %v6903_v54 = vpop.f32.mrb[176].mxu1 }
0x20d4   :  { %v6904_v40 = vadd.f32 %v9373_v56, %v6903_v54  ;;  %v10815_v0 = vpop.f32.mrb[177].mxu1 }
0x20d5   :  { %v6906_v3 = vpop.f32.mrb[178].mxu1 }
0x20d6   :  { %v13273_v61 = vadd.f32 %v6904_v40, %v13015_v34  ;;  %v6907_v57 = vadd.f32 %v9373_v56, %v6906_v3  ;;  %v10816_v32 = vpop.f32.mrb[179].mxu1 }
0x20d8   :  { %v13276_v41 = vadd.f32 %v6907_v57, %v13018_v7  ;;  %v6912_v49 = vsel %vm100_vm0, %v13273_v61, 0.0 }
0x20d9   :  { %6913 = vadd.xlane.f32.xlu0 %v6912_v49  ;;  %v11354_v49 = vld [vmem:[%s13961_s26 + $0x4] sm:$0x7]  ;;  %s13976_s26 = sld [smem:[#allocation14_spill]] }
0x20da   :  { %v6915_v52 = vsel %vm100_vm0, %v13276_v41, 0.0 }
0x20db   :  { %6916 = vadd.xlane.f32.xlu1 %v6915_v52  ;;  %v6955_v52 = vrot.slane %v11354_v49, %v12165_v19  ;;  %v11039_v49 = vld [vmem:[%s13918_s18 + $0x4c0] sm:$0xff]  }
0x2166   :  { %v6914_v36 = vpop.xlane.xlu0 %6913 }
0x2167   :  { %v6918_v43 = vmul.f32 0.03125, %v6914_v36 }
0x2168   :  { %v6917_v8 = vpop.xlane.xlu1 %6916 }
0x2169   :  { %v13283_v38 = vsub.f32 %v13273_v61, %v6918_v43  ;;  %v6919_v34 = vmul.f32 0.03125, %v6917_v8  ;;  %v11355_v8 = vld [vmem:[%s13962_s3 + $0x4] sm:$0x7] }
0x216b   :  { %v13286_v25 = vsub.f32 %v13276_v41, %v6919_v34  ;;  %v6922_v7 = vmul.f32 %v13283_v38, %v13283_v38  ;;  %v6961_v34 = vrot.slane %v11355_v8, %v12165_v19  ;;  %v11044_v8 = vld [vmem:[%s13918_s18 + $0x408] sm:$0xff]  }
0x216d   :  { %v6924_v28 = vsel %vm100_vm0, %v6922_v7, 0.0  ;;  %v6923_v17 = vmul.f32 %v13286_v25, %v13286_v25 }
0x216e   :  { %6925 = vadd.xlane.f32.xlu0 %v6924_v28 }
0x216f   :  { %v6927_v59 = vsel %vm100_vm0, %v6923_v17, 0.0 }
0x2172   :  { %6928 = vadd.xlane.f32.xlu0 %v6927_v59  ;;  %v9395_v59 = vld [vmem:[%s13974_s20 + $0x190] sm:$0xff] }
0x2173   :  { %v9432_v21 = vcombine.high %v9395_v59, %v9403_v50  ;;  %v9431_v37 = vcombine.low %v9395_v59, %v9403_v50  ;;  %v11049_v59 = vld [vmem:[%s13918_s18 + $0x490] sm:$0xff]   ;;  %v11050_v50 = vld [vmem:[%s13918_s18 + $0x458] sm:$0xff]  }
0x21fb   :  { %v6926_v24 = vpop.xlane.xlu0 %6925 }
0x21fc   :  { %v6930_v30 = vmul.f32 0.032258064, %v6926_v24  ;;  %v9384_v24 = vld [vmem:[%s13974_s20 + $0x138] sm:$0xff] }
0x21fe   :  { %11334 = vrsqrt.f32 %v6930_v30  ;;  %vm6934_vm1 = vcmp.eq.f32.partialorder %v6930_v30, inf  ;;  %v6937_v23 = vand.u32 2147483648, %v6930_v30  ;;  %vm6936_vm6 = vcmp.eq.f32.partialorder %v6930_v30, 0.0 }
0x21ff   :  { %v6929_v10 = vpop.xlane.xlu0 %6928 }
0x2200   :  { %v6931_v29 = vmul.f32 0.032258064, %v6929_v10  ;;  %v9435_v10 = vcombine.low %v9397_v20, %v9405_v16  ;;  %v11066_v20 = vld [vmem:[%s13918_s18 + $0x478] sm:$0xff]  }
0x2201   :  { %v11067_v16 = vld [vmem:[%s13918_s18 + $0x4f8] sm:$0xff]  }
0x2202   :  { %11336 = vrsqrt.f32 %v6931_v29  ;;  %vm6941_vm9 = vcmp.eq.f32.partialorder %v6931_v29, inf  ;;  %v6944_v40 = vand.u32 2147483648, %v6931_v29  ;;  %vm6943_vm10 = vcmp.eq.f32.partialorder %v6931_v29, 0.0 }
0x2208   :  { %v11335_v39 = vpop.eup %11334 }
0x2209   :  { %v6933_v18 = vmul.f32 %v11335_v39, %v6930_v30 }
0x220b   :  { %v6935_v33 = vsel %vm6934_vm1, %v6930_v30, %v6933_v18  ;;  %v9392_v30 = vld [vmem:[%s13974_s20 + $0x178] sm:$0xff] }
0x220c   :  { %v11337_v46 = vpop.eup %11336  ;;  %v6938_v31 = vsel %vm6936_vm6, %v6937_v23, %v6935_v33  ;;  %v9426_v18 = vcombine.high %v9384_v24, %v9392_v30  ;;  %v9399_v23 = vld [vmem:[%s13974_s20 + $0x1b0] sm:$0xff] }
0x220d   :  { %v6946_v56 = vadd.f32 1e-06, %v6938_v31  ;;  %v6940_v54 = vmul.f32 %v11337_v46, %v6931_v29  ;;  %v9407_v33 = vld [vmem:[%s13974_s20 + $0x1f0] sm:$0xff]  ;;  %v9400_v46 = vld [vmem:[%s13974_s20 + $0x1b8] sm:$0xff] }
0x220e   :  { %v9408_v31 = vld [vmem:[%s13974_s20 + $0x1f8] sm:$0xff] }
0x220f   :  { %11338 = vrcp.f32 %v6946_v56  ;;  %v6942_v0 = vsel %vm6941_vm9, %v6931_v29, %v6940_v54  ;;  %v9437_v29 = vcombine.low %v9398_v26, %v9406_v42  ;;  %v9425_v54 = vcombine.low %v9384_v24, %v9392_v30  ;;  %v11068_v26 = vld [vmem:[%s13918_s18 + $0x438] sm:$0xff]  }
0x2210   :  { %v6945_v3 = vsel %vm6943_vm10, %v6944_v40, %v6942_v0  ;;  %v9440_v40 = vcombine.high %v9399_v23, %v9407_v33  ;;  %v9442_v0 = vcombine.high %v9400_v46, %v9408_v31  ;;  %v11069_v42 = vld [vmem:[%s13918_s18 + $0x4b8] sm:$0xff]  }
0x2211   :  { %v6947_v57 = vadd.f32 1e-06, %v6945_v3  ;;  %v9439_v3 = vcombine.low %v9399_v23, %v9407_v33 }
0x2213   :  { %11340 = vrcp.f32 %v6947_v57  ;;  %v9441_v57 = vcombine.low %v9400_v46, %v9408_v31 }
0x2219   :  { %v11339_v32 = vpop.eup %11338 }
0x221a   :  { %v6950_v36 = vmul.f32 %v11339_v32, %v13283_v38  ;;  %v9396_v38 = vld [vmem:[%s13974_s20 + $0x198] sm:$0xff]  ;;  %v11038_v32 = vld [vmem:[%s13918_s18 + $0x440] sm:$0xff]  }
0x221b   :  { %v9434_v4 = vcombine.high %v9396_v38, %v9404_v62  ;;  %v9433_v45 = vcombine.low %v9396_v38, %v9404_v62  ;;  %v11051_v38 = vld [vmem:[%s13918_s18 + $0x4d8] sm:$0xff]  }
0x221c   :  { %v6956_v7 = vmul.f32 %v6955_v52, %v6950_v36  ;;  %v11041_v36 = vld [vmem:[%s13918_s18 + $0x480] sm:$0xff]   ;;  %v11052_v62 = vld [vmem:[%s13918_s18 + $0x418] sm:$0xff]  }
0x221d   :  { %v11341_v43 = vpop.eup %11340 }
0x221e   :  { %v6951_v28 = vmul.f32 %v11341_v43, %v13286_v25  ;;  %v6962_v48 = vadd.f32 %v6961_v34, %v6956_v7  ;;  %v11042_v43 = vld [vmem:[%s13918_s18 + $0x448] sm:$0xff]   ;;  %v11046_v7 = vld [vmem:[%s13918_s18 + $0x450] sm:$0xff]  }
0x2220   :  { %v6957_v17 = vmul.f32 %v6955_v52, %v6951_v28  ;;  %v11040_v52 = vld [vmem:[%s13918_s18 + $0x400] sm:$0xff]   ;;  %v11047_v28 = vld [vmem:[%s13918_s18 + $0x4d0] sm:$0xff]  }
0x2222   :  { %v6963_v22 = vadd.f32 %v6961_v34, %v6957_v17  ;;  %v11045_v34 = vld [vmem:[%s13918_s18 + $0x488] sm:$0xff]   ;;  %v11048_v17 = vld [vmem:[%s13918_s18 + $0x410] sm:$0xff]  }
0x2224   :  { %v13352_v25 = vpack.c.bf16 %v6963_v22, %v6962_v48  ;;  %v11053_v48 = vld [vmem:[%s13918_s18 + $0x498] sm:$0xff]   ;;  %v11054_v22 = vld [vmem:[%s13918_s18 + $0x460] sm:$0xff]  }
0x2226   :  { %9443 = vmatmul.mubr.msk.bf16.vlgmr.msra.gmra.mrb[180].mxu0 %vm100_vm0, %v13352_v25  ;;  %9444 = vmatmul.mubr.msk.bf16.vlgmr.msra.gmra.mrb[180].mxu1 %vm100_vm0, %v13352_v25 }
0x2227   :  { %7333 = vmatpush1.bf16.msra.mxu0 %v9415_v58  ;;  %7376 = vmatpush1.bf16.msra.mxu1 %v9417_v1  ;;  %v9421_v58 = vcombine.low %v9382_v47, %v9390_v27  ;;  %v9383_v1 = vld [vmem:[%s13974_s20 + $0x130] sm:$0xff]  ;;  %v11060_v47 = vld [vmem:[%s13918_s18 + $0x428] sm:$0xff]  }
0x2228   :  { %7334 = vmatprep.subr.bf16.mxu0 %v9432_v21  ;;  %7377 = vmatprep.subr.bf16.mxu1 %v9434_v4  ;;  %v9424_v39 = vcombine.high %v9383_v1, %v9391_v6  ;;  %v9423_v56 = vcombine.low %v9383_v1, %v9391_v6  ;;  %v11056_v21 = vld [vmem:[%s13918_s18 + $0x420] sm:$0xff]   ;;  %v11061_v27 = vld [vmem:[%s13918_s18 + $0x4a8] sm:$0xff]  }
0x2229   :  { %7364 = vmatprep.mubr.bf16.mxu0 %v11390_v60  ;;  %7407 = vmatprep.mubr.bf16.mxu1 %v11390_v60  ;;  %v11057_v4 = vld [vmem:[%s13918_s18 + $0x4a0] sm:$0xff]  }
0x222b   :  { %7335 = vmatpush1.bf16.msra.mxu0 %v9431_v37  ;;  %7378 = vmatpush1.bf16.msra.mxu1 %v9433_v45  ;;  %v11062_v37 = vld [vmem:[%s13918_s18 + $0x470] sm:$0xff]  }
0x222c   :  { %7418 = vmatprep.subr.bf16.mxu0 %v9420_v14  ;;  %7461 = vmatprep.subr.bf16.mxu1 %v9422_v11  ;;  %v11063_v45 = vld [vmem:[%s13918_s18 + $0x4f0] sm:$0xff]  }
0x222d   :  { %v11064_v14 = vld [vmem:[%s13918_s18 + $0x430] sm:$0xff]  }
0x222e   :  { %9445 = vmatmul.mubr.msk.bf16.vlgmr.msra.gmra.mrb[184].mxu0 %vm100_vm0, %v13352_v25  ;;  %9446 = vmatmul.mubr.msk.bf16.vlgmr.msra.gmra.mrb[184].mxu1 %vm100_vm0, %v13352_v25  ;;  %v11065_v11 = vld [vmem:[%s13918_s18 + $0x4b0] sm:$0xff]  }
0x222f   :  { %7419 = vmatpush1.bf16.msra.mxu0 %v9419_v15  ;;  %7462 = vmatpush1.bf16.msra.mxu1 %v9421_v58  ;;  %v11070_v15 = vld [vmem:[%s13918_s18 + $0x540] sm:$0xff]  }
0x2230   :  { %7420 = vmatprep.subr.bf16.mxu0 %v9436_v44  ;;  %7463 = vmatprep.subr.bf16.mxu1 %v9438_v63  ;;  %v11071_v58 = vld [vmem:[%s13918_s18 + $0x5c0] sm:$0xff]   ;;  %v9409_v44 = vld [vmem:[%s13917_s17 + $0x10] sm:$0xff] }
0x2231   :  { %7450 = vmatprep.mubr.bf16.mxu0 %v11390_v60  ;;  %7493 = vmatprep.mubr.bf16.mxu1 %v11390_v60  ;;  %v7006_v63 = vrot.slane %v9409_v44, %v11535_v35  ;;  %v7014_v1 = vrot.slane %v9409_v44, %v12165_v19  ;;  %v7010_v6 = vrot.slane %v9409_v44, %v11862_v55 }
0x2232   :  { %v7018_v24 = vrot.slane %v9409_v44, %v12367_v51 }
0x2233   :  { %7421 = vmatpush1.bf16.msra.mxu0 %v9435_v10  ;;  %7464 = vmatpush1.bf16.msra.mxu1 %v9437_v29 }
0x2234   :  { %7504 = vmatprep.subr.bf16.mxu0 %v9424_v39  ;;  %7547 = vmatprep.subr.bf16.mxu1 %v9426_v18 }
0x2236   :  { %9447 = vmatmul.mubr.msk.bf16.vlgmr.msra.gmra.mrb[188].mxu0 %vm100_vm0, %v13352_v25  ;;  %9448 = vmatmul.mubr.msk.bf16.vlgmr.msra.gmra.mrb[188].mxu1 %vm100_vm0, %v13352_v25 }
0x2237   :  { %7505 = vmatpush1.bf16.msra.mxu0 %v9423_v56  ;;  %7548 = vmatpush1.bf16.msra.mxu1 %v9425_v54 }
0x2238   :  { %7506 = vmatprep.subr.bf16.mxu0 %v9440_v40  ;;  %7549 = vmatprep.subr.bf16.mxu1 %v9442_v0 }
0x2239   :  { %7536 = vmatprep.mubr.bf16.mxu0 %v11390_v60  ;;  %7579 = vmatprep.mubr.bf16.mxu1 %v11390_v60  ;;  %v11043_v60 = vld [vmem:[%s13918_s18 + $0x4c8] sm:$0xff]  }
0x223b   :  { %7507 = vmatpush1.bf16.msra.mxu0 %v9439_v3  ;;  %7550 = vmatpush1.bf16.msra.mxu1 %v9441_v57  ;;  %v7022_v57 = vrot.slane %v9409_v44, %v12374_v2 }
0x223c   :  { %10177 = vmatprep.subr.bf16.mxu0 %v11038_v32  ;;  %10199 = vmatprep.subr.bf16.mxu1 %v11039_v49  ;;  %v7030_v32 = vrot.slane %v9409_v44, %v12377_v5 }
0x223e   :  { %9449 = vmatmul.mubr.msk.bf16.vlgmr.msra.gmra.mrb[192].mxu0 %vm100_vm0, %v13352_v25  ;;  %9450 = vmatmul.mubr.msk.bf16.vlgmr.msra.gmra.mrb[192].mxu1 %vm100_vm0, %v13352_v25  ;;  %v11055_v25 = vld [vmem:[%s13918_s18 + $0x4e0] sm:$0xff]  }
0x223f   :  { %10178 = vmatpush3.bf16.msra.mxu0 %v11040_v52  ;;  %10200 = vmatpush3.bf16.msra.mxu1 %v11041_v36  ;;  %v7026_v36 = vrot.slane %v9409_v44, %v12380_v12 }
0x2240   :  { %10179 = vmatprep.subr.bf16.mxu0 %v11042_v43  ;;  %10201 = vmatprep.subr.bf16.mxu1 %v11043_v60  ;;  %v7034_v43 = vrot.slane %v9409_v44, %v12383_v13 }
0x2243   :  { %10180 = vmatpush3.bf16.msra.mxu0 %v11044_v8  ;;  %10202 = vmatpush3.bf16.msra.mxu1 %v11045_v34 }
0x2244   :  { %10181 = vmatprep.subr.bf16.mxu0 %v11046_v7  ;;  %10203 = vmatprep.subr.bf16.mxu1 %v11047_v28 }
0x2247   :  { %10182 = vmatpush3.bf16.msra.mxu0 %v11048_v17  ;;  %10204 = vmatpush3.bf16.msra.mxu1 %v11049_v59 }
0x2248   :  { %10183 = vmatprep.subr.bf16.mxu0 %v11050_v50  ;;  %10205 = vmatprep.subr.bf16.mxu1 %v11051_v38  ;;  %v13540_v38 = vld [vmem:[%s13917_s17 + $0x18] sm:$0xff] }
0x224b   :  { %10184 = vmatpush3.bf16.msra.mxu0 %v11052_v62  ;;  %10206 = vmatpush3.bf16.msra.mxu1 %v11053_v48 }
0x224c   :  { %10185 = vmatprep.subr.bf16.mxu0 %v11054_v22  ;;  %10207 = vmatprep.subr.bf16.mxu1 %v11055_v25 }
0x224f   :  { %10186 = vmatpush3.bf16.msra.mxu0 %v11056_v21  ;;  %10208 = vmatpush3.bf16.msra.mxu1 %v11057_v4 }
0x2250   :  { %10187 = vmatprep.subr.bf16.mxu0 %v11058_v9  ;;  %10209 = vmatprep.subr.bf16.mxu1 %v11059_v53  ;;  %v11072_v9 = vld [vmem:[%s13918_s18 + $0x500] sm:$0xff]  }
0x2251   :  { %v11073_v53 = vld [vmem:[%s13918_s18 + $0x580] sm:$0xff]  }
0x2253   :  { %10188 = vmatpush3.bf16.msra.mxu0 %v11060_v47  ;;  %10210 = vmatpush3.bf16.msra.mxu1 %v11061_v27 }
0x2254   :  { %10189 = vmatprep.subr.bf16.mxu0 %v11062_v37  ;;  %10211 = vmatprep.subr.bf16.mxu1 %v11063_v45 }
0x2257   :  { %10190 = vmatpush3.bf16.msra.mxu0 %v11064_v14  ;;  %10212 = vmatpush3.bf16.msra.mxu1 %v11065_v11  ;;  %v11074_v14 = vld [vmem:[%s13918_s18 + $0x548] sm:$0xff]  }
0x2258   :  { %10191 = vmatprep.subr.bf16.mxu0 %v11066_v20  ;;  %10213 = vmatprep.subr.bf16.mxu1 %v11067_v16  ;;  %v11075_v11 = vld [vmem:[%s13918_s18 + $0x5c8] sm:$0xff]   ;;  %v7038_v20 = vrot.slane %v13540_v38, %v11535_v35 }
0x225b   :  { %10192 = vmatpush3.bf16.msra.mxu0 %v11068_v26  ;;  %10214 = vmatpush3.bf16.msra.mxu1 %v11069_v42 }
0x225c   :  { %10221 = vmatprep.subr.bf16.mxu0 %v11070_v15  ;;  %10243 = vmatprep.subr.bf16.mxu1 %v11071_v58  ;;  %v7046_v58 = vrot.slane %v13540_v38, %v12165_v19  ;;  %v11077_v19 = vld [vmem:[%s13918_s18 + $0x588] sm:$0xff]  }
0x22f9   :  { %v7280_v30 = vpop.f32.mrb[180].mxu0  ;;  %v7323_v10 = vpop.f32.mrb[180].mxu1 }
0x22fa   :  { %v7281_v29 = vadd.f32 %v7280_v30, %v7006_v63  ;;  %v7324_v39 = vadd.f32 %v7323_v10, %v7014_v1  ;;  %v7282_v18 = vpop.f32.mrb[181].mxu0  ;;  %v7325_v23 = vpop.f32.mrb[181].mxu1  ;;  %v11076_v10 = vld [vmem:[%s13918_s18 + $0x508] sm:$0xff]  }
0x22fb   :  { %v7283_v33 = vadd.f32 %v7282_v18, %v7010_v6  ;;  %v7326_v46 = vadd.f32 %v7325_v23, %v7018_v24  ;;  %v7284_v31 = vpop.f32.mrb[182].mxu0  ;;  %v7327_v56 = vpop.f32.mrb[182].mxu1 }
0x22fc   :  { %v7285_v54 = vadd.f32 %v7284_v31, %v7006_v63  ;;  %v7328_v40 = vadd.f32 %v7327_v56, %v7014_v1  ;;  %v7286_v0 = vpop.f32.mrb[183].mxu0  ;;  %v7329_v3 = vpop.f32.mrb[183].mxu1  ;;  %v7590_v60 = vmax.f32 %v7281_v29, 0.0  ;;  %v7592_v8 = vmax.f32 %v7324_v39, 0.0 }
0x22fd   :  { %v7287_v49 = vadd.f32 %v7286_v0, %v7010_v6  ;;  %v7330_v52 = vadd.f32 %v7329_v3, %v7018_v24  ;;  %v7591_v28 = vmax.f32 %v7283_v33, 0.0  ;;  %v7593_v17 = vmax.f32 %v7326_v46, 0.0  ;;  %v11079_v46 = vld [vmem:[%s13918_s18 + $0x5d0] sm:$0xff]  }
0x22fe   :  { %v7606_v34 = vmax.f32 %v7285_v54, 0.0  ;;  %v7608_v7 = vmax.f32 %v7328_v40, 0.0  ;;  %v7042_v24 = vrot.slane %v13540_v38, %v11862_v55  ;;  %v7050_v29 = vrot.slane %v13540_v38, %v12367_v51  ;;  %v11078_v55 = vld [vmem:[%s13918_s18 + $0x550] sm:$0xff]  }
0x22ff   :  { %v7607_v59 = vmax.f32 %v7287_v49, 0.0  ;;  %v7609_v50 = vmax.f32 %v7330_v52, 0.0  ;;  %v11080_v52 = vld [vmem:[%s13918_s18 + $0x510] sm:$0xff]  }
0x2300   :  { %v7622_v62 = vpack.c.bf16 %v7606_v34, %v7590_v60  ;;  %v7624_v48 = vpack.c.bf16 %v7608_v7, %v7592_v8  ;;  %v11082_v7 = vld [vmem:[%s13918_s18 + $0x558] sm:$0xff]  }
0x2301   :  { %v7623_v22 = vpack.c.bf16 %v7607_v59, %v7591_v28  ;;  %v7625_v25 = vpack.c.bf16 %v7609_v50, %v7593_v17  ;;  %v7366_v21 = vpop.f32.mrb[184].mxu0  ;;  %v7409_v4 = vpop.f32.mrb[184].mxu1  ;;  %v11083_v28 = vld [vmem:[%s13918_s18 + $0x5d8] sm:$0xff]  }
0x2302   :  { %v7367_v47 = vadd.f32 %v7366_v21, %v7022_v57  ;;  %v7410_v27 = vadd.f32 %v7409_v4, %v7030_v32  ;;  %v7368_v37 = vpop.f32.mrb[185].mxu0  ;;  %v7411_v45 = vpop.f32.mrb[185].mxu1 }
0x2303   :  { %v7369_v16 = vadd.f32 %v7368_v37, %v7026_v36  ;;  %v7412_v26 = vadd.f32 %v7411_v45, %v7034_v43  ;;  %v7370_v42 = vpop.f32.mrb[186].mxu0  ;;  %v7413_v15 = vpop.f32.mrb[186].mxu1  ;;  %8703 = vmatprep.mubr.bf16.mxu0 %v7623_v22  ;;  %8744 = vmatprep.mubr.bf16.mxu1 %v7625_v25  ;;  %v11084_v37 = vld [vmem:[%s13918_s18 + $0x518] sm:$0xff]   ;;  %v7066_v45 = vrot.slane %v13540_v38, %v12383_v13 }
0x2304   :  { %v7371_v44 = vadd.f32 %v7370_v42, %v7022_v57  ;;  %v7414_v63 = vadd.f32 %v7413_v15, %v7030_v32  ;;  %v7372_v1 = vpop.f32.mrb[187].mxu0  ;;  %v7415_v6 = vpop.f32.mrb[187].mxu1  ;;  %8704 = vmatmul.mubr.bf16.vlgmr.msra.gmra.mrb[196].mxu0 %v7622_v62  ;;  %8745 = vmatmul.mubr.bf16.vlgmr.msra.gmra.mrb[196].mxu1 %v7624_v48  ;;  %v7594_v39 = vmax.f32 %v7367_v47, 0.0  ;;  %v7596_v18 = vmax.f32 %v7410_v27, 0.0 }
0x2305   :  { %v7373_v30 = vadd.f32 %v7372_v1, %v7026_v36  ;;  %v7416_v35 = vadd.f32 %v7415_v6, %v7034_v43  ;;  %10222 = vmatpush3.bf16.msra.mxu0 %v11072_v9  ;;  %10244 = vmatpush3.bf16.msra.mxu1 %v11073_v53  ;;  %v7595_v31 = vmax.f32 %v7369_v16, 0.0  ;;  %v7597_v56 = vmax.f32 %v7412_v26, 0.0  ;;  %v11081_v36 = vld [vmem:[%s13918_s18 + $0x590] sm:$0xff]   ;;  %v11087_v16 = vld [vmem:[%s13918_s18 + $0x5e0] sm:$0xff]  }
0x2306   :  { %v7610_v23 = vmax.f32 %v7371_v44, 0.0  ;;  %v7612_v33 = vmax.f32 %v7414_v63, 0.0  ;;  %10223 = vmatprep.subr.bf16.mxu0 %v11074_v14  ;;  %10245 = vmatprep.subr.bf16.mxu1 %v11075_v11  ;;  %v7054_v48 = vrot.slane %v13540_v38, %v12374_v2  ;;  %v7062_v9 = vrot.slane %v13540_v38, %v12377_v5  ;;  %v11085_v2 = vld [vmem:[%s13918_s18 + $0x598] sm:$0xff]  }
0x2307   :  { %v7611_v54 = vmax.f32 %v7373_v30, 0.0  ;;  %v7613_v40 = vmax.f32 %v7416_v35, 0.0  ;;  %v7058_v53 = vrot.slane %v13540_v38, %v12380_v12  ;;  %v11086_v12 = vld [vmem:[%s13918_s18 + $0x560] sm:$0xff]  }
0x2308   :  { %v13574_v0 = vpack.c.bf16 %v7610_v23, %v7594_v39  ;;  %v13576_v51 = vpack.c.bf16 %v7612_v33, %v7596_v18  ;;  %v11089_v30 = vld [vmem:[%s13918_s18 + $0x5a0] sm:$0xff]   ;;  %v11090_v39 = vld [vmem:[%s13918_s18 + $0x568] sm:$0xff]  }
0x2309   :  { %v7627_v3 = vpack.c.bf16 %v7611_v54, %v7595_v31  ;;  %v7629_v57 = vpack.c.bf16 %v7613_v40, %v7597_v56  ;;  %10224 = vmatpush3.bf16.msra.mxu0 %v11076_v10  ;;  %10246 = vmatpush3.bf16.msra.mxu1 %v11077_v19  ;;  %v7452_v32 = vpop.f32.mrb[188].mxu0  ;;  %v7495_v49 = vpop.f32.mrb[188].mxu1  ;;  %v11091_v18 = vld [vmem:[%s13918_s18 + $0x5e8] sm:$0xff]  }
0x230a   :  { %v7453_v43 = vadd.f32 %v7452_v32, %v7038_v20  ;;  %v7496_v60 = vadd.f32 %v7495_v49, %v7046_v58  ;;  %v7454_v8 = vpop.f32.mrb[189].mxu0  ;;  %v7497_v34 = vpop.f32.mrb[189].mxu1  ;;  %10225 = vmatprep.subr.bf16.mxu0 %v11078_v55  ;;  %10247 = vmatprep.subr.bf16.mxu1 %v11079_v46  ;;  %v11092_v32 = vld [vmem:[%s13918_s18 + $0x528] sm:$0xff]  }
0x230b   :  { %v7455_v17 = vadd.f32 %v7454_v8, %v7042_v24  ;;  %v7498_v59 = vadd.f32 %v7497_v34, %v7050_v29  ;;  %v7456_v50 = vpop.f32.mrb[190].mxu0  ;;  %v7499_v62 = vpop.f32.mrb[190].mxu1  ;;  %8785 = vmatprep.mubr.bf16.mxu0 %v7627_v3  ;;  %8826 = vmatprep.mubr.bf16.mxu1 %v7629_v57  ;;  %v11093_v49 = vld [vmem:[%s13918_s18 + $0x5a8] sm:$0xff]   ;;  %v11094_v8 = vld [vmem:[%s13918_s18 + $0x570] sm:$0xff]  }
0x230c   :  { %v7457_v22 = vadd.f32 %v7456_v50, %v7038_v20  ;;  %v7500_v25 = vadd.f32 %v7499_v62, %v7046_v58  ;;  %v7458_v21 = vpop.f32.mrb[191].mxu0  ;;  %v7501_v4 = vpop.f32.mrb[191].mxu1  ;;  %v7598_v14 = vmax.f32 %v7453_v43, 0.0  ;;  %v7600_v5 = vmax.f32 %v7496_v60, 0.0  ;;  %v11095_v34 = vld [vmem:[%s13918_s18 + $0x5f0] sm:$0xff]  }
0x230d   :  { %v7459_v47 = vadd.f32 %v7458_v21, %v7042_v24  ;;  %v7502_v27 = vadd.f32 %v7501_v4, %v7050_v29  ;;  %10226 = vmatpush3.bf16.msra.mxu0 %v11080_v52  ;;  %10248 = vmatpush3.bf16.msra.mxu1 %v11081_v36  ;;  %v7599_v26 = vmax.f32 %v7455_v17, 0.0  ;;  %v7601_v42 = vmax.f32 %v7498_v59, 0.0  ;;  %v11088_v24 = vld [vmem:[%s13918_s18 + $0x520] sm:$0xff]   ;;  %v11097_v21 = vld [vmem:[%s13918_s18 + $0x5b0] sm:$0xff]   ;;  %v11098_v4 = vld [vmem:[%s13918_s18 + $0x578] sm:$0xff]  }
0x230e   :  { %v7614_v11 = vmax.f32 %v7457_v22, 0.0  ;;  %v7616_v20 = vmax.f32 %v7500_v25, 0.0  ;;  %10227 = vmatprep.subr.bf16.mxu0 %v11082_v7  ;;  %10249 = vmatprep.subr.bf16.mxu1 %v11083_v28  ;;  %v11096_v25 = vld [vmem:[%s13918_s18 + $0x530] sm:$0xff]  }
0x230f   :  { %v7615_v15 = vmax.f32 %v7459_v47, 0.0  ;;  %v7617_v58 = vmax.f32 %v7502_v27, 0.0  ;;  %v11101_v47 = vld [vmem:[%s13918_s18 + $0x5b8] sm:$0xff]   ;;  %v11102_v27 = vld [vmem:[%s13918_s18 + $0x640] sm:$0xff]  }
0x2310   :  { %v13610_v44 = vpack.c.bf16 %v7614_v11, %v7598_v14  ;;  %v13612_v13 = vpack.c.bf16 %v7616_v20, %v7600_v5  ;;  %v11106_v14 = vld [vmem:[%s13918_s18 + $0x648] sm:$0xff]  }
0x2311   :  { %v13614_v38 = vpack.c.bf16 %v7615_v15, %v7599_v26  ;;  %v13616_v63 = vpack.c.bf16 %v7617_v58, %v7601_v42  ;;  %10228 = vmatpush3.bf16.msra.mxu0 %v11084_v37  ;;  %10250 = vmatpush3.bf16.msra.mxu1 %v11085_v2  ;;  %v7538_v1 = vpop.f32.mrb[192].mxu0  ;;  %v7581_v6 = vpop.f32.mrb[192].mxu1  ;;  %v11103_v37 = vld [vmem:[%s13918_s18 + $0x6c0] sm:$0xff]   ;;  %v11107_v5 = vld [vmem:[%s13918_s18 + $0x6c8] sm:$0xff]   ;;  %v11114_v26 = vld [vmem:[%s13918_s18 + $0x658] sm:$0xff]  }
0x2312   :  { %v7539_v35 = vadd.f32 %v7538_v1, %v7054_v48  ;;  %v7582_v10 = vadd.f32 %v7581_v6, %v7062_v9  ;;  %v7540_v19 = vpop.f32.mrb[193].mxu0  ;;  %v7583_v29 = vpop.f32.mrb[193].mxu1  ;;  %10229 = vmatprep.subr.bf16.mxu0 %v11086_v12  ;;  %10251 = vmatprep.subr.bf16.mxu1 %v11087_v16  ;;  %v11104_v2 = vld [vmem:[%s13918_s18 + $0x600] sm:$0xff]   ;;  %v11108_v11 = vld [vmem:[%s13918_s18 + $0x608] sm:$0xff]   ;;  %v11112_v12 = vld [vmem:[%s13918_s18 + $0x610] sm:$0xff]  }
0x2313   :  { %v7541_v23 = vadd.f32 %v7540_v19, %v7058_v53  ;;  %v7584_v33 = vadd.f32 %v7583_v29, %v7066_v45  ;;  %v7542_v55 = vpop.f32.mrb[194].mxu0  ;;  %v7585_v46 = vpop.f32.mrb[194].mxu1  ;;  %v11109_v20 = vld [vmem:[%s13918_s18 + $0x688] sm:$0xff]   ;;  %v11113_v16 = vld [vmem:[%s13918_s18 + $0x690] sm:$0xff]   ;;  %v11115_v42 = vld [vmem:[%s13918_s18 + $0x6d8] sm:$0xff]  }
0x2314   :  { %v7543_v31 = vadd.f32 %v7542_v55, %v7054_v48  ;;  %v7586_v56 = vadd.f32 %v7585_v46, %v7062_v9  ;;  %v7544_v54 = vpop.f32.mrb[195].mxu0  ;;  %v7587_v40 = vpop.f32.mrb[195].mxu1  ;;  %v7602_v52 = vmax.f32 %v7539_v35, 0.0  ;;  %v7604_v36 = vmax.f32 %v7582_v10, 0.0  ;;  %v11099_v9 = vld [vmem:[%s13918_s18 + $0x5f8] sm:$0xff]   ;;  %v11120_v1 = vld [vmem:[%s13918_s18 + $0x620] sm:$0xff]  }
0x2315   :  { %v7545_v3 = vadd.f32 %v7544_v54, %v7058_v53  ;;  %v7588_v57 = vadd.f32 %v7587_v40, %v7066_v45  ;;  %10230 = vmatpush3.bf16.msra.mxu0 %v11088_v24  ;;  %10252 = vmatpush3.bf16.msra.mxu1 %v11089_v30  ;;  %v7603_v7 = vmax.f32 %v7541_v23, 0.0  ;;  %v7605_v28 = vmax.f32 %v7584_v33, 0.0  ;;  %v11100_v53 = vld [vmem:[%s13918_s18 + $0x538] sm:$0xff]   ;;  %v11105_v45 = vld [vmem:[%s13918_s18 + $0x680] sm:$0xff]   ;;  %v11122_v24 = vld [vmem:[%s13918_s18 + $0x668] sm:$0xff]  }
0x2316   :  { %v7618_v43 = vmax.f32 %v7543_v31, 0.0  ;;  %v7620_v60 = vmax.f32 %v7586_v56, 0.0  ;;  %10231 = vmatprep.subr.bf16.mxu0 %v11090_v39  ;;  %10253 = vmatprep.subr.bf16.mxu1 %v11091_v18  ;;  %v11116_v15 = vld [vmem:[%s13918_s18 + $0x618] sm:$0xff]   ;;  %v11121_v6 = vld [vmem:[%s13918_s18 + $0x6a0] sm:$0xff]   ;;  %v11123_v30 = vld [vmem:[%s13918_s18 + $0x6e8] sm:$0xff]  }
0x2317   :  { %v7619_v17 = vmax.f32 %v7545_v3, 0.0  ;;  %v7621_v59 = vmax.f32 %v7588_v57, 0.0  ;;  %v11117_v58 = vld [vmem:[%s13918_s18 + $0x698] sm:$0xff]   ;;  %v11124_v35 = vld [vmem:[%s13918_s18 + $0x628] sm:$0xff]   ;;  %v11126_v19 = vld [vmem:[%s13918_s18 + $0x670] sm:$0xff]  }
0x2318   :  { %v13642_v50 = vpack.c.bf16 %v7618_v43, %v7602_v52  ;;  %v13644_v62 = vpack.c.bf16 %v7620_v60, %v7604_v36  ;;  %v11125_v10 = vld [vmem:[%s13918_s18 + $0x6a8] sm:$0xff]   ;;  %v11127_v29 = vld [vmem:[%s13918_s18 + $0x6f0] sm:$0xff]   ;;  %v11130_v23 = vld [vmem:[%s13918_s18 + $0x678] sm:$0xff]  }
0x2319   :  { %v13646_v48 = vpack.c.bf16 %v7619_v17, %v7603_v7  ;;  %v13648_v22 = vpack.c.bf16 %v7621_v59, %v7605_v28  ;;  %10232 = vmatpush3.bf16.msra.mxu0 %v11092_v32  ;;  %10254 = vmatpush3.bf16.msra.mxu1 %v11093_v49  ;;  %v11128_v39 = vld [vmem:[%s13918_s18 + $0x630] sm:$0xff]   ;;  %v11131_v33 = vld [vmem:[%s13918_s18 + $0x6f8] sm:$0xff]   ;;  %v11134_v31 = vld [vmem:[%s13918_s18 + $0x740] sm:$0xff]  }
0x231a   :  { %10233 = vmatprep.subr.bf16.mxu0 %v11094_v8  ;;  %10255 = vmatprep.subr.bf16.mxu1 %v11095_v34  ;;  %v11129_v18 = vld [vmem:[%s13918_s18 + $0x6b0] sm:$0xff]   ;;  %v11132_v55 = vld [vmem:[%s13918_s18 + $0x638] sm:$0xff]   ;;  %v11135_v56 = vld [vmem:[%s13918_s18 + $0x7c0] sm:$0xff]  }
0x231b   :  { %v11133_v46 = vld [vmem:[%s13918_s18 + $0x6b8] sm:$0xff]   ;;  %v11136_v54 = vld [vmem:[%s13918_s18 + $0x700] sm:$0xff]   ;;  %v11138_v3 = vld [vmem:[%s13918_s18 + $0x748] sm:$0xff]  }
0x231c   :  { %v11137_v40 = vld [vmem:[%s13918_s18 + $0x780] sm:$0xff]   ;;  %v11139_v57 = vld [vmem:[%s13918_s18 + $0x7c8] sm:$0xff]   ;;  %v11144_v52 = vld [vmem:[%s13918_s18 + $0x710] sm:$0xff]  }
0x231d   :  { %10234 = vmatpush3.bf16.msra.mxu0 %v11096_v25  ;;  %10256 = vmatpush3.bf16.msra.mxu1 %v11097_v21  ;;  %v11140_v32 = vld [vmem:[%s13918_s18 + $0x708] sm:$0xff]   ;;  %v11145_v36 = vld [vmem:[%s13918_s18 + $0x790] sm:$0xff]   ;;  %v11146_v43 = vld [vmem:[%s13918_s18 + $0x758] sm:$0xff]  }
0x231e   :  { %10235 = vmatprep.subr.bf16.mxu0 %v11098_v4  ;;  %10257 = vmatprep.subr.bf16.mxu1 %v11099_v9  ;;  %v11141_v49 = vld [vmem:[%s13918_s18 + $0x788] sm:$0xff]   ;;  %v11147_v60 = vld [vmem:[%s13918_s18 + $0x7d8] sm:$0xff]   ;;  %v11150_v7 = vld [vmem:[%s13918_s18 + $0x760] sm:$0xff]  }
0x231f   :  { %v11148_v8 = vld [vmem:[%s13918_s18 + $0x718] sm:$0xff]   ;;  %v11151_v28 = vld [vmem:[%s13918_s18 + $0x7e0] sm:$0xff]   ;;  %v11156_v25 = vld [vmem:[%s13918_s18 + $0x728] sm:$0xff]  }
0x2320   :  { %v11149_v34 = vld [vmem:[%s13918_s18 + $0x798] sm:$0xff]   ;;  %v11152_v17 = vld [vmem:[%s13918_s18 + $0x720] sm:$0xff]   ;;  %v11157_v21 = vld [vmem:[%s13918_s18 + $0x7a8] sm:$0xff]  }
0x2321   :  { %10236 = vmatpush3.bf16.msra.mxu0 %v11100_v53  ;;  %10258 = vmatpush3.bf16.msra.mxu1 %v11101_v47  ;;  %v11153_v59 = vld [vmem:[%s13918_s18 + $0x7a0] sm:$0xff]   ;;  %v11158_v4 = vld [vmem:[%s13918_s18 + $0x770] sm:$0xff]  }
0x2322   :  { %10265 = vmatprep.subr.bf16.mxu0 %v11102_v27  ;;  %10287 = vmatprep.subr.bf16.mxu1 %v11103_v37  ;;  %v11159_v9 = vld [vmem:[%s13918_s18 + $0x7f0] sm:$0xff]   ;;  %v11162_v27 = vld [vmem:[%s13918_s18 + $0x778] sm:$0xff]  }
0x2323   :  { %v11160_v53 = vld [vmem:[%s13918_s18 + $0x730] sm:$0xff]   ;;  %v11163_v37 = vld [vmem:[%s13918_s18 + $0x7f8] sm:$0xff]  }
0x2324   :  { %8786 = vmatmul.mubr.bf16.vlgmr.msra.gmra.mrb[200].mxu0 %v13574_v0  ;;  %8827 = vmatmul.mubr.bf16.vlgmr.msra.gmra.mrb[200].mxu1 %v13576_v51  ;;  %v11110_v0 = vld [vmem:[%s13918_s18 + $0x650] sm:$0xff]  }
0x2325   :  { %10266 = vmatpush3.bf16.msra.mxu0 %v11104_v2  ;;  %8867 = vmatprep.mubr.bf16.mxu0 %v13614_v38  ;;  %v11111_v51 = vld [vmem:[%s13918_s18 + $0x6d0] sm:$0xff]   ;;  %v11118_v38 = vld [vmem:[%s13918_s18 + $0x660] sm:$0xff]   ;;  %v11164_v2 = vld [vmem:[%s13918_s18 + $0x738] sm:$0xff]  }
0x2326   :  { %10288 = vmatpush3.bf16.msra.mxu1 %v11105_v45  ;;  %8908 = vmatprep.mubr.bf16.mxu1 %v13616_v63  ;;  %v11119_v63 = vld [vmem:[%s13918_s18 + $0x6e0] sm:$0xff]   ;;  %v11161_v47 = vld [vmem:[%s13918_s18 + $0x7b0] sm:$0xff]   ;;  %v11165_v45 = vld [vmem:[%s13918_s18 + $0x7b8] sm:$0xff]  }
0x2327   :  { %10267 = vmatprep.subr.bf16.mxu0 %v11106_v14  ;;  %10289 = vmatprep.subr.bf16.mxu1 %v11107_v5 }
0x2329   :  { %10268 = vmatpush3.bf16.msra.mxu0 %v11108_v11  ;;  %v9708_v11 = vld [vmem:[%s13919_s19 + $0x1] ss:$0 sm:$0xff] }
0x232a   :  { %10290 = vmatpush3.bf16.msra.mxu1 %v11109_v20  ;;  %10269 = vmatprep.subr.bf16.mxu0 %v11110_v0 }
0x232b   :  { %10291 = vmatprep.subr.bf16.mxu1 %v11111_v51 }
0x232d   :  { %10270 = vmatpush3.bf16.msra.mxu0 %v11112_v12 }
0x232e   :  { %10292 = vmatpush3.bf16.msra.mxu1 %v11113_v16  ;;  %10271 = vmatprep.subr.bf16.mxu0 %v11114_v26 }
0x232f   :  { %10293 = vmatprep.subr.bf16.mxu1 %v11115_v42 }
0x2331   :  { %10272 = vmatpush3.bf16.msra.mxu0 %v11116_v15 }
0x2332   :  { %10294 = vmatpush3.bf16.msra.mxu1 %v11117_v58  ;;  %10273 = vmatprep.subr.bf16.mxu0 %v11118_v38 }
0x2333   :  { %10295 = vmatprep.subr.bf16.mxu1 %v11119_v63 }
0x2335   :  { %10274 = vmatpush3.bf16.msra.mxu0 %v11120_v1 }
0x2336   :  { %10296 = vmatpush3.bf16.msra.mxu1 %v11121_v6  ;;  %10275 = vmatprep.subr.bf16.mxu0 %v11122_v24 }
0x2337   :  { %10297 = vmatprep.subr.bf16.mxu1 %v11123_v30 }
0x2339   :  { %10276 = vmatpush3.bf16.msra.mxu0 %v11124_v35 }
0x233a   :  { %10298 = vmatpush3.bf16.msra.mxu1 %v11125_v10  ;;  %10277 = vmatprep.subr.bf16.mxu0 %v11126_v19 }
0x233b   :  { %10299 = vmatprep.subr.bf16.mxu1 %v11127_v29 }
0x233d   :  { %10278 = vmatpush3.bf16.msra.mxu0 %v11128_v39 }
0x233e   :  { %10300 = vmatpush3.bf16.msra.mxu1 %v11129_v18  ;;  %10279 = vmatprep.subr.bf16.mxu0 %v11130_v23 }
0x233f   :  { %10301 = vmatprep.subr.bf16.mxu1 %v11131_v33 }
0x2341   :  { %10280 = vmatpush3.bf16.msra.mxu0 %v11132_v55 }
0x2342   :  { %10302 = vmatpush3.bf16.msra.mxu1 %v11133_v46  ;;  %10309 = vmatprep.subr.bf16.mxu0 %v11134_v31 }
0x2343   :  { %10331 = vmatprep.subr.bf16.mxu1 %v11135_v56 }
0x2344   :  { %8868 = vmatmul.mubr.bf16.vlgmr.msra.gmra.mrb[204].mxu0 %v13610_v44  ;;  %v11142_v44 = vld [vmem:[%s13918_s18 + $0x750] sm:$0xff]  }
0x2345   :  { %8909 = vmatmul.mubr.bf16.vlgmr.msra.gmra.mrb[204].mxu1 %v13612_v13  ;;  %10310 = vmatpush3.bf16.msra.mxu0 %v11136_v54  ;;  %v11143_v13 = vld [vmem:[%s13918_s18 + $0x7d0] sm:$0xff]  }
0x2346   :  { %8949 = vmatprep.mubr.bf16.mxu0 %v13646_v48  ;;  %10332 = vmatpush3.bf16.msra.mxu1 %v11137_v40  ;;  %v11154_v48 = vld [vmem:[%s13918_s18 + $0x768] sm:$0xff]  }
0x2347   :  { %8990 = vmatprep.mubr.bf16.mxu1 %v13648_v22  ;;  %10311 = vmatprep.subr.bf16.mxu0 %v11138_v3  ;;  %v11155_v22 = vld [vmem:[%s13918_s18 + $0x7e8] sm:$0xff]  }
0x2348   :  { %10333 = vmatprep.subr.bf16.mxu1 %v11139_v57 }
0x2349   :  { %10312 = vmatpush3.bf16.msra.mxu0 %v11140_v32 }
0x234a   :  { %10334 = vmatpush3.bf16.msra.mxu1 %v11141_v49  ;;  %10313 = vmatprep.subr.bf16.mxu0 %v11142_v44 }
0x234b   :  { %10335 = vmatprep.subr.bf16.mxu1 %v11143_v13 }
0x234d   :  { %10314 = vmatpush3.bf16.msra.mxu0 %v11144_v52 }
0x234e   :  { %10336 = vmatpush3.bf16.msra.mxu1 %v11145_v36  ;;  %10315 = vmatprep.subr.bf16.mxu0 %v11146_v43 }
0x234f   :  { %10337 = vmatprep.subr.bf16.mxu1 %v11147_v60 }
0x2351   :  { %10316 = vmatpush3.bf16.msra.mxu0 %v11148_v8 }
0x2352   :  { %10338 = vmatpush3.bf16.msra.mxu1 %v11149_v34  ;;  %10317 = vmatprep.subr.bf16.mxu0 %v11150_v7 }
0x2353   :  { %10339 = vmatprep.subr.bf16.mxu1 %v11151_v28 }
0x2355   :  { %10318 = vmatpush3.bf16.msra.mxu0 %v11152_v17 }
0x2356   :  { %10340 = vmatpush3.bf16.msra.mxu1 %v11153_v59  ;;  %10319 = vmatprep.subr.bf16.mxu0 %v11154_v48 }
0x2357   :  { %10341 = vmatprep.subr.bf16.mxu1 %v11155_v22 }
0x2359   :  { %10320 = vmatpush3.bf16.msra.mxu0 %v11156_v25 }
0x235a   :  { %10342 = vmatpush3.bf16.msra.mxu1 %v11157_v21  ;;  %10321 = vmatprep.subr.bf16.mxu0 %v11158_v4 }
0x235b   :  { %10343 = vmatprep.subr.bf16.mxu1 %v11159_v9 }
0x235d   :  { %10322 = vmatpush3.bf16.msra.mxu0 %v11160_v53 }
0x235e   :  { %10344 = vmatpush3.bf16.msra.mxu1 %v11161_v47  ;;  %10323 = vmatprep.subr.bf16.mxu0 %v11162_v27 }
0x235f   :  { %10345 = vmatprep.subr.bf16.mxu1 %v11163_v37 }
0x2361   :  { %10324 = vmatpush3.bf16.msra.mxu0 %v11164_v2 }
0x2362   :  { %10346 = vmatpush3.bf16.msra.mxu1 %v11165_v45 }
0x2364   :  { %8950 = vmatmul.mubr.bf16.vlgmr.msra.gmra.mrb[208].mxu0 %v13642_v50 }
0x2365   :  { %8991 = vmatmul.mubr.bf16.vlgmr.msra.gmra.mrb[208].mxu1 %v13644_v62 }
0x23d7   :  { %v10193_v14 = vpop.f32.mrb[196].mxu0  ;;  %v10215_v5 = vpop.f32.mrb[196].mxu1 }
0x23d8   :  { %v10194_v20 = vpop.f32.mrb[197].mxu0  ;;  %v10216_v0 = vpop.f32.mrb[197].mxu1 }
0x23d9   :  { %v10195_v51 = vadd.f32 %v10194_v20, %v10193_v14  ;;  %v10217_v12 = vadd.f32 %v10216_v0, %v10215_v5  ;;  %v10196_v16 = vpop.f32.mrb[198].mxu0  ;;  %v10218_v26 = vpop.f32.mrb[198].mxu1 }
0x23da   :  { %v10197_v42 = vpop.f32.mrb[199].mxu0  ;;  %v10219_v15 = vpop.f32.mrb[199].mxu1 }
0x23db   :  { %v8706_v58 = vadd.f32 %v10195_v51, %v9708_v11  ;;  %v10198_v38 = vadd.f32 %v10197_v42, %v10196_v16  ;;  %v10220_v63 = vadd.f32 %v10219_v15, %v10218_v26 }
0x23dd   :  { %v8747_v50 = vadd.f32 %v10217_v12, %v8706_v58  ;;  %v8709_v1 = vadd.f32 %v10198_v38, %v9708_v11 }
0x23df   :  { %v8750_v62 = vadd.f32 %v10220_v63, %v8709_v1 }
0x23f7   :  { %v10237_v6 = vpop.f32.mrb[200].mxu0  ;;  %v10259_v24 = vpop.f32.mrb[200].mxu1 }
0x23f8   :  { %v10238_v30 = vpop.f32.mrb[201].mxu0  ;;  %v10260_v35 = vpop.f32.mrb[201].mxu1 }
0x23f9   :  { %v10239_v10 = vadd.f32 %v10238_v30, %v10237_v6  ;;  %v10261_v19 = vadd.f32 %v10260_v35, %v10259_v24  ;;  %v10240_v29 = vpop.f32.mrb[202].mxu0  ;;  %v10262_v39 = vpop.f32.mrb[202].mxu1 }
0x23fa   :  { %v10241_v18 = vpop.f32.mrb[203].mxu0  ;;  %v10263_v23 = vpop.f32.mrb[203].mxu1 }
0x23fb   :  { %v8788_v33 = vadd.f32 %v10239_v10, %v8747_v50  ;;  %v10242_v55 = vadd.f32 %v10241_v18, %v10240_v29  ;;  %v10264_v46 = vadd.f32 %v10263_v23, %v10262_v39 }
0x23fd   :  { %v8829_v31 = vadd.f32 %v10261_v19, %v8788_v33  ;;  %v8791_v56 = vadd.f32 %v10242_v55, %v8750_v62 }
0x23ff   :  { %v8832_v54 = vadd.f32 %v10264_v46, %v8791_v56 }
0x2417   :  { %v10281_v40 = vpop.f32.mrb[204].mxu0 }
0x2418   :  { %v10303_v3 = vpop.f32.mrb[204].mxu1  ;;  %v10282_v57 = vpop.f32.mrb[205].mxu0 }
0x2419   :  { %v10283_v32 = vadd.f32 %v10282_v57, %v10281_v40  ;;  %v10304_v49 = vpop.f32.mrb[205].mxu1  ;;  %v10284_v44 = vpop.f32.mrb[206].mxu0 }
0x241a   :  { %v10305_v13 = vadd.f32 %v10304_v49, %v10303_v3  ;;  %v10306_v52 = vpop.f32.mrb[206].mxu1  ;;  %v10285_v36 = vpop.f32.mrb[207].mxu0  ;;  %v9838_v3 = vld [vmem:[%s13976_s26] ss:$0 sm:$0xff] }
0x241b   :  { %v8870_v43 = vadd.f32 %v10283_v32, %v8829_v31  ;;  %v10286_v60 = vadd.f32 %v10285_v36, %v10284_v44  ;;  %v10307_v8 = vpop.f32.mrb[207].mxu1 }
0x241c   :  { %v10308_v34 = vadd.f32 %v10307_v8, %v10306_v52 }
0x241d   :  { %v8911_v7 = vadd.f32 %v10305_v13, %v8870_v43  ;;  %v8873_v28 = vadd.f32 %v10286_v60, %v8832_v54  ;;  %v9837_v54 = vld [vmem:[%s13975_s25] ss:$0 sm:$0xff] }
0x241f   :  { %v8914_v17 = vadd.f32 %v10308_v34, %v8873_v28 }
0x2437   :  { %v10325_v59 = vpop.f32.mrb[208].mxu0 }
0x2438   :  { %v10347_v48 = vpop.f32.mrb[208].mxu1  ;;  %v10326_v22 = vpop.f32.mrb[209].mxu0 }
0x2439   :  { %v10327_v25 = vadd.f32 %v10326_v22, %v10325_v59  ;;  %v10348_v21 = vpop.f32.mrb[209].mxu1  ;;  %v10328_v4 = vpop.f32.mrb[210].mxu0 }
0x243a   :  { %v10349_v9 = vadd.f32 %v10348_v21, %v10347_v48  ;;  %v10350_v53 = vpop.f32.mrb[210].mxu1  ;;  %v10329_v47 = vpop.f32.mrb[211].mxu0 }
0x243b   :  { %v8952_v27 = vadd.f32 %v10327_v25, %v8911_v7  ;;  %v10330_v37 = vadd.f32 %v10329_v47, %v10328_v4  ;;  %v10351_v2 = vpop.f32.mrb[211].mxu1 }
0x243c   :  { %v10352_v45 = vadd.f32 %v10351_v2, %v10350_v53 }
0x243d   :  { %v8993_v14 = vadd.f32 %v10349_v9, %v8952_v27  ;;  %v8955_v5 = vadd.f32 %v10330_v37, %v8914_v17 }
0x243f   :  { %v8996_v11 = vadd.f32 %v10352_v45, %v8955_v5  ;;  %v8999_v20 = vadd.f32 %v8993_v14, %v13273_v61 }
0x2441   :  { %v9003_v0 = vsel %vm100_vm0, %v8999_v20, 0.0  ;;  %v9000_v51 = vadd.f32 %v8996_v11, %v13276_v41 }
0x2442   :  { %9004 = vadd.xlane.f32.xlu0 %v9003_v0 }
0x2443   :  { %v9006_v12 = vsel %vm100_vm0, %v9000_v51, 0.0 }
0x2444   :  { %9007 = vadd.xlane.f32.xlu1 %v9006_v12 }
0x24cf   :  { %v9005_v16 = vpop.xlane.xlu0 %9004 }
0x24d0   :  { %v9009_v26 = vmul.f32 0.03125, %v9005_v16 }
0x24d1   :  { %v9008_v42 = vpop.xlane.xlu1 %9007 }
0x24d2   :  { %v9011_v15 = vsub.f32 %v8999_v20, %v9009_v26  ;;  %v9010_v58 = vmul.f32 0.03125, %v9008_v42 }
0x24d4   :  { %v9012_v38 = vsub.f32 %v9000_v51, %v9010_v58  ;;  %v9013_v63 = vmul.f32 %v9011_v15, %v9011_v15 }
0x24d6   :  { %v9015_v50 = vsel %vm100_vm0, %v9013_v63, 0.0  ;;  %v9014_v1 = vmul.f32 %v9012_v38, %v9012_v38 }
0x24d7   :  { %9016 = vadd.xlane.f32.xlu0 %v9015_v50 }
0x24d8   :  { %v9018_v61 = vsel %vm100_vm0, %v9014_v1, 0.0 }
0x24d9   :  { %9019 = vadd.xlane.f32.xlu1 %v9018_v61 }
0x2564   :  { %v9017_v62 = vpop.xlane.xlu0 %9016 }
0x2565   :  { %v9021_v41 = vmul.f32 0.032258064, %v9017_v62 }
0x2566   :  { %v9020_v6 = vpop.xlane.xlu1 %9019 }
0x2567   :  { %11342 = vrsqrt.f32 %v9021_v41  ;;  %v9022_v24 = vmul.f32 0.032258064, %v9020_v6  ;;  %vm9025_vm11 = vcmp.eq.f32.partialorder %v9021_v41, inf  ;;  %v9028_v10 = vand.u32 2147483648, %v9021_v41 }
0x2568   :  { %vm9027_vm7 = vcmp.eq.f32.partialorder %v9021_v41, 0.0 }
0x2569   :  { %11344 = vrsqrt.f32 %v9022_v24  ;;  %vm9032_vm8 = vcmp.eq.f32.partialorder %v9022_v24, inf  ;;  %v9035_v33 = vand.u32 2147483648, %v9022_v24  ;;  %vm9034_vm12 = vcmp.eq.f32.partialorder %v9022_v24, 0.0 }
0x2571   :  { %v11343_v30 = vpop.eup %11342 }
0x2572   :  { %v9024_v35 = vmul.f32 %v11343_v30, %v9021_v41 }
0x2573   :  { %v11345_v19 = vpop.eup %11344 }
0x2574   :  { %v9026_v29 = vsel %vm9025_vm11, %v9021_v41, %v9024_v35  ;;  %v9031_v18 = vmul.f32 %v11345_v19, %v9022_v24 }
0x2575   :  { %v9029_v39 = vsel %vm9027_vm7, %v9028_v10, %v9026_v29 }
0x2576   :  { %v9037_v23 = vadd.f32 1e-06, %v9029_v39  ;;  %v9033_v55 = vsel %vm9032_vm8, %v9022_v24, %v9031_v18 }
0x2577   :  { %v9036_v46 = vsel %vm9034_vm12, %v9035_v33, %v9033_v55 }
0x2578   :  { %11346 = vrcp.f32 %v9037_v23  ;;  %v9038_v31 = vadd.f32 1e-06, %v9036_v46 }
0x257a   :  { %11348 = vrcp.f32 %v9038_v31 }
0x2582   :  { %v11347_v56 = vpop.eup %11346 }
0x2583   :  { %v9041_v40 = vmul.f32 %v11347_v56, %v9011_v15 }
0x2584   :  { %v11349_v57 = vpop.eup %11348 }
0x2585   :  { %v9049_v32 = vmul.f32 %v9837_v54, %v9041_v40  ;;  %v9042_v49 = vmul.f32 %v11349_v57, %v9012_v38 }
0x2587   :  { %v9057_v44 = vadd.f32 %v9838_v3, %v9049_v32  ;;  %v9050_v13 = vmul.f32 %v9837_v54, %v9042_v49 }
0x2589   :  { %9059 = vst.msk [vmem:[#allocation2] sm:$0xff] %vm100_vm0, %v9057_v44  ;;  %v9058_v52 = vadd.f32 %v9838_v3, %v9050_v13 }
0x258b   :  { %9060 = vst.msk [vmem:[#allocation2 + $0x8] sm:$0xff] %vm100_vm0, %v9058_v52 }
0x258c   :  { %11367 = shalt.err (!%p11364_p4)
}
0x258d   :  { %s13977_s22 = sld [smem:[#allocation15_spill]] }
0x2593   :  { %s11368_s17 = scalar_lea.hbm %s13977_s22, 256 }
0x2594   :  { %p11369_p5 = scmp.ne.s32.totalorder %s13977_s22, %s11368_s17  ;;  %p11372_p6 = scmp.lt.u32.totalorder %s11368_s17, %s13977_s22 }
0x2596   :  { %p11374_p7 = pnand %p11372_p6, %p11369_p5 }
0x2598   :  { %11377 = shalt.err (!%p11374_p7)
}
0x2599   :  { %s11392_s12 = smov 128  }
0x259a   :  { %9072 = dma.vmem_to_hbm [thread:$0]  %s9067_s4, 256, %s13977_s22, [#allocation3], %s11392_s12, %s11392_s12, %s13970_s29  }
0x259b   :  { %11378 = dma.done.wait [#allocation3], 256  }
0x259c   :  { %11379 = vsyncadd [#allocation3], 4294967040 }
0x259d   :  { %9076 = vsyncpa [#allocation3], 1 }

</bundles_post_ra>
